<compile_context>
chip_gen: v5e
topology: v5e:2x2
jax: 0.10.0
libtpu: 0.0.40
codegen_flags: <defaults>
</compile_context>

<pallas_src>
import jax
import jax.numpy as jnp
from jax import lax
from jax.experimental import pallas as pl
from jax.experimental.pallas import tpu as pltpu


# ----------------------------------------------------------------------------
# Fused Pallas kernel: whole AMO forward for one batch element per grid step.
#
# Spatial maps are stored "padded-flat": an HxW map with a 1-pixel zero border
# becomes ((H+2)*(W+2) + 2 spare zero rows, C).  A 3x3 conv is then 9 shifted
# (row-offset) MXU matmuls; output rows r = y*(W+2)+x with x < W are valid.
# ----------------------------------------------------------------------------
def _amo_fused_kernel(p1_ref, mx_ref, s1_ref, sz_ref,
                      w1_ref, sh1_ref,
                      w2afm_ref, w2amx_ref, sh2a_ref, w2b_ref, b2b_ref,
                      wd_ref, shd_ref, wu2_ref, shu2_ref, wu3_ref, shu3_ref,
                      m16_ref, o_ref):
    f32, bf16 = jnp.float32, jnp.bfloat16
    leaky = lambda v: jnp.where(v >= 0.0, v, 0.1 * v)
    relu = lambda v: jnp.maximum(v, 0.0)

    def conv3x3(pairs, shift, act, wp, rows):
        # pairs: [(padded-flat activation (len, Cg) bf16, tap stack ref (9, Cg, 32))]
        acc = jnp.zeros((rows, 32), f32)
        for dy in range(3):
            for dx in range(3):
                off = dy * wp + dx
                t = dy * 3 + dx
                for xf, taps in pairs:
                    acc = acc + jnp.dot(xf[off:off + rows, :], taps[t],
                                        preferred_element_type=f32)
        return act(acc + shift)

    # ---- conv_1: 3->32, k3 s2 p1 (folded BN) + LeakyReLU(0.1) -----------------
    fm = leaky(jnp.dot(p1_ref[0], w1_ref[...], preferred_element_type=f32)
               + sh1_ref[...])                                       # (64, 32) f32
    # scatter the 8x8 map into the padded-flat 10x10 layout (constant 0/1 matmul)
    fm_flat = jnp.dot(s1_ref[...], fm.astype(bf16),
                      preferred_element_type=f32).astype(bf16)       # (102, 32)

    # ---- conv_2: 3x3 (65->32, folded BN) + LeakyReLU, then fused 1x1 (+bias) --
    y2 = conv3x3([(fm_flat, w2afm_ref), (mx_ref[0], w2amx_ref)],
                 sh2a_ref[...], leaky, wp=10, rows=80)               # (80, 32) f32
    h = jnp.dot(y2.astype(bf16), w2b_ref[...],
                preferred_element_type=f32) + b2b_ref[...]           # (80, 32) f32

    # ---- upsample_1 deconv (k3 s2 p1 op1): on-chip zero-insert via a constant
    #      selection matmul, then a VALID 3x3 conv over the resulting 18x18 grid
    z = jnp.dot(sz_ref[...], h.astype(bf16),
                preferred_element_type=f32).astype(bf16)             # (326, 32)
    u = conv3x3([(z, wd_ref)], shd_ref[...], relu, wp=18, rows=288)  # (288, 32)

    # ---- two trailing 3x3 convs (+ folded BN + ReLU) at 16x16 -----------------
    zpad = jnp.zeros((19, 32), f32)
    for taps_ref, shift_ref in ((wu2_ref, shu2_ref), (wu3_ref, shu3_ref)):
        uf = (jnp.concatenate([zpad, u, zpad], axis=0) * m16_ref[...]).astype(bf16)
        u = conv3x3([(uf, taps_ref)], shift_ref[...], relu, wp=18, rows=288)

    # lane-dense output: pack four 72-row blocks into 128 lanes
    o_ref[0, :, 0:32] = u[0:72, :]
    o_ref[0, :, 32:64] = u[72:144, :]
    o_ref[0, :, 64:96] = u[144:216, :]
    o_ref[0, :, 96:128] = u[216:288, :]


# ----------------------------------------------------------------------------
# Trace-time preparation: fold BN scales into weights, build tap stacks,
# constant scatter matrices and the 16x16 interior mask.
# ----------------------------------------------------------------------------
def fold_bn(gamma, beta, mean, var, eps=1e-5):
    inv = gamma / jnp.sqrt(var + eps)
    return inv, beta - mean * inv


def _prepare_operands(params):
    f32, bf16 = jnp.float32, jnp.bfloat16

    def taps(w_oihw, scale):  # (O, I, 3, 3) -> (9, I, O), BN scale folded
        t = jnp.stack([w_oihw[:, :, dy, dx].T
                       for dy in range(3) for dx in range(3)], axis=0)
        return (t * scale[None, None, :]).astype(bf16)

    sc1, of1 = params["bn1"]
    sc2a, of2a = params["bn2a"]
    scu1, ofu1 = params["bnu1"]
    scu2, ofu2 = params["bnu2"]
    scu3, ofu3 = params["bnu3"]

    ops = {}
    # conv_1: (32,3,3,3) -> (27,32), K padded to 32, scale folded
    w1 = jnp.transpose(params["w1"], (2, 3, 1, 0)).reshape(27, 32) * sc1[None, :]
    ops["w1"] = jnp.pad(w1, ((0, 5), (0, 0))).astype(bf16)
    ops["sh1"] = of1.reshape(1, 32).astype(f32)

    # conv_2 3x3: split input channels into fm(0:32) and [mask, x128, zero-pad]
    ops["w2afm"] = taps(params["w2a"][:, 0:32], sc2a)
    w2amx = jnp.stack([params["w2a"][:, 32:65, dy, dx].T
                       for dy in range(3) for dx in range(3)], axis=0)  # (9,33,32)
    w2amx = jnp.pad(w2amx, ((0, 0), (0, 31), (0, 0))) * sc2a[None, None, :]
    ops["w2amx"] = w2amx.astype(bf16)
    ops["sh2a"] = of2a.reshape(1, 32).astype(f32)

    # conv_2 trailing 1x1 (+bias, no BN)
    ops["w2b"] = params["w2b"][:, :, 0, 0].T.astype(bf16)
    ops["b2b"] = params["b2b"].reshape(1, 32).astype(f32)

    # deconv: equivalent regular-conv tap (dy,dx) of ConvTranspose weight (I,O,kh,kw)
    wd = jnp.stack([params["wt"][:, :, 2 - dy, 2 - dx]
                    for dy in range(3) for dx in range(3)], axis=0)     # (9,32,32)
    ops["wd"] = (wd * scu1[None, None, :]).astype(bf16)
    ops["shd"] = ofu1.reshape(1, 32).astype(f32)

    ops["wu2"] = taps(params["wu2"], scu2)
    ops["shu2"] = ofu2.reshape(1, 32).astype(f32)
    ops["wu3"] = taps(params["wu3"], scu3)
    ops["shu3"] = ofu3.reshape(1, 32).astype(f32)

    # constant 0/1 scatter matrices
    a = jnp.arange(8)
    r1 = (10 * a[:, None] + a[None, :] + 11).reshape(-1)      # (a+1)*10 + (b+1)
    c1 = (8 * a[:, None] + a[None, :]).reshape(-1)            # a*8 + b
    ops["s1"] = jnp.zeros((102, 64), f32).at[r1, c1].set(1.0).astype(bf16)

    rz = (19 + 36 * a[:, None] + 2 * a[None, :]).reshape(-1)  # (1+2a)*18 + (1+2b)
    cz = (10 * a[:, None] + a[None, :]).reshape(-1)           # a*10 + b
    ops["sz"] = jnp.zeros((326, 80), f32).at[rz, cz].set(1.0).astype(bf16)

    # interior mask for the padded-flat 16x16 (18x18 + 2 spare rows) layout
    r = jnp.arange(326)
    yy, xx = r // 18, r % 18
    m16 = (r < 324) & (yy >= 1) & (yy <= 16) & (xx >= 1) & (xx <= 16)
    ops["m16"] = m16.astype(f32).reshape(326, 1)
    return ops


# ----------------------------------------------------------------------------
# Wrapper: NCHW in / NCHW out, one fused pallas_call over grid=(batch,)
# ----------------------------------------------------------------------------
def amo_forward(params, x_nchw, mask_nchw, x128_nchw):
    f32, bf16 = jnp.float32, jnp.bfloat16
    B = x_nchw.shape[0]

    x = jnp.transpose(x_nchw, (0, 2, 3, 1))        # (B,16,16,3)
    mask = jnp.transpose(mask_nchw, (0, 2, 3, 1))  # (B,8,8,1)
    x128 = jnp.transpose(x128_nchw, (0, 2, 3, 1))  # (B,8,8,32)

    ops = _prepare_operands(params)

    # conv_1 im2col (tiny: 64x27 per image), K padded 27->32
    xp = jnp.pad(x, ((0, 0), (1, 1), (1, 1), (0, 0)))
    cols = [xp[:, dy:dy + 15:2, dx:dx + 15:2, :]
            for dy in range(3) for dx in range(3)]
    p1 = jnp.concatenate(cols, axis=-1).reshape(B, 64, 27)
    p1 = jnp.pad(p1, ((0, 0), (0, 0), (0, 5))).astype(bf16)         # (B,64,32)

    # [mask, x_128] in padded-flat 8x8 layout (+2 spare rows), channels padded to 64
    mx = jnp.concatenate([mask, x128], axis=-1)                      # (B,8,8,33)
    mx = jnp.pad(mx, ((0, 0), (1, 1), (1, 1), (0, 31)))              # (B,10,10,64)
    mx = jnp.pad(mx.reshape(B, 100, 64), ((0, 0), (0, 2), (0, 0))).astype(bf16)

    batch3 = lambda s: pl.BlockSpec((1,) + s, lambda b: (b, 0, 0))
    const2 = lambda s: pl.BlockSpec(s, lambda b: (0, 0))
    const3 = lambda s: pl.BlockSpec(s, lambda b: (0, 0, 0))

    out = pl.pallas_call(
        _amo_fused_kernel,
        out_shape=jax.ShapeDtypeStruct((B, 72, 128), f32),
        grid=(B,),
        in_specs=[
            batch3((64, 32)),        # p1
            batch3((102, 64)),       # mx
            const2((102, 64)),       # s1
            const2((326, 80)),       # sz
            const2((32, 32)),        # w1
            const2((1, 32)),         # sh1
            const3((9, 32, 32)),     # w2a (fm part)
            const3((9, 64, 32)),     # w2a (mask/x128 part)
            const2((1, 32)),         # sh2a
            const2((32, 32)),        # w2b
            const2((1, 32)),         # b2b
            const3((9, 32, 32)),     # deconv taps
            const2((1, 32)),         # shd
            const3((9, 32, 32)),     # wu2
            const2((1, 32)),         # shu2
            const3((9, 32, 32)),     # wu3
            const2((1, 32)),         # shu3
            const2((326, 1)),        # interior mask
        ],
        out_specs=pl.BlockSpec((1, 72, 128), lambda b: (b, 0, 0)),
        compiler_params=pltpu.CompilerParams(
            dimension_semantics=("parallel",)),
    )(p1, mx, ops["s1"], ops["sz"], ops["w1"], ops["sh1"],
      ops["w2afm"], ops["w2amx"], ops["sh2a"], ops["w2b"], ops["b2b"],
      ops["wd"], ops["shd"], ops["wu2"], ops["shu2"], ops["wu3"], ops["shu3"],
      ops["m16"])

    # unscramble the lane-dense packing; drop the 2 junk columns per row
    o = out.reshape(B, 72, 4, 32).transpose(0, 2, 1, 3).reshape(B, 16, 18, 32)
    o = o[:, :, :16, :]
    return jnp.transpose(o, (0, 3, 1, 2))          # (B, 32, 16, 16)


# ----------------------------------------------------------------------------
# Deterministic parameter construction (shapes from AMO.__init__)
# ----------------------------------------------------------------------------
def make_params(key):
    ks = iter(jax.random.split(key, 64))

    def conv_w(co, ci, kh, kw):
        return 0.05 * jax.random.normal(next(ks), (co, ci, kh, kw), jnp.float32)

    def bn(c):
        gamma = 1.0 + 0.1 * jax.random.normal(next(ks), (c,), jnp.float32)
        beta = 0.1 * jax.random.normal(next(ks), (c,), jnp.float32)
        mean = 0.1 * jax.random.normal(next(ks), (c,), jnp.float32)
        var = jnp.abs(jax.random.normal(next(ks), (c,), jnp.float32)) + 0.5
        return fold_bn(gamma, beta, mean, var)

    p = {}
    p["w1"] = conv_w(32, 3, 3, 3)            # conv_1
    p["bn1"] = bn(32)
    p["w2a"] = conv_w(32, 65, 3, 3)          # conv_2 3x3
    p["bn2a"] = bn(32)
    p["w2b"] = conv_w(32, 32, 1, 1)          # conv_2 1x1 (+bias)
    p["b2b"] = 0.05 * jax.random.normal(next(ks), (32,), jnp.float32)
    p["wt"] = 0.05 * jax.random.normal(next(ks), (32, 32, 3, 3), jnp.float32)  # ConvT (IOHW)
    p["bnu1"] = bn(32)
    p["wu2"] = conv_w(32, 32, 3, 3)
    p["bnu2"] = bn(32)
    p["wu3"] = conv_w(32, 32, 3, 3)
    p["bnu3"] = bn(32)
    return p


# ----------------------------------------------------------------------------
# Pure-JAX (XLA) reference of the same forward, used as a numerical check
# ----------------------------------------------------------------------------
def ref_forward(params, x_nchw, mask_nchw, x128_nchw):
    dn = ("NHWC", "HWIO", "NHWC")
    hp = lax.Precision.HIGHEST

    x = jnp.transpose(x_nchw, (0, 2, 3, 1))
    mask = jnp.transpose(mask_nchw, (0, 2, 3, 1))
    x128 = jnp.transpose(x128_nchw, (0, 2, 3, 1))

    def conv(v, w_oihw, stride, pad):
        w = jnp.transpose(w_oihw, (2, 3, 1, 0))
        return lax.conv_general_dilated(
            v, w, (stride, stride), ((pad, pad), (pad, pad)),
            dimension_numbers=dn, precision=hp)

    def aff(v, sb):
        s, b = sb
        return v * s + b

    lrelu = lambda v: jnp.where(v >= 0.0, v, 0.1 * v)

    fm = lrelu(aff(conv(x, params["w1"], 2, 1), params["bn1"]))
    cat = jnp.concatenate([fm, mask, x128], axis=-1)
    h = lrelu(aff(conv(cat, params["w2a"], 1, 1), params["bn2a"]))
    h = conv(h, params["w2b"], 1, 0) + params["b2b"]

    wt = jnp.transpose(params["wt"][:, :, ::-1, ::-1], (2, 3, 0, 1))  # HWIO
    u = lax.conv_general_dilated(h, wt, (1, 1), ((1, 2), (1, 2)),
                                 lhs_dilation=(2, 2),
                                 dimension_numbers=dn, precision=hp)
    u = jnp.maximum(aff(u, params["bnu1"]), 0.0)
    u = jnp.maximum(aff(conv(u, params["wu2"], 1, 1), params["bnu2"]), 0.0)
    u = jnp.maximum(aff(conv(u, params["wu3"], 1, 1), params["bnu3"]), 0.0)
    return jnp.transpose(u, (0, 3, 1, 2))


if __name__ == "__main__":
    key = jax.random.PRNGKey(0)
    kp, kx, km, kf = jax.random.split(key, 4)

    params = make_params(kp)

    B, H, W = 2, 16, 16
    x = jax.random.normal(kx, (B, 3, H, W), jnp.float32)                       # image
    mask = (jax.random.uniform(km, (B, 1, H // 2, W // 2)) > 0.5).astype(jnp.float32)
    x_128 = jax.random.normal(kf, (B, 32, H // 2, W // 2), jnp.float32)        # resnet feat

    out = jax.jit(amo_forward)(params, x, mask, x_128)
    out = jax.block_until_ready(out)

    assert out.shape == (B, 32, H, W), out.shape
    assert bool(jnp.all(jnp.isfinite(out)))

    ref = jax.jit(ref_forward)(params, x, mask, x_128)
    err = float(jnp.max(jnp.abs(out - ref)))
    assert err < 5e-2, f"max abs err vs reference: {err}"

    print("KERNEL_OK")
</pallas_src>

<mosaic_0001>
module attributes {stable_mosaic.version = 11 : i64} {
  func.func @_amo_fused_kernel(%arg0: i32, %arg1: memref<1x64x32xbf16, #tpu.memory_space<vmem>>, %arg2: memref<1x102x64xbf16, #tpu.memory_space<vmem>>, %arg3: memref<102x64xbf16, #tpu.memory_space<vmem>>, %arg4: memref<326x80xbf16, #tpu.memory_space<vmem>>, %arg5: memref<32x32xbf16, #tpu.memory_space<vmem>>, %arg6: memref<1x32xf32, #tpu.memory_space<vmem>>, %arg7: memref<9x32x32xbf16, #tpu.memory_space<vmem>>, %arg8: memref<9x64x32xbf16, #tpu.memory_space<vmem>>, %arg9: memref<1x32xf32, #tpu.memory_space<vmem>>, %arg10: memref<32x32xbf16, #tpu.memory_space<vmem>>, %arg11: memref<1x32xf32, #tpu.memory_space<vmem>>, %arg12: memref<9x32x32xbf16, #tpu.memory_space<vmem>>, %arg13: memref<1x32xf32, #tpu.memory_space<vmem>>, %arg14: memref<9x32x32xbf16, #tpu.memory_space<vmem>>, %arg15: memref<1x32xf32, #tpu.memory_space<vmem>>, %arg16: memref<9x32x32xbf16, #tpu.memory_space<vmem>>, %arg17: memref<1x32xf32, #tpu.memory_space<vmem>>, %arg18: memref<326x1xf32, #tpu.memory_space<vmem>>, %arg19: memref<1x72x128xf32, #tpu.memory_space<vmem>>) attributes {dimension_semantics = [#tpu.dimension_semantics<parallel>], iteration_bounds = array<i64: 2>, scalar_prefetch = 0 : i64, scratch_operands = 0 : i64, tpu.core_type = #tpu.core_type<tc>, window_params = [{transform_indices = @transform_0, window_bounds = array<i64: 1, 64, 32>}, {transform_indices = @transform_1, window_bounds = array<i64: 1, 102, 64>}, {pipeline_mode = #tpu.pipeline_mode<synchronous>, transform_indices = @transform_2, window_bounds = array<i64: 102, 64>}, {pipeline_mode = #tpu.pipeline_mode<synchronous>, transform_indices = @transform_3, window_bounds = array<i64: 326, 80>}, {pipeline_mode = #tpu.pipeline_mode<synchronous>, transform_indices = @transform_4, window_bounds = array<i64: 32, 32>}, {pipeline_mode = #tpu.pipeline_mode<synchronous>, transform_indices = @transform_5, window_bounds = array<i64: 1, 32>}, {pipeline_mode = #tpu.pipeline_mode<synchronous>, transform_indices = @transform_6, window_bounds = array<i64: 9, 32, 32>}, {pipeline_mode = #tpu.pipeline_mode<synchronous>, transform_indices = @transform_7, window_bounds = array<i64: 9, 64, 32>}, {pipeline_mode = #tpu.pipeline_mode<synchronous>, transform_indices = @transform_8, window_bounds = array<i64: 1, 32>}, {pipeline_mode = #tpu.pipeline_mode<synchronous>, transform_indices = @transform_9, window_bounds = array<i64: 32, 32>}, {pipeline_mode = #tpu.pipeline_mode<synchronous>, transform_indices = @transform_10, window_bounds = array<i64: 1, 32>}, {pipeline_mode = #tpu.pipeline_mode<synchronous>, transform_indices = @transform_11, window_bounds = array<i64: 9, 32, 32>}, {pipeline_mode = #tpu.pipeline_mode<synchronous>, transform_indices = @transform_12, window_bounds = array<i64: 1, 32>}, {pipeline_mode = #tpu.pipeline_mode<synchronous>, transform_indices = @transform_13, window_bounds = array<i64: 9, 32, 32>}, {pipeline_mode = #tpu.pipeline_mode<synchronous>, transform_indices = @transform_14, window_bounds = array<i64: 1, 32>}, {pipeline_mode = #tpu.pipeline_mode<synchronous>, transform_indices = @transform_15, window_bounds = array<i64: 9, 32, 32>}, {pipeline_mode = #tpu.pipeline_mode<synchronous>, transform_indices = @transform_16, window_bounds = array<i64: 1, 32>}, {pipeline_mode = #tpu.pipeline_mode<synchronous>, transform_indices = @transform_17, window_bounds = array<i64: 326, 1>}, {transform_indices = @transform_18, window_bounds = array<i64: 1, 72, 128>}]} {
    %c0 = arith.constant 0 : index
    %c0_0 = arith.constant 0 : index
    %c0_1 = arith.constant 0 : index
    %0 = vector.load %arg1[%c0, %c0_0, %c0_1] : memref<1x64x32xbf16, #tpu.memory_space<vmem>>, vector<1x64x32xbf16>
    %1 = vector.shape_cast %0 : vector<1x64x32xbf16> to vector<64x32xbf16>
    %c0_2 = arith.constant 0 : index
    %c0_3 = arith.constant 0 : index
    %2 = vector.load %arg5[%c0_2, %c0_3] : memref<32x32xbf16, #tpu.memory_space<vmem>>, vector<32x32xbf16>
    %cst = arith.constant dense<0.000000e+00> : vector<64x32xf32>
    %3 = tpu.matmul %1, %2, %cst {dimension_numbers = #tpu.dot_dimension_numbers<[1], [0], [0], [1], [0, 0, 1, 1], [], []>} : vector<64x32xbf16>, vector<32x32xbf16>, vector<64x32xf32> -> vector<64x32xf32>
    %c0_4 = arith.constant 0 : index
    %c0_5 = arith.constant 0 : index
    %4 = vector.load %arg6[%c0_4, %c0_5] : memref<1x32xf32, #tpu.memory_space<vmem>>, vector<1x32xf32>
    %5 = vector.broadcast %4 : vector<1x32xf32> to vector<64x32xf32>
    %6 = arith.addf %3, %5 : vector<64x32xf32>
    %cst_6 = arith.constant 0.000000e+00 : f32
    %7 = vector.broadcast %cst_6 : f32 to vector<64x32xf32>
    %8 = arith.cmpf oge, %6, %7 : vector<64x32xf32>
    %cst_7 = arith.constant 1.000000e-01 : f32
    %9 = vector.broadcast %cst_7 : f32 to vector<64x32xf32>
    %10 = arith.mulf %9, %6 : vector<64x32xf32>
    %11 = arith.select %8, %6, %10 : vector<64x32xi1>, vector<64x32xf32>
    %c0_8 = arith.constant 0 : index
    %c0_9 = arith.constant 0 : index
    %12 = vector.load %arg3[%c0_8, %c0_9] : memref<102x64xbf16, #tpu.memory_space<vmem>>, vector<102x64xbf16>
    %13 = arith.truncf %11 : vector<64x32xf32> to vector<64x32xbf16>
    %cst_10 = arith.constant dense<0.000000e+00> : vector<102x32xf32>
    %14 = tpu.matmul %12, %13, %cst_10 {dimension_numbers = #tpu.dot_dimension_numbers<[1], [0], [0], [1], [0, 0, 1, 1], [], []>} : vector<102x64xbf16>, vector<64x32xbf16>, vector<102x32xf32> -> vector<102x32xf32>
    %15 = arith.truncf %14 : vector<102x32xf32> to vector<102x32xbf16>
    %c0_11 = arith.constant 0 : index
    %c0_12 = arith.constant 0 : index
    %c0_13 = arith.constant 0 : index
    %16 = vector.load %arg2[%c0_11, %c0_12, %c0_13] : memref<1x102x64xbf16, #tpu.memory_space<vmem>>, vector<1x102x64xbf16>
    %17 = vector.shape_cast %16 : vector<1x102x64xbf16> to vector<102x64xbf16>
    %c0_14 = arith.constant 0 : index
    %c0_15 = arith.constant 0 : index
    %18 = vector.load %arg9[%c0_14, %c0_15] : memref<1x32xf32, #tpu.memory_space<vmem>>, vector<1x32xf32>
    %cst_16 = arith.constant 0.000000e+00 : f32
    %19 = vector.broadcast %cst_16 : f32 to vector<80x32xf32>
    %20 = vector.extract_strided_slice %15 {offsets = [0, 0], sizes = [80, 32], strides = [1, 1]} : vector<102x32xbf16> to vector<80x32xbf16>
    %c0_17 = arith.constant 0 : index
    %c0_18 = arith.constant 0 : index
    %c0_19 = arith.constant 0 : index
    %21 = vector.load %arg7[%c0_17, %c0_18, %c0_19] : memref<9x32x32xbf16, #tpu.memory_space<vmem>>, vector<1x32x32xbf16>
    %22 = vector.shape_cast %21 : vector<1x32x32xbf16> to vector<32x32xbf16>
    %cst_20 = arith.constant dense<0.000000e+00> : vector<80x32xf32>
    %23 = tpu.matmul %20, %22, %cst_20 {dimension_numbers = #tpu.dot_dimension_numbers<[1], [0], [0], [1], [0, 0, 1, 1], [], []>} : vector<80x32xbf16>, vector<32x32xbf16>, vector<80x32xf32> -> vector<80x32xf32>
    %24 = arith.addf %19, %23 : vector<80x32xf32>
    %25 = vector.extract_strided_slice %17 {offsets = [0, 0], sizes = [80, 64], strides = [1, 1]} : vector<102x64xbf16> to vector<80x64xbf16>
    %c0_21 = arith.constant 0 : index
    %c0_22 = arith.constant 0 : index
    %c0_23 = arith.constant 0 : index
    %26 = vector.load %arg8[%c0_21, %c0_22, %c0_23] : memref<9x64x32xbf16, #tpu.memory_space<vmem>>, vector<1x64x32xbf16>
    %27 = vector.shape_cast %26 : vector<1x64x32xbf16> to vector<64x32xbf16>
    %cst_24 = arith.constant dense<0.000000e+00> : vector<80x32xf32>
    %28 = tpu.matmul %25, %27, %cst_24 {dimension_numbers = #tpu.dot_dimension_numbers<[1], [0], [0], [1], [0, 0, 1, 1], [], []>} : vector<80x64xbf16>, vector<64x32xbf16>, vector<80x32xf32> -> vector<80x32xf32>
    %29 = arith.addf %24, %28 : vector<80x32xf32>
    %30 = vector.extract_strided_slice %15 {offsets = [1, 0], sizes = [80, 32], strides = [1, 1]} : vector<102x32xbf16> to vector<80x32xbf16>
    %c1 = arith.constant 1 : index
    %c0_25 = arith.constant 0 : index
    %c0_26 = arith.constant 0 : index
    %31 = vector.load %arg7[%c1, %c0_25, %c0_26] : memref<9x32x32xbf16, #tpu.memory_space<vmem>>, vector<1x32x32xbf16>
    %32 = vector.shape_cast %31 : vector<1x32x32xbf16> to vector<32x32xbf16>
    %cst_27 = arith.constant dense<0.000000e+00> : vector<80x32xf32>
    %33 = tpu.matmul %30, %32, %cst_27 {dimension_numbers = #tpu.dot_dimension_numbers<[1], [0], [0], [1], [0, 0, 1, 1], [], []>} : vector<80x32xbf16>, vector<32x32xbf16>, vector<80x32xf32> -> vector<80x32xf32>
    %34 = arith.addf %29, %33 : vector<80x32xf32>
    %35 = vector.extract_strided_slice %17 {offsets = [1, 0], sizes = [80, 64], strides = [1, 1]} : vector<102x64xbf16> to vector<80x64xbf16>
    %c1_28 = arith.constant 1 : index
    %c0_29 = arith.constant 0 : index
    %c0_30 = arith.constant 0 : index
    %36 = vector.load %arg8[%c1_28, %c0_29, %c0_30] : memref<9x64x32xbf16, #tpu.memory_space<vmem>>, vector<1x64x32xbf16>
    %37 = vector.shape_cast %36 : vector<1x64x32xbf16> to vector<64x32xbf16>
    %cst_31 = arith.constant dense<0.000000e+00> : vector<80x32xf32>
    %38 = tpu.matmul %35, %37, %cst_31 {dimension_numbers = #tpu.dot_dimension_numbers<[1], [0], [0], [1], [0, 0, 1, 1], [], []>} : vector<80x64xbf16>, vector<64x32xbf16>, vector<80x32xf32> -> vector<80x32xf32>
    %39 = arith.addf %34, %38 : vector<80x32xf32>
    %40 = vector.extract_strided_slice %15 {offsets = [2, 0], sizes = [80, 32], strides = [1, 1]} : vector<102x32xbf16> to vector<80x32xbf16>
    %c2 = arith.constant 2 : index
    %c0_32 = arith.constant 0 : index
    %c0_33 = arith.constant 0 : index
    %41 = vector.load %arg7[%c2, %c0_32, %c0_33] : memref<9x32x32xbf16, #tpu.memory_space<vmem>>, vector<1x32x32xbf16>
    %42 = vector.shape_cast %41 : vector<1x32x32xbf16> to vector<32x32xbf16>
    %cst_34 = arith.constant dense<0.000000e+00> : vector<80x32xf32>
    %43 = tpu.matmul %40, %42, %cst_34 {dimension_numbers = #tpu.dot_dimension_numbers<[1], [0], [0], [1], [0, 0, 1, 1], [], []>} : vector<80x32xbf16>, vector<32x32xbf16>, vector<80x32xf32> -> vector<80x32xf32>
    %44 = arith.addf %39, %43 : vector<80x32xf32>
    %45 = vector.extract_strided_slice %17 {offsets = [2, 0], sizes = [80, 64], strides = [1, 1]} : vector<102x64xbf16> to vector<80x64xbf16>
    %c2_35 = arith.constant 2 : index
    %c0_36 = arith.constant 0 : index
    %c0_37 = arith.constant 0 : index
    %46 = vector.load %arg8[%c2_35, %c0_36, %c0_37] : memref<9x64x32xbf16, #tpu.memory_space<vmem>>, vector<1x64x32xbf16>
    %47 = vector.shape_cast %46 : vector<1x64x32xbf16> to vector<64x32xbf16>
    %cst_38 = arith.constant dense<0.000000e+00> : vector<80x32xf32>
    %48 = tpu.matmul %45, %47, %cst_38 {dimension_numbers = #tpu.dot_dimension_numbers<[1], [0], [0], [1], [0, 0, 1, 1], [], []>} : vector<80x64xbf16>, vector<64x32xbf16>, vector<80x32xf32> -> vector<80x32xf32>
    %49 = arith.addf %44, %48 : vector<80x32xf32>
    %50 = vector.extract_strided_slice %15 {offsets = [10, 0], sizes = [80, 32], strides = [1, 1]} : vector<102x32xbf16> to vector<80x32xbf16>
    %c3 = arith.constant 3 : index
    %c0_39 = arith.constant 0 : index
    %c0_40 = arith.constant 0 : index
    %51 = vector.load %arg7[%c3, %c0_39, %c0_40] : memref<9x32x32xbf16, #tpu.memory_space<vmem>>, vector<1x32x32xbf16>
    %52 = vector.shape_cast %51 : vector<1x32x32xbf16> to vector<32x32xbf16>
    %cst_41 = arith.constant dense<0.000000e+00> : vector<80x32xf32>
    %53 = tpu.matmul %50, %52, %cst_41 {dimension_numbers = #tpu.dot_dimension_numbers<[1], [0], [0], [1], [0, 0, 1, 1], [], []>} : vector<80x32xbf16>, vector<32x32xbf16>, vector<80x32xf32> -> vector<80x32xf32>
    %54 = arith.addf %49, %53 : vector<80x32xf32>
    %55 = vector.extract_strided_slice %17 {offsets = [10, 0], sizes = [80, 64], strides = [1, 1]} : vector<102x64xbf16> to vector<80x64xbf16>
    %c3_42 = arith.constant 3 : index
    %c0_43 = arith.constant 0 : index
    %c0_44 = arith.constant 0 : index
    %56 = vector.load %arg8[%c3_42, %c0_43, %c0_44] : memref<9x64x32xbf16, #tpu.memory_space<vmem>>, vector<1x64x32xbf16>
    %57 = vector.shape_cast %56 : vector<1x64x32xbf16> to vector<64x32xbf16>
    %cst_45 = arith.constant dense<0.000000e+00> : vector<80x32xf32>
    %58 = tpu.matmul %55, %57, %cst_45 {dimension_numbers = #tpu.dot_dimension_numbers<[1], [0], [0], [1], [0, 0, 1, 1], [], []>} : vector<80x64xbf16>, vector<64x32xbf16>, vector<80x32xf32> -> vector<80x32xf32>
    %59 = arith.addf %54, %58 : vector<80x32xf32>
    %60 = vector.extract_strided_slice %15 {offsets = [11, 0], sizes = [80, 32], strides = [1, 1]} : vector<102x32xbf16> to vector<80x32xbf16>
    %c4 = arith.constant 4 : index
    %c0_46 = arith.constant 0 : index
    %c0_47 = arith.constant 0 : index
    %61 = vector.load %arg7[%c4, %c0_46, %c0_47] : memref<9x32x32xbf16, #tpu.memory_space<vmem>>, vector<1x32x32xbf16>
    %62 = vector.shape_cast %61 : vector<1x32x32xbf16> to vector<32x32xbf16>
    %cst_48 = arith.constant dense<0.000000e+00> : vector<80x32xf32>
    %63 = tpu.matmul %60, %62, %cst_48 {dimension_numbers = #tpu.dot_dimension_numbers<[1], [0], [0], [1], [0, 0, 1, 1], [], []>} : vector<80x32xbf16>, vector<32x32xbf16>, vector<80x32xf32> -> vector<80x32xf32>
    %64 = arith.addf %59, %63 : vector<80x32xf32>
    %65 = vector.extract_strided_slice %17 {offsets = [11, 0], sizes = [80, 64], strides = [1, 1]} : vector<102x64xbf16> to vector<80x64xbf16>
    %c4_49 = arith.constant 4 : index
    %c0_50 = arith.constant 0 : index
    %c0_51 = arith.constant 0 : index
    %66 = vector.load %arg8[%c4_49, %c0_50, %c0_51] : memref<9x64x32xbf16, #tpu.memory_space<vmem>>, vector<1x64x32xbf16>
    %67 = vector.shape_cast %66 : vector<1x64x32xbf16> to vector<64x32xbf16>
    %cst_52 = arith.constant dense<0.000000e+00> : vector<80x32xf32>
    %68 = tpu.matmul %65, %67, %cst_52 {dimension_numbers = #tpu.dot_dimension_numbers<[1], [0], [0], [1], [0, 0, 1, 1], [], []>} : vector<80x64xbf16>, vector<64x32xbf16>, vector<80x32xf32> -> vector<80x32xf32>
    %69 = arith.addf %64, %68 : vector<80x32xf32>
    %70 = vector.extract_strided_slice %15 {offsets = [12, 0], sizes = [80, 32], strides = [1, 1]} : vector<102x32xbf16> to vector<80x32xbf16>
    %c5 = arith.constant 5 : index
    %c0_53 = arith.constant 0 : index
    %c0_54 = arith.constant 0 : index
    %71 = vector.load %arg7[%c5, %c0_53, %c0_54] : memref<9x32x32xbf16, #tpu.memory_space<vmem>>, vector<1x32x32xbf16>
    %72 = vector.shape_cast %71 : vector<1x32x32xbf16> to vector<32x32xbf16>
    %cst_55 = arith.constant dense<0.000000e+00> : vector<80x32xf32>
    %73 = tpu.matmul %70, %72, %cst_55 {dimension_numbers = #tpu.dot_dimension_numbers<[1], [0], [0], [1], [0, 0, 1, 1], [], []>} : vector<80x32xbf16>, vector<32x32xbf16>, vector<80x32xf32> -> vector<80x32xf32>
    %74 = arith.addf %69, %73 : vector<80x32xf32>
    %75 = vector.extract_strided_slice %17 {offsets = [12, 0], sizes = [80, 64], strides = [1, 1]} : vector<102x64xbf16> to vector<80x64xbf16>
    %c5_56 = arith.constant 5 : index
    %c0_57 = arith.constant 0 : index
    %c0_58 = arith.constant 0 : index
    %76 = vector.load %arg8[%c5_56, %c0_57, %c0_58] : memref<9x64x32xbf16, #tpu.memory_space<vmem>>, vector<1x64x32xbf16>
    %77 = vector.shape_cast %76 : vector<1x64x32xbf16> to vector<64x32xbf16>
    %cst_59 = arith.constant dense<0.000000e+00> : vector<80x32xf32>
    %78 = tpu.matmul %75, %77, %cst_59 {dimension_numbers = #tpu.dot_dimension_numbers<[1], [0], [0], [1], [0, 0, 1, 1], [], []>} : vector<80x64xbf16>, vector<64x32xbf16>, vector<80x32xf32> -> vector<80x32xf32>
    %79 = arith.addf %74, %78 : vector<80x32xf32>
    %80 = vector.extract_strided_slice %15 {offsets = [20, 0], sizes = [80, 32], strides = [1, 1]} : vector<102x32xbf16> to vector<80x32xbf16>
    %c6 = arith.constant 6 : index
    %c0_60 = arith.constant 0 : index
    %c0_61 = arith.constant 0 : index
    %81 = vector.load %arg7[%c6, %c0_60, %c0_61] : memref<9x32x32xbf16, #tpu.memory_space<vmem>>, vector<1x32x32xbf16>
    %82 = vector.shape_cast %81 : vector<1x32x32xbf16> to vector<32x32xbf16>
    %cst_62 = arith.constant dense<0.000000e+00> : vector<80x32xf32>
    %83 = tpu.matmul %80, %82, %cst_62 {dimension_numbers = #tpu.dot_dimension_numbers<[1], [0], [0], [1], [0, 0, 1, 1], [], []>} : vector<80x32xbf16>, vector<32x32xbf16>, vector<80x32xf32> -> vector<80x32xf32>
    %84 = arith.addf %79, %83 : vector<80x32xf32>
    %85 = vector.extract_strided_slice %17 {offsets = [20, 0], sizes = [80, 64], strides = [1, 1]} : vector<102x64xbf16> to vector<80x64xbf16>
    %c6_63 = arith.constant 6 : index
    %c0_64 = arith.constant 0 : index
    %c0_65 = arith.constant 0 : index
    %86 = vector.load %arg8[%c6_63, %c0_64, %c0_65] : memref<9x64x32xbf16, #tpu.memory_space<vmem>>, vector<1x64x32xbf16>
    %87 = vector.shape_cast %86 : vector<1x64x32xbf16> to vector<64x32xbf16>
    %cst_66 = arith.constant dense<0.000000e+00> : vector<80x32xf32>
    %88 = tpu.matmul %85, %87, %cst_66 {dimension_numbers = #tpu.dot_dimension_numbers<[1], [0], [0], [1], [0, 0, 1, 1], [], []>} : vector<80x64xbf16>, vector<64x32xbf16>, vector<80x32xf32> -> vector<80x32xf32>
    %89 = arith.addf %84, %88 : vector<80x32xf32>
    %90 = vector.extract_strided_slice %15 {offsets = [21, 0], sizes = [80, 32], strides = [1, 1]} : vector<102x32xbf16> to vector<80x32xbf16>
    %c7 = arith.constant 7 : index
    %c0_67 = arith.constant 0 : index
    %c0_68 = arith.constant 0 : index
    %91 = vector.load %arg7[%c7, %c0_67, %c0_68] : memref<9x32x32xbf16, #tpu.memory_space<vmem>>, vector<1x32x32xbf16>
    %92 = vector.shape_cast %91 : vector<1x32x32xbf16> to vector<32x32xbf16>
    %cst_69 = arith.constant dense<0.000000e+00> : vector<80x32xf32>
    %93 = tpu.matmul %90, %92, %cst_69 {dimension_numbers = #tpu.dot_dimension_numbers<[1], [0], [0], [1], [0, 0, 1, 1], [], []>} : vector<80x32xbf16>, vector<32x32xbf16>, vector<80x32xf32> -> vector<80x32xf32>
    %94 = arith.addf %89, %93 : vector<80x32xf32>
    %95 = vector.extract_strided_slice %17 {offsets = [21, 0], sizes = [80, 64], strides = [1, 1]} : vector<102x64xbf16> to vector<80x64xbf16>
    %c7_70 = arith.constant 7 : index
    %c0_71 = arith.constant 0 : index
    %c0_72 = arith.constant 0 : index
    %96 = vector.load %arg8[%c7_70, %c0_71, %c0_72] : memref<9x64x32xbf16, #tpu.memory_space<vmem>>, vector<1x64x32xbf16>
    %97 = vector.shape_cast %96 : vector<1x64x32xbf16> to vector<64x32xbf16>
    %cst_73 = arith.constant dense<0.000000e+00> : vector<80x32xf32>
    %98 = tpu.matmul %95, %97, %cst_73 {dimension_numbers = #tpu.dot_dimension_numbers<[1], [0], [0], [1], [0, 0, 1, 1], [], []>} : vector<80x64xbf16>, vector<64x32xbf16>, vector<80x32xf32> -> vector<80x32xf32>
    %99 = arith.addf %94, %98 : vector<80x32xf32>
    %100 = vector.extract_strided_slice %15 {offsets = [22, 0], sizes = [80, 32], strides = [1, 1]} : vector<102x32xbf16> to vector<80x32xbf16>
    %c8 = arith.constant 8 : index
    %c0_74 = arith.constant 0 : index
    %c0_75 = arith.constant 0 : index
    %101 = vector.load %arg7[%c8, %c0_74, %c0_75] : memref<9x32x32xbf16, #tpu.memory_space<vmem>>, vector<1x32x32xbf16>
    %102 = vector.shape_cast %101 : vector<1x32x32xbf16> to vector<32x32xbf16>
    %cst_76 = arith.constant dense<0.000000e+00> : vector<80x32xf32>
    %103 = tpu.matmul %100, %102, %cst_76 {dimension_numbers = #tpu.dot_dimension_numbers<[1], [0], [0], [1], [0, 0, 1, 1], [], []>} : vector<80x32xbf16>, vector<32x32xbf16>, vector<80x32xf32> -> vector<80x32xf32>
    %104 = arith.addf %99, %103 : vector<80x32xf32>
    %105 = vector.extract_strided_slice %17 {offsets = [22, 0], sizes = [80, 64], strides = [1, 1]} : vector<102x64xbf16> to vector<80x64xbf16>
    %c8_77 = arith.constant 8 : index
    %c0_78 = arith.constant 0 : index
    %c0_79 = arith.constant 0 : index
    %106 = vector.load %arg8[%c8_77, %c0_78, %c0_79] : memref<9x64x32xbf16, #tpu.memory_space<vmem>>, vector<1x64x32xbf16>
    %107 = vector.shape_cast %106 : vector<1x64x32xbf16> to vector<64x32xbf16>
    %cst_80 = arith.constant dense<0.000000e+00> : vector<80x32xf32>
    %108 = tpu.matmul %105, %107, %cst_80 {dimension_numbers = #tpu.dot_dimension_numbers<[1], [0], [0], [1], [0, 0, 1, 1], [], []>} : vector<80x64xbf16>, vector<64x32xbf16>, vector<80x32xf32> -> vector<80x32xf32>
    %109 = arith.addf %104, %108 : vector<80x32xf32>
    %110 = vector.broadcast %18 : vector<1x32xf32> to vector<80x32xf32>
    %111 = arith.addf %109, %110 : vector<80x32xf32>
    %cst_81 = arith.constant 0.000000e+00 : f32
    %112 = vector.broadcast %cst_81 : f32 to vector<80x32xf32>
    %113 = arith.cmpf oge, %111, %112 : vector<80x32xf32>
    %cst_82 = arith.constant 1.000000e-01 : f32
    %114 = vector.broadcast %cst_82 : f32 to vector<80x32xf32>
    %115 = arith.mulf %114, %111 : vector<80x32xf32>
    %116 = arith.select %113, %111, %115 : vector<80x32xi1>, vector<80x32xf32>
    %117 = arith.truncf %116 : vector<80x32xf32> to vector<80x32xbf16>
    %c0_83 = arith.constant 0 : index
    %c0_84 = arith.constant 0 : index
    %118 = vector.load %arg10[%c0_83, %c0_84] : memref<32x32xbf16, #tpu.memory_space<vmem>>, vector<32x32xbf16>
    %cst_85 = arith.constant dense<0.000000e+00> : vector<80x32xf32>
    %119 = tpu.matmul %117, %118, %cst_85 {dimension_numbers = #tpu.dot_dimension_numbers<[1], [0], [0], [1], [0, 0, 1, 1], [], []>} : vector<80x32xbf16>, vector<32x32xbf16>, vector<80x32xf32> -> vector<80x32xf32>
    %c0_86 = arith.constant 0 : index
    %c0_87 = arith.constant 0 : index
    %120 = vector.load %arg11[%c0_86, %c0_87] : memref<1x32xf32, #tpu.memory_space<vmem>>, vector<1x32xf32>
    %121 = vector.broadcast %120 : vector<1x32xf32> to vector<80x32xf32>
    %122 = arith.addf %119, %121 : vector<80x32xf32>
    %c0_88 = arith.constant 0 : index
    %c0_89 = arith.constant 0 : index
    %123 = vector.load %arg4[%c0_88, %c0_89] : memref<326x80xbf16, #tpu.memory_space<vmem>>, vector<326x80xbf16>
    %124 = arith.truncf %122 : vector<80x32xf32> to vector<80x32xbf16>
    %cst_90 = arith.constant dense<0.000000e+00> : vector<326x32xf32>
    %125 = tpu.matmul %123, %124, %cst_90 {dimension_numbers = #tpu.dot_dimension_numbers<[1], [0], [0], [1], [0, 0, 1, 1], [], []>} : vector<326x80xbf16>, vector<80x32xbf16>, vector<326x32xf32> -> vector<326x32xf32>
    %126 = arith.truncf %125 : vector<326x32xf32> to vector<326x32xbf16>
    %c0_91 = arith.constant 0 : index
    %c0_92 = arith.constant 0 : index
    %127 = vector.load %arg13[%c0_91, %c0_92] : memref<1x32xf32, #tpu.memory_space<vmem>>, vector<1x32xf32>
    %cst_93 = arith.constant 0.000000e+00 : f32
    %128 = vector.broadcast %cst_93 : f32 to vector<288x32xf32>
    %129 = vector.extract_strided_slice %126 {offsets = [0, 0], sizes = [288, 32], strides = [1, 1]} : vector<326x32xbf16> to vector<288x32xbf16>
    %c0_94 = arith.constant 0 : index
    %c0_95 = arith.constant 0 : index
    %c0_96 = arith.constant 0 : index
    %130 = vector.load %arg12[%c0_94, %c0_95, %c0_96] : memref<9x32x32xbf16, #tpu.memory_space<vmem>>, vector<1x32x32xbf16>
    %131 = vector.shape_cast %130 : vector<1x32x32xbf16> to vector<32x32xbf16>
    %cst_97 = arith.constant dense<0.000000e+00> : vector<288x32xf32>
    %132 = tpu.matmul %129, %131, %cst_97 {dimension_numbers = #tpu.dot_dimension_numbers<[1], [0], [0], [1], [0, 0, 1, 1], [], []>} : vector<288x32xbf16>, vector<32x32xbf16>, vector<288x32xf32> -> vector<288x32xf32>
    %133 = arith.addf %128, %132 : vector<288x32xf32>
    %134 = vector.extract_strided_slice %126 {offsets = [1, 0], sizes = [288, 32], strides = [1, 1]} : vector<326x32xbf16> to vector<288x32xbf16>
    %c1_98 = arith.constant 1 : index
    %c0_99 = arith.constant 0 : index
    %c0_100 = arith.constant 0 : index
    %135 = vector.load %arg12[%c1_98, %c0_99, %c0_100] : memref<9x32x32xbf16, #tpu.memory_space<vmem>>, vector<1x32x32xbf16>
    %136 = vector.shape_cast %135 : vector<1x32x32xbf16> to vector<32x32xbf16>
    %cst_101 = arith.constant dense<0.000000e+00> : vector<288x32xf32>
    %137 = tpu.matmul %134, %136, %cst_101 {dimension_numbers = #tpu.dot_dimension_numbers<[1], [0], [0], [1], [0, 0, 1, 1], [], []>} : vector<288x32xbf16>, vector<32x32xbf16>, vector<288x32xf32> -> vector<288x32xf32>
    %138 = arith.addf %133, %137 : vector<288x32xf32>
    %139 = vector.extract_strided_slice %126 {offsets = [2, 0], sizes = [288, 32], strides = [1, 1]} : vector<326x32xbf16> to vector<288x32xbf16>
    %c2_102 = arith.constant 2 : index
    %c0_103 = arith.constant 0 : index
    %c0_104 = arith.constant 0 : index
    %140 = vector.load %arg12[%c2_102, %c0_103, %c0_104] : memref<9x32x32xbf16, #tpu.memory_space<vmem>>, vector<1x32x32xbf16>
    %141 = vector.shape_cast %140 : vector<1x32x32xbf16> to vector<32x32xbf16>
    %cst_105 = arith.constant dense<0.000000e+00> : vector<288x32xf32>
    %142 = tpu.matmul %139, %141, %cst_105 {dimension_numbers = #tpu.dot_dimension_numbers<[1], [0], [0], [1], [0, 0, 1, 1], [], []>} : vector<288x32xbf16>, vector<32x32xbf16>, vector<288x32xf32> -> vector<288x32xf32>
    %143 = arith.addf %138, %142 : vector<288x32xf32>
    %144 = vector.extract_strided_slice %126 {offsets = [18, 0], sizes = [288, 32], strides = [1, 1]} : vector<326x32xbf16> to vector<288x32xbf16>
    %c3_106 = arith.constant 3 : index
    %c0_107 = arith.constant 0 : index
    %c0_108 = arith.constant 0 : index
    %145 = vector.load %arg12[%c3_106, %c0_107, %c0_108] : memref<9x32x32xbf16, #tpu.memory_space<vmem>>, vector<1x32x32xbf16>
    %146 = vector.shape_cast %145 : vector<1x32x32xbf16> to vector<32x32xbf16>
    %cst_109 = arith.constant dense<0.000000e+00> : vector<288x32xf32>
    %147 = tpu.matmul %144, %146, %cst_109 {dimension_numbers = #tpu.dot_dimension_numbers<[1], [0], [0], [1], [0, 0, 1, 1], [], []>} : vector<288x32xbf16>, vector<32x32xbf16>, vector<288x32xf32> -> vector<288x32xf32>
    %148 = arith.addf %143, %147 : vector<288x32xf32>
    %149 = vector.extract_strided_slice %126 {offsets = [19, 0], sizes = [288, 32], strides = [1, 1]} : vector<326x32xbf16> to vector<288x32xbf16>
    %c4_110 = arith.constant 4 : index
    %c0_111 = arith.constant 0 : index
    %c0_112 = arith.constant 0 : index
    %150 = vector.load %arg12[%c4_110, %c0_111, %c0_112] : memref<9x32x32xbf16, #tpu.memory_space<vmem>>, vector<1x32x32xbf16>
    %151 = vector.shape_cast %150 : vector<1x32x32xbf16> to vector<32x32xbf16>
    %cst_113 = arith.constant dense<0.000000e+00> : vector<288x32xf32>
    %152 = tpu.matmul %149, %151, %cst_113 {dimension_numbers = #tpu.dot_dimension_numbers<[1], [0], [0], [1], [0, 0, 1, 1], [], []>} : vector<288x32xbf16>, vector<32x32xbf16>, vector<288x32xf32> -> vector<288x32xf32>
    %153 = arith.addf %148, %152 : vector<288x32xf32>
    %154 = vector.extract_strided_slice %126 {offsets = [20, 0], sizes = [288, 32], strides = [1, 1]} : vector<326x32xbf16> to vector<288x32xbf16>
    %c5_114 = arith.constant 5 : index
    %c0_115 = arith.constant 0 : index
    %c0_116 = arith.constant 0 : index
    %155 = vector.load %arg12[%c5_114, %c0_115, %c0_116] : memref<9x32x32xbf16, #tpu.memory_space<vmem>>, vector<1x32x32xbf16>
    %156 = vector.shape_cast %155 : vector<1x32x32xbf16> to vector<32x32xbf16>
    %cst_117 = arith.constant dense<0.000000e+00> : vector<288x32xf32>
    %157 = tpu.matmul %154, %156, %cst_117 {dimension_numbers = #tpu.dot_dimension_numbers<[1], [0], [0], [1], [0, 0, 1, 1], [], []>} : vector<288x32xbf16>, vector<32x32xbf16>, vector<288x32xf32> -> vector<288x32xf32>
    %158 = arith.addf %153, %157 : vector<288x32xf32>
    %159 = vector.extract_strided_slice %126 {offsets = [36, 0], sizes = [288, 32], strides = [1, 1]} : vector<326x32xbf16> to vector<288x32xbf16>
    %c6_118 = arith.constant 6 : index
    %c0_119 = arith.constant 0 : index
    %c0_120 = arith.constant 0 : index
    %160 = vector.load %arg12[%c6_118, %c0_119, %c0_120] : memref<9x32x32xbf16, #tpu.memory_space<vmem>>, vector<1x32x32xbf16>
    %161 = vector.shape_cast %160 : vector<1x32x32xbf16> to vector<32x32xbf16>
    %cst_121 = arith.constant dense<0.000000e+00> : vector<288x32xf32>
    %162 = tpu.matmul %159, %161, %cst_121 {dimension_numbers = #tpu.dot_dimension_numbers<[1], [0], [0], [1], [0, 0, 1, 1], [], []>} : vector<288x32xbf16>, vector<32x32xbf16>, vector<288x32xf32> -> vector<288x32xf32>
    %163 = arith.addf %158, %162 : vector<288x32xf32>
    %164 = vector.extract_strided_slice %126 {offsets = [37, 0], sizes = [288, 32], strides = [1, 1]} : vector<326x32xbf16> to vector<288x32xbf16>
    %c7_122 = arith.constant 7 : index
    %c0_123 = arith.constant 0 : index
    %c0_124 = arith.constant 0 : index
    %165 = vector.load %arg12[%c7_122, %c0_123, %c0_124] : memref<9x32x32xbf16, #tpu.memory_space<vmem>>, vector<1x32x32xbf16>
    %166 = vector.shape_cast %165 : vector<1x32x32xbf16> to vector<32x32xbf16>
    %cst_125 = arith.constant dense<0.000000e+00> : vector<288x32xf32>
    %167 = tpu.matmul %164, %166, %cst_125 {dimension_numbers = #tpu.dot_dimension_numbers<[1], [0], [0], [1], [0, 0, 1, 1], [], []>} : vector<288x32xbf16>, vector<32x32xbf16>, vector<288x32xf32> -> vector<288x32xf32>
    %168 = arith.addf %163, %167 : vector<288x32xf32>
    %169 = vector.extract_strided_slice %126 {offsets = [38, 0], sizes = [288, 32], strides = [1, 1]} : vector<326x32xbf16> to vector<288x32xbf16>
    %c8_126 = arith.constant 8 : index
    %c0_127 = arith.constant 0 : index
    %c0_128 = arith.constant 0 : index
    %170 = vector.load %arg12[%c8_126, %c0_127, %c0_128] : memref<9x32x32xbf16, #tpu.memory_space<vmem>>, vector<1x32x32xbf16>
    %171 = vector.shape_cast %170 : vector<1x32x32xbf16> to vector<32x32xbf16>
    %cst_129 = arith.constant dense<0.000000e+00> : vector<288x32xf32>
    %172 = tpu.matmul %169, %171, %cst_129 {dimension_numbers = #tpu.dot_dimension_numbers<[1], [0], [0], [1], [0, 0, 1, 1], [], []>} : vector<288x32xbf16>, vector<32x32xbf16>, vector<288x32xf32> -> vector<288x32xf32>
    %173 = arith.addf %168, %172 : vector<288x32xf32>
    %174 = vector.broadcast %127 : vector<1x32xf32> to vector<288x32xf32>
    %175 = arith.addf %173, %174 : vector<288x32xf32>
    %cst_130 = arith.constant 0.000000e+00 : f32
    %176 = vector.broadcast %cst_130 : f32 to vector<288x32xf32>
    %177 = arith.maximumf %175, %176 : vector<288x32xf32>
    %cst_131 = arith.constant 0.000000e+00 : f32
    %178 = vector.broadcast %cst_131 : f32 to vector<19x32xf32>
    %179 = tpu.concatenate %178, %177, %178 in 0 : vector<19x32xf32>, vector<288x32xf32>, vector<19x32xf32> -> vector<326x32xf32>
    %c0_132 = arith.constant 0 : index
    %c0_133 = arith.constant 0 : index
    %180 = vector.load %arg18[%c0_132, %c0_133] : memref<326x1xf32, #tpu.memory_space<vmem>>, vector<326x1xf32>
    %181 = vector.broadcast %180 : vector<326x1xf32> to vector<326x32xf32>
    %182 = arith.mulf %179, %181 : vector<326x32xf32>
    %183 = arith.truncf %182 : vector<326x32xf32> to vector<326x32xbf16>
    %c0_134 = arith.constant 0 : index
    %c0_135 = arith.constant 0 : index
    %184 = vector.load %arg15[%c0_134, %c0_135] : memref<1x32xf32, #tpu.memory_space<vmem>>, vector<1x32xf32>
    %cst_136 = arith.constant 0.000000e+00 : f32
    %185 = vector.broadcast %cst_136 : f32 to vector<288x32xf32>
    %186 = vector.extract_strided_slice %183 {offsets = [0, 0], sizes = [288, 32], strides = [1, 1]} : vector<326x32xbf16> to vector<288x32xbf16>
    %c0_137 = arith.constant 0 : index
    %c0_138 = arith.constant 0 : index
    %c0_139 = arith.constant 0 : index
    %187 = vector.load %arg14[%c0_137, %c0_138, %c0_139] : memref<9x32x32xbf16, #tpu.memory_space<vmem>>, vector<1x32x32xbf16>
    %188 = vector.shape_cast %187 : vector<1x32x32xbf16> to vector<32x32xbf16>
    %cst_140 = arith.constant dense<0.000000e+00> : vector<288x32xf32>
    %189 = tpu.matmul %186, %188, %cst_140 {dimension_numbers = #tpu.dot_dimension_numbers<[1], [0], [0], [1], [0, 0, 1, 1], [], []>} : vector<288x32xbf16>, vector<32x32xbf16>, vector<288x32xf32> -> vector<288x32xf32>
    %190 = arith.addf %185, %189 : vector<288x32xf32>
    %191 = vector.extract_strided_slice %183 {offsets = [1, 0], sizes = [288, 32], strides = [1, 1]} : vector<326x32xbf16> to vector<288x32xbf16>
    %c1_141 = arith.constant 1 : index
    %c0_142 = arith.constant 0 : index
    %c0_143 = arith.constant 0 : index
    %192 = vector.load %arg14[%c1_141, %c0_142, %c0_143] : memref<9x32x32xbf16, #tpu.memory_space<vmem>>, vector<1x32x32xbf16>
    %193 = vector.shape_cast %192 : vector<1x32x32xbf16> to vector<32x32xbf16>
    %cst_144 = arith.constant dense<0.000000e+00> : vector<288x32xf32>
    %194 = tpu.matmul %191, %193, %cst_144 {dimension_numbers = #tpu.dot_dimension_numbers<[1], [0], [0], [1], [0, 0, 1, 1], [], []>} : vector<288x32xbf16>, vector<32x32xbf16>, vector<288x32xf32> -> vector<288x32xf32>
    %195 = arith.addf %190, %194 : vector<288x32xf32>
    %196 = vector.extract_strided_slice %183 {offsets = [2, 0], sizes = [288, 32], strides = [1, 1]} : vector<326x32xbf16> to vector<288x32xbf16>
    %c2_145 = arith.constant 2 : index
    %c0_146 = arith.constant 0 : index
    %c0_147 = arith.constant 0 : index
    %197 = vector.load %arg14[%c2_145, %c0_146, %c0_147] : memref<9x32x32xbf16, #tpu.memory_space<vmem>>, vector<1x32x32xbf16>
    %198 = vector.shape_cast %197 : vector<1x32x32xbf16> to vector<32x32xbf16>
    %cst_148 = arith.constant dense<0.000000e+00> : vector<288x32xf32>
    %199 = tpu.matmul %196, %198, %cst_148 {dimension_numbers = #tpu.dot_dimension_numbers<[1], [0], [0], [1], [0, 0, 1, 1], [], []>} : vector<288x32xbf16>, vector<32x32xbf16>, vector<288x32xf32> -> vector<288x32xf32>
    %200 = arith.addf %195, %199 : vector<288x32xf32>
    %201 = vector.extract_strided_slice %183 {offsets = [18, 0], sizes = [288, 32], strides = [1, 1]} : vector<326x32xbf16> to vector<288x32xbf16>
    %c3_149 = arith.constant 3 : index
    %c0_150 = arith.constant 0 : index
    %c0_151 = arith.constant 0 : index
    %202 = vector.load %arg14[%c3_149, %c0_150, %c0_151] : memref<9x32x32xbf16, #tpu.memory_space<vmem>>, vector<1x32x32xbf16>
    %203 = vector.shape_cast %202 : vector<1x32x32xbf16> to vector<32x32xbf16>
    %cst_152 = arith.constant dense<0.000000e+00> : vector<288x32xf32>
    %204 = tpu.matmul %201, %203, %cst_152 {dimension_numbers = #tpu.dot_dimension_numbers<[1], [0], [0], [1], [0, 0, 1, 1], [], []>} : vector<288x32xbf16>, vector<32x32xbf16>, vector<288x32xf32> -> vector<288x32xf32>
    %205 = arith.addf %200, %204 : vector<288x32xf32>
    %206 = vector.extract_strided_slice %183 {offsets = [19, 0], sizes = [288, 32], strides = [1, 1]} : vector<326x32xbf16> to vector<288x32xbf16>
    %c4_153 = arith.constant 4 : index
    %c0_154 = arith.constant 0 : index
    %c0_155 = arith.constant 0 : index
    %207 = vector.load %arg14[%c4_153, %c0_154, %c0_155] : memref<9x32x32xbf16, #tpu.memory_space<vmem>>, vector<1x32x32xbf16>
    %208 = vector.shape_cast %207 : vector<1x32x32xbf16> to vector<32x32xbf16>
    %cst_156 = arith.constant dense<0.000000e+00> : vector<288x32xf32>
    %209 = tpu.matmul %206, %208, %cst_156 {dimension_numbers = #tpu.dot_dimension_numbers<[1], [0], [0], [1], [0, 0, 1, 1], [], []>} : vector<288x32xbf16>, vector<32x32xbf16>, vector<288x32xf32> -> vector<288x32xf32>
    %210 = arith.addf %205, %209 : vector<288x32xf32>
    %211 = vector.extract_strided_slice %183 {offsets = [20, 0], sizes = [288, 32], strides = [1, 1]} : vector<326x32xbf16> to vector<288x32xbf16>
    %c5_157 = arith.constant 5 : index
    %c0_158 = arith.constant 0 : index
    %c0_159 = arith.constant 0 : index
    %212 = vector.load %arg14[%c5_157, %c0_158, %c0_159] : memref<9x32x32xbf16, #tpu.memory_space<vmem>>, vector<1x32x32xbf16>
    %213 = vector.shape_cast %212 : vector<1x32x32xbf16> to vector<32x32xbf16>
    %cst_160 = arith.constant dense<0.000000e+00> : vector<288x32xf32>
    %214 = tpu.matmul %211, %213, %cst_160 {dimension_numbers = #tpu.dot_dimension_numbers<[1], [0], [0], [1], [0, 0, 1, 1], [], []>} : vector<288x32xbf16>, vector<32x32xbf16>, vector<288x32xf32> -> vector<288x32xf32>
    %215 = arith.addf %210, %214 : vector<288x32xf32>
    %216 = vector.extract_strided_slice %183 {offsets = [36, 0], sizes = [288, 32], strides = [1, 1]} : vector<326x32xbf16> to vector<288x32xbf16>
    %c6_161 = arith.constant 6 : index
    %c0_162 = arith.constant 0 : index
    %c0_163 = arith.constant 0 : index
    %217 = vector.load %arg14[%c6_161, %c0_162, %c0_163] : memref<9x32x32xbf16, #tpu.memory_space<vmem>>, vector<1x32x32xbf16>
    %218 = vector.shape_cast %217 : vector<1x32x32xbf16> to vector<32x32xbf16>
    %cst_164 = arith.constant dense<0.000000e+00> : vector<288x32xf32>
    %219 = tpu.matmul %216, %218, %cst_164 {dimension_numbers = #tpu.dot_dimension_numbers<[1], [0], [0], [1], [0, 0, 1, 1], [], []>} : vector<288x32xbf16>, vector<32x32xbf16>, vector<288x32xf32> -> vector<288x32xf32>
    %220 = arith.addf %215, %219 : vector<288x32xf32>
    %221 = vector.extract_strided_slice %183 {offsets = [37, 0], sizes = [288, 32], strides = [1, 1]} : vector<326x32xbf16> to vector<288x32xbf16>
    %c7_165 = arith.constant 7 : index
    %c0_166 = arith.constant 0 : index
    %c0_167 = arith.constant 0 : index
    %222 = vector.load %arg14[%c7_165, %c0_166, %c0_167] : memref<9x32x32xbf16, #tpu.memory_space<vmem>>, vector<1x32x32xbf16>
    %223 = vector.shape_cast %222 : vector<1x32x32xbf16> to vector<32x32xbf16>
    %cst_168 = arith.constant dense<0.000000e+00> : vector<288x32xf32>
    %224 = tpu.matmul %221, %223, %cst_168 {dimension_numbers = #tpu.dot_dimension_numbers<[1], [0], [0], [1], [0, 0, 1, 1], [], []>} : vector<288x32xbf16>, vector<32x32xbf16>, vector<288x32xf32> -> vector<288x32xf32>
    %225 = arith.addf %220, %224 : vector<288x32xf32>
    %226 = vector.extract_strided_slice %183 {offsets = [38, 0], sizes = [288, 32], strides = [1, 1]} : vector<326x32xbf16> to vector<288x32xbf16>
    %c8_169 = arith.constant 8 : index
    %c0_170 = arith.constant 0 : index
    %c0_171 = arith.constant 0 : index
    %227 = vector.load %arg14[%c8_169, %c0_170, %c0_171] : memref<9x32x32xbf16, #tpu.memory_space<vmem>>, vector<1x32x32xbf16>
    %228 = vector.shape_cast %227 : vector<1x32x32xbf16> to vector<32x32xbf16>
    %cst_172 = arith.constant dense<0.000000e+00> : vector<288x32xf32>
    %229 = tpu.matmul %226, %228, %cst_172 {dimension_numbers = #tpu.dot_dimension_numbers<[1], [0], [0], [1], [0, 0, 1, 1], [], []>} : vector<288x32xbf16>, vector<32x32xbf16>, vector<288x32xf32> -> vector<288x32xf32>
    %230 = arith.addf %225, %229 : vector<288x32xf32>
    %231 = vector.broadcast %184 : vector<1x32xf32> to vector<288x32xf32>
    %232 = arith.addf %230, %231 : vector<288x32xf32>
    %cst_173 = arith.constant 0.000000e+00 : f32
    %233 = vector.broadcast %cst_173 : f32 to vector<288x32xf32>
    %234 = arith.maximumf %232, %233 : vector<288x32xf32>
    %235 = tpu.concatenate %178, %234, %178 in 0 : vector<19x32xf32>, vector<288x32xf32>, vector<19x32xf32> -> vector<326x32xf32>
    %c0_174 = arith.constant 0 : index
    %c0_175 = arith.constant 0 : index
    %236 = vector.load %arg18[%c0_174, %c0_175] : memref<326x1xf32, #tpu.memory_space<vmem>>, vector<326x1xf32>
    %237 = vector.broadcast %236 : vector<326x1xf32> to vector<326x32xf32>
    %238 = arith.mulf %235, %237 : vector<326x32xf32>
    %239 = arith.truncf %238 : vector<326x32xf32> to vector<326x32xbf16>
    %c0_176 = arith.constant 0 : index
    %c0_177 = arith.constant 0 : index
    %240 = vector.load %arg17[%c0_176, %c0_177] : memref<1x32xf32, #tpu.memory_space<vmem>>, vector<1x32xf32>
    %cst_178 = arith.constant 0.000000e+00 : f32
    %241 = vector.broadcast %cst_178 : f32 to vector<288x32xf32>
    %242 = vector.extract_strided_slice %239 {offsets = [0, 0], sizes = [288, 32], strides = [1, 1]} : vector<326x32xbf16> to vector<288x32xbf16>
    %c0_179 = arith.constant 0 : index
    %c0_180 = arith.constant 0 : index
    %c0_181 = arith.constant 0 : index
    %243 = vector.load %arg16[%c0_179, %c0_180, %c0_181] : memref<9x32x32xbf16, #tpu.memory_space<vmem>>, vector<1x32x32xbf16>
    %244 = vector.shape_cast %243 : vector<1x32x32xbf16> to vector<32x32xbf16>
    %cst_182 = arith.constant dense<0.000000e+00> : vector<288x32xf32>
    %245 = tpu.matmul %242, %244, %cst_182 {dimension_numbers = #tpu.dot_dimension_numbers<[1], [0], [0], [1], [0, 0, 1, 1], [], []>} : vector<288x32xbf16>, vector<32x32xbf16>, vector<288x32xf32> -> vector<288x32xf32>
    %246 = arith.addf %241, %245 : vector<288x32xf32>
    %247 = vector.extract_strided_slice %239 {offsets = [1, 0], sizes = [288, 32], strides = [1, 1]} : vector<326x32xbf16> to vector<288x32xbf16>
    %c1_183 = arith.constant 1 : index
    %c0_184 = arith.constant 0 : index
    %c0_185 = arith.constant 0 : index
    %248 = vector.load %arg16[%c1_183, %c0_184, %c0_185] : memref<9x32x32xbf16, #tpu.memory_space<vmem>>, vector<1x32x32xbf16>
    %249 = vector.shape_cast %248 : vector<1x32x32xbf16> to vector<32x32xbf16>
    %cst_186 = arith.constant dense<0.000000e+00> : vector<288x32xf32>
    %250 = tpu.matmul %247, %249, %cst_186 {dimension_numbers = #tpu.dot_dimension_numbers<[1], [0], [0], [1], [0, 0, 1, 1], [], []>} : vector<288x32xbf16>, vector<32x32xbf16>, vector<288x32xf32> -> vector<288x32xf32>
    %251 = arith.addf %246, %250 : vector<288x32xf32>
    %252 = vector.extract_strided_slice %239 {offsets = [2, 0], sizes = [288, 32], strides = [1, 1]} : vector<326x32xbf16> to vector<288x32xbf16>
    %c2_187 = arith.constant 2 : index
    %c0_188 = arith.constant 0 : index
    %c0_189 = arith.constant 0 : index
    %253 = vector.load %arg16[%c2_187, %c0_188, %c0_189] : memref<9x32x32xbf16, #tpu.memory_space<vmem>>, vector<1x32x32xbf16>
    %254 = vector.shape_cast %253 : vector<1x32x32xbf16> to vector<32x32xbf16>
    %cst_190 = arith.constant dense<0.000000e+00> : vector<288x32xf32>
    %255 = tpu.matmul %252, %254, %cst_190 {dimension_numbers = #tpu.dot_dimension_numbers<[1], [0], [0], [1], [0, 0, 1, 1], [], []>} : vector<288x32xbf16>, vector<32x32xbf16>, vector<288x32xf32> -> vector<288x32xf32>
    %256 = arith.addf %251, %255 : vector<288x32xf32>
    %257 = vector.extract_strided_slice %239 {offsets = [18, 0], sizes = [288, 32], strides = [1, 1]} : vector<326x32xbf16> to vector<288x32xbf16>
    %c3_191 = arith.constant 3 : index
    %c0_192 = arith.constant 0 : index
    %c0_193 = arith.constant 0 : index
    %258 = vector.load %arg16[%c3_191, %c0_192, %c0_193] : memref<9x32x32xbf16, #tpu.memory_space<vmem>>, vector<1x32x32xbf16>
    %259 = vector.shape_cast %258 : vector<1x32x32xbf16> to vector<32x32xbf16>
    %cst_194 = arith.constant dense<0.000000e+00> : vector<288x32xf32>
    %260 = tpu.matmul %257, %259, %cst_194 {dimension_numbers = #tpu.dot_dimension_numbers<[1], [0], [0], [1], [0, 0, 1, 1], [], []>} : vector<288x32xbf16>, vector<32x32xbf16>, vector<288x32xf32> -> vector<288x32xf32>
    %261 = arith.addf %256, %260 : vector<288x32xf32>
    %262 = vector.extract_strided_slice %239 {offsets = [19, 0], sizes = [288, 32], strides = [1, 1]} : vector<326x32xbf16> to vector<288x32xbf16>
    %c4_195 = arith.constant 4 : index
    %c0_196 = arith.constant 0 : index
    %c0_197 = arith.constant 0 : index
    %263 = vector.load %arg16[%c4_195, %c0_196, %c0_197] : memref<9x32x32xbf16, #tpu.memory_space<vmem>>, vector<1x32x32xbf16>
    %264 = vector.shape_cast %263 : vector<1x32x32xbf16> to vector<32x32xbf16>
    %cst_198 = arith.constant dense<0.000000e+00> : vector<288x32xf32>
    %265 = tpu.matmul %262, %264, %cst_198 {dimension_numbers = #tpu.dot_dimension_numbers<[1], [0], [0], [1], [0, 0, 1, 1], [], []>} : vector<288x32xbf16>, vector<32x32xbf16>, vector<288x32xf32> -> vector<288x32xf32>
    %266 = arith.addf %261, %265 : vector<288x32xf32>
    %267 = vector.extract_strided_slice %239 {offsets = [20, 0], sizes = [288, 32], strides = [1, 1]} : vector<326x32xbf16> to vector<288x32xbf16>
    %c5_199 = arith.constant 5 : index
    %c0_200 = arith.constant 0 : index
    %c0_201 = arith.constant 0 : index
    %268 = vector.load %arg16[%c5_199, %c0_200, %c0_201] : memref<9x32x32xbf16, #tpu.memory_space<vmem>>, vector<1x32x32xbf16>
    %269 = vector.shape_cast %268 : vector<1x32x32xbf16> to vector<32x32xbf16>
    %cst_202 = arith.constant dense<0.000000e+00> : vector<288x32xf32>
    %270 = tpu.matmul %267, %269, %cst_202 {dimension_numbers = #tpu.dot_dimension_numbers<[1], [0], [0], [1], [0, 0, 1, 1], [], []>} : vector<288x32xbf16>, vector<32x32xbf16>, vector<288x32xf32> -> vector<288x32xf32>
    %271 = arith.addf %266, %270 : vector<288x32xf32>
    %272 = vector.extract_strided_slice %239 {offsets = [36, 0], sizes = [288, 32], strides = [1, 1]} : vector<326x32xbf16> to vector<288x32xbf16>
    %c6_203 = arith.constant 6 : index
    %c0_204 = arith.constant 0 : index
    %c0_205 = arith.constant 0 : index
    %273 = vector.load %arg16[%c6_203, %c0_204, %c0_205] : memref<9x32x32xbf16, #tpu.memory_space<vmem>>, vector<1x32x32xbf16>
    %274 = vector.shape_cast %273 : vector<1x32x32xbf16> to vector<32x32xbf16>
    %cst_206 = arith.constant dense<0.000000e+00> : vector<288x32xf32>
    %275 = tpu.matmul %272, %274, %cst_206 {dimension_numbers = #tpu.dot_dimension_numbers<[1], [0], [0], [1], [0, 0, 1, 1], [], []>} : vector<288x32xbf16>, vector<32x32xbf16>, vector<288x32xf32> -> vector<288x32xf32>
    %276 = arith.addf %271, %275 : vector<288x32xf32>
    %277 = vector.extract_strided_slice %239 {offsets = [37, 0], sizes = [288, 32], strides = [1, 1]} : vector<326x32xbf16> to vector<288x32xbf16>
    %c7_207 = arith.constant 7 : index
    %c0_208 = arith.constant 0 : index
    %c0_209 = arith.constant 0 : index
    %278 = vector.load %arg16[%c7_207, %c0_208, %c0_209] : memref<9x32x32xbf16, #tpu.memory_space<vmem>>, vector<1x32x32xbf16>
    %279 = vector.shape_cast %278 : vector<1x32x32xbf16> to vector<32x32xbf16>
    %cst_210 = arith.constant dense<0.000000e+00> : vector<288x32xf32>
    %280 = tpu.matmul %277, %279, %cst_210 {dimension_numbers = #tpu.dot_dimension_numbers<[1], [0], [0], [1], [0, 0, 1, 1], [], []>} : vector<288x32xbf16>, vector<32x32xbf16>, vector<288x32xf32> -> vector<288x32xf32>
    %281 = arith.addf %276, %280 : vector<288x32xf32>
    %282 = vector.extract_strided_slice %239 {offsets = [38, 0], sizes = [288, 32], strides = [1, 1]} : vector<326x32xbf16> to vector<288x32xbf16>
    %c8_211 = arith.constant 8 : index
    %c0_212 = arith.constant 0 : index
    %c0_213 = arith.constant 0 : index
    %283 = vector.load %arg16[%c8_211, %c0_212, %c0_213] : memref<9x32x32xbf16, #tpu.memory_space<vmem>>, vector<1x32x32xbf16>
    %284 = vector.shape_cast %283 : vector<1x32x32xbf16> to vector<32x32xbf16>
    %cst_214 = arith.constant dense<0.000000e+00> : vector<288x32xf32>
    %285 = tpu.matmul %282, %284, %cst_214 {dimension_numbers = #tpu.dot_dimension_numbers<[1], [0], [0], [1], [0, 0, 1, 1], [], []>} : vector<288x32xbf16>, vector<32x32xbf16>, vector<288x32xf32> -> vector<288x32xf32>
    %286 = arith.addf %281, %285 : vector<288x32xf32>
    %287 = vector.broadcast %240 : vector<1x32xf32> to vector<288x32xf32>
    %288 = arith.addf %286, %287 : vector<288x32xf32>
    %cst_215 = arith.constant 0.000000e+00 : f32
    %289 = vector.broadcast %cst_215 : f32 to vector<288x32xf32>
    %290 = arith.maximumf %288, %289 : vector<288x32xf32>
    %291 = vector.extract_strided_slice %290 {offsets = [0, 0], sizes = [72, 32], strides = [1, 1]} : vector<288x32xf32> to vector<72x32xf32>
    %c0_216 = arith.constant 0 : index
    %c0_217 = arith.constant 0 : index
    %c0_218 = arith.constant 0 : index
    %292 = vector.load %arg19[%c0_216, %c0_217, %c0_218] : memref<1x72x128xf32, #tpu.memory_space<vmem>>, vector<1x72x32xf32>
    %293 = vector.shape_cast %292 : vector<1x72x32xf32> to vector<72x32xf32>
    %294 = vector.shape_cast %291 : vector<72x32xf32> to vector<1x72x32xf32>
    tpu.vector_store %arg19[%c0_216, %c0_217, %c0_218], %294 {strides = array<i32>} : memref<1x72x128xf32, #tpu.memory_space<vmem>>, vector<1x72x32xf32>,
    %295 = vector.extract_strided_slice %290 {offsets = [72, 0], sizes = [72, 32], strides = [1, 1]} : vector<288x32xf32> to vector<72x32xf32>
    %c0_219 = arith.constant 0 : index
    %c0_220 = arith.constant 0 : index
    %c32 = arith.constant 32 : index
    %296 = vector.load %arg19[%c0_219, %c0_220, %c32] : memref<1x72x128xf32, #tpu.memory_space<vmem>>, vector<1x72x32xf32>
    %297 = vector.shape_cast %296 : vector<1x72x32xf32> to vector<72x32xf32>
    %298 = vector.shape_cast %295 : vector<72x32xf32> to vector<1x72x32xf32>
    tpu.vector_store %arg19[%c0_219, %c0_220, %c32], %298 {strides = array<i32>} : memref<1x72x128xf32, #tpu.memory_space<vmem>>, vector<1x72x32xf32>,
    %299 = vector.extract_strided_slice %290 {offsets = [144, 0], sizes = [72, 32], strides = [1, 1]} : vector<288x32xf32> to vector<72x32xf32>
    %c0_221 = arith.constant 0 : index
    %c0_222 = arith.constant 0 : index
    %c64 = arith.constant 64 : index
    %300 = vector.load %arg19[%c0_221, %c0_222, %c64] : memref<1x72x128xf32, #tpu.memory_space<vmem>>, vector<1x72x32xf32>
    %301 = vector.shape_cast %300 : vector<1x72x32xf32> to vector<72x32xf32>
    %302 = vector.shape_cast %299 : vector<72x32xf32> to vector<1x72x32xf32>
    tpu.vector_store %arg19[%c0_221, %c0_222, %c64], %302 {strides = array<i32>} : memref<1x72x128xf32, #tpu.memory_space<vmem>>, vector<1x72x32xf32>,
    %303 = vector.extract_strided_slice %290 {offsets = [216, 0], sizes = [72, 32], strides = [1, 1]} : vector<288x32xf32> to vector<72x32xf32>
    %c0_223 = arith.constant 0 : index
    %c0_224 = arith.constant 0 : index
    %c96 = arith.constant 96 : index
    %304 = vector.load %arg19[%c0_223, %c0_224, %c96] : memref<1x72x128xf32, #tpu.memory_space<vmem>>, vector<1x72x32xf32>
    %305 = vector.shape_cast %304 : vector<1x72x32xf32> to vector<72x32xf32>
    %306 = vector.shape_cast %303 : vector<72x32xf32> to vector<1x72x32xf32>
    tpu.vector_store %arg19[%c0_223, %c0_224, %c96], %306 {strides = array<i32>} : memref<1x72x128xf32, #tpu.memory_space<vmem>>, vector<1x72x32xf32>,
    return
  }
  func.func @transform_0(%arg0: i32) -> (i32, i32, i32) {
    %c0_i32 = arith.constant 0 : i32
    %c0_i32_0 = arith.constant 0 : i32
    %c0_i32_1 = arith.constant 0 : i32
    return %arg0, %c0_i32, %c0_i32_0 : i32, i32, i32
  }
  func.func @transform_1(%arg0: i32) -> (i32, i32, i32) {
    %c0_i32 = arith.constant 0 : i32
    %c0_i32_0 = arith.constant 0 : i32
    %c0_i32_1 = arith.constant 0 : i32
    return %arg0, %c0_i32, %c0_i32_0 : i32, i32, i32
  }
  func.func @transform_2(%arg0: i32) -> (i32, i32) {
    %c0_i32 = arith.constant 0 : i32
    %c0_i32_0 = arith.constant 0 : i32
    %c0_i32_1 = arith.constant 0 : i32
    return %c0_i32, %c0_i32_0 : i32, i32
  }
  func.func @transform_3(%arg0: i32) -> (i32, i32) {
    %c0_i32 = arith.constant 0 : i32
    %c0_i32_0 = arith.constant 0 : i32
    %c0_i32_1 = arith.constant 0 : i32
    return %c0_i32, %c0_i32_0 : i32, i32
  }
  func.func @transform_4(%arg0: i32) -> (i32, i32) {
    %c0_i32 = arith.constant 0 : i32
    %c0_i32_0 = arith.constant 0 : i32
    %c0_i32_1 = arith.constant 0 : i32
    return %c0_i32, %c0_i32_0 : i32, i32
  }
  func.func @transform_5(%arg0: i32) -> (i32, i32) {
    %c0_i32 = arith.constant 0 : i32
    %c0_i32_0 = arith.constant 0 : i32
    %c0_i32_1 = arith.constant 0 : i32
    return %c0_i32, %c0_i32_0 : i32, i32
  }
  func.func @transform_6(%arg0: i32) -> (i32, i32, i32) {
    %c0_i32 = arith.constant 0 : i32
    %c0_i32_0 = arith.constant 0 : i32
    %c0_i32_1 = arith.constant 0 : i32
    %c0_i32_2 = arith.constant 0 : i32
    return %c0_i32, %c0_i32_0, %c0_i32_1 : i32, i32, i32
  }
  func.func @transform_7(%arg0: i32) -> (i32, i32, i32) {
    %c0_i32 = arith.constant 0 : i32
    %c0_i32_0 = arith.constant 0 : i32
    %c0_i32_1 = arith.constant 0 : i32
    %c0_i32_2 = arith.constant 0 : i32
    return %c0_i32, %c0_i32_0, %c0_i32_1 : i32, i32, i32
  }
  func.func @transform_8(%arg0: i32) -> (i32, i32) {
    %c0_i32 = arith.constant 0 : i32
    %c0_i32_0 = arith.constant 0 : i32
    %c0_i32_1 = arith.constant 0 : i32
    return %c0_i32, %c0_i32_0 : i32, i32
  }
  func.func @transform_9(%arg0: i32) -> (i32, i32) {
    %c0_i32 = arith.constant 0 : i32
    %c0_i32_0 = arith.constant 0 : i32
    %c0_i32_1 = arith.constant 0 : i32
    return %c0_i32, %c0_i32_0 : i32, i32
  }
  func.func @transform_10(%arg0: i32) -> (i32, i32) {
    %c0_i32 = arith.constant 0 : i32
    %c0_i32_0 = arith.constant 0 : i32
    %c0_i32_1 = arith.constant 0 : i32
    return %c0_i32, %c0_i32_0 : i32, i32
  }
  func.func @transform_11(%arg0: i32) -> (i32, i32, i32) {
    %c0_i32 = arith.constant 0 : i32
    %c0_i32_0 = arith.constant 0 : i32
    %c0_i32_1 = arith.constant 0 : i32
    %c0_i32_2 = arith.constant 0 : i32
    return %c0_i32, %c0_i32_0, %c0_i32_1 : i32, i32, i32
  }
  func.func @transform_12(%arg0: i32) -> (i32, i32) {
    %c0_i32 = arith.constant 0 : i32
    %c0_i32_0 = arith.constant 0 : i32
    %c0_i32_1 = arith.constant 0 : i32
    return %c0_i32, %c0_i32_0 : i32, i32
  }
  func.func @transform_13(%arg0: i32) -> (i32, i32, i32) {
    %c0_i32 = arith.constant 0 : i32
    %c0_i32_0 = arith.constant 0 : i32
    %c0_i32_1 = arith.constant 0 : i32
    %c0_i32_2 = arith.constant 0 : i32
    return %c0_i32, %c0_i32_0, %c0_i32_1 : i32, i32, i32
  }
  func.func @transform_14(%arg0: i32) -> (i32, i32) {
    %c0_i32 = arith.constant 0 : i32
    %c0_i32_0 = arith.constant 0 : i32
    %c0_i32_1 = arith.constant 0 : i32
    return %c0_i32, %c0_i32_0 : i32, i32
  }
  func.func @transform_15(%arg0: i32) -> (i32, i32, i32) {
    %c0_i32 = arith.constant 0 : i32
    %c0_i32_0 = arith.constant 0 : i32
    %c0_i32_1 = arith.constant 0 : i32
    %c0_i32_2 = arith.constant 0 : i32
    return %c0_i32, %c0_i32_0, %c0_i32_1 : i32, i32, i32
  }
  func.func @transform_16(%arg0: i32) -> (i32, i32) {
    %c0_i32 = arith.constant 0 : i32
    %c0_i32_0 = arith.constant 0 : i32
    %c0_i32_1 = arith.constant 0 : i32
    return %c0_i32, %c0_i32_0 : i32, i32
  }
  func.func @transform_17(%arg0: i32) -> (i32, i32) {
    %c0_i32 = arith.constant 0 : i32
    %c0_i32_0 = arith.constant 0 : i32
    %c0_i32_1 = arith.constant 0 : i32
    return %c0_i32, %c0_i32_0 : i32, i32
  }
  func.func @transform_18(%arg0: i32) -> (i32, i32, i32) {
    %c0_i32 = arith.constant 0 : i32
    %c0_i32_0 = arith.constant 0 : i32
    %c0_i32_1 = arith.constant 0 : i32
    return %arg0, %c0_i32, %c0_i32_0 : i32, i32, i32
  }
}

</mosaic_0001>

<bundles_post_ra>
// kernel: amo_forward.1
= control target key start
LH: loop header
LB: loop body
LE: loop exit
PB: predicated region body
PF: predicated region fallthrough
CT: control target
= control target key end

     0   :  { %s12729_s27 = smov 0   ;;  %s18758_s0 = inlined_call_operand.vmem [shape: bf16[2,64,32], index: 0, kind: input, shape index: {}]   ;;  %s18759_s1 = inlined_call_operand.vmem [shape: bf16[2,102,64], index: 1, kind: input, shape index: {}]   ;;  %s18760_s2 = inlined_call_operand.vmem [shape: bf16[102,64], index: 2, kind: input, shape index: {}]   ;;  %s18761_s3 = inlined_call_operand.vmem [shape: bf16[326,80], index: 3, kind: input, shape index: {}]   ;;  %s18762_s4 = inlined_call_operand.vmem [shape: bf16[32,32], index: 4, kind: input, shape index: {}]   ;;  %s18763_s5 = inlined_call_operand.vmem [shape: f32[1,32], index: 5, kind: input, shape index: {}]   ;;  %s18764_s6 = inlined_call_operand.vmem [shape: bf16[9,32,32], index: 6, kind: input, shape index: {}]   ;;  %s18765_s7 = inlined_call_operand.vmem [shape: bf16[9,64,32], index: 7, kind: input, shape index: {}]   ;;  %s18766_s8 = inlined_call_operand.vmem [shape: f32[1,32], index: 8, kind: input, shape index: {}]   ;;  %s18767_s9 = inlined_call_operand.vmem [shape: bf16[32,32], index: 9, kind: input, shape index: {}]   ;;  %s18768_s10 = inlined_call_operand.vmem [shape: f32[1,32], index: 10, kind: input, shape index: {}]   ;;  %s18769_s11 = inlined_call_operand.vmem [shape: bf16[9,32,32], index: 11, kind: input, shape index: {}]   ;;  %s18770_s12 = inlined_call_operand.vmem [shape: f32[1,32], index: 12, kind: input, shape index: {}]   ;;  %s18771_s13 = inlined_call_operand.vmem [shape: bf16[9,32,32], index: 13, kind: input, shape index: {}]   ;;  %s18772_s14 = inlined_call_operand.vmem [shape: f32[1,32], index: 14, kind: input, shape index: {}]   ;;  %s18773_s15 = inlined_call_operand.vmem [shape: bf16[9,32,32], index: 15, kind: input, shape index: {}]   ;;  %s18774_s16 = inlined_call_operand.vmem [shape: f32[1,32], index: 16, kind: input, shape index: {}]   ;;  %s18775_s17 = inlined_call_operand.vmem [shape: f32[326,1], index: 17, kind: input, shape index: {}]   ;;  %s18776_s18 = inlined_call_operand.vmem [shape: f32[2,72,128], index: 18, kind: output, shape index: {}]  }
   0x1   :  { %18918 = sst [smem:[#allocation111_spill]] %s18758_s0 }
   0x2   :  { %18919 = sst [smem:[#allocation112_spill]] %s18759_s1 }
   0x3   :  { %18920 = sst [smem:[#allocation113_spill]] %s18760_s2 }
   0x4   :  { %18921 = sst [smem:[#allocation114_spill]] %s18762_s4 }
   0x5 LB: > { %s11007_s28 = sadd.s32 4294967295, %s12628_s27   ;;  %p11011_p0 = scmp.ge.s32.totalorder %s12628_s27, 1  ;;  %s12628_s27 = sphi %s12729_s27, %s28_s27  }
   0x6   : > { %p522_p1 = scmp.lt.s32.totalorder %s12628_s27, 3 }
   0x8   : > { %p523_p2 = pnand %p11011_p0, %p522_p1 }
   0xa   : > { %526 = sbr.rel (%p523_p2) target bundleno = 3806 (0xede), region = 92 }
   0xf   : > { %s18922_s4 = sld [smem:[#allocation114_spill]]  ;;  %p581_p3 = scmp.lt.s32.totalorder %s11007_s28, 1  ;;  %vm645_vm0 = vcmask 261120   ;;  %v12610_v12 = vld [vmem:[%s18763_s5] ss:$0 sm:$0xff]  ;;  %vm761_vm9 = vcmask 523264  }
  0x10   : > { %s18923_s22 = sld [smem:[#allocation111_spill]]  ;;  %v12409_v46 = vld [vmem:[%s18765_s7 + $0x18] sm:$0xff]  ;;  %v12408_v47 = vld [vmem:[%s18765_s7 + $0x10] sm:$0xff]  ;;  %v12407_v48 = vld [vmem:[%s18765_s7 + $0x8] sm:$0xff]  ;;  %vm1307_vm10 = vcmask 1046528   ;;  %vm1979_vm12 = vcmask 1045504  }
  0x11   : > { %s19626_s28 = smov (!%p581_p3, %s11007_s28), 1  ;;  %s18924_s29 = sld [smem:[#allocation113_spill]]  ;;  %v12406_v49 = vld [vmem:[%s18765_s7] sm:$0xff]  ;;  %v12405_v57 = vld [vmem:[%s18764_s6 + $0x8] sm:$0xff]  ;;  %vm1057_vm11 = vsmask.f32 7424 }
  0x12   : > { %s12391_s1 = sshll.u32 %s19626_s28, 5  ;;  %s12593_s25 = smul.u32 52, %s19626_s28  ;;  %1021 = vmatpush.bf16.msra.mxu3 %v12405_v57  ;;  %v12404_v58 = vld [vmem:[%s18764_s6] sm:$0xff]  ;;  %v12417_v63 = vld [vmem:[%s18764_s6 + $0x28] sm:$0xff]  ;;  %vm1704_vm13 = vsmask.f32 6400 }
  0x13   : > { %vm2603_vm14 = vcmask 1044480   ;;  %vm2368_vm15 = vsmask.f32 5376  ;;  %s12632_s24 = smov 64  }
  0x15   : > { %v12397_v0 = vld [vmem:[%s18922_s4 + $0x8] sm:$0xff]  ;;  %v12396_v1 = vld [vmem:[%s18922_s4] sm:$0xff] }
  0x16   : > { %12591 = vmatpush.bf16.msra.mxu2 %v12397_v0  ;;  %664 = vmatpush.bf16.msra.mxu0 %v12397_v0  ;;  %s585_s2 = scalar_lea.vmem %s18923_s22, %s12391_s1  ;;  %s18925_s1 = sld [smem:[#allocation112_spill]]  ;;  %v12411_v0 = vld [vmem:[%s18764_s6 + $0x18] sm:$0xff] }
  0x17   : > { %v12393_v2 = vld [vmem:[%s585_s2 + $0x8] sm:$0xff]  ;;  %v12392_v3 = vld [vmem:[%s585_s2] sm:$0xff]  ;;  %v12394_v4 = vld [vmem:[%s585_s2 + $0x10] sm:$0xff]  ;;  %1022 = vmatpush.bf16.msra.mxu3 %v12404_v58  ;;  %s12594_s22 = smul.u32 72, %s19626_s28  ;;  %s12631_s28 = smov 32  }
  0x18   : > { %v12395_v5 = vld [vmem:[%s585_s2 + $0x18] sm:$0xff]  ;;  %v12398_v43 = vld [vmem:[%s18924_s29] sm:$0xff]  ;;  %v12399_v44 = vld [vmem:[%s18924_s29 + $0x8] sm:$0xff] }
  0x19   : > { %v12400_v45 = vld [vmem:[%s18924_s29 + $0x10] sm:$0xff]  ;;  %v12401_v50 = vld [vmem:[%s18924_s29 + $0x18] sm:$0xff]  ;;  %v12402_v52 = vld [vmem:[%s18924_s29 + $0x20] sm:$0xff]  ;;  %s18562_s23 = scalar_lea.vmem %s18776_s18, %s12594_s22 }
  0x1a   : > { %12592 = vmatpush.bf16.msra.mxu2 %v12396_v1  ;;  %665 = vmatpush.bf16.msra.mxu0 %v12396_v1  ;;  %v12403_v54 = vld [vmem:[%s18924_s29 + $0x28] sm:$0xff]  ;;  %v723_v60 = vld [vmem:[%s18924_s29 + $0x30] sm:$0x7]  ;;  %v12416_v1 = vld [vmem:[%s18764_s6 + $0x20] sm:$0xff] }
  0x1b   : > { %v753_v61 = vunpack.c.l.b16 %v723_v60 }
  0x1c   : > { %s12784_s20 = scalar_lea.vmem %s18925_s1, %s12593_s25  ;;  %s12633_s25 = smov 96  }
  0x1d   : > { %11041 = vmatmul.msk.bf16.vlgmr.msra.gmra.mxu2 %vm645_vm0, %v12393_v2  ;;  %11040 = vmatmul.msk.bf16.vlgmr.msra.gmra.mxu0 %vm645_vm0, %v12392_v3  ;;  %v12790_v51 = vld [vmem:[%s12784_s20] sm:$0xff]   ;;  %v12799_v53 = vld [vmem:[%s12784_s20 + $0x8] sm:$0xff]   ;;  %v12808_v55 = vld [vmem:[%s12784_s20 + $0x10] sm:$0xff]   ;;  %v760_v62 = vpack.c.b16 %v753_v61, %v753_v61 }
  0x1e   : > { %933 = vmatpush.bf16.msrb.mxu2 %v12409_v46  ;;  %v12814_v56 = vld [vmem:[%s12784_s20 + $0x18] sm:$0xff]   ;;  %v12825_v59 = vld [vmem:[%s12784_s20 + $0x20] sm:$0xff]   ;;  %1130 = vmatpush.bf16.msrb.mxu0 %v12411_v0  ;;  %v12410_v2 = vld [vmem:[%s18764_s6 + $0x10] sm:$0xff] }
  0x1f   : > { %18926 = vst [vmem:[#allocation2_spill] sm:$0xff] %v12814_v56 }
  0x22   : > { %934 = vmatpush.bf16.msrb.mxu2 %v12408_v47  ;;  %1131 = vmatpush.bf16.msrb.mxu0 %v12410_v2 }
  0x26   : > { %935 = vmatpush.bf16.msrb.mxu2 %v12407_v48 }
  0x2a   : > { %936 = vmatpush.bf16.msrb.mxu2 %v12406_v49 }
  0x2d   : > { %11042 = vmatmul.msk.bf16.gmra.mxu2 %vm645_vm0, %v12394_v4 }
  0x2e   : > { %1352 = vmatpush.bf16.msra.mxu2 %v12417_v63 }
  0x32   : > { %1353 = vmatpush.bf16.msra.mxu2 %v12416_v1 }
  0x3d   : > { %11043 = vmatmul.msk.bf16.gmra.mxu2 %vm645_vm0, %v12395_v5 }
  0x4d   : > { %11091 = vmatmul.msk.bf16.vlgmr.msrb.gmra.mxu2 %vm761_vm9, %v12790_v51 }
  0x5d   : > { %11092 = vmatmul.msk.bf16.gmra.mxu2 %vm761_vm9, %v12799_v53 }
  0x6d   : > { %11093 = vmatmul.msk.bf16.gmra.mxu2 %vm761_vm9, %v12808_v55 }
  0x7d   : > { %11094 = vmatmul.msk.bf16.gmra.mxu2 %vm761_vm9, %v12814_v56 }
  0x8d   : > { %11095 = vmatmul.msk.bf16.gmra.mxu2 %vm761_vm9, %v12825_v59 }
  0x9a   : > { %v667_v11 = vpop.f32.mrf.mxu0 }
  0x9b   : > { %v668_v29 = vadd.f32 %v12610_v12, %v667_v11 }
  0x9d   : > { %v695_v35 = vmul.f32 0.1, %v668_v29  ;;  %vm687_vm7 = vcmp.ge.f32.partialorder %v668_v29, 0.0 }
  0x9f   : > { %v703_v40 = vsel %vm687_vm7, %v668_v29, %v695_v35 }
  0xa0   : > { %v672_v6 = vpop.f32.mrf.mxu2 }
  0xa1   : > { %v673_v23 = vadd.f32 %v12610_v12, %v672_v6 }
  0xa2   : > { %v669_v22 = vpop.f32.mrf.mxu0 }
  0xa3   : > { %v670_v30 = vadd.f32 %v12610_v12, %v669_v22  ;;  %v697_v32 = vmul.f32 0.1, %v673_v23  ;;  %vm689_vm6 = vcmp.ge.f32.partialorder %v673_v23, 0.0 }
  0xa5   : > { %v696_v36 = vmul.f32 0.1, %v670_v30  ;;  %vm688_vm8 = vcmp.ge.f32.partialorder %v670_v30, 0.0  ;;  %v705_v38 = vsel %vm689_vm6, %v673_v23, %v697_v32 }
  0xa7   : > { %v704_v41 = vsel %vm688_vm8, %v670_v30, %v696_v36 }
  0xa8   : > { %v674_v7 = vpop.f32.mrf.mxu2  ;;  %v724_v42 = vpack.c.bf16 %v704_v41, %v703_v40 }
  0xa9   : > { %v675_v19 = vadd.f32 %v12610_v12, %v674_v7 }
  0xab   : > { %v698_v28 = vmul.f32 0.1, %v675_v19  ;;  %vm690_vm5 = vcmp.ge.f32.partialorder %v675_v19, 0.0 }
  0xad   : > { %v706_v37 = vsel %vm690_vm5, %v675_v19, %v698_v28 }
  0xae   : > { %v725_v39 = vpack.c.bf16 %v706_v37, %v705_v38 }
  0xb0   : > { %v677_v8 = vpop.f32.mrf.mxu2 }
  0xb1   : > { %v678_v16 = vadd.f32 %v12610_v12, %v677_v8 }
  0xb3   : > { %v699_v24 = vmul.f32 0.1, %v678_v16  ;;  %vm691_vm4 = vcmp.ge.f32.partialorder %v678_v16, 0.0 }
  0xb5   : > { %v707_v33 = vsel %vm691_vm4, %v678_v16, %v699_v24 }
  0xb8   : > { %v679_v9 = vpop.f32.mrf.mxu2 }
  0xb9   : > { %v680_v14 = vadd.f32 %v12610_v12, %v679_v9 }
  0xbb   : > { %v700_v20 = vmul.f32 0.1, %v680_v14  ;;  %vm692_vm3 = vcmp.ge.f32.partialorder %v680_v14, 0.0 }
  0xbd   : > { %v708_v31 = vsel %vm692_vm3, %v680_v14, %v700_v20  ;;  %v12421_v14 = vld [vmem:[%s18765_s7 + $0x58] sm:$0xff] }
  0xbe   : > { %v726_v34 = vpack.c.bf16 %v708_v31, %v707_v33 }
  0xc0   : > { %v682_v10 = vpop.f32.mrf.mxu2 }
  0xc1   : > { %v683_v13 = vadd.f32 %v12610_v12, %v682_v10 }
  0xc3   : > { %v701_v17 = vmul.f32 0.1, %v683_v13  ;;  %vm693_vm1 = vcmp.ge.f32.partialorder %v683_v13, 0.0 }
  0xc5   : > { %v709_v25 = vsel %vm693_vm1, %v683_v13, %v701_v17 }
  0xc8   : > { %v684_v15 = vpop.f32.mrf.mxu2 }
  0xc9   : > { %v685_v18 = vadd.f32 %v12610_v12, %v684_v15 }
  0xcb   : > { %vm694_vm2 = vcmp.ge.f32.partialorder %v685_v18, 0.0  ;;  %v702_v21 = vmul.f32 0.1, %v685_v18 }
  0xcd   : > { %v710_v26 = vsel %vm694_vm2, %v685_v18, %v702_v21 }
  0xce   : > { %v727_v27 = vpack.c.bf16 %v710_v26, %v709_v25 }
  0xd0   : > { %787 = vmatpush.bf16.msra.mxu1 %v727_v27 }
  0xd4   : > { %788 = vmatpush.bf16.msra.mxu1 %v726_v34 }
  0xd8   : > { %789 = vmatpush.bf16.msra.mxu1 %v725_v39 }
  0xdc   : > { %790 = vmatpush.bf16.msra.mxu1 %v724_v42 }
  0xdf   : > { %11068 = vmatmul.msk.bf16.vlgmr.msra.gmra.mxu1 %vm761_vm9, %v12398_v43 }
  0xe0   : > { %1453 = vmatpush.bf16.msrb.mxu1 %v12421_v14 }
  0xef   : > { %11069 = vmatmul.msk.bf16.gmra.mxu1 %vm761_vm9, %v12399_v44 }
  0xff   : > { %11070 = vmatmul.msk.bf16.gmra.mxu1 %vm761_vm9, %v12400_v45 }
 0x10f   : > { %11071 = vmatmul.msk.bf16.gmra.mxu1 %vm761_vm9, %v12401_v50 }
 0x11f   : > { %11072 = vmatmul.msk.bf16.gmra.mxu1 %vm761_vm9, %v12402_v52 }
 0x12f   : > { %11073 = vmatmul.msk.bf16.gmra.mxu1 %vm761_vm9, %v12403_v54 }
 0x13f   : > { %11074 = vmatmul.msk.bf16.gmra.mxu1 %vm761_vm9, %v760_v62  ;;  %v12415_v62 = vld [vmem:[%s18765_s7 + $0x38] sm:$0xff] }
 0x140   : > { %1262 = vmatpush.bf16.msrb.mxu3 %v12415_v62 }
 0x15c   : > { %v792_v3 = vpop.f32.mrf.mxu1 }
 0x15d   : > { %v826_v4 = vpack.c.bf16 %v792_v3, %v792_v3 }
 0x15f   : > { %v973_v7 = vunpack.c.l.b16 %v826_v4 }
 0x164   : > { %v794_v5 = vpop.f32.mrf.mxu1 }
 0x165   : > { %v827_v6 = vpack.c.bf16 %v794_v5, %v794_v5 }
 0x167   : > { %v974_v8 = vunpack.c.l.b16 %v827_v6 }
 0x169   : > { %v983_v9 = vpack.c.b16 %v974_v8, %v973_v7 }
 0x16b   : > { %11104 = vmatmul.msk.bf16.vlgmr.msra.gmra.mxu3 %vm645_vm0, %v983_v9  ;;  %v1060_v16 = vshll.u32 %v983_v9, 16  ;;  %v1058_v21 = vshrl.u32 %v983_v9, 16  ;;  %v1308_v22 = vrot.slane %v983_v9, 1 }
 0x16c   : > { %v797_v10 = vpop.f32.mrf.mxu1 }
 0x16d   : > { %v828_v11 = vpack.c.bf16 %v797_v10, %v797_v10  ;;  %v1062_v19 = vrot.slane %v1060_v16, 1 }
 0x16f   : > { %v975_v12 = vunpack.c.l.b16 %v828_v11  ;;  %v1063_v27 = vor.u32 %v1062_v19, %v1058_v21  ;;  %v12420_v21 = vld [vmem:[%s18765_s7 + $0x50] sm:$0xff] }
 0x170   : > { %1454 = vmatpush.bf16.msrb.mxu1 %v12420_v21 }
 0x171   : > { %v1500_v13 = vpack.c.b16 %v975_v12, %v974_v8 }
 0x173   : > { %v1706_v32 = vshrl.u32 %v1500_v13, 16  ;;  %v1709_v33 = vshll.u32 %v1500_v13, 16  ;;  %v1506_v41 = vrot.slane %v1500_v13, 1  ;;  %v1980_v47 = vrot.slane %v1500_v13, 2 }
 0x174   : > { %v799_v15 = vpop.f32.mrf.mxu1 }
 0x175   : > { %v829_v17 = vpack.c.bf16 %v799_v15, %v799_v15  ;;  %v1708_v39 = vrot.slane %v1706_v32, 1  ;;  %v1711_v40 = vrot.slane %v1709_v33, 2 }
 0x177   : > { %v976_v18 = vunpack.c.l.b16 %v829_v17  ;;  %v1712_v58 = vor.u32 %v1711_v40, %v1708_v39  ;;  %v12418_v39 = vld [vmem:[%s18765_s7 + $0x40] sm:$0xff] }
 0x179   : > { %v12849_v20 = vpack.c.b16 %v976_v18, %v975_v12 }
 0x17b   : > { %11105 = vmatmul.msk.bf16.gmra.mxu3 %vm645_vm0, %v12849_v20  ;;  %v1309_v23 = vrot.slane %v12849_v20, 1  ;;  %v1064_v24 = vshll.u32 %v12849_v20, 16  ;;  %v1068_v25 = vshrl.u32 %v12849_v20, 16  ;;  %v2174_v6 = vrot.slane %v12849_v20, 2 }
 0x17c   : > { %v802_v26 = vpop.f32.mrf.mxu1  ;;  %v2604_v7 = vrot.slane %v12849_v20, 3 }
 0x17d   : > { %v830_v28 = vpack.c.bf16 %v802_v26, %v802_v26  ;;  %v1310_v29 = vsel %vm1307_vm10, %v1308_v22, %v1309_v23  ;;  %v1066_v30 = vrot.slane %v1064_v24, 1  ;;  %v12857_v31 = vrot.slane %v1064_v24, 3 }
 0x17e   : > { %11167 = vmatmul.msk.bf16.vlgmr.msra.gmra.mxu2 %vm645_vm0, %v1310_v29  ;;  %v2369_v34 = vrot.slane %v1068_v25, 2 }
 0x17f   : > { %v977_v35 = vunpack.c.l.b16 %v830_v28  ;;  %v1067_v36 = vsel %vm1057_vm11, %v1063_v27, %v1066_v30  ;;  %v1070_v5 = vor.u32 %v1068_v25, %v1066_v30  ;;  %v12419_v30 = vld [vmem:[%s18765_s7 + $0x48] sm:$0xff] }
 0x180   : > { %11121 = vmatmul.msk.bf16.vlgmr.msrb.gmra.mxu0 %vm645_vm0, %v1067_v36  ;;  %v2371_v37 = vor.u32 %v12857_v31, %v2369_v34  ;;  %1455 = vmatpush.bf16.msrb.mxu1 %v12419_v30  ;;  %v12412_v36 = vld [vmem:[%s18765_s7 + $0x20] sm:$0xff] }
 0x181   : > { %v12863_v38 = vpack.c.b16 %v977_v35, %v976_v18  ;;  %v12414_v18 = vld [vmem:[%s18765_s7 + $0x30] sm:$0xff] }
 0x182   : > { %1263 = vmatpush.bf16.msrb.mxu3 %v12414_v18 }
 0x183   : > { %v1714_v42 = vshrl.u32 %v12863_v38, 16  ;;  %v1717_v43 = vshll.u32 %v12863_v38, 16  ;;  %v1507_v44 = vrot.slane %v12863_v38, 1  ;;  %v1981_v45 = vrot.slane %v12863_v38, 2 }
 0x184   : > { %v804_v46 = vpop.f32.mrf.mxu1  ;;  %1456 = vmatpush.bf16.msrb.mxu1 %v12418_v39 }
 0x185   : > { %v1716_v48 = vrot.slane %v1714_v42, 1  ;;  %v1719_v49 = vrot.slane %v1717_v43, 2  ;;  %v831_v50 = vpack.c.bf16 %v804_v46, %v804_v46  ;;  %v12870_v52 = vsel %vm1307_vm10, %v1506_v41, %v1507_v44 }
 0x186   : > { %v12873_v54 = vsel %vm1979_vm12, %v1980_v47, %v1981_v45  ;;  %v1399_v41 = vrot.slane %v12790_v51, 1  ;;  %v1400_v47 = vrot.slane %v12799_v53, 1 }
 0x187   : > { %v978_v57 = vunpack.c.l.b16 %v831_v50  ;;  %v1720_v60 = vor.u32 %v1719_v49, %v1716_v48 }
 0x189   : > { %v12875_v61 = vpack.c.b16 %v978_v57, %v977_v35  ;;  %v12881_v63 = vsel %vm1704_vm13, %v1712_v58, %v1720_v60 }
 0x18b   : > { %11106 = vmatmul.msk.bf16.gmra.mxu3 %vm645_vm0, %v12875_v61  ;;  %v1311_v0 = vrot.slane %v12875_v61, 1  ;;  %v1071_v1 = vshll.u32 %v12875_v61, 16  ;;  %v1075_v2 = vshrl.u32 %v12875_v61, 16  ;;  %v2175_v3 = vrot.slane %v12875_v61, 2 }
 0x18c   : > { %v807_v4 = vpop.f32.mrf.mxu1  ;;  %v2605_v8 = vrot.slane %v12875_v61, 3  ;;  %v12429_v61 = vld [vmem:[%s18764_s6 + $0x48] sm:$0xff] }
 0x18d   : > { %v832_v9 = vpack.c.bf16 %v807_v4, %v807_v4  ;;  %v1312_v10 = vsel %vm1307_vm10, %v1309_v23, %v1311_v0  ;;  %v1073_v11 = vrot.slane %v1071_v1, 1  ;;  %v2373_v12 = vrot.slane %v1071_v1, 3  ;;  %v12413_v23 = vld [vmem:[%s18765_s7 + $0x28] sm:$0xff]  ;;  %1791 = vmatpush.bf16.msrb.mxu2 %v12429_v61 }
 0x18e   : > { %11168 = vmatmul.msk.bf16.gmra.mxu2 %vm645_vm0, %v1312_v10  ;;  %v2372_v13 = vrot.slane %v1075_v2, 2  ;;  %v12899_v14 = vsel %vm1979_vm12, %v2174_v6, %v2175_v3  ;;  %v12902_v15 = vsel %vm2603_vm14, %v2604_v7, %v2605_v8  ;;  %1264 = vmatpush.bf16.msrb.mxu3 %v12413_v23  ;;  %v1401_v1 = vsel %vm1307_vm10, %v1399_v41, %v1400_v47 }
 0x18f   : > { %v979_v16 = vunpack.c.l.b16 %v832_v9  ;;  %v1074_v17 = vsel %vm1057_vm11, %v1070_v5, %v1073_v11  ;;  %v1077_v46 = vor.u32 %v1075_v2, %v1073_v11  ;;  %11196 = vmatmul.msk.bf16.vlgmr.msrb.gmra.mxu1 %vm761_vm9, %v1401_v1 }
 0x190   : > { %11122 = vmatmul.msk.bf16.gmra.mxu0 %vm645_vm0, %v1074_v17  ;;  %v2374_v19 = vor.u32 %v2373_v12, %v2372_v13 }
 0x191   : > { %v12909_v20 = vpack.c.b16 %v979_v16, %v978_v57 }
 0x192   : > { %v12915_v22 = vsel %vm2368_vm15, %v2371_v37, %v2374_v19  ;;  %1265 = vmatpush.bf16.msrb.mxu3 %v12412_v36 }
 0x193   : > { %v1723_v24 = vshrl.u32 %v12909_v20, 16  ;;  %v1726_v25 = vshll.u32 %v12909_v20, 16  ;;  %v1509_v26 = vrot.slane %v12909_v20, 1  ;;  %v1983_v27 = vrot.slane %v12909_v20, 2 }
 0x194   : > { %v809_v28 = vpop.f32.mrf.mxu1 }
 0x195   : > { %v833_v29 = vpack.c.bf16 %v809_v28, %v809_v28  ;;  %v1725_v31 = vrot.slane %v1723_v24, 1  ;;  %v1728_v32 = vrot.slane %v1726_v25, 2  ;;  %v12928_v33 = vsel %vm1307_vm10, %v1507_v44, %v1509_v26 }
 0x196   : > { %v12931_v34 = vsel %vm1979_vm12, %v1981_v45, %v1983_v27  ;;  %v1186_v25 = vshll.u32 %v12799_v53, 16 }
 0x197   : > { %v980_v35 = vunpack.c.l.b16 %v833_v29  ;;  %v1729_v37 = vor.u32 %v1728_v32, %v1725_v31  ;;  %v1190_v31 = vshrl.u32 %v12799_v53, 16  ;;  %v1182_v32 = vshll.u32 %v12790_v51, 16 }
 0x198   : > { %v13014_v30 = vrot.slane %v1186_v25, 3 }
 0x199   : > { %v12936_v38 = vpack.c.b16 %v980_v35, %v979_v16  ;;  %v12942_v40 = vsel %vm1704_vm13, %v1720_v60, %v1729_v37  ;;  %v12958_v60 = vpop.f32.mrf.mxu2  ;;  %v1184_v61 = vrot.slane %v1182_v32, 1  ;;  %v1188_v32 = vrot.slane %v1186_v25, 1 }
 0x19b   : > { %11107 = vmatmul.msk.bf16.gmra.mxu3 %vm645_vm0, %v12936_v38  ;;  %v1313_v42 = vrot.slane %v12936_v38, 1  ;;  %v1078_v43 = vshll.u32 %v12936_v38, 16  ;;  %v1082_v44 = vshrl.u32 %v12936_v38, 16  ;;  %v2177_v48 = vrot.slane %v12936_v38, 2 }
 0x19c   : > { %v812_v45 = vpop.f32.mrf.mxu1  ;;  %v2607_v49 = vrot.slane %v12936_v38, 3 }
 0x19d   : > { %v834_v50 = vpack.c.bf16 %v812_v45, %v812_v45  ;;  %v1314_v57 = vsel %vm1307_vm10, %v1311_v0, %v1313_v42  ;;  %v1080_v58 = vrot.slane %v1078_v43, 1  ;;  %v2376_v62 = vrot.slane %v1082_v44, 2 }
 0x19e   : > { %11169 = vmatmul.msk.bf16.gmra.mxu2 %vm645_vm0, %v1314_v57  ;;  %v12969_v2 = vsel %vm1979_vm12, %v2175_v3, %v2177_v48  ;;  %v12974_v0 = vsel %vm2603_vm14, %v2605_v8, %v2607_v49  ;;  %v2377_v4 = vrot.slane %v1078_v43, 3  ;;  %v12423_v3 = vld [vmem:[%s18764_s6 + $0x38] sm:$0xff] }
 0x19f   : > { %v981_v5 = vunpack.c.l.b16 %v834_v50  ;;  %v1081_v6 = vsel %vm1057_vm11, %v1077_v46, %v1080_v58  ;;  %1550 = vmatpush.bf16.msra.mxu0 %v12423_v3  ;;  %v1084_v45 = vor.u32 %v1082_v44, %v1080_v58  ;;  %v1402_v46 = vrot.slane %v12808_v55, 1 }
 0x1a0   : > { %11123 = vmatmul.msk.bf16.gmra.mxu0 %vm645_vm0, %v1081_v6  ;;  %v12985_v7 = vor.u32 %v2377_v4, %v2376_v62 }
 0x1a1   : > { %v12987_v8 = vpack.c.b16 %v981_v5, %v980_v35  ;;  %v13007_v24 = vpop.f32.mrf.mxu2  ;;  %v12428_v35 = vld [vmem:[%s18764_s6 + $0x40] sm:$0xff]  ;;  %v1403_v44 = vsel %vm1307_vm10, %v1400_v47, %v1402_v46 }
 0x1a2   : > { %v12991_v9 = vsel %vm2368_vm15, %v2374_v19, %v12985_v7  ;;  %1792 = vmatpush.bf16.msrb.mxu2 %v12428_v35  ;;  %11197 = vmatmul.msk.bf16.gmra.mxu1 %vm761_vm9, %v1403_v44 }
 0x1a3   : > { %v1732_v10 = vshrl.u32 %v12987_v8, 16  ;;  %v1735_v11 = vshll.u32 %v12987_v8, 16  ;;  %v1511_v12 = vrot.slane %v12987_v8, 1  ;;  %v1985_v13 = vrot.slane %v12987_v8, 2 }
 0x1a4   : > { %v814_v16 = vpop.f32.mrf.mxu1 }
 0x1a5   : > { %v835_v17 = vpack.c.bf16 %v814_v16, %v814_v16  ;;  %v1734_v18 = vrot.slane %v1732_v10, 1  ;;  %v1737_v20 = vrot.slane %v1735_v11, 2  ;;  %v13000_v21 = vsel %vm1307_vm10, %v1509_v26, %v1511_v12 }
 0x1a6   : > { %v13005_v19 = vsel %vm1979_vm12, %v1983_v27, %v1985_v13  ;;  %v1180_v27 = vshrl.u32 %v12790_v51, 16  ;;  %v12422_v51 = vld [vmem:[%s18764_s6 + $0x30] sm:$0xff] }
 0x1a7   : > { %v982_v23 = vunpack.c.l.b16 %v835_v17  ;;  %v13010_v28 = vor.u32 %v1737_v20, %v1734_v18  ;;  %1551 = vmatpush.bf16.msra.mxu0 %v12422_v51 }
 0x1a9   : > { %v13012_v29 = vpack.c.b16 %v982_v23, %v981_v5  ;;  %v13019_v26 = vsel %vm1704_vm13, %v1729_v37, %v13010_v28  ;;  %v13033_v37 = vrot.slane %v1190_v31, 2 }
 0x1ab   : > { %11108 = vmatmul.msk.bf16.gmra.mxu3 %vm645_vm0, %v13012_v29  ;;  %v1315_v36 = vrot.slane %v13012_v29, 1  ;;  %v1085_v39 = vshll.u32 %v13012_v29, 16  ;;  %v1089_v41 = vshrl.u32 %v13012_v29, 16  ;;  %v2179_v50 = vrot.slane %v13012_v29, 2 }
 0x1ac   : > { %v817_v43 = vpop.f32.mrf.mxu1  ;;  %v2609_v57 = vrot.slane %v13012_v29, 3 }
 0x1ad   : > { %v836_v62 = vpack.c.bf16 %v817_v43, %v817_v43  ;;  %v1316_v1 = vsel %vm1307_vm10, %v1313_v42, %v1315_v36  ;;  %v1087_v4 = vrot.slane %v1085_v39, 1  ;;  %v13055_v58 = vsel %vm1979_vm12, %v2177_v48, %v2179_v50  ;;  %v13069_v48 = vpop.f32.mrf.mxu2 }
 0x1ae   : > { %11170 = vmatmul.msk.bf16.gmra.mxu2 %vm645_vm0, %v1316_v1  ;;  %v13060_v42 = vsel %vm2603_vm14, %v2607_v49, %v2609_v57  ;;  %v2380_v6 = vrot.slane %v1089_v41, 2  ;;  %v2381_v47 = vrot.slane %v1085_v39, 3  ;;  %v1185_v49 = vor.u32 %v1184_v61, %v1180_v27 }
 0x1af   : > { %v1055_v3 = vunpack.c.l.b16 %v836_v62  ;;  %v1088_v10 = vsel %vm1057_vm11, %v1084_v45, %v1087_v4  ;;  %v1193_v45 = vshll.u32 %v12808_v55, 16 }
 0x1b0   : > { %11124 = vmatmul.msk.bf16.gmra.mxu0 %vm645_vm0, %v1088_v10  ;;  %v2382_v38 = vor.u32 %v2381_v47, %v2380_v6  ;;  %v1189_v44 = vsel %vm1057_vm11, %v1185_v49, %v1188_v32 }
 0x1b1   : > { %v13067_v11 = vpack.c.b16 %v1055_v3, %v982_v23  ;;  %v1056_v16 = vpack.c.b16 %v1055_v3, %v1055_v3  ;;  %v2486_v6 = vrot.slane %v1193_v45, 3 }
 0x1b2   : > { %v13077_v39 = vsel %vm2368_vm15, %v12985_v7, %v2382_v38 }
 0x1b3   : > { %v1741_v17 = vshrl.u32 %v13067_v11, 16  ;;  %v1744_v18 = vshll.u32 %v13067_v11, 16  ;;  %v18781_v35 = vrot.slane %v13067_v11, 1  ;;  %v1987_v51 = vrot.slane %v13067_v11, 2 }
 0x1b4   : > { %v819_v20 = vpop.f32.mrf.mxu1  ;;  %v1093_v7 = vshll.u32 %v1056_v16, 16  ;;  %v1317_v10 = vrot.slane %v1056_v16, 1 }
 0x1b5   : > { %v837_v23 = vpack.c.bf16 %v819_v20, %v819_v20  ;;  %v1743_v43 = vrot.slane %v1741_v17, 1  ;;  %v1746_v62 = vrot.slane %v1744_v18, 2  ;;  %v13085_v27 = vsel %vm1307_vm10, %v1511_v12, %v18781_v35  ;;  %v13106_v18 = vpop.f32.mrf.mxu2 }
 0x1b6   : > { %v13090_v25 = vsel %vm1979_vm12, %v1985_v13, %v1987_v51  ;;  %v1197_v12 = vshrl.u32 %v12808_v55, 16  ;;  %v1095_v13 = vrot.slane %v1093_v7, 1  ;;  %v1404_v20 = vrot.slane %v12814_v56, 1 }
 0x1b7   : > { %v1499_v1 = vunpack.c.l.b16 %v837_v23  ;;  %v13093_v61 = vor.u32 %v1746_v62, %v1743_v43  ;;  %v1318_v43 = vsel %vm1307_vm10, %v1315_v36, %v1317_v10 }
 0x1b8   : > { %v2485_v49 = vrot.slane %v1197_v12, 2 }
 0x1b9   : > { %v13095_v47 = vpack.c.b16 %v1499_v1, %v1499_v1  ;;  %v13097_v17 = vpack.c.b16 %v1499_v1, %v1055_v3  ;;  %v13103_v8 = vsel %vm1704_vm13, %v13010_v28, %v13093_v61  ;;  %v1091_v28 = vor.u32 %v1089_v41, %v1087_v4 }
 0x1ba   : > { %v13117_v62 = vor.u32 %v2486_v6, %v2485_v49  ;;  %v1405_v1 = vsel %vm1307_vm10, %v1402_v46, %v1404_v20  ;;  %v1195_v6 = vrot.slane %v1193_v45, 1 }
 0x1bb   : > { %11150 = vmatmul.msk.bf16.vlgmr.msrb.gmra.mxu3 %vm761_vm9, %v1189_v44  ;;  %v2181_v16 = vrot.slane %v13097_v17, 2  ;;  %v1989_v3 = vrot.slane %v13095_v47, 2  ;;  %v2611_v23 = vrot.slane %v13097_v17, 3  ;;  %v1096_v36 = vsel %vm1057_vm11, %v1091_v28, %v1095_v13  ;;  %11198 = vmatmul.msk.bf16.gmra.mxu1 %vm761_vm9, %v1405_v1  ;;  %v12427_v1 = vld [vmem:[%s18765_s7 + $0x78] sm:$0xff] }
 0x1bc   : > { %v2385_v29 = vshrl.u32 %v13097_v17, 16  ;;  %v2388_v41 = vshll.u32 %v13097_v17, 16  ;;  %v1406_v17 = vrot.slane %v12825_v59, 1  ;;  %v1199_v45 = vor.u32 %v1197_v12, %v1195_v6  ;;  %1659 = vmatpush.bf16.msra.mxu3 %v12427_v1 }
 0x1bd   : > { %v13122_v7 = vsel %vm1979_vm12, %v2179_v50, %v2181_v16  ;;  %v13125_v44 = vsel %vm1979_vm12, %v1987_v51, %v1989_v3  ;;  %v13128_v5 = vsel %vm2603_vm14, %v2609_v57, %v2611_v23  ;;  %v1192_v51 = vor.u32 %v1190_v31, %v1188_v32  ;;  %v13137_v57 = vpop.f32.mrf.mxu2  ;;  %v822_v32 = vpop.f32.mrf.mxu1 }
 0x1be   : > { %11171 = vmatmul.msk.bf16.gmra.mxu2 %vm645_vm0, %v1318_v43  ;;  %v2387_v46 = vrot.slane %v2385_v29, 2  ;;  %v2390_v50 = vrot.slane %v2388_v41, 3  ;;  %v1407_v49 = vsel %vm1307_vm10, %v1404_v20, %v1406_v17  ;;  %v18779_v31 = vshll.u32 %v12814_v56, 16 }
 0x1bf   : > { %v1196_v13 = vsel %vm1057_vm11, %v1192_v51, %v1195_v6  ;;  %v838_v20 = vpack.c.bf16 %v822_v32, %v822_v32 }
 0x1c0   : > { %11125 = vmatmul.msk.bf16.gmra.mxu0 %vm645_vm0, %v1096_v36  ;;  %v2391_v4 = vor.u32 %v2390_v50, %v2387_v46  ;;  %v1202_v43 = vrot.slane %v18779_v31, 1 }
 0x1c2   : > { %v13140_v10 = vsel %vm2368_vm15, %v2382_v38, %v2391_v4  ;;  %v13155_v38 = vld [vmem:[%s12784_s20 + $0x28] sm:$0xff]  }
 0x1c3   : > { %18927 = vst [vmem:[#allocation3_spill] sm:$0xff] %v13140_v10  ;;  %v13160_v28 = vunpack.c.l.b16 %v13155_v38 }
 0x1c5   : > { %v13148_v3 = vpop.f32.mrf.mxu2  ;;  %v1179_v12 = vpack.c.b16 %v13160_v28, %v13160_v28  ;;  %v824_v46 = vpop.f32.mrf.mxu1 }
 0x1c7   : > { %v1408_v41 = vrot.slane %v1179_v12, 1 }
 0x1cb   : > { %11151 = vmatmul.msk.bf16.gmra.mxu3 %vm761_vm9, %v1196_v13  ;;  %11199 = vmatmul.msk.bf16.gmra.mxu1 %vm761_vm9, %v1407_v49  ;;  %v1409_v13 = vsel %vm1307_vm10, %v1406_v17, %v1408_v41  ;;  %v12433_v49 = vld [vmem:[%s18765_s7 + $0x98] sm:$0xff]  ;;  %v18778_v17 = vshll.u32 %v12825_v59, 16 }
 0x1cc   : > { %1934 = vmatpush.bf16.msra.mxu1 %v12433_v49 }
 0x1cd   : > { %v13166_v29 = vpop.f32.mrf.mxu2 }
 0x1ce   : > { %11259 = vmatmul.msk.bf16.vlgmr.msrb.gmra.mxu2 %vm645_vm0, %v12881_v63  ;;  %v2171_v63 = vunpack.c.l.b16 %v838_v20  ;;  %v18780_v20 = vshrl.u32 %v12814_v56, 16 }
 0x1d0   : > { %11213 = vmatmul.msk.bf16.vlgmr.msra.gmra.mxu0 %vm645_vm0, %v12870_v52  ;;  %v1203_v52 = vsel %vm1057_vm11, %v1199_v45, %v1202_v43  ;;  %v2173_v36 = vpack.c.b16 %v2171_v63, %v2171_v63  ;;  %v12426_v63 = vld [vmem:[%s18765_s7 + $0x70] sm:$0xff]  ;;  %v1206_v46 = vor.u32 %v18780_v20, %v1202_v43  ;;  %v12424_v43 = vld [vmem:[%s18765_s7 + $0x60] sm:$0xff] }
 0x1d1   : > { %1660 = vmatpush.bf16.msra.mxu3 %v12426_v63 }
 0x1d2   : > { %v2183_v50 = vrot.slane %v2173_v36, 2  ;;  %v2394_v51 = vshrl.u32 %v2173_v36, 16  ;;  %v2397_v6 = vshll.u32 %v2173_v36, 16  ;;  %v2613_v45 = vrot.slane %v2173_v36, 3  ;;  %v12425_v36 = vld [vmem:[%s18765_s7 + $0x68] sm:$0xff] }
 0x1d4   : > { %v13176_v32 = vsel %vm1979_vm12, %v2181_v16, %v2183_v50  ;;  %v13189_v16 = vsel %vm2603_vm14, %v2611_v23, %v2613_v45  ;;  %v2399_v1 = vrot.slane %v2397_v6, 3  ;;  %v1209_v23 = vrot.slane %v18778_v17, 1  ;;  %v13210_v6 = vld [vmem:[%s12784_s20 + $0x4] sm:$0xff]  }
 0x1d5   : > { %18928 = vst [vmem:[#allocation4_spill] sm:$0xff] %v13189_v16  ;;  %v13197_v41 = vpop.f32.mrf.mxu2  ;;  %1661 = vmatpush.bf16.msra.mxu3 %v12425_v36  ;;  %v1839_v49 = vshrl.u32 %v13210_v6, 16  ;;  %v1842_v45 = vshll.u32 %v13210_v6, 16 }
 0x1d7   : > { %v1844_v36 = vrot.slane %v1842_v45, 2  ;;  %v13239_v45 = vld [vmem:[%s12784_s20 + $0x14] sm:$0xff]  }
 0x1d9   : > { %1662 = vmatpush.bf16.msra.mxu3 %v12424_v43  ;;  %v1215_v43 = vshll.u32 %v1179_v12, 16  ;;  %v12435_v12 = vld [vmem:[%s18764_s6 + $0x58] sm:$0xff] }
 0x1da   : > { %2024 = vmatpush.bf16.msrb.mxu0 %v12435_v12 }
 0x1db   : > { %11152 = vmatmul.msk.bf16.gmra.mxu3 %vm761_vm9, %v1203_v52  ;;  %11200 = vmatmul.msk.bf16.gmra.mxu1 %vm761_vm9, %v1409_v13  ;;  %v12432_v52 = vld [vmem:[%s18765_s7 + $0x90] sm:$0xff] }
 0x1dc   : > { %1935 = vmatpush.bf16.msra.mxu1 %v12432_v52  ;;  %v13213_v13 = vld [vmem:[%s12784_s20 + $0xc] sm:$0xff]   ;;  %v1841_v52 = vrot.slane %v1839_v49, 1 }
 0x1dd   : > { %v1850_v63 = vshll.u32 %v13213_v13, 16  ;;  %v13227_v35 = vpop.f32.mrf.mxu2 }
 0x1de   : > { %11260 = vmatmul.msk.bf16.gmra.mxu2 %vm645_vm0, %v12942_v40  ;;  %v2396_v40 = vrot.slane %v2394_v51, 2  ;;  %v12431_v51 = vld [vmem:[%s18765_s7 + $0x88] sm:$0xff]  ;;  %v1845_v31 = vor.u32 %v1844_v36, %v1841_v52  ;;  %v12440_v52 = vld [vmem:[%s18764_s6 + $0x60] sm:$0xff] }
 0x1df   : > { %v1852_v17 = vrot.slane %v1850_v63, 2  ;;  %v1856_v63 = vshrl.u32 %v13239_v45, 16 }
 0x1e0   : > { %11214 = vmatmul.msk.bf16.gmra.mxu0 %vm645_vm0, %v12928_v33  ;;  %v2400_v33 = vor.u32 %v2399_v1, %v2396_v40  ;;  %v1210_v40 = vsel %vm1057_vm11, %v1206_v46, %v1209_v23  ;;  %1936 = vmatpush.bf16.msra.mxu1 %v12431_v51  ;;  %v12430_v1 = vld [vmem:[%s18765_s7 + $0x80] sm:$0xff]  ;;  %v18784_v51 = vshrl.u32 %v12825_v59, 16 }
 0x1e2   : > { %v13204_v50 = vsel %vm2368_vm15, %v2391_v4, %v2400_v33  ;;  %v1847_v4 = vshrl.u32 %v13213_v13, 16  ;;  %v1213_v49 = vor.u32 %v18784_v51, %v1209_v23  ;;  %v1858_v23 = vrot.slane %v1856_v63, 1 }
 0x1e3   : > { %18929 = vst [vmem:[#allocation5_spill] sm:$0xff] %v13204_v50  ;;  %v1753_v63 = vshll.u32 %v13095_v47, 16 }
 0x1e4   : > { %v1849_v33 = vrot.slane %v1847_v4, 1  ;;  %1937 = vmatpush.bf16.msra.mxu1 %v12430_v1 }
 0x1e6   : > { %v1853_v20 = vor.u32 %v1852_v17, %v1849_v33  ;;  %v1217_v17 = vrot.slane %v1215_v43, 1 }
 0x1e8   : > { %v1854_v46 = vsel %vm1704_vm13, %v1845_v31, %v1853_v20  ;;  %v13244_v31 = vpop.f32.mrf.mxu2 }
 0x1eb   : > { %11153 = vmatmul.msk.bf16.gmra.mxu3 %vm761_vm9, %v1210_v40  ;;  %11288 = vmatmul.msk.bf16.vlgmr.msra.gmra.mxu1 %vm761_vm9, %v1854_v46  ;;  %v1218_v40 = vsel %vm1057_vm11, %v1213_v49, %v1217_v17  ;;  %v12434_v46 = vld [vmem:[%s18764_s6 + $0x50] sm:$0xff] }
 0x1ec   : > { %2025 = vmatpush.bf16.msrb.mxu0 %v12434_v46 }
 0x1ee   : > { %v1024_v56 = vpop.f32.mrf.mxu3  ;;  %11261 = vmatmul.msk.bf16.gmra.mxu2 %vm645_vm0, %v13019_v26  ;;  %v12441_v26 = vld [vmem:[%s18764_s6 + $0x68] sm:$0xff] }
 0x1ef   : > { %2218 = vmatpush.bf16.msra.mxu2 %v12441_v26  ;;  %v1025_v33 = vadd.f32 %v1024_v56, %v12958_v60  ;;  %v1750_v60 = vshrl.u32 %v13095_v47, 16 }
 0x1f0   : > { %11215 = vmatmul.msk.bf16.gmra.mxu0 %vm645_vm0, %v13000_v21  ;;  %v1859_v21 = vshll.u32 %v13239_v45, 16 }
 0x1f2   : > { %v1861_v1 = vrot.slane %v1859_v21, 2  ;;  %v1605_v21 = vrot.slane %v13210_v6, 1 }
 0x1f3   : > { %2219 = vmatpush.bf16.msra.mxu2 %v12440_v52 }
 0x1f4   : > { %v1862_v36 = vor.u32 %v1861_v1, %v1858_v23  ;;  %v1755_v23 = vrot.slane %v1753_v63, 2  ;;  %v13276_v1 = vld [vmem:[%s12784_s20 + $0x1c] sm:$0xff]  }
 0x1f5   : > { %v1868_v46 = vshll.u32 %v13276_v1, 16 }
 0x1f6   : > { %v1026_v4 = vpop.f32.mrf.mxu3  ;;  %v1863_v49 = vsel %vm1704_vm13, %v1853_v20, %v1862_v36 }
 0x1f7   : > { %v1027_v20 = vadd.f32 %v1026_v4, %v13007_v24  ;;  %v1870_v51 = vrot.slane %v1868_v46, 2 }
 0x1fb   : > { %11154 = vmatmul.msk.bf16.gmra.mxu3 %vm761_vm9, %v1218_v40  ;;  %11289 = vmatmul.msk.bf16.gmra.mxu1 %vm761_vm9, %v1863_v49  ;;  %v1606_v40 = vrot.slane %v13213_v13, 1 }
 0x1fd   : > { %v1133_v43 = vpop.f32.mrf.mxu0 }
 0x1fe   : > { %v13261_v17 = vadd.f32 %v1133_v43, %v1025_v33  ;;  %v1029_v26 = vpop.f32.mrf.mxu3  ;;  %11262 = vmatmul.msk.bf16.gmra.mxu2 %vm645_vm0, %v13103_v8  ;;  %v1752_v8 = vrot.slane %v1750_v60, 1  ;;  %v1865_v33 = vshrl.u32 %v13276_v1, 16  ;;  %v1607_v43 = vsel %vm1307_vm10, %v1605_v21, %v1606_v40 }
 0x1ff   : > { %v1515_v60 = vrot.slane %v13095_v47, 1 }
 0x200   : > { %11216 = vmatmul.msk.bf16.gmra.mxu0 %vm645_vm0, %v13085_v27  ;;  %v1756_v24 = vor.u32 %v1755_v23, %v1752_v8  ;;  %v1867_v4 = vrot.slane %v1865_v33, 1  ;;  %v12553_v8 = vunpack.c.h.b16 %v12825_v59  ;;  %v18930_v23 = vrot.slane %v13067_v11, 1 }
 0x201   : > { %v13268_v56 = vpop.f32.mrf.mxu2 }
 0x202   : > { %v1871_v63 = vor.u32 %v1870_v51, %v1867_v4  ;;  %v1757_v50 = vsel %vm1704_vm13, %v13093_v61, %v1756_v24  ;;  %v1516_v47 = vsel %vm1307_vm10, %v18930_v23, %v1515_v60  ;;  %v13303_v61 = vpack.c.b16 %v13160_v28, %v12553_v8 }
 0x203   : > { %v1610_v23 = vrot.slane %v13276_v1, 1 }
 0x204   : > { %v1872_v16 = vsel %vm1704_vm13, %v1862_v36, %v1871_v63  ;;  %v1608_v36 = vrot.slane %v13239_v45, 1  ;;  %v1874_v11 = vshrl.u32 %v13303_v61, 16  ;;  %v1877_v46 = vshll.u32 %v13303_v61, 16 }
 0x205   : > { %v1135_v12 = vpop.f32.mrf.mxu0 }
 0x206   : > { %v13278_v52 = vadd.f32 %v1135_v12, %v1027_v20  ;;  %v1031_v27 = vpop.f32.mrf.mxu3  ;;  %v1030_v20 = vadd.f32 %v1029_v26, %v13069_v48  ;;  %v1876_v24 = vrot.slane %v1874_v11, 1  ;;  %v1879_v4 = vrot.slane %v1877_v46, 2 }
 0x207   : > { %v1032_v51 = vadd.f32 %v1031_v27, %v13106_v18  ;;  %v1611_v46 = vsel %vm1307_vm10, %v1608_v36, %v1610_v23 }
 0x208   : > { %v1880_v28 = vor.u32 %v1879_v4, %v1876_v24 }
 0x209   : > { %v13283_v49 = vpop.f32.mrf.mxu2 }
 0x20b   : > { %11242 = vmatmul.msk.bf16.vlgmr.msra.gmra.mxu3 %vm761_vm9, %v1607_v43  ;;  %11290 = vmatmul.msk.bf16.gmra.mxu1 %vm761_vm9, %v1872_v16  ;;  %v1609_v16 = vsel %vm1307_vm10, %v1606_v40, %v1608_v36  ;;  %v12445_v36 = vld [vmem:[%s18765_s7 + $0xd8] sm:$0xff] }
 0x20c   : > { %v13316_v27 = vpop.f32.mrf.mxu1  ;;  %2323 = vmatpush.bf16.msrb.mxu1 %v12445_v36 }
 0x20d   : > { %v1138_v12 = vpop.f32.mrf.mxu0 }
 0x20e   : > { %v13291_v10 = vadd.f32 %v1138_v12, %v1030_v20  ;;  %v1034_v21 = vpop.f32.mrf.mxu3  ;;  %11263 = vmatmul.msk.bf16.gmra.mxu2 %vm645_vm0, %v1757_v50  ;;  %v1881_v20 = vsel %vm1704_vm13, %v1871_v63, %v1880_v28 }
 0x20f   : > { %v1035_v18 = vadd.f32 %v1034_v21, %v13137_v57  ;;  %v12557_v57 = vunpack.c.h.b16 %v13155_v38 }
 0x210   : > { %11217 = vmatmul.msk.bf16.gmra.mxu0 %vm645_vm0, %v1516_v47 }
 0x211   : > { %v13300_v48 = vpop.f32.mrf.mxu2 }
 0x214   : > { %v13331_v63 = vpop.f32.mrf.mxu1 }
 0x215   : > { %v1140_v50 = vpop.f32.mrf.mxu0 }
 0x216   : > { %v13307_v26 = vadd.f32 %v1140_v50, %v1032_v51  ;;  %v1036_v33 = vpop.f32.mrf.mxu3  ;;  %v13333_v51 = vpack.c.b16 %v12557_v57, %v12557_v57 }
 0x217   : > { %v1037_v21 = vadd.f32 %v1036_v33, %v13148_v3  ;;  %v12439_v3 = vld [vmem:[%s18765_s7 + $0xb8] sm:$0xff] }
 0x218   : > { %v1883_v11 = vshrl.u32 %v13333_v51, 16  ;;  %2125 = vmatpush.bf16.msrb.mxu3 %v12439_v3  ;;  %v12443_v3 = vld [vmem:[%s18765_s7 + $0xc8] sm:$0xff] }
 0x219   : > { %v13312_v43 = vpop.f32.mrf.mxu2 }
 0x21a   : > { %v1885_v33 = vrot.slane %v1883_v11, 1 }
 0x21b   : > { %11243 = vmatmul.msk.bf16.gmra.mxu3 %vm761_vm9, %v1609_v16  ;;  %11291 = vmatmul.msk.bf16.gmra.mxu1 %vm761_vm9, %v1881_v20 }
 0x21d   : > { %v1143_v60 = vpop.f32.mrf.mxu0 }
 0x21e   : > { %v13319_v12 = vadd.f32 %v1143_v60, %v1035_v18  ;;  %v1039_v8 = vpop.f32.mrf.mxu3  ;;  %11351 = vmatmul.msk.bf16.vlgmr.msra.gmra.mxu2 %vm645_vm0, %v12899_v14 }
 0x21f   : > { %v1040_v18 = vadd.f32 %v1039_v8, %v13166_v29  ;;  %v13347_v60 = vpop.f32.mrf.mxu1  ;;  %v12438_v29 = vld [vmem:[%s18765_s7 + $0xb0] sm:$0xff] }
 0x220   : > { %11305 = vmatmul.msk.bf16.vlgmr.msrb.gmra.mxu0 %vm645_vm0, %v12873_v54  ;;  %v1886_v54 = vshll.u32 %v13333_v51, 16  ;;  %2126 = vmatpush.bf16.msrb.mxu3 %v12438_v29  ;;  %v12444_v8 = vld [vmem:[%s18765_s7 + $0xd0] sm:$0xff] }
 0x221   : > { %v13326_v40 = vpop.f32.mrf.mxu2  ;;  %2324 = vmatpush.bf16.msrb.mxu1 %v12444_v8 }
 0x222   : > { %v1888_v24 = vrot.slane %v1886_v54, 2  ;;  %v1612_v54 = vrot.slane %v13303_v61, 1 }
 0x224   : > { %v1889_v4 = vor.u32 %v1888_v24, %v1885_v33 }
 0x225   : > { %v1145_v47 = vpop.f32.mrf.mxu0  ;;  %2325 = vmatpush.bf16.msrb.mxu1 %v12443_v3 }
 0x226   : > { %v13335_v50 = vadd.f32 %v1145_v47, %v1037_v21  ;;  %v1041_v14 = vpop.f32.mrf.mxu3  ;;  %v1890_v57 = vsel %vm1704_vm13, %v1880_v28, %v1889_v4 }
 0x227   : > { %v1042_v11 = vadd.f32 %v1041_v14, %v13197_v41  ;;  %v12436_v41 = vld [vmem:[%s18765_s7 + $0xa0] sm:$0xff]  ;;  %v1613_v14 = vsel %vm1307_vm10, %v1610_v23, %v1612_v54 }
 0x229   : > { %v13340_v16 = vpop.f32.mrf.mxu2 }
 0x22b   : > { %11244 = vmatmul.msk.bf16.gmra.mxu3 %vm761_vm9, %v1611_v46  ;;  %11292 = vmatmul.msk.bf16.gmra.mxu1 %vm761_vm9, %v1890_v57  ;;  %v13373_v46 = vpop.f32.mrf.mxu1  ;;  %v2269_v57 = vrot.slane %v12799_v53, 2 }
 0x22d   : > { %v1148_v20 = vpop.f32.mrf.mxu0 }
 0x22e   : > { %v13353_v21 = vadd.f32 %v1148_v20, %v1040_v18  ;;  %v1044_v47 = vpop.f32.mrf.mxu3  ;;  %11352 = vmatmul.msk.bf16.gmra.mxu2 %vm645_vm0, %v12969_v2  ;;  %v12437_v2 = vld [vmem:[%s18765_s7 + $0xa8] sm:$0xff]  ;;  %v12442_v20 = vld [vmem:[%s18765_s7 + $0xc0] sm:$0xff] }
 0x22f   : > { %2127 = vmatpush.bf16.msrb.mxu3 %v12437_v2  ;;  %v1045_v36 = vadd.f32 %v1044_v47, %v13227_v35  ;;  %2326 = vmatpush.bf16.msrb.mxu1 %v12442_v20  ;;  %v1614_v47 = vrot.slane %v13333_v51, 1 }
 0x230   : > { %11306 = vmatmul.msk.bf16.gmra.mxu0 %vm645_vm0, %v12931_v34 }
 0x231   : > { %v13363_v28 = vpop.f32.mrf.mxu2 }
 0x233   : > { %2128 = vmatpush.bf16.msrb.mxu3 %v12436_v41  ;;  %v12453_v41 = vld [vmem:[%s18764_s6 + $0x88] sm:$0xff] }
 0x234   : > { %2648 = vmatpush.bf16.msrb.mxu2 %v12453_v41 }
 0x235   : > { %v1150_v34 = vpop.f32.mrf.mxu0 }
 0x236   : > { %v13378_v33 = vadd.f32 %v1150_v34, %v1042_v11  ;;  %v1046_v24 = vpop.f32.mrf.mxu3 }
 0x237   : > { %v1047_v4 = vadd.f32 %v1046_v24, %v13244_v31  ;;  %v2270_v31 = vrot.slane %v12808_v55, 2 }
 0x238   : > { %v13394_v29 = vpop.f32.mrf.mxu1 }
 0x239   : > { %v13385_v18 = vpop.f32.mrf.mxu2  ;;  %v2271_v8 = vsel %vm1979_vm12, %v2269_v57, %v2270_v31  ;;  %v13429_v57 = vld [vmem:[%s12784_s20 + $0x18] sm:$0xff]  }
 0x23b   : > { %11245 = vmatmul.msk.bf16.gmra.mxu3 %vm761_vm9, %v1613_v14  ;;  %11380 = vmatmul.msk.bf16.vlgmr.msrb.gmra.mxu1 %vm761_vm9, %v2271_v8 }
 0x23d   : > { %v1153_v23 = vpop.f32.mrf.mxu0 }
 0x23e   : > { %v13397_v2 = vadd.f32 %v1153_v23, %v1045_v36  ;;  %v1267_v11 = vpop.f32.mrf.mxu3  ;;  %11353 = vmatmul.msk.bf16.gmra.mxu2 %vm645_vm0, %v13055_v58 }
 0x23f   : > { %v1292_v34 = vadd.f32 %v1267_v11, %v13261_v17 }
 0x240   : > { %11307 = vmatmul.msk.bf16.gmra.mxu0 %vm645_vm0, %v13005_v19  ;;  %v13410_v3 = vpop.f32.mrf.mxu1 }
 0x241   : > { %v1380_v53 = vadd.f32 %v13268_v56, %v1292_v34  ;;  %v13406_v55 = vpop.f32.mrf.mxu2  ;;  %v1615_v56 = vsel %vm1307_vm10, %v1612_v54, %v1614_v47 }
 0x243   : > { %v1483_v35 = vadd.f32 %v13316_v27, %v1380_v53  ;;  %v12447_v27 = vld [vmem:[%s18764_s6 + $0x78] sm:$0xff] }
 0x244   : > { %2435 = vmatpush.bf16.msra.mxu0 %v12447_v27 }
 0x245   : > { %v1155_v24 = vpop.f32.mrf.mxu0 }
 0x246   : > { %v13412_v58 = vadd.f32 %v1155_v24, %v1047_v4  ;;  %v1269_v17 = vpop.f32.mrf.mxu3  ;;  %v12452_v4 = vld [vmem:[%s18764_s6 + $0x80] sm:$0xff] }
 0x247   : > { %v1293_v19 = vadd.f32 %v1269_v17, %v13278_v52  ;;  %v2272_v52 = vrot.slane %v13429_v57, 2  ;;  %2649 = vmatpush.bf16.msrb.mxu2 %v12452_v4 }
 0x248   : > { %v1473_v36 = vpop.f32.mrf.mxu1 }
 0x249   : > { %v1381_v14 = vadd.f32 %v13283_v49, %v1293_v19  ;;  %v13432_v54 = vpop.f32.mrf.mxu2  ;;  %v12446_v49 = vld [vmem:[%s18764_s6 + $0x70] sm:$0xff]  ;;  %v2273_v8 = vsel %vm1979_vm12, %v2270_v31, %v2272_v52  ;;  %v2071_v31 = vrot.slane %v13210_v6, 2  ;;  %v13460_v6 = vld [vmem:[%s12784_s20 + $0x20] sm:$0xff]  }
 0x24a   : > { %2436 = vmatpush.bf16.msra.mxu0 %v12446_v49 }
 0x24b   : > { %11246 = vmatmul.msk.bf16.gmra.mxu3 %vm761_vm9, %v1615_v56  ;;  %v1484_v20 = vadd.f32 %v13331_v63, %v1381_v14  ;;  %11381 = vmatmul.msk.bf16.gmra.mxu1 %vm761_vm9, %v2273_v8 }
 0x24d   : > { %v1553_v23 = vpop.f32.mrf.mxu0 }
 0x24e   : > { %v13438_v11 = vadd.f32 %v1553_v23, %v1483_v35  ;;  %v1272_v34 = vpop.f32.mrf.mxu3  ;;  %11354 = vmatmul.msk.bf16.gmra.mxu2 %vm645_vm0, %v13122_v7  ;;  %v2072_v35 = vrot.slane %v13213_v13, 2  ;;  %v2274_v13 = vrot.slane %v13460_v6, 2 }
 0x24f   : > { %v1294_v63 = vadd.f32 %v1272_v34, %v13291_v10 }
 0x250   : > { %11308 = vmatmul.msk.bf16.gmra.mxu0 %vm645_vm0, %v13090_v25  ;;  %v1475_v24 = vpop.f32.mrf.mxu1  ;;  %v2073_v56 = vsel %vm1979_vm12, %v2071_v31, %v2072_v35  ;;  %v2275_v14 = vsel %vm1979_vm12, %v2272_v52, %v2274_v13  ;;  %v2074_v52 = vrot.slane %v13239_v45, 2  ;;  %v2276_v45 = vrot.slane %v13155_v38, 2 }
 0x251   : > { %v1382_v53 = vadd.f32 %v13300_v48, %v1294_v63  ;;  %v13450_v7 = vpop.f32.mrf.mxu2 }
 0x252   : > { %v2075_v63 = vsel %vm1979_vm12, %v2072_v35, %v2074_v52  ;;  %v2277_v31 = vsel %vm1979_vm12, %v2274_v13, %v2276_v45 }
 0x253   : > { %v1485_v47 = vadd.f32 %v13347_v60, %v1382_v53 }
 0x255   : > { %v1555_v17 = vpop.f32.mrf.mxu0 }
 0x256   : > { %v13452_v41 = vadd.f32 %v1555_v17, %v1484_v20  ;;  %v1274_v10 = vpop.f32.mrf.mxu3 }
 0x257   : > { %v1295_v19 = vadd.f32 %v1274_v10, %v13307_v26 }
 0x258   : > { %v13463_v60 = vpop.f32.mrf.mxu1 }
 0x259   : > { %v1383_v25 = vadd.f32 %v13312_v43, %v1295_v19  ;;  %v2076_v19 = vrot.slane %v13276_v1, 2 }
 0x25b   : > { %11334 = vmatmul.msk.bf16.vlgmr.msrb.gmra.mxu3 %vm761_vm9, %v2073_v56  ;;  %v1486_v48 = vadd.f32 %v13373_v46, %v1383_v25  ;;  %11382 = vmatmul.msk.bf16.gmra.mxu1 %vm761_vm9, %v2275_v14  ;;  %v13472_v46 = vpop.f32.mrf.mxu2  ;;  %v2077_v13 = vsel %vm1979_vm12, %v2074_v52, %v2076_v19 }
 0x25d   : > { %v1558_v27 = vpop.f32.mrf.mxu0 }
 0x25e   : > { %v13466_v4 = vadd.f32 %v1558_v27, %v1485_v47  ;;  %v1277_v26 = vpop.f32.mrf.mxu3  ;;  %11355 = vmatmul.msk.bf16.gmra.mxu2 %vm645_vm0, %v13176_v32  ;;  %v851_v27 = vld [vmem:[%s12784_s20 + $0x30] sm:$0x7] }
 0x25f   : > { %v1296_v43 = vadd.f32 %v1277_v26, %v13319_v12 }
 0x260   : > { %11309 = vmatmul.msk.bf16.gmra.mxu0 %vm645_vm0, %v13125_v44  ;;  %v13479_v23 = vpop.f32.mrf.mxu1 }
 0x261   : > { %v1384_v20 = vadd.f32 %v13326_v40, %v1296_v43 }
 0x263   : > { %v1487_v49 = vadd.f32 %v13394_v29, %v1384_v20  ;;  %v13486_v47 = vpop.f32.mrf.mxu2 }
 0x265   : > { %v1560_v8 = vpop.f32.mrf.mxu0 }
 0x266   : > { %v13481_v34 = vadd.f32 %v1560_v8, %v1486_v48  ;;  %v1279_v32 = vpop.f32.mrf.mxu3  ;;  %v12457_v8 = vld [vmem:[%s18765_s7 + $0x118] sm:$0xff] }
 0x267   : > { %v1297_v12 = vadd.f32 %v1279_v32, %v13335_v50  ;;  %2749 = vmatpush.bf16.msra.mxu1 %v12457_v8 }
 0x268   : > { %v13491_v40 = vpop.f32.mrf.mxu1 }
 0x269   : > { %v1385_v53 = vadd.f32 %v13340_v16, %v1297_v12 }
 0x26b   : > { %11335 = vmatmul.msk.bf16.gmra.mxu3 %vm761_vm9, %v2075_v63  ;;  %v1488_v44 = vadd.f32 %v13410_v3, %v1385_v53  ;;  %11383 = vmatmul.msk.bf16.gmra.mxu1 %vm761_vm9, %v2277_v31  ;;  %v13503_v10 = vpop.f32.mrf.mxu2  ;;  %v2078_v63 = vrot.slane %v13303_v61, 2  ;;  %v12455_v31 = vld [vmem:[%s18765_s7 + $0x108] sm:$0xff] }
 0x26d   : > { %v1563_v29 = vpop.f32.mrf.mxu0 }
 0x26e   : > { %v13494_v17 = vadd.f32 %v1563_v29, %v1487_v49  ;;  %v1282_v50 = vpop.f32.mrf.mxu3  ;;  %11443 = vmatmul.msk.bf16.vlgmr.msrb.gmra.mxu2 %vm645_vm0, %v12902_v15 }
 0x26f   : > { %v1298_v16 = vadd.f32 %v1282_v50, %v13353_v21  ;;  %v12448_v50 = vld [vmem:[%s18765_s7 + $0xe0] sm:$0xff] }
 0x270   : > { %11397 = vmatmul.msk.bf16.vlgmr.msra.gmra.mxu0 %vm645_vm0, %v12915_v22  ;;  %v13506_v56 = vpop.f32.mrf.mxu1 }
 0x271   : > { %v1386_v3 = vadd.f32 %v13363_v28, %v1298_v16  ;;  %v12451_v28 = vld [vmem:[%s18765_s7 + $0xf8] sm:$0xff] }
 0x272   : > { %2558 = vmatpush.bf16.msra.mxu3 %v12451_v28 }
 0x273   : > { %v1489_v35 = vadd.f32 %v1473_v36, %v1386_v3  ;;  %v2266_v36 = vunpack.c.l.b16 %v851_v27  ;;  %v13525_v20 = vpop.f32.mrf.mxu2  ;;  %v12454_v3 = vld [vmem:[%s18765_s7 + $0x100] sm:$0xff] }
 0x275   : > { %v1565_v25 = vpop.f32.mrf.mxu0  ;;  %v13520_v14 = vpack.c.b16 %v2266_v36, %v2266_v36  ;;  %v2080_v36 = vrot.slane %v13333_v51, 2 }
 0x276   : > { %v13508_v48 = vadd.f32 %v1565_v25, %v1488_v44  ;;  %v1284_v15 = vpop.f32.mrf.mxu3 }
 0x277   : > { %v1299_v21 = vadd.f32 %v1284_v15, %v13378_v33  ;;  %v2278_v43 = vrot.slane %v13520_v14, 2 }
 0x278   : > { %v13522_v26 = vpop.f32.mrf.mxu1 }
 0x279   : > { %v1387_v22 = vadd.f32 %v13385_v18, %v1299_v21  ;;  %v12619_v21 = vld [vmem:[%s12784_s20 + $0x10] sm:$0xff]  }
 0x27b   : > { %11336 = vmatmul.msk.bf16.gmra.mxu3 %vm761_vm9, %v2077_v13  ;;  %v13518_v1 = vadd.f32 %v1475_v24, %v1387_v22  ;;  %v2279_v24 = vsel %vm1979_vm12, %v2276_v45, %v2278_v43  ;;  %v13556_v29 = vpop.f32.mrf.mxu2  ;;  %v2696_v13 = vrot.slane %v12619_v21, 3 }
 0x27c   : > { %11384 = vmatmul.msk.bf16.gmra.mxu1 %vm761_vm9, %v2279_v24 }
 0x27d   : > { %v1568_v33 = vpop.f32.mrf.mxu0 }
 0x27e   : > { %v13527_v18 = vadd.f32 %v1568_v33, %v1489_v35  ;;  %v1287_v49 = vpop.f32.mrf.mxu3  ;;  %11444 = vmatmul.msk.bf16.gmra.mxu2 %vm645_vm0, %v12974_v0  ;;  %v12450_v0 = vld [vmem:[%s18765_s7 + $0xf0] sm:$0xff] }
 0x27f   : > { %v1300_v52 = vadd.f32 %v1287_v49, %v13397_v2  ;;  %v12456_v2 = vld [vmem:[%s18765_s7 + $0x110] sm:$0xff]  ;;  %2559 = vmatpush.bf16.msra.mxu3 %v12450_v0 }
 0x280   : > { %11398 = vmatmul.msk.bf16.gmra.mxu0 %vm645_vm0, %v12991_v9  ;;  %v12449_v9 = vld [vmem:[%s18765_s7 + $0xe8] sm:$0xff]  ;;  %v13551_v53 = vpop.f32.mrf.mxu1  ;;  %2750 = vmatpush.bf16.msra.mxu1 %v12456_v2 }
 0x281   : > { %v1388_v32 = vadd.f32 %v13406_v55, %v1300_v52 }
 0x283   : > { %v1491_v12 = vadd.f32 %v13463_v60, %v1388_v32  ;;  %2560 = vmatpush.bf16.msra.mxu3 %v12449_v9  ;;  %v2079_v60 = vsel %vm1979_vm12, %v2076_v19, %v2078_v63  ;;  %v13590_v28 = vpop.f32.mrf.mxu2 }
 0x284   : > { %2751 = vmatpush.bf16.msra.mxu1 %v12455_v31 }
 0x285   : > { %v13553_v55 = vpop.f32.mrf.mxu0 }
 0x286   : > { %v1289_v44 = vpop.f32.mrf.mxu3 }
 0x287   : > { %v1301_v45 = vadd.f32 %v1289_v44, %v13412_v58  ;;  %v18931_v58 = vor.u32 %v13014_v30, %v13033_v37  ;;  %2561 = vmatpush.bf16.msra.mxu3 %v12448_v50  ;;  %v12618_v30 = vld [vmem:[%s12784_s20 + $0x8] sm:$0xff]   ;;  %v2700_v50 = vrot.slane %v13460_v6, 3 }
 0x288   : > { %v1949_v35 = vpop.f32.mrf.mxu1  ;;  %2752 = vmatpush.bf16.msra.mxu1 %v12454_v3  ;;  %v2695_v37 = vrot.slane %v12618_v30, 3 }
 0x289   : > { %v1389_v61 = vadd.f32 %v13432_v54, %v1301_v45  ;;  %v2488_v16 = vsel %vm2368_vm15, %v18931_v58, %v13117_v62 }
 0x28b   : > { %11337 = vmatmul.msk.bf16.gmra.mxu3 %vm761_vm9, %v2079_v60  ;;  %v13576_v54 = vadd.f32 %v13479_v23, %v1389_v61  ;;  %v2697_v23 = vsel %vm2603_vm14, %v2695_v37, %v2696_v13  ;;  %v13603_v24 = vpop.f32.mrf.mxu2  ;;  %v18933_v61 = vld [vmem:[#allocation4_spill] sm:$0xff] }
 0x28c   : > { %11472 = vmatmul.msk.bf16.vlgmr.msra.gmra.mxu1 %vm761_vm9, %v2697_v23 }
 0x28d   : > { %v1573_v19 = vpop.f32.mrf.mxu0 }
 0x28e   : > { %v13578_v25 = vadd.f32 %v1573_v19, %v1491_v12  ;;  %v1664_v15 = vpop.f32.mrf.mxu3  ;;  %11445 = vmatmul.msk.bf16.gmra.mxu2 %vm645_vm0, %v13060_v42 }
 0x28f   : > { %v1689_v27 = vadd.f32 %v1664_v15, %v13438_v11 }
 0x290   : > { %11399 = vmatmul.msk.bf16.gmra.mxu0 %vm645_vm0, %v13077_v39  ;;  %v1951_v33 = vpop.f32.mrf.mxu1  ;;  %v2081_v39 = vsel %vm1979_vm12, %v2078_v63, %v2080_v36 }
 0x291   : > { %v1819_v22 = vadd.f32 %v13450_v7, %v1689_v27 }
 0x293   : > { %v1964_v42 = vadd.f32 %v13491_v40, %v1819_v22 }
 0x295   : > { %v13594_v43 = vpop.f32.mrf.mxu0 }
 0x296   : > { %v1666_v49 = vpop.f32.mrf.mxu3 }
 0x297   : > { %v1690_v11 = vadd.f32 %v1666_v49, %v13452_v41  ;;  %v2698_v41 = vrot.slane %v13429_v57, 3 }
 0x298   : > { %v1954_v40 = vpop.f32.mrf.mxu1 }
 0x299   : > { %v1820_v52 = vadd.f32 %v13472_v46, %v1690_v11  ;;  %v18932_v46 = vld [vmem:[#allocation3_spill] sm:$0xff]  ;;  %v2701_v30 = vsel %vm2603_vm14, %v2698_v41, %v2700_v50 }
 0x29b   : > { %11338 = vmatmul.msk.bf16.gmra.mxu3 %vm761_vm9, %v2081_v39  ;;  %v13601_v7 = vadd.f32 %v13506_v56, %v1820_v52  ;;  %v2699_v56 = vsel %vm2603_vm14, %v2696_v13, %v2698_v41  ;;  %v2702_v52 = vrot.slane %v13155_v38, 3 }
 0x29c   : > { %11473 = vmatmul.msk.bf16.gmra.mxu1 %vm761_vm9, %v2699_v56 }
 0x29d   : > { %v2027_v8 = vpop.f32.mrf.mxu0  ;;  %v2703_v41 = vsel %vm2603_vm14, %v2700_v50, %v2702_v52 }
 0x29e   : > { %v13605_v51 = vadd.f32 %v2027_v8, %v1964_v42  ;;  %v1669_v32 = vpop.f32.mrf.mxu3  ;;  %11446 = vmatmul.msk.bf16.gmra.mxu2 %vm645_vm0, %v13128_v5  ;;  %v13621_v5 = vpop.f32.mrf.mxu2 }
 0x29f   : > { %v1691_v0 = vadd.f32 %v1669_v32, %v13466_v4 }
 0x2a0   : > { %11400 = vmatmul.msk.bf16.gmra.mxu0 %vm645_vm0, %v18932_v46  ;;  %v13617_v9 = vpop.f32.mrf.mxu1 }
 0x2a1   : > { %v1821_v2 = vadd.f32 %v13486_v47, %v1691_v0 }
 0x2a3   : > { %v1966_v12 = vadd.f32 %v13522_v26, %v1821_v2 }
 0x2a5   : > { %v13619_v63 = vpop.f32.mrf.mxu0 }
 0x2a6   : > { %v1671_v57 = vpop.f32.mrf.mxu3 }
 0x2a7   : > { %v1692_v4 = vadd.f32 %v1671_v57, %v13481_v34  ;;  %v13635_v34 = vpop.f32.mrf.mxu2 }
 0x2a8   : > { %v1959_v47 = vpop.f32.mrf.mxu1 }
 0x2a9   : > { %v1822_v44 = vadd.f32 %v13503_v10, %v1692_v4  ;;  %v18934_v10 = vld [vmem:[#allocation5_spill] sm:$0xff] }
 0x2ab   : > { %11426 = vmatmul.msk.bf16.vlgmr.msra.gmra.mxu3 %vm761_vm9, %v2488_v16  ;;  %v13627_v45 = vadd.f32 %v13551_v53, %v1822_v44  ;;  %v18935_v16 = vld [vmem:[#allocation2_spill] sm:$0xff] }
 0x2ac   : > { %v18936_v53 = vshrl.u32 %v18935_v16, 16  ;;  %v18937_v19 = vshll.u32 %v18935_v16, 16  ;;  %11474 = vmatmul.msk.bf16.gmra.mxu1 %vm761_vm9, %v2701_v30 }
 0x2ad   : > { %v2032_v60 = vpop.f32.mrf.mxu0 }
 0x2ae   : > { %v13629_v31 = vadd.f32 %v2032_v60, %v1966_v12  ;;  %v1674_v26 = vpop.f32.mrf.mxu3  ;;  %11447 = vmatmul.msk.bf16.gmra.mxu2 %vm645_vm0, %v18933_v61  ;;  %v2489_v3 = vrot.slane %v18936_v53, 2  ;;  %v2490_v15 = vrot.slane %v18937_v19, 3 }
 0x2af   : > { %v1693_v58 = vadd.f32 %v1674_v26, %v13494_v17  ;;  %v2221_v36 = vpop.f32.mrf.mxu2  ;;  %v2704_v26 = vrot.slane %v13520_v14, 3 }
 0x2b0   : > { %11401 = vmatmul.msk.bf16.gmra.mxu0 %vm645_vm0, %v18934_v10  ;;  %v2491_v21 = vor.u32 %v2490_v15, %v2489_v3  ;;  %v13646_v17 = vpop.f32.mrf.mxu1 }
 0x2b1   : > { %v1823_v37 = vadd.f32 %v13525_v20, %v1693_v58  ;;  %v2705_v16 = vsel %vm2603_vm14, %v2702_v52, %v2704_v26 }
 0x2b2   : > { %v2492_v22 = vsel %vm2368_vm15, %v13117_v62, %v2491_v21  ;;  %v18939_v62 = vshll.u32 %v12825_v59, 16 }
 0x2b3   : > { %v1968_v6 = vadd.f32 %v1949_v35, %v1823_v37 }
 0x2b5   : > { %v13648_v13 = vpop.f32.mrf.mxu0 }
 0x2b6   : > { %v1676_v27 = vpop.f32.mrf.mxu3 }
 0x2b7   : > { %v1694_v23 = vadd.f32 %v1676_v27, %v13508_v48  ;;  %v18938_v48 = vshrl.u32 %v12825_v59, 16  ;;  %v13668_v46 = vpop.f32.mrf.mxu2  ;;  %v2498_v59 = vshrl.u32 %v13155_v38, 16 }
 0x2b8   : > { %v2328_v49 = vpop.f32.mrf.mxu1 }
 0x2b9   : > { %v1824_v42 = vadd.f32 %v13556_v29, %v1694_v23  ;;  %v2493_v32 = vrot.slane %v18938_v48, 2  ;;  %v2494_v29 = vrot.slane %v18939_v62, 3  ;;  %v2500_v50 = vrot.slane %v2498_v59, 2 }
 0x2bb   : > { %11427 = vmatmul.msk.bf16.gmra.mxu3 %vm761_vm9, %v2492_v22  ;;  %v13655_v20 = vadd.f32 %v1951_v33, %v1824_v42  ;;  %v2495_v56 = vor.u32 %v2494_v29, %v2493_v32 }
 0x2bc   : > { %11475 = vmatmul.msk.bf16.gmra.mxu1 %vm761_vm9, %v2703_v41 }
 0x2bd   : > { %v2037_v35 = vpop.f32.mrf.mxu0  ;;  %v2496_v57 = vsel %vm2368_vm15, %v2491_v21, %v2495_v56 }
 0x2be   : > { %v13657_v11 = vadd.f32 %v2037_v35, %v1968_v6  ;;  %v1679_v39 = vpop.f32.mrf.mxu3  ;;  %v2507_v6 = vshrl.u32 %v13520_v14, 16 }
 0x2bf   : > { %v1695_v8 = vadd.f32 %v1679_v39, %v13527_v18  ;;  %v2226_v44 = vpop.f32.mrf.mxu2 }
 0x2c0   : > { %v13674_v18 = vpop.f32.mrf.mxu1  ;;  %v2509_v22 = vrot.slane %v2507_v6, 2  ;;  %v12459_v6 = vld [vmem:[%s18767_s9 + $0x8] sm:$0xff] }
 0x2c1   : > { %v1825_v33 = vadd.f32 %v13590_v28, %v1695_v8  ;;  %v2501_v28 = vshll.u32 %v13155_v38, 16  ;;  %2878 = vmatpush.bf16.msrb.mxu0 %v12459_v6 }
 0x2c3   : > { %v1970_v0 = vadd.f32 %v1954_v40, %v1825_v33  ;;  %v2503_v58 = vrot.slane %v2501_v28, 3 }
 0x2c5   : > { %v13670_v2 = vpop.f32.mrf.mxu0  ;;  %v2504_v19 = vor.u32 %v2503_v58, %v2500_v50 }
 0x2c6   : > { %v13672_v12 = vpop.f32.mrf.mxu3 }
 0x2c7   : > { %v13689_v30 = vpop.f32.mrf.mxu2  ;;  %v2505_v37 = vsel %vm2368_vm15, %v2495_v56, %v2504_v19 }
 0x2c8   : > { %v2333_v10 = vpop.f32.mrf.mxu1 }
 0x2cb   : > { %11428 = vmatmul.msk.bf16.gmra.mxu3 %vm761_vm9, %v2496_v57 }
 0x2cc   : > { %11476 = vmatmul.msk.bf16.gmra.mxu1 %vm761_vm9, %v2705_v16 }
 0x2cd   : > { %v2042_v4 = vpop.f32.mrf.mxu0 }
 0x2ce   : > { %v2058_v40 = vadd.f32 %v2042_v4, %v1970_v0  ;;  %v1684_v60 = vpop.f32.mrf.mxu3 }
 0x2cf   : > { %v1697_v61 = vadd.f32 %v1684_v60, %v13578_v25  ;;  %v2231_v39 = vpop.f32.mrf.mxu2 }
 0x2d0   : > { %v13692_v25 = vpop.f32.mrf.mxu1 }
 0x2d1   : > { %v1827_v53 = vadd.f32 %v13621_v5, %v1697_v61  ;;  %v2510_v5 = vshll.u32 %v13520_v14, 16 }
 0x2d3   : > { %v1972_v3 = vadd.f32 %v1959_v47, %v1827_v53  ;;  %v2512_v42 = vrot.slane %v2510_v5, 3 }
 0x2d5   : > { %v13685_v38 = vpop.f32.mrf.mxu0  ;;  %v2513_v8 = vor.u32 %v2512_v42, %v2509_v22 }
 0x2d6   : > { %v13687_v15 = vpop.f32.mrf.mxu3 }
 0x2d7   : > { %v2514_v62 = vsel %vm2368_vm15, %v2504_v19, %v2513_v8  ;;  %v13700_v29 = vpop.f32.mrf.mxu2 }
 0x2d8   : > { %v2338_v48 = vpop.f32.mrf.mxu1 }
 0x2db   : > { %11429 = vmatmul.msk.bf16.gmra.mxu3 %vm761_vm9, %v2505_v37 }
 0x2dd   : > { %v2047_v21 = vpop.f32.mrf.mxu0 }
 0x2de   : > { %v2060_v27 = vadd.f32 %v2047_v21, %v1972_v3  ;;  %v2130_v47 = vpop.f32.mrf.mxu3 }
 0x2df   : > { %v2155_v23 = vadd.f32 %v2130_v47, %v13605_v51  ;;  %v2236_v56 = vpop.f32.mrf.mxu2 }
 0x2e0   : > { %v13702_v41 = vpop.f32.mrf.mxu1 }
 0x2e1   : > { %v2246_v35 = vadd.f32 %v2221_v36, %v2155_v23 }
 0x2e3   : > { %v2353_v52 = vadd.f32 %v2328_v49, %v2246_v35  ;;  %v12458_v35 = vld [vmem:[%s18767_s9] sm:$0xff] }
 0x2e4   : > { %2879 = vmatpush.bf16.msrb.mxu0 %v12458_v35 }
 0x2e6   : > { %v2132_v32 = vpop.f32.mrf.mxu3 }
 0x2e7   : > { %v13706_v28 = vpop.f32.mrf.mxu2 }
 0x2e8   : > { %v2343_v57 = vpop.f32.mrf.mxu1 }
 0x2eb   : > { %11430 = vmatmul.msk.bf16.gmra.mxu3 %vm761_vm9, %v2514_v62 }
 0x2ee   : > { %v2135_v14 = vpop.f32.mrf.mxu3 }
 0x2ef   : > { %v2157_v33 = vadd.f32 %v2135_v14, %v13629_v31  ;;  %v2241_v50 = vpop.f32.mrf.mxu2  ;;  %v13714_v31 = vpop.f32.mrf.mxu0 }
 0x2f0   : > { %v13708_v60 = vpop.f32.mrf.mxu1 }
 0x2f1   : > { %v2248_v51 = vadd.f32 %v2226_v44, %v2157_v33 }
 0x2f3   : > { %v2355_v0 = vadd.f32 %v2333_v10, %v2248_v51 }
 0x2f6   : > { %v2137_v36 = vpop.f32.mrf.mxu3 }
 0x2f7   : > { %v13718_v3 = vpop.f32.mrf.mxu2  ;;  %v2438_v37 = vpop.f32.mrf.mxu0 }
 0x2f9   : > { %v2348_v58 = vpop.f32.mrf.mxu1 }
 0x2fe   : > { %v2140_v49 = vpop.f32.mrf.mxu3 }
 0x2ff   : > { %v2159_v59 = vadd.f32 %v2140_v49, %v13657_v11  ;;  %v2651_v5 = vpop.f32.mrf.mxu2  ;;  %v2440_v22 = vpop.f32.mrf.mxu0 }
 0x301   : > { %v2250_v4 = vadd.f32 %v2231_v39, %v2159_v59  ;;  %v13722_v19 = vpop.f32.mrf.mxu1 }
 0x303   : > { %v13710_v26 = vadd.f32 %v2338_v48, %v2250_v4  ;;  %v2053_v48 = vadd.f32 %v13619_v63, %v13601_v7 }
 0x305   : > { %v2156_v14 = vadd.f32 %v2132_v32, %v2053_v48 }
 0x306   : > { %v13712_v61 = vpop.f32.mrf.mxu3 }
 0x307   : > { %v2653_v8 = vpop.f32.mrf.mxu2  ;;  %v2443_v33 = vpop.f32.mrf.mxu0 }
 0x309   : > { %v2754_v23 = vpop.f32.mrf.mxu1 }
 0x30e   : > { %v2145_v44 = vpop.f32.mrf.mxu3 }
 0x30f   : > { %v2161_v10 = vadd.f32 %v2145_v44, %v2058_v40  ;;  %v2656_v59 = vpop.f32.mrf.mxu2  ;;  %v2445_v7 = vpop.f32.mrf.mxu0 }
 0x311   : > { %v2252_v16 = vadd.f32 %v2236_v56, %v2161_v10  ;;  %v2756_v62 = vpop.f32.mrf.mxu1  ;;  %v2247_v56 = vadd.f32 %v13668_v46, %v2156_v14  ;;  %v13741_v10 = vld [vmem:[%s18766_s8] ss:$0 sm:$0xff] }
 0x313   : > { %v13716_v53 = vadd.f32 %v2343_v57, %v2252_v16  ;;  %v2354_v4 = vadd.f32 %v13674_v18, %v2247_v56 }
 0x316   : > { %v13720_v11 = vpop.f32.mrf.mxu3 }
 0x317   : > { %v2658_v18 = vpop.f32.mrf.mxu2  ;;  %v2448_v14 = vpop.f32.mrf.mxu0 }
 0x31e   : > { %v2150_v21 = vpop.f32.mrf.mxu3 }
 0x31f   : > { %v2163_v47 = vadd.f32 %v2150_v21, %v2060_v27  ;;  %v2463_v27 = vadd.f32 %v2438_v37, %v2353_v52  ;;  %v2055_v52 = vadd.f32 %v13648_v13, %v13627_v45 }
 0x321   : > { %v2254_v40 = vadd.f32 %v2241_v50, %v2163_v47  ;;  %v2759_v50 = vpop.f32.mrf.mxu1  ;;  %v2158_v37 = vadd.f32 %v2137_v36, %v2055_v52 }
 0x323   : > { %v13727_v42 = vadd.f32 %v2348_v58, %v2254_v40  ;;  %v2464_v58 = vadd.f32 %v2440_v22, %v2354_v4  ;;  %v2249_v22 = vadd.f32 %v13689_v30, %v2158_v37  ;;  %v2057_v30 = vadd.f32 %v13670_v2, %v13655_v20 }
 0x325   : > { %v2356_v36 = vadd.f32 %v13692_v25, %v2249_v22  ;;  %v1585_v25 = vadd.f32 %v13553_v55, %v13518_v1 }
 0x326   : > { %v13732_v39 = vpop.f32.mrf.mxu3 }
 0x329   : > { %v2761_v40 = vpop.f32.mrf.mxu1 }
 0x32e   : > { %v2563_v51 = vpop.f32.mrf.mxu3 }
 0x32f   : > { %v2588_v57 = vadd.f32 %v2563_v51, %v2463_v27 }
 0x331   : > { %v2676_v49 = vadd.f32 %v2651_v5, %v2588_v57  ;;  %v2465_v5 = vadd.f32 %v2443_v33, %v2355_v0  ;;  %v2466_v0 = vadd.f32 %v2445_v7, %v2356_v36  ;;  %v2661_v33 = vpop.f32.mrf.mxu2  ;;  %v2764_v57 = vpop.f32.mrf.mxu1  ;;  %v2467_v7 = vadd.f32 %v2448_v14, %v13710_v26 }
 0x333   : > { %v2779_v44 = vadd.f32 %v2754_v23, %v2676_v49 }
 0x335   : > { %v2792_v46 = vadd.f32 %v13741_v10, %v2779_v44 }
 0x336   : > { %v2565_v63 = vpop.f32.mrf.mxu3 }
 0x337   : > { %v2589_v32 = vadd.f32 %v2565_v63, %v2464_v58  ;;  %v2812_v21 = vmul.f32 0.1, %v2792_v46  ;;  %vm2802_vm1 = vcmp.ge.f32.partialorder %v2792_v46, 0.0  ;;  %v2450_v58 = vpop.f32.mrf.mxu0 }
 0x339   : > { %v2677_v16 = vadd.f32 %v2653_v8, %v2589_v32  ;;  %v2822_v45 = vsel %vm2802_vm1, %v2792_v46, %v2812_v21  ;;  %v1696_v32 = vadd.f32 %v13672_v12, %v1585_v25 }
 0x33b   : > { %v2780_v6 = vadd.f32 %v2756_v62, %v2677_v16  ;;  %v2663_v16 = vpop.f32.mrf.mxu2  ;;  %v1826_v55 = vadd.f32 %v13603_v24, %v1696_v32 }
 0x33d   : > { %v2793_v47 = vadd.f32 %v13741_v10, %v2780_v6 }
 0x33e   : > { %v2568_v23 = vpop.f32.mrf.mxu3 }
 0x33f   : > { %vm2803_vm2 = vcmp.ge.f32.partialorder %v2793_v47, 0.0  ;;  %v2813_v35 = vmul.f32 0.1, %v2793_v47  ;;  %v2590_v48 = vadd.f32 %v2568_v23, %v2465_v5  ;;  %v2453_v5 = vpop.f32.mrf.mxu0 }
 0x341   : > { %v2823_v13 = vsel %vm2803_vm2, %v2793_v47, %v2813_v35  ;;  %v2678_v27 = vadd.f32 %v2656_v59, %v2590_v48  ;;  %v2160_v59 = vadd.f32 %v13712_v61, %v2057_v30  ;;  %vm3055_vm2 = vcmask 654336  }
 0x342   : > { %v2832_v8 = vpack.c.bf16 %v2823_v13, %v2822_v45  ;;  %v2469_v13 = vadd.f32 %v2453_v5, %v13716_v53 }
 0x343   : > { %v2781_v62 = vadd.f32 %v2759_v50, %v2678_v27  ;;  %v2251_v20 = vadd.f32 %v13700_v29, %v2160_v59  ;;  %v1971_v29 = vadd.f32 %v13617_v9, %v1826_v55  ;;  %v2666_v48 = vpop.f32.mrf.mxu2 }
 0x344   : > { %11485 = vmatmul.msk.bf16.vlgmr.msrb.gmra.mxu0 %vm645_vm0, %v2832_v8 }
 0x345   : > { %v2794_v49 = vadd.f32 %v13741_v10, %v2781_v62  ;;  %v2358_v26 = vadd.f32 %v13702_v41, %v2251_v20  ;;  %v1587_v41 = vadd.f32 %v13594_v43, %v13576_v54 }
 0x346   : > { %v2570_v51 = vpop.f32.mrf.mxu3 }
 0x347   : > { %v2591_v56 = vadd.f32 %v2570_v51, %v2466_v0  ;;  %v2814_v50 = vmul.f32 0.1, %v2794_v49  ;;  %vm2804_vm3 = vcmp.ge.f32.partialorder %v2794_v49, 0.0  ;;  %v2468_v12 = vadd.f32 %v2450_v58, %v2358_v26  ;;  %v2455_v36 = vpop.f32.mrf.mxu0 }
 0x348   : > { %v1698_v9 = vadd.f32 %v13687_v15, %v1587_v41 }
 0x349   : > { %v2679_v4 = vadd.f32 %v2658_v18, %v2591_v56  ;;  %v2824_v37 = vsel %vm2804_vm3, %v2794_v49, %v2814_v50  ;;  %v2766_v18 = vpop.f32.mrf.mxu1  ;;  %vm5594_vm3 = vcmask 1042432  }
 0x34a   : > { %v1828_v43 = vadd.f32 %v13635_v34, %v1698_v9 }
 0x34b   : > { %v2782_v44 = vadd.f32 %v2761_v40, %v2679_v4  ;;  %v2059_v40 = vadd.f32 %v13685_v38, %v1971_v29 }
 0x34d   : > { %v2795_v63 = vadd.f32 %v13741_v10, %v2782_v44  ;;  %v2162_v14 = vadd.f32 %v13720_v11, %v2059_v40 }
 0x34e   : > { %v2573_v52 = vpop.f32.mrf.mxu3 }
 0x34f   : > { %v2815_v2 = vmul.f32 0.1, %v2795_v63  ;;  %v2592_v46 = vadd.f32 %v2573_v52, %v2467_v7  ;;  %vm2805_vm4 = vcmp.ge.f32.partialorder %v2795_v63, 0.0  ;;  %v2253_v0 = vadd.f32 %v13706_v28, %v2162_v14  ;;  %v2458_v59 = vpop.f32.mrf.mxu0 }
 0x350   : > { %v1973_v28 = vadd.f32 %v13646_v17, %v1828_v43 }
 0x351   : > { %v2680_v61 = vadd.f32 %v2661_v33, %v2592_v46  ;;  %v2825_v6 = vsel %vm2805_vm4, %v2795_v63, %v2815_v2  ;;  %v2769_v45 = vpop.f32.mrf.mxu1  ;;  %v2360_v53 = vadd.f32 %v13708_v60, %v2253_v0  ;;  %v2471_v60 = vadd.f32 %v2458_v59, %v13727_v42  ;;  %v12462_v59 = vld [vmem:[%s18761_s3 + $0x10] sm:$0xff] }
 0x352   : > { %v2833_v1 = vpack.c.bf16 %v2825_v6, %v2824_v37  ;;  %v2061_v44 = vadd.f32 %v13714_v31, %v1973_v28  ;;  %v12460_v28 = vld [vmem:[%s18761_s3] sm:$0xff] }
 0x353   : > { %v2783_v21 = vadd.f32 %v2764_v57, %v2680_v61  ;;  %v2668_v57 = vpop.f32.mrf.mxu2  ;;  %v2470_v15 = vadd.f32 %v2455_v36, %v2360_v53 }
 0x354   : > { %11486 = vmatmul.msk.bf16.gmra.mxu0 %vm645_vm0, %v2833_v1  ;;  %v2164_v34 = vadd.f32 %v13732_v39, %v2061_v44  ;;  %v12463_v44 = vld [vmem:[%s18761_s3 + $0x18] sm:$0xff] }
 0x355   : > { %v2796_v22 = vadd.f32 %v13741_v10, %v2783_v21 }
 0x356   : > { %v2575_v47 = vpop.f32.mrf.mxu3  ;;  %v2255_v17 = vadd.f32 %v13718_v3, %v2164_v34  ;;  %v12466_v34 = vld [vmem:[%s18761_s3 + $0x30] sm:$0xff] }
 0x357   : > { %v2593_v23 = vadd.f32 %v2575_v47, %v2468_v12  ;;  %v2816_v27 = vmul.f32 0.1, %v2796_v22  ;;  %vm2806_vm5 = vcmp.ge.f32.partialorder %v2796_v22, 0.0  ;;  %v2460_v6 = vpop.f32.mrf.mxu0 }
 0x359   : > { %v2681_v35 = vadd.f32 %v2663_v16, %v2593_v23  ;;  %v2826_v51 = vsel %vm2806_vm5, %v2796_v22, %v2816_v27  ;;  %v2771_v49 = vpop.f32.mrf.mxu1 }
 0x35b   : > { %v2784_v24 = vadd.f32 %v2766_v18, %v2681_v35  ;;  %v2671_v52 = vpop.f32.mrf.mxu2  ;;  %v2362_v18 = vadd.f32 %v13722_v19, %v2255_v17  ;;  %v12484_v17 = vld [vmem:[%s18769_s11 + $0x20] sm:$0xff] }
 0x35d   : > { %v2797_v8 = vadd.f32 %v13741_v10, %v2784_v24  ;;  %v2472_v1 = vadd.f32 %v2460_v6, %v2362_v18 }
 0x35e   : > { %v2578_v38 = vpop.f32.mrf.mxu3 }
 0x35f   : > { %v2817_v62 = vmul.f32 0.1, %v2797_v8  ;;  %v2594_v33 = vadd.f32 %v2578_v38, %v2469_v13  ;;  %vm2807_vm6 = vcmp.ge.f32.partialorder %v2797_v8, 0.0 }
 0x361   : > { %v2682_v11 = vadd.f32 %v2666_v48, %v2594_v33  ;;  %v2827_v56 = vsel %vm2807_vm6, %v2797_v8, %v2817_v62  ;;  %v2774_v31 = vpop.f32.mrf.mxu1 }
 0x362   : > { %v2834_v54 = vpack.c.bf16 %v2827_v56, %v2826_v51 }
 0x363   : > { %v2785_v30 = vadd.f32 %v2769_v45, %v2682_v11  ;;  %v2673_v3 = vpop.f32.mrf.mxu2 }
 0x364   : > { %11487 = vmatmul.msk.bf16.gmra.mxu0 %vm645_vm0, %v2834_v54 }
 0x365   : > { %v2798_v25 = vadd.f32 %v13741_v10, %v2785_v30 }
 0x366   : > { %v2580_v4 = vpop.f32.mrf.mxu3 }
 0x367   : > { %v2595_v58 = vadd.f32 %v2580_v4, %v2470_v15  ;;  %v2818_v63 = vmul.f32 0.1, %v2798_v25  ;;  %vm2808_vm7 = vcmp.ge.f32.partialorder %v2798_v25, 0.0 }
 0x369   : > { %v2683_v7 = vadd.f32 %v2668_v57, %v2595_v58  ;;  %v2828_v61 = vsel %vm2808_vm7, %v2798_v25, %v2818_v63  ;;  %v2776_v21 = vpop.f32.mrf.mxu1  ;;  %v12461_v58 = vld [vmem:[%s18761_s3 + $0x8] sm:$0xff]  ;;  %v12464_v25 = vld [vmem:[%s18761_s3 + $0x20] sm:$0xff] }
 0x36a   : > { %v12480_v63 = vld [vmem:[%s18769_s11] sm:$0xff] }
 0x36b   : > { %v2786_v50 = vadd.f32 %v2771_v49, %v2683_v7  ;;  %v12465_v7 = vld [vmem:[%s18761_s3 + $0x28] sm:$0xff] }
 0x36d   : > { %v2799_v32 = vadd.f32 %v13741_v10, %v2786_v50  ;;  %v12467_v50 = vld [vmem:[%s18761_s3 + $0x38] sm:$0xff] }
 0x36e   : > { %v2583_v20 = vpop.f32.mrf.mxu3 }
 0x36f   : > { %v2819_v2 = vmul.f32 0.1, %v2799_v32  ;;  %v2596_v46 = vadd.f32 %v2583_v20, %v2471_v60  ;;  %vm2809_vm8 = vcmp.ge.f32.partialorder %v2799_v32, 0.0  ;;  %v12481_v60 = vld [vmem:[%s18769_s11 + $0x8] sm:$0xff] }
 0x370   : > { %3743 = vmatpush.bf16.msrb.mxu1 %v12481_v60  ;;  %v12485_v20 = vld [vmem:[%s18769_s11 + $0x28] sm:$0xff] }
 0x371   : > { %v2684_v16 = vadd.f32 %v2671_v52, %v2596_v46  ;;  %v2829_v37 = vsel %vm2809_vm8, %v2799_v32, %v2819_v2  ;;  %v12483_v32 = vld [vmem:[%s18769_s11 + $0x18] sm:$0xff]  ;;  %v12468_v52 = vld [vmem:[%s18761_s3 + $0x40] sm:$0xff]  ;;  %3950 = vmatpush.bf16.msra.mxu0 %v12485_v20  ;;  %v12482_v46 = vld [vmem:[%s18769_s11 + $0x10] sm:$0xff] }
 0x372   : > { %v2835_v39 = vpack.c.bf16 %v2829_v37, %v2828_v61  ;;  %3596 = vmatpush.bf16.msra.mxu2 %v12483_v32  ;;  %v12469_v37 = vld [vmem:[%s18761_s3 + $0x48] sm:$0xff]  ;;  %v12472_v32 = vld [vmem:[%s18761_s3 + $0x60] sm:$0xff] }
 0x373   : > { %v2787_v42 = vadd.f32 %v2774_v31, %v2684_v16 }
 0x374   : > { %11488 = vmatmul.msk.bf16.gmra.mxu0 %vm645_vm0, %v2835_v39  ;;  %3744 = vmatpush.bf16.msrb.mxu1 %v12480_v63 }
 0x375   : > { %v2800_v55 = vadd.f32 %v13741_v10, %v2787_v42  ;;  %3951 = vmatpush.bf16.msra.mxu0 %v12484_v17 }
 0x376   : > { %v2585_v26 = vpop.f32.mrf.mxu3  ;;  %3597 = vmatpush.bf16.msra.mxu2 %v12482_v46 }
 0x377   : > { %v2597_v5 = vadd.f32 %v2585_v26, %v2472_v1  ;;  %v2820_v29 = vmul.f32 0.1, %v2800_v55  ;;  %vm2810_vm9 = vcmp.ge.f32.partialorder %v2800_v55, 0.0 }
 0x379   : > { %v2685_v12 = vadd.f32 %v2673_v3, %v2597_v5  ;;  %v2830_v22 = vsel %vm2810_vm9, %v2800_v55, %v2820_v29  ;;  %v12470_v3 = vld [vmem:[%s18761_s3 + $0x50] sm:$0xff] }
 0x37b   : > { %v2788_v47 = vadd.f32 %v2776_v21, %v2685_v12 }
 0x37d   : > { %v2801_v23 = vadd.f32 %v13741_v10, %v2788_v47  ;;  %v12612_v10 = vld [vmem:[%s18768_s10] ss:$0 sm:$0xff] }
 0x37f   : > { %v2821_v40 = vmul.f32 0.1, %v2801_v23  ;;  %vm2811_vm1 = vcmp.ge.f32.partialorder %v2801_v23, 0.0 }
 0x381   : > { %v2831_v19 = vsel %vm2811_vm1, %v2801_v23, %v2821_v40 }
 0x382   : > { %v2836_v35 = vpack.c.bf16 %v2831_v19, %v2830_v22 }
 0x384   : > { %11489 = vmatmul.msk.bf16.gmra.mxu0 %vm645_vm0, %v2836_v35 }
 0x3c1   : > { %v2881_v48 = vpop.f32.mrf.mxu0 }
 0x3c2   : > { %v2882_v49 = vadd.f32 %v12612_v10, %v2881_v48 }
 0x3c9   : > { %v2883_v14 = vpop.f32.mrf.mxu0 }
 0x3ca   : > { %v2884_v15 = vadd.f32 %v12612_v10, %v2883_v14 }
 0x3cc   : > { %v2947_v4 = vpack.c.bf16 %v2884_v15, %v2882_v49 }
 0x3d1   : > { %v2886_v24 = vpop.f32.mrf.mxu0 }
 0x3d2   : > { %v2887_v57 = vadd.f32 %v12612_v10, %v2886_v24 }
 0x3d9   : > { %v2888_v41 = vpop.f32.mrf.mxu0 }
 0x3da   : > { %v2889_v43 = vadd.f32 %v12612_v10, %v2888_v41 }
 0x3dc   : > { %v2948_v30 = vpack.c.bf16 %v2889_v43, %v2887_v57 }
 0x3e1   : > { %v2891_v45 = vpop.f32.mrf.mxu0 }
 0x3e2   : > { %v2892_v54 = vadd.f32 %v12612_v10, %v2891_v45 }
 0x3e9   : > { %v2893_v13 = vpop.f32.mrf.mxu0 }
 0x3ea   : > { %v2894_v51 = vadd.f32 %v12612_v10, %v2893_v13 }
 0x3ec   : > { %v2949_v53 = vpack.c.bf16 %v2894_v51, %v2892_v54 }
 0x3f1   : > { %v2896_v27 = vpop.f32.mrf.mxu0 }
 0x3f2   : > { %v2897_v11 = vadd.f32 %v12612_v10, %v2896_v27 }
 0x3f9   : > { %v2898_v8 = vpop.f32.mrf.mxu0 }
 0x3fa   : > { %v2899_v62 = vadd.f32 %v12612_v10, %v2898_v8 }
 0x3fc   : > { %v2950_v56 = vpack.c.bf16 %v2899_v62, %v2897_v11 }
 0x401   : > { %v2901_v9 = vpop.f32.mrf.mxu0 }
 0x402   : > { %v2902_v38 = vadd.f32 %v12612_v10, %v2901_v9 }
 0x409   : > { %v2903_v36 = vpop.f32.mrf.mxu0 }
 0x40a   : > { %v2904_v0 = vadd.f32 %v12612_v10, %v2903_v36 }
 0x40c   : > { %v2951_v33 = vpack.c.bf16 %v2904_v0, %v2902_v38  ;;  %v12471_v38 = vld [vmem:[%s18761_s3 + $0x58] sm:$0xff] }
 0x40e   : > { %3122 = vmatpush.bf16.msrb.mxu3 %v2951_v33 }
 0x412   : > { %3123 = vmatpush.bf16.msrb.mxu3 %v2950_v56 }
 0x416   : > { %3124 = vmatpush.bf16.msrb.mxu3 %v2949_v53 }
 0x41a   : > { %3125 = vmatpush.bf16.msrb.mxu3 %v2948_v30 }
 0x41e   : > { %3126 = vmatpush.bf16.msrb.mxu3 %v2947_v4 }
 0x421   : > { %11570 = vmatmul.msk.bf16.vlgmr.msrb.gmra.mxu3 %vm3055_vm2, %v12460_v28 }
 0x431   : > { %11571 = vmatmul.msk.bf16.gmra.mxu3 %vm3055_vm2, %v12461_v58 }
 0x441   : > { %11572 = vmatmul.msk.bf16.gmra.mxu3 %vm3055_vm2, %v12462_v59 }
 0x451   : > { %11573 = vmatmul.msk.bf16.gmra.mxu3 %vm3055_vm2, %v12463_v44 }
 0x461   : > { %11574 = vmatmul.msk.bf16.gmra.mxu3 %vm3055_vm2, %v12464_v25 }
 0x471   : > { %11575 = vmatmul.msk.bf16.gmra.mxu3 %vm3055_vm2, %v12465_v7 }
 0x481   : > { %11576 = vmatmul.msk.bf16.gmra.mxu3 %vm3055_vm2, %v12466_v34 }
 0x491   : > { %11577 = vmatmul.msk.bf16.gmra.mxu3 %vm3055_vm2, %v12467_v50 }
 0x4a1   : > { %11578 = vmatmul.msk.bf16.gmra.mxu3 %vm3055_vm2, %v12468_v52 }
 0x4a4   : > { %v3128_v2 = vpop.f32.mrf.mxu3 }
 0x4a5   : > { %v3232_v31 = vpack.c.bf16 %v3128_v2, %v3128_v2 }
 0x4a7   : > { %v3320_v6 = vunpack.c.l.b16 %v3232_v31 }
 0x4ac   : > { %v3130_v16 = vpop.f32.mrf.mxu3 }
 0x4ad   : > { %v3233_v61 = vpack.c.bf16 %v3130_v16, %v3130_v16 }
 0x4af   : > { %v3321_v39 = vunpack.c.l.b16 %v3233_v61 }
 0x4b1   : > { %v3357_v18 = vpack.c.b16 %v3321_v39, %v3320_v6  ;;  %11579 = vmatmul.msk.bf16.gmra.mxu3 %vm3055_vm2, %v12469_v37 }
 0x4b3   : > { %11629 = vmatmul.msk.bf16.vlgmr.msrb.gmra.mxu1 %vm645_vm0, %v3357_v18  ;;  %v3379_v26 = vshll.u32 %v3357_v18, 16  ;;  %v3377_v23 = vshrl.u32 %v3357_v18, 16  ;;  %v3841_v40 = vrot.slane %v3357_v18, 1 }
 0x4b4   : > { %v3133_v42 = vpop.f32.mrf.mxu3 }
 0x4b5   : > { %v3234_v1 = vpack.c.bf16 %v3133_v42, %v3133_v42  ;;  %v3381_v47 = vrot.slane %v3379_v26, 1 }
 0x4b7   : > { %v3322_v12 = vunpack.c.l.b16 %v3234_v1  ;;  %v3382_v24 = vor.u32 %v3381_v47, %v3377_v23 }
 0x4bc   : > { %v3135_v55 = vpop.f32.mrf.mxu3 }
 0x4bd   : > { %v3235_v5 = vpack.c.bf16 %v3135_v55, %v3135_v55 }
 0x4bf   : > { %v3323_v21 = vunpack.c.l.b16 %v3235_v5 }
 0x4c1   : > { %v3358_v29 = vpack.c.b16 %v3323_v21, %v3322_v12  ;;  %11580 = vmatmul.msk.bf16.gmra.mxu3 %vm3055_vm2, %v12470_v3  ;;  %v12487_v21 = vld [vmem:[%s18769_s11 + $0x38] sm:$0xff] }
 0x4c2   : > { %4118 = vmatpush.bf16.msrb.mxu2 %v12487_v21 }
 0x4c3   : > { %11630 = vmatmul.msk.bf16.gmra.mxu1 %vm645_vm0, %v3358_v29  ;;  %v3842_v22 = vrot.slane %v3358_v29, 1  ;;  %v3384_v19 = vshll.u32 %v3358_v29, 16  ;;  %v3388_v35 = vshrl.u32 %v3358_v29, 16  ;;  %v4543_v11 = vrot.slane %v3358_v29, 2 }
 0x4c4   : > { %v3138_v48 = vpop.f32.mrf.mxu3 }
 0x4c5   : > { %v3843_v14 = vsel %vm1307_vm10, %v3841_v40, %v3842_v22  ;;  %v3386_v41 = vrot.slane %v3384_v19, 1  ;;  %v4252_v45 = vrot.slane %v3388_v35, 1  ;;  %v4253_v13 = vrot.slane %v3384_v19, 2 }
 0x4c6   : > { %11659 = vmatmul.msk.bf16.vlgmr.msra.gmra.mxu0 %vm645_vm0, %v3843_v14  ;;  %v3236_v9 = vpack.c.bf16 %v3138_v48, %v3138_v48  ;;  %v12473_v14 = vld [vmem:[%s18761_s3 + $0x68] sm:$0xff] }
 0x4c7   : > { %v3387_v27 = vsel %vm1057_vm11, %v3382_v24, %v3386_v41  ;;  %v4254_v8 = vor.u32 %v4253_v13, %v4252_v45  ;;  %v3390_v15 = vor.u32 %v3388_v35, %v3386_v41  ;;  %v12489_v13 = vld [vmem:[%s18769_s11 + $0x48] sm:$0xff] }
 0x4c8   : > { %11603 = vmatmul.msk.bf16.vlgmr.msra.gmra.mxu2 %vm645_vm0, %v3387_v27  ;;  %v3324_v0 = vunpack.c.l.b16 %v3236_v9  ;;  %4409 = vmatpush.bf16.msra.mxu1 %v12489_v13 }
 0x4cc   : > { %v3140_v10 = vpop.f32.mrf.mxu3 }
 0x4cd   : > { %v3237_v36 = vpack.c.bf16 %v3140_v10, %v3140_v10 }
 0x4cf   : > { %v3325_v62 = vunpack.c.l.b16 %v3237_v36 }
 0x4d1   : > { %v3359_v33 = vpack.c.b16 %v3325_v62, %v3324_v0  ;;  %11581 = vmatmul.msk.bf16.gmra.mxu3 %vm3055_vm2, %v12471_v38 }
 0x4d3   : > { %11631 = vmatmul.msk.bf16.gmra.mxu1 %vm645_vm0, %v3359_v33  ;;  %v3844_v51 = vrot.slane %v3359_v33, 1  ;;  %v3392_v56 = vshll.u32 %v3359_v33, 16  ;;  %v3396_v54 = vshrl.u32 %v3359_v33, 16  ;;  %v4544_v43 = vrot.slane %v3359_v33, 2 }
 0x4d4   : > { %v3143_v53 = vpop.f32.mrf.mxu3  ;;  %v5245_v37 = vrot.slane %v3359_v33, 3 }
 0x4d5   : > { %v13865_v57 = vsel %vm1307_vm10, %v3842_v22, %v3844_v51  ;;  %v3394_v30 = vrot.slane %v3392_v56, 1  ;;  %v13868_v49 = vsel %vm1979_vm12, %v4543_v11, %v4544_v43  ;;  %v4255_v4 = vrot.slane %v3396_v54, 1 }
 0x4d6   : > { %11660 = vmatmul.msk.bf16.gmra.mxu0 %vm645_vm0, %v13865_v57  ;;  %v4256_v28 = vrot.slane %v3392_v56, 2  ;;  %v4954_v58 = vrot.slane %v3396_v54, 2  ;;  %v4955_v59 = vrot.slane %v3392_v56, 3  ;;  %v3238_v50 = vpack.c.bf16 %v3143_v53, %v3143_v53 }
 0x4d7   : > { %v3395_v44 = vsel %vm1057_vm11, %v3390_v15, %v3394_v30  ;;  %v3398_v18 = vor.u32 %v3396_v54, %v3394_v30 }
 0x4d8   : > { %11604 = vmatmul.msk.bf16.gmra.mxu2 %vm645_vm0, %v3395_v44  ;;  %v4257_v25 = vor.u32 %v4256_v28, %v4255_v4  ;;  %v4956_v7 = vor.u32 %v4955_v59, %v4954_v58  ;;  %v3326_v52 = vunpack.c.l.b16 %v3238_v50 }
 0x4da   : > { %v13875_v34 = vsel %vm1704_vm13, %v4254_v8, %v4257_v25 }
 0x4dc   : > { %v3145_v60 = vpop.f32.mrf.mxu3 }
 0x4dd   : > { %v3239_v63 = vpack.c.bf16 %v3145_v60, %v3145_v60 }
 0x4df   : > { %v3327_v20 = vunpack.c.l.b16 %v3239_v63 }
 0x4e1   : > { %v3360_v17 = vpack.c.b16 %v3327_v20, %v3326_v52  ;;  %11582 = vmatmul.msk.bf16.gmra.mxu3 %vm3055_vm2, %v12472_v32 }
 0x4e3   : > { %11632 = vmatmul.msk.bf16.gmra.mxu1 %vm645_vm0, %v3360_v17  ;;  %v3846_v2 = vrot.slane %v3360_v17, 1  ;;  %v3400_v46 = vshll.u32 %v3360_v17, 16  ;;  %v3404_v31 = vshrl.u32 %v3360_v17, 16  ;;  %v4546_v16 = vrot.slane %v3360_v17, 2 }
 0x4e4   : > { %v3148_v61 = vpop.f32.mrf.mxu3  ;;  %v5246_v6 = vrot.slane %v3360_v17, 3 }
 0x4e5   : > { %v13883_v39 = vsel %vm1307_vm10, %v3844_v51, %v3846_v2  ;;  %v3402_v42 = vrot.slane %v3400_v46, 1  ;;  %v13886_v1 = vsel %vm1979_vm12, %v4544_v43, %v4546_v16  ;;  %v4259_v55 = vrot.slane %v3404_v31, 1 }
 0x4e6   : > { %11661 = vmatmul.msk.bf16.gmra.mxu0 %vm645_vm0, %v13883_v39  ;;  %v4260_v26 = vrot.slane %v3400_v46, 2  ;;  %v13891_v5 = vsel %vm2603_vm14, %v5245_v37, %v5246_v6  ;;  %v4957_v3 = vrot.slane %v3404_v31, 2  ;;  %v4958_v47 = vrot.slane %v3400_v46, 3 }
 0x4e7   : > { %18940 = vst [vmem:[#allocation3_spill] sm:$0xff] %v13891_v5  ;;  %v3403_v12 = vsel %vm1057_vm11, %v3398_v18, %v3402_v42  ;;  %v3240_v22 = vpack.c.bf16 %v3148_v61, %v3148_v61  ;;  %v3406_v62 = vor.u32 %v3404_v31, %v3402_v42 }
 0x4e8   : > { %11605 = vmatmul.msk.bf16.gmra.mxu2 %vm645_vm0, %v3403_v12  ;;  %v4261_v29 = vor.u32 %v4260_v26, %v4259_v55  ;;  %v4959_v23 = vor.u32 %v4958_v47, %v4957_v3 }
 0x4e9   : > { %v3328_v24 = vunpack.c.l.b16 %v3240_v22 }
 0x4ea   : > { %v13899_v40 = vsel %vm1704_vm13, %v4257_v25, %v4261_v29  ;;  %v13902_v19 = vsel %vm2368_vm15, %v4956_v7, %v4959_v23  ;;  %v12474_v7 = vld [vmem:[%s18761_s3 + $0x70] sm:$0xff] }
 0x4eb   : > { %18941 = vst [vmem:[#allocation4_spill] sm:$0xff] %v13902_v19 }
 0x4ec   : > { %v3150_v35 = vpop.f32.mrf.mxu3 }
 0x4ed   : > { %v3241_v48 = vpack.c.bf16 %v3150_v35, %v3150_v35 }
 0x4ef   : > { %v3329_v41 = vunpack.c.l.b16 %v3241_v48  ;;  %v12475_v48 = vld [vmem:[%s18761_s3 + $0x78] sm:$0xff] }
 0x4f1   : > { %v3361_v45 = vpack.c.b16 %v3329_v41, %v3328_v24  ;;  %11583 = vmatmul.msk.bf16.gmra.mxu3 %vm3055_vm2, %v12473_v14 }
 0x4f3   : > { %11633 = vmatmul.msk.bf16.gmra.mxu1 %vm645_vm0, %v3361_v45  ;;  %v3848_v27 = vrot.slane %v3361_v45, 1  ;;  %v3408_v8 = vshll.u32 %v3361_v45, 16  ;;  %v3412_v9 = vshrl.u32 %v3361_v45, 16  ;;  %v4548_v10 = vrot.slane %v3361_v45, 2 }
 0x4f4   : > { %v3153_v36 = vpop.f32.mrf.mxu3  ;;  %v5248_v38 = vrot.slane %v3361_v45, 3 }
 0x4f5   : > { %v13913_v0 = vsel %vm1307_vm10, %v3846_v2, %v3848_v27  ;;  %v3410_v33 = vrot.slane %v3408_v8, 1  ;;  %v13916_v11 = vsel %vm1979_vm12, %v4546_v16, %v4548_v10  ;;  %v4263_v51 = vrot.slane %v3412_v9, 1 }
 0x4f6   : > { %11662 = vmatmul.msk.bf16.gmra.mxu0 %vm645_vm0, %v13913_v0  ;;  %v4264_v56 = vrot.slane %v3408_v8, 2  ;;  %v13921_v54 = vsel %vm2603_vm14, %v5246_v6, %v5248_v38  ;;  %v4961_v43 = vrot.slane %v3412_v9, 2  ;;  %v4962_v15 = vrot.slane %v3408_v8, 3 }
 0x4f7   : > { %18942 = vst [vmem:[#allocation5_spill] sm:$0xff] %v13921_v54  ;;  %v3411_v53 = vsel %vm1057_vm11, %v3406_v62, %v3410_v33  ;;  %v3242_v58 = vpack.c.bf16 %v3153_v36, %v3153_v36  ;;  %v3414_v16 = vor.u32 %v3412_v9, %v3410_v33 }
 0x4f8   : > { %11606 = vmatmul.msk.bf16.gmra.mxu2 %vm645_vm0, %v3411_v53  ;;  %v4265_v30 = vor.u32 %v4264_v56, %v4263_v51  ;;  %v4963_v4 = vor.u32 %v4962_v15, %v4961_v43 }
 0x4f9   : > { %v3330_v50 = vunpack.c.l.b16 %v3242_v58 }
 0x4fa   : > { %v13926_v28 = vsel %vm1704_vm13, %v4261_v29, %v4265_v30  ;;  %v13929_v59 = vsel %vm2368_vm15, %v4959_v23, %v4963_v4 }
 0x4fb   : > { %18943 = vst [vmem:[#allocation2_spill] sm:$0xff] %v13929_v59 }
 0x4fc   : > { %v3155_v44 = vpop.f32.mrf.mxu3 }
 0x4fd   : > { %v3243_v25 = vpack.c.bf16 %v3155_v44, %v3155_v44 }
 0x4ff   : > { %v3331_v60 = vunpack.c.l.b16 %v3243_v25 }
 0x501   : > { %v3362_v63 = vpack.c.b16 %v3331_v60, %v3330_v50  ;;  %11584 = vmatmul.msk.bf16.gmra.mxu3 %vm3055_vm2, %v12474_v7 }
 0x503   : > { %11634 = vmatmul.msk.bf16.gmra.mxu1 %vm645_vm0, %v3362_v63  ;;  %v3850_v32 = vrot.slane %v3362_v63, 1  ;;  %v3416_v52 = vshll.u32 %v3362_v63, 16  ;;  %v3420_v20 = vshrl.u32 %v3362_v63, 16  ;;  %v4550_v17 = vrot.slane %v3362_v63, 2 }
 0x504   : > { %v3158_v2 = vpop.f32.mrf.mxu3  ;;  %v5250_v46 = vrot.slane %v3362_v63, 3  ;;  %v12476_v63 = vld [vmem:[%s18761_s3 + $0x80] sm:$0xff] }
 0x505   : > { %v13937_v31 = vsel %vm1307_vm10, %v3848_v27, %v3850_v32  ;;  %v3418_v61 = vrot.slane %v3416_v52, 1  ;;  %v13940_v37 = vsel %vm1979_vm12, %v4548_v10, %v4550_v17  ;;  %v4267_v6 = vrot.slane %v3420_v20, 1 }
 0x506   : > { %11663 = vmatmul.msk.bf16.gmra.mxu0 %vm645_vm0, %v13937_v31  ;;  %v4268_v18 = vrot.slane %v3416_v52, 2  ;;  %v13945_v42 = vsel %vm2603_vm14, %v5248_v38, %v5250_v46  ;;  %v4965_v55 = vrot.slane %v3420_v20, 2  ;;  %v4966_v3 = vrot.slane %v3416_v52, 3 }
 0x507   : > { %18944 = vst [vmem:[#allocation6_spill] sm:$0xff] %v13945_v42  ;;  %v3419_v26 = vsel %vm1057_vm11, %v3414_v16, %v3418_v61  ;;  %v3244_v29 = vpack.c.bf16 %v3158_v2, %v3158_v2  ;;  %v3422_v38 = vor.u32 %v3420_v20, %v3418_v61 }
 0x508   : > { %11607 = vmatmul.msk.bf16.gmra.mxu2 %vm645_vm0, %v3419_v26  ;;  %v4269_v12 = vor.u32 %v4268_v18, %v4267_v6  ;;  %v4967_v21 = vor.u32 %v4966_v3, %v4965_v55 }
 0x509   : > { %v3332_v14 = vunpack.c.l.b16 %v3244_v29 }
 0x50a   : > { %v13950_v47 = vsel %vm1704_vm13, %v4265_v30, %v4269_v12  ;;  %v13953_v23 = vsel %vm2368_vm15, %v4963_v4, %v4967_v21 }
 0x50b   : > { %18945 = vst [vmem:[#allocation7_spill] sm:$0xff] %v13953_v23 }
 0x50c   : > { %v3160_v22 = vpop.f32.mrf.mxu3 }
 0x50d   : > { %v3245_v35 = vpack.c.bf16 %v3160_v22, %v3160_v22 }
 0x50f   : > { %v3333_v24 = vunpack.c.l.b16 %v3245_v35 }
 0x511   : > { %v3363_v41 = vpack.c.b16 %v3333_v24, %v3332_v14  ;;  %11585 = vmatmul.msk.bf16.gmra.mxu3 %vm3055_vm2, %v12475_v48 }
 0x513   : > { %11635 = vmatmul.msk.bf16.gmra.mxu1 %vm645_vm0, %v3363_v41  ;;  %v3852_v45 = vrot.slane %v3363_v41, 1  ;;  %v3424_v13 = vshll.u32 %v3363_v41, 16  ;;  %v3428_v27 = vshrl.u32 %v3363_v41, 16  ;;  %v4552_v8 = vrot.slane %v3363_v41, 2 }
 0x514   : > { %v3163_v9 = vpop.f32.mrf.mxu3  ;;  %v5252_v10 = vrot.slane %v3363_v41, 3 }
 0x515   : > { %v13961_v36 = vsel %vm1307_vm10, %v3850_v32, %v3852_v45  ;;  %v3426_v62 = vrot.slane %v3424_v13, 1  ;;  %v13964_v33 = vsel %vm1979_vm12, %v4550_v17, %v4552_v8  ;;  %v4271_v51 = vrot.slane %v3428_v27, 1 }
 0x516   : > { %11664 = vmatmul.msk.bf16.gmra.mxu0 %vm645_vm0, %v13961_v36  ;;  %v4272_v56 = vrot.slane %v3424_v13, 2  ;;  %v13969_v43 = vsel %vm2603_vm14, %v5250_v46, %v5252_v10  ;;  %v4969_v53 = vrot.slane %v3428_v27, 2  ;;  %v4970_v30 = vrot.slane %v3424_v13, 3 }
 0x517   : > { %18946 = vst [vmem:[#allocation8_spill] sm:$0xff] %v13969_v43  ;;  %v3427_v15 = vsel %vm1057_vm11, %v3422_v38, %v3426_v62  ;;  %v3246_v25 = vpack.c.bf16 %v3163_v9, %v3163_v9  ;;  %v3430_v55 = vor.u32 %v3428_v27, %v3426_v62  ;;  %v12477_v9 = vld [vmem:[%s18761_s3 + $0x88] sm:$0xff] }
 0x518   : > { %11608 = vmatmul.msk.bf16.gmra.mxu2 %vm645_vm0, %v3427_v15  ;;  %v4273_v4 = vor.u32 %v4272_v56, %v4271_v51  ;;  %v4971_v58 = vor.u32 %v4970_v30, %v4969_v53 }
 0x519   : > { %v3334_v32 = vunpack.c.l.b16 %v3246_v25 }
 0x51a   : > { %v13974_v44 = vsel %vm1704_vm13, %v4269_v12, %v4273_v4  ;;  %v13977_v7 = vsel %vm2368_vm15, %v4967_v21, %v4971_v58 }
 0x51b   : > { %18947 = vst [vmem:[#allocation9_spill] sm:$0xff] %v13977_v7 }
 0x51c   : > { %v3165_v50 = vpop.f32.mrf.mxu3 }
 0x51d   : > { %v3247_v60 = vpack.c.bf16 %v3165_v50, %v3165_v50 }
 0x51f   : > { %v3335_v52 = vunpack.c.l.b16 %v3247_v60 }
 0x521   : > { %v3364_v20 = vpack.c.b16 %v3335_v52, %v3334_v32  ;;  %11586 = vmatmul.msk.bf16.gmra.mxu3 %vm3055_vm2, %v12476_v63 }
 0x523   : > { %11636 = vmatmul.msk.bf16.gmra.mxu1 %vm645_vm0, %v3364_v20  ;;  %v3854_v17 = vrot.slane %v3364_v20, 1  ;;  %v3432_v2 = vshll.u32 %v3364_v20, 16  ;;  %v3436_v46 = vshrl.u32 %v3364_v20, 16  ;;  %v4554_v16 = vrot.slane %v3364_v20, 2 }
 0x524   : > { %v3168_v61 = vpop.f32.mrf.mxu3  ;;  %v5254_v6 = vrot.slane %v3364_v20, 3 }
 0x525   : > { %v13985_v18 = vsel %vm1307_vm10, %v3852_v45, %v3854_v17  ;;  %v3434_v26 = vrot.slane %v3432_v2, 1  ;;  %v13988_v3 = vsel %vm1979_vm12, %v4552_v8, %v4554_v16  ;;  %v4275_v12 = vrot.slane %v3436_v46, 1 }
 0x526   : > { %11665 = vmatmul.msk.bf16.gmra.mxu0 %vm645_vm0, %v13985_v18  ;;  %v4276_v21 = vrot.slane %v3432_v2, 2  ;;  %v13993_v29 = vsel %vm2603_vm14, %v5252_v10, %v5254_v6  ;;  %v4973_v22 = vrot.slane %v3436_v46, 2  ;;  %v4974_v48 = vrot.slane %v3432_v2, 3 }
 0x527   : > { %18948 = vst [vmem:[#allocation10_spill] sm:$0xff] %v13993_v29  ;;  %v3435_v35 = vsel %vm1057_vm11, %v3430_v55, %v3434_v26  ;;  %v3248_v45 = vpack.c.bf16 %v3168_v61, %v3168_v61  ;;  %v3438_v50 = vor.u32 %v3436_v46, %v3434_v26 }
 0x528   : > { %11609 = vmatmul.msk.bf16.gmra.mxu2 %vm645_vm0, %v3435_v35  ;;  %v4277_v14 = vor.u32 %v4276_v21, %v4275_v12  ;;  %v4975_v24 = vor.u32 %v4974_v48, %v4973_v22  ;;  %v12478_v35 = vld [vmem:[%s18761_s3 + $0x90] sm:$0xff] }
 0x529   : > { %v3336_v10 = vunpack.c.l.b16 %v3248_v45 }
 0x52a   : > { %v13998_v41 = vsel %vm1704_vm13, %v4273_v4, %v4277_v14  ;;  %v14001_v13 = vsel %vm2368_vm15, %v4971_v58, %v4975_v24 }
 0x52b   : > { %18949 = vst [vmem:[#allocation11_spill] sm:$0xff] %v14001_v13 }
 0x52c   : > { %v3170_v27 = vpop.f32.mrf.mxu3 }
 0x52d   : > { %v3249_v8 = vpack.c.bf16 %v3170_v27, %v3170_v27 }
 0x52f   : > { %v3337_v38 = vunpack.c.l.b16 %v3249_v8 }
 0x530   : > { %v14006_v62 = vpop.f32.mrf.mxu1 }
 0x531   : > { %v3365_v51 = vpack.c.b16 %v3337_v38, %v3336_v10  ;;  %11587 = vmatmul.msk.bf16.gmra.mxu3 %vm3055_vm2, %v12477_v9 }
 0x533   : > { %11637 = vmatmul.msk.bf16.gmra.mxu1 %vm645_vm0, %v3365_v51  ;;  %v3856_v56 = vrot.slane %v3365_v51, 1  ;;  %v3440_v53 = vshll.u32 %v3365_v51, 16  ;;  %v3444_v15 = vshrl.u32 %v3365_v51, 16  ;;  %v4556_v30 = vrot.slane %v3365_v51, 2 }
 0x534   : > { %v3173_v4 = vpop.f32.mrf.mxu3  ;;  %v5256_v58 = vrot.slane %v3365_v51, 3 }
 0x535   : > { %v14011_v25 = vsel %vm1307_vm10, %v3854_v17, %v3856_v56  ;;  %v3442_v60 = vrot.slane %v3440_v53, 1  ;;  %v14014_v63 = vsel %vm1979_vm12, %v4554_v16, %v4556_v30  ;;  %v4279_v32 = vrot.slane %v3444_v15, 1 }
 0x536   : > { %11666 = vmatmul.msk.bf16.gmra.mxu0 %vm645_vm0, %v14011_v25  ;;  %v4280_v52 = vrot.slane %v3440_v53, 2  ;;  %v14019_v20 = vsel %vm2603_vm14, %v5254_v6, %v5256_v58  ;;  %v4977_v2 = vrot.slane %v3444_v15, 2  ;;  %v4978_v55 = vrot.slane %v3440_v53, 3 }
 0x537   : > { %18950 = vst [vmem:[#allocation12_spill] sm:$0xff] %v14019_v20  ;;  %v3443_v61 = vsel %vm1057_vm11, %v3438_v50, %v3442_v60  ;;  %v3250_v12 = vpack.c.bf16 %v3173_v4, %v3173_v4  ;;  %v3446_v50 = vor.u32 %v3444_v15, %v3442_v60  ;;  %v12491_v15 = vld [vmem:[%s18769_s11 + $0x58] sm:$0xff] }
 0x538   : > { %11610 = vmatmul.msk.bf16.gmra.mxu2 %vm645_vm0, %v3443_v61  ;;  %v14023_v17 = vpop.f32.mrf.mxu1  ;;  %v4281_v46 = vor.u32 %v4280_v52, %v4279_v32  ;;  %v4979_v26 = vor.u32 %v4978_v55, %v4977_v2  ;;  %4652 = vmatpush.bf16.msra.mxu3 %v12491_v15 }
 0x539   : > { %v3338_v48 = vunpack.c.l.b16 %v3250_v12 }
 0x53a   : > { %v14026_v16 = vsel %vm1704_vm13, %v4277_v14, %v4281_v46  ;;  %v14029_v21 = vsel %vm2368_vm15, %v4975_v24, %v4979_v26 }
 0x53b   : > { %18951 = vst [vmem:[#allocation13_spill] sm:$0xff] %v14029_v21  ;;  %v12479_v21 = vld [vmem:[%s18761_s3 + $0x98] sm:$0xff] }
 0x53c   : > { %v3175_v22 = vpop.f32.mrf.mxu3 }
 0x53d   : > { %v3251_v6 = vpack.c.bf16 %v3175_v22, %v3175_v22 }
 0x53f   : > { %v3339_v45 = vunpack.c.l.b16 %v3251_v6 }
 0x540   : > { %v14034_v27 = vpop.f32.mrf.mxu1 }
 0x541   : > { %v14036_v8 = vpack.c.b16 %v3339_v45, %v3338_v48  ;;  %11588 = vmatmul.msk.bf16.gmra.mxu3 %vm3055_vm2, %v12478_v35 }
 0x543   : > { %11638 = vmatmul.msk.bf16.gmra.mxu1 %vm645_vm0, %v14036_v8  ;;  %v3953_v14 = vpop.f32.mrf.mxu0  ;;  %v3858_v24 = vrot.slane %v14036_v8, 1  ;;  %v3448_v9 = vshll.u32 %v14036_v8, 16  ;;  %v3452_v10 = vshrl.u32 %v14036_v8, 16  ;;  %v4558_v51 = vrot.slane %v14036_v8, 2 }
 0x544   : > { %v3178_v38 = vpop.f32.mrf.mxu3  ;;  %v5258_v53 = vrot.slane %v14036_v8, 3 }
 0x545   : > { %v14047_v4 = vsel %vm1307_vm10, %v3856_v56, %v3858_v24  ;;  %v3450_v32 = vrot.slane %v3448_v9, 1  ;;  %v4283_v52 = vrot.slane %v3452_v10, 1  ;;  %v14052_v2 = vsel %vm1979_vm12, %v4556_v30, %v4558_v51 }
 0x546   : > { %11667 = vmatmul.msk.bf16.gmra.mxu0 %vm645_vm0, %v14047_v4  ;;  %v4284_v61 = vrot.slane %v3448_v9, 2  ;;  %v14055_v55 = vsel %vm2603_vm14, %v5256_v58, %v5258_v53  ;;  %v4981_v12 = vrot.slane %v3452_v10, 2  ;;  %v4982_v6 = vrot.slane %v3448_v9, 3 }
 0x547   : > { %18952 = vst [vmem:[#allocation14_spill] sm:$0xff] %v14055_v55  ;;  %v3451_v22 = vsel %vm1057_vm11, %v3446_v50, %v3450_v32  ;;  %v3252_v58 = vpack.c.bf16 %v3178_v38, %v3178_v38  ;;  %v12490_v38 = vld [vmem:[%s18769_s11 + $0x50] sm:$0xff] }
 0x548   : > { %11611 = vmatmul.msk.bf16.gmra.mxu2 %vm645_vm0, %v3451_v22  ;;  %v14059_v56 = vpop.f32.mrf.mxu1  ;;  %v4285_v60 = vor.u32 %v4284_v61, %v4283_v52  ;;  %v4983_v35 = vor.u32 %v4982_v6, %v4981_v12  ;;  %4653 = vmatpush.bf16.msra.mxu3 %v12490_v38 }
 0x549   : > { %v3340_v61 = vunpack.c.l.b16 %v3252_v58 }
 0x54a   : > { %v14065_v30 = vsel %vm1704_vm13, %v4281_v46, %v4285_v60  ;;  %v14068_v8 = vsel %vm2368_vm15, %v4979_v26, %v4983_v35 }
 0x54b   : > { %v3599_v48 = vpop.f32.mrf.mxu2  ;;  %v3955_v45 = vpop.f32.mrf.mxu0  ;;  %18953 = vst [vmem:[#allocation15_spill] sm:$0xff] %v14068_v8  ;;  %v2946_v8 = vld [vmem:[%s18761_s3 + $0xa0] sm:$0x7] }
 0x54c   : > { %v3747_v9 = vadd.f32 %v14006_v62, %v3599_v48  ;;  %v3180_v50 = vpop.f32.mrf.mxu3  ;;  %v3033_v20 = vunpack.c.l.b16 %v2946_v8 }
 0x54d   : > { %v3253_v22 = vpack.c.bf16 %v3180_v50, %v3180_v50 }
 0x54e   : > { %v14074_v52 = vadd.f32 %v3953_v14, %v3747_v9 }
 0x54f   : > { %v3341_v12 = vunpack.c.l.b16 %v3253_v22 }
 0x550   : > { %18954 = vst [vmem:[#allocation16_spill] sm:$0xff] %v14074_v52  ;;  %v14076_v46 = vpop.f32.mrf.mxu1 }
 0x551   : > { %v14081_v26 = vpack.c.b16 %v3341_v12, %v3340_v61  ;;  %11589 = vmatmul.msk.bf16.gmra.mxu3 %vm3055_vm2, %v12479_v21  ;;  %v3454_v61 = vor.u32 %v3452_v10, %v3450_v32 }
 0x553   : > { %v3601_v62 = vpop.f32.mrf.mxu2  ;;  %11639 = vmatmul.msk.bf16.gmra.mxu1 %vm645_vm0, %v14081_v26  ;;  %v3958_v6 = vpop.f32.mrf.mxu0  ;;  %v3860_v14 = vrot.slane %v14081_v26, 1  ;;  %v3456_v15 = vshll.u32 %v14081_v26, 16  ;;  %v3460_v58 = vshrl.u32 %v14081_v26, 16  ;;  %v4560_v48 = vrot.slane %v14081_v26, 2 }
 0x554   : > { %v3749_v9 = vadd.f32 %v14023_v17, %v3601_v62  ;;  %v3183_v50 = vpop.f32.mrf.mxu3  ;;  %v5260_v22 = vrot.slane %v14081_v26, 3 }
 0x555   : > { %v14093_v21 = vsel %vm1307_vm10, %v3858_v24, %v3860_v14  ;;  %v3458_v12 = vrot.slane %v3456_v15, 1  ;;  %v14096_v38 = vsel %vm1979_vm12, %v4558_v51, %v4560_v48  ;;  %v4287_v55 = vrot.slane %v3460_v58, 1 }
 0x556   : > { %18955 = vst [vmem:[#allocation17_spill] sm:$0xff] %v14093_v21  ;;  %11668 = vmatmul.msk.bf16.gmra.mxu0 %vm645_vm0, %v14093_v21  ;;  %v4288_v17 = vrot.slane %v3456_v15, 2  ;;  %v14103_v62 = vadd.f32 %v3955_v45, %v3749_v9  ;;  %v14106_v26 = vsel %vm2603_vm14, %v5258_v53, %v5260_v22  ;;  %v4985_v10 = vrot.slane %v3460_v58, 2 }
 0x557   : > { %18957 = vst [vmem:[#allocation19_spill] sm:$0xff] %v14106_v26  ;;  %v3459_v24 = vsel %vm1057_vm11, %v3454_v61, %v3458_v12  ;;  %v4986_v13 = vrot.slane %v3456_v15, 3  ;;  %v3254_v23 = vpack.c.bf16 %v3183_v50, %v3183_v50 }
 0x558   : > { %18956 = vst [vmem:[#allocation18_spill] sm:$0xff] %v14103_v62  ;;  %11612 = vmatmul.msk.bf16.gmra.mxu2 %vm645_vm0, %v3459_v24  ;;  %v14110_v51 = vpop.f32.mrf.mxu1  ;;  %v4289_v32 = vor.u32 %v4288_v17, %v4287_v55  ;;  %v3054_v24 = vpack.c.b16 %v3033_v20, %v3033_v20 }
 0x559   : > { %v4987_v29 = vor.u32 %v4986_v13, %v4985_v10  ;;  %v3342_v55 = vunpack.c.l.b16 %v3254_v23 }
 0x55a   : > { %v14113_v7 = vsel %vm1704_vm13, %v4285_v60, %v4289_v32 }
 0x55b   : > { %v3604_v45 = vpop.f32.mrf.mxu2  ;;  %v3960_v9 = vpop.f32.mrf.mxu0  ;;  %v14117_v61 = vsel %vm2368_vm15, %v4983_v35, %v4987_v29 }
 0x55c   : > { %v3752_v53 = vadd.f32 %v14034_v27, %v3604_v45  ;;  %v3185_v26 = vpop.f32.mrf.mxu3  ;;  %18958 = vst [vmem:[#allocation20_spill] sm:$0xff] %v14117_v61 }
 0x55d   : > { %v3255_v43 = vpack.c.bf16 %v3185_v26, %v3185_v26 }
 0x55e   : > { %v14119_v59 = vadd.f32 %v3958_v6, %v3752_v53 }
 0x55f   : > { %v3343_v15 = vunpack.c.l.b16 %v3255_v43  ;;  %v3462_v43 = vor.u32 %v3460_v58, %v3458_v12 }
 0x560   : > { %18959 = vst [vmem:[#allocation21_spill] sm:$0xff] %v14119_v59  ;;  %v14121_v8 = vpop.f32.mrf.mxu1 }
 0x561   : > { %v3368_v60 = vpack.c.b16 %v3343_v15, %v3342_v55  ;;  %11590 = vmatmul.msk.bf16.gmra.mxu3 %vm3055_vm2, %v3054_v24 }
 0x563   : > { %v3606_v13 = vpop.f32.mrf.mxu2  ;;  %11640 = vmatmul.msk.bf16.gmra.mxu1 %vm645_vm0, %v3368_v60  ;;  %v3963_v50 = vpop.f32.mrf.mxu0  ;;  %v3862_v27 = vrot.slane %v3368_v60, 1  ;;  %v3464_v17 = vshll.u32 %v3368_v60, 16  ;;  %v3468_v10 = vshrl.u32 %v3368_v60, 16  ;;  %v4562_v35 = vrot.slane %v3368_v60, 2 }
 0x564   : > { %v3754_v26 = vadd.f32 %v14059_v56, %v3606_v13  ;;  %v3188_v20 = vpop.f32.mrf.mxu3  ;;  %v5262_v6 = vrot.slane %v3368_v60, 3 }
 0x565   : > { %v14127_v23 = vsel %vm1307_vm10, %v3860_v14, %v3862_v27  ;;  %v3466_v45 = vrot.slane %v3464_v17, 1  ;;  %v14130_v53 = vsel %vm1979_vm12, %v4560_v48, %v4562_v35  ;;  %v4291_v24 = vrot.slane %v3468_v10, 1 }
 0x566   : > { %18960 = vst [vmem:[#allocation22_spill] sm:$0xff] %v14127_v23  ;;  %11669 = vmatmul.msk.bf16.gmra.mxu0 %vm645_vm0, %v14127_v23  ;;  %v4292_v55 = vrot.slane %v3464_v17, 2  ;;  %v14134_v15 = vadd.f32 %v3960_v9, %v3754_v26  ;;  %v14137_v61 = vsel %vm2603_vm14, %v5260_v22, %v5262_v6  ;;  %v4989_v60 = vrot.slane %v3468_v10, 2 }
 0x567   : > { %18962 = vst [vmem:[#allocation24_spill] sm:$0xff] %v14137_v61  ;;  %v3467_v56 = vsel %vm1057_vm11, %v3462_v43, %v3466_v45  ;;  %v4990_v48 = vrot.slane %v3464_v17, 3  ;;  %v3256_v42 = vpack.c.bf16 %v3188_v20, %v3188_v20 }
 0x568   : > { %18961 = vst [vmem:[#allocation23_spill] sm:$0xff] %v14134_v15  ;;  %11613 = vmatmul.msk.bf16.gmra.mxu2 %vm645_vm0, %v3467_v56  ;;  %v14141_v14 = vpop.f32.mrf.mxu1  ;;  %v4293_v58 = vor.u32 %v4292_v55, %v4291_v24 }
 0x569   : > { %v4991_v13 = vor.u32 %v4990_v48, %v4989_v60  ;;  %v3344_v56 = vunpack.c.l.b16 %v3256_v42  ;;  %v3470_v60 = vor.u32 %v3468_v10, %v3466_v45 }
 0x56a   : > { %v14144_v12 = vsel %vm1704_vm13, %v4289_v32, %v4293_v58 }
 0x56b   : > { %v3609_v19 = vpop.f32.mrf.mxu2  ;;  %v3965_v9 = vpop.f32.mrf.mxu0  ;;  %v14148_v61 = vsel %vm2368_vm15, %v4987_v29, %v4991_v13 }
 0x56c   : > { %v3757_v26 = vadd.f32 %v14076_v46, %v3609_v19  ;;  %v3190_v22 = vpop.f32.mrf.mxu3  ;;  %18963 = vst [vmem:[#allocation25_spill] sm:$0xff] %v14148_v61 }
 0x56d   : > { %v3257_v43 = vpack.c.bf16 %v3190_v22, %v3190_v22 }
 0x56e   : > { %v14150_v54 = vadd.f32 %v3963_v50, %v3757_v26 }
 0x56f   : > { %v3345_v5 = vunpack.c.l.b16 %v3257_v43 }
 0x570   : > { %18964 = vst [vmem:[#allocation26_spill] sm:$0xff] %v14150_v54  ;;  %v14152_v24 = vpop.f32.mrf.mxu1 }
 0x571   : > { %v14154_v17 = vpack.c.b16 %v3345_v5, %v3344_v56  ;;  %11749 = vmatmul.msk.bf16.vlgmr.msra.gmra.mxu3 %vm645_vm0, %v13868_v49 }
 0x573   : > { %v3611_v32 = vpop.f32.mrf.mxu2  ;;  %11641 = vmatmul.msk.bf16.gmra.mxu1 %vm645_vm0, %v14154_v17  ;;  %v3968_v19 = vpop.f32.mrf.mxu0  ;;  %v3864_v29 = vrot.slane %v14154_v17, 1  ;;  %v3472_v46 = vshll.u32 %v14154_v17, 16  ;;  %v3476_v50 = vshrl.u32 %v14154_v17, 16  ;;  %v4564_v42 = vrot.slane %v14154_v17, 2 }
 0x574   : > { %v3759_v20 = vadd.f32 %v14110_v51, %v3611_v32  ;;  %v3193_v5 = vpop.f32.mrf.mxu3  ;;  %v5264_v55 = vrot.slane %v14154_v17, 3 }
 0x575   : > { %v14167_v49 = vsel %vm1307_vm10, %v3862_v27, %v3864_v29  ;;  %v3474_v48 = vrot.slane %v3472_v46, 1  ;;  %v14170_v26 = vsel %vm1979_vm12, %v4562_v35, %v4564_v42  ;;  %v4295_v22 = vrot.slane %v3476_v50, 1  ;;  %v12486_v27 = vld [vmem:[%s18769_s11 + $0x30] sm:$0xff] }
 0x576   : > { %18965 = vst [vmem:[#allocation27_spill] sm:$0xff] %v14167_v49  ;;  %11670 = vmatmul.msk.bf16.gmra.mxu0 %vm645_vm0, %v14167_v49  ;;  %v4296_v43 = vrot.slane %v3472_v46, 2  ;;  %v14174_v56 = vadd.f32 %v3965_v9, %v3759_v20  ;;  %v14177_v51 = vsel %vm2603_vm14, %v5262_v6, %v5264_v55  ;;  %v4993_v10 = vrot.slane %v3476_v50, 2  ;;  %4119 = vmatpush.bf16.msrb.mxu2 %v12486_v27 }
 0x577   : > { %18967 = vst [vmem:[#allocation29_spill] sm:$0xff] %v14177_v51  ;;  %v3475_v17 = vsel %vm1057_vm11, %v3470_v60, %v3474_v48  ;;  %v4994_v32 = vrot.slane %v3472_v46, 3  ;;  %v3258_v6 = vpack.c.bf16 %v3193_v5, %v3193_v5 }
 0x578   : > { %18966 = vst [vmem:[#allocation28_spill] sm:$0xff] %v14174_v56  ;;  %11614 = vmatmul.msk.bf16.gmra.mxu2 %vm645_vm0, %v3475_v17  ;;  %v14184_v35 = vpop.f32.mrf.mxu1  ;;  %v4297_v45 = vor.u32 %v4296_v43, %v4295_v22 }
 0x579   : > { %v4995_v20 = vor.u32 %v4994_v32, %v4993_v10  ;;  %v3346_v15 = vunpack.c.l.b16 %v3258_v6  ;;  %v3478_v32 = vor.u32 %v3476_v50, %v3474_v48 }
 0x57a   : > { %v14187_v9 = vsel %vm1704_vm13, %v4293_v58, %v4297_v45 }
 0x57b   : > { %18968 = vst [vmem:[#allocation30_spill] sm:$0xff] %v14187_v9  ;;  %v3614_v61 = vpop.f32.mrf.mxu2  ;;  %v3970_v51 = vpop.f32.mrf.mxu0  ;;  %v14191_v54 = vsel %vm2368_vm15, %v4991_v13, %v4995_v20 }
 0x57c   : > { %v3762_v60 = vadd.f32 %v14121_v8, %v3614_v61  ;;  %v3195_v56 = vpop.f32.mrf.mxu3  ;;  %18969 = vst [vmem:[#allocation31_spill] sm:$0xff] %v14191_v54  ;;  %v12488_v61 = vld [vmem:[%s18769_s11 + $0x40] sm:$0xff] }
 0x57d   : > { %v3259_v49 = vpack.c.bf16 %v3195_v56, %v3195_v56  ;;  %4410 = vmatpush.bf16.msra.mxu1 %v12488_v61 }
 0x57e   : > { %v14193_v17 = vadd.f32 %v3968_v19, %v3762_v60 }
 0x57f   : > { %v3347_v22 = vunpack.c.l.b16 %v3259_v49 }
 0x580   : > { %18970 = vst [vmem:[#allocation32_spill] sm:$0xff] %v14193_v17  ;;  %v14195_v46 = vpop.f32.mrf.mxu1 }
 0x581   : > { %v14197_v43 = vpack.c.b16 %v3347_v22, %v3346_v15  ;;  %11750 = vmatmul.msk.bf16.gmra.mxu3 %vm645_vm0, %v13886_v1 }
 0x583   : > { %v3616_v8 = vpop.f32.mrf.mxu2  ;;  %11642 = vmatmul.msk.bf16.gmra.mxu1 %vm645_vm0, %v14197_v43  ;;  %v3973_v58 = vpop.f32.mrf.mxu0  ;;  %v3866_v13 = vrot.slane %v14197_v43, 1  ;;  %v3480_v19 = vshll.u32 %v14197_v43, 16  ;;  %v3484_v5 = vshrl.u32 %v14197_v43, 16  ;;  %v4566_v15 = vrot.slane %v14197_v43, 2 }
 0x584   : > { %v3764_v49 = vadd.f32 %v14141_v14, %v3616_v8  ;;  %v3198_v56 = vpop.f32.mrf.mxu3  ;;  %v5266_v27 = vrot.slane %v14197_v43, 3 }
 0x585   : > { %v14213_v10 = vsel %vm1307_vm10, %v3864_v29, %v3866_v13  ;;  %v3482_v6 = vrot.slane %v3480_v19, 1  ;;  %v14216_v60 = vsel %vm1979_vm12, %v4564_v42, %v4566_v15  ;;  %v4299_v22 = vrot.slane %v3484_v5, 1 }
 0x586   : > { %18971 = vst [vmem:[#allocation33_spill] sm:$0xff] %v14213_v10  ;;  %11671 = vmatmul.msk.bf16.gmra.mxu0 %vm645_vm0, %v14213_v10  ;;  %v4300_v54 = vrot.slane %v3480_v19, 2  ;;  %v14220_v17 = vadd.f32 %v3970_v51, %v3764_v49  ;;  %v14223_v14 = vsel %vm2603_vm14, %v5264_v55, %v5266_v27  ;;  %v4997_v61 = vrot.slane %v3484_v5, 2 }
 0x587   : > { %18973 = vst [vmem:[#allocation35_spill] sm:$0xff] %v14223_v14  ;;  %v3483_v43 = vsel %vm1057_vm11, %v3478_v32, %v3482_v6  ;;  %v4998_v42 = vrot.slane %v3480_v19, 3  ;;  %v3260_v10 = vpack.c.bf16 %v3198_v56, %v3198_v56 }
 0x588   : > { %18972 = vst [vmem:[#allocation34_spill] sm:$0xff] %v14220_v17  ;;  %11615 = vmatmul.msk.bf16.gmra.mxu2 %vm645_vm0, %v3483_v43  ;;  %v14227_v29 = vpop.f32.mrf.mxu1  ;;  %v4301_v50 = vor.u32 %v4300_v54, %v4299_v22 }
 0x589   : > { %v4999_v8 = vor.u32 %v4998_v42, %v4997_v61  ;;  %v3348_v43 = vunpack.c.l.b16 %v3260_v10 }
 0x58a   : > { %v14230_v48 = vsel %vm1704_vm13, %v4297_v45, %v4301_v50 }
 0x58b   : > { %18974 = vst [vmem:[#allocation36_spill] sm:$0xff] %v14230_v48  ;;  %v3619_v59 = vpop.f32.mrf.mxu2  ;;  %v3975_v51 = vpop.f32.mrf.mxu0  ;;  %v14234_v14 = vsel %vm2368_vm15, %v4995_v20, %v4999_v8 }
 0x58c   : > { %v3767_v49 = vadd.f32 %v14152_v24, %v3619_v59  ;;  %v3200_v55 = vpop.f32.mrf.mxu3  ;;  %18975 = vst [vmem:[#allocation37_spill] sm:$0xff] %v14234_v14 }
 0x58d   : > { %v3261_v32 = vpack.c.bf16 %v3200_v55, %v3200_v55 }
 0x58e   : > { %v14236_v17 = vadd.f32 %v3973_v58, %v3767_v49  ;;  %v3486_v49 = vor.u32 %v3484_v5, %v3482_v6 }
 0x58f   : > { %v3349_v23 = vunpack.c.l.b16 %v3261_v32 }
 0x590   : > { %18976 = vst [vmem:[#allocation38_spill] sm:$0xff] %v14236_v17  ;;  %v14238_v54 = vpop.f32.mrf.mxu1 }
 0x591   : > { %v3371_v19 = vpack.c.b16 %v3349_v23, %v3348_v43  ;;  %11751 = vmatmul.msk.bf16.gmra.mxu3 %vm645_vm0, %v13916_v11 }
 0x593   : > { %v3621_v45 = vpop.f32.mrf.mxu2  ;;  %11643 = vmatmul.msk.bf16.gmra.mxu1 %vm645_vm0, %v3371_v19  ;;  %v3978_v56 = vpop.f32.mrf.mxu0  ;;  %v3868_v59 = vrot.slane %v3371_v19, 1  ;;  %v3488_v24 = vshll.u32 %v3371_v19, 16  ;;  %v3492_v22 = vshrl.u32 %v3371_v19, 16  ;;  %v4568_v20 = vrot.slane %v3371_v19, 2 }
 0x594   : > { %v3769_v61 = vadd.f32 %v14184_v35, %v3621_v45  ;;  %v3203_v58 = vpop.f32.mrf.mxu3  ;;  %v5268_v42 = vrot.slane %v3371_v19, 3 }
 0x595   : > { %v14245_v10 = vsel %vm1307_vm10, %v3866_v13, %v3868_v59  ;;  %v3490_v23 = vrot.slane %v3488_v24, 1  ;;  %v14248_v55 = vsel %vm1979_vm12, %v4566_v15, %v4568_v20  ;;  %v4303_v32 = vrot.slane %v3492_v22, 1 }
 0x596   : > { %18977 = vst [vmem:[#allocation39_spill] sm:$0xff] %v14245_v10  ;;  %11672 = vmatmul.msk.bf16.gmra.mxu0 %vm645_vm0, %v14245_v10  ;;  %v4304_v43 = vrot.slane %v3488_v24, 2  ;;  %v14252_v14 = vadd.f32 %v3975_v51, %v3769_v61  ;;  %v14255_v17 = vsel %vm2603_vm14, %v5266_v27, %v5268_v42  ;;  %v5001_v19 = vrot.slane %v3492_v22, 2 }
 0x597   : > { %18979 = vst [vmem:[#allocation41_spill] sm:$0xff] %v14255_v17  ;;  %v3491_v35 = vsel %vm1057_vm11, %v3486_v49, %v3490_v23  ;;  %v5002_v15 = vrot.slane %v3488_v24, 3  ;;  %v3262_v10 = vpack.c.bf16 %v3203_v58, %v3203_v58 }
 0x598   : > { %18978 = vst [vmem:[#allocation40_spill] sm:$0xff] %v14252_v14  ;;  %11616 = vmatmul.msk.bf16.gmra.mxu2 %vm645_vm0, %v3491_v35  ;;  %v14259_v13 = vpop.f32.mrf.mxu1  ;;  %v4305_v5 = vor.u32 %v4304_v43, %v4303_v32 }
 0x599   : > { %v5003_v45 = vor.u32 %v5002_v15, %v5001_v19  ;;  %v3350_v35 = vunpack.c.l.b16 %v3262_v10 }
 0x59a   : > { %v14262_v6 = vsel %vm1704_vm13, %v4301_v50, %v4305_v5 }
 0x59b   : > { %18980 = vst [vmem:[#allocation42_spill] sm:$0xff] %v14262_v6  ;;  %v3624_v48 = vpop.f32.mrf.mxu2  ;;  %v3980_v51 = vpop.f32.mrf.mxu0  ;;  %v14266_v17 = vsel %vm2368_vm15, %v4999_v8, %v5003_v45 }
 0x59c   : > { %v3772_v61 = vadd.f32 %v14195_v46, %v3624_v48  ;;  %v3205_v27 = vpop.f32.mrf.mxu3  ;;  %18981 = vst [vmem:[#allocation43_spill] sm:$0xff] %v14266_v17 }
 0x59d   : > { %v3263_v49 = vpack.c.bf16 %v3205_v27, %v3205_v27 }
 0x59e   : > { %v14268_v14 = vadd.f32 %v3978_v56, %v3772_v61  ;;  %v3494_v61 = vor.u32 %v3492_v22, %v3490_v23 }
 0x59f   : > { %v3351_v62 = vunpack.c.l.b16 %v3263_v49 }
 0x5a0   : > { %18982 = vst [vmem:[#allocation44_spill] sm:$0xff] %v14268_v14  ;;  %v14270_v32 = vpop.f32.mrf.mxu1 }
 0x5a1   : > { %v3372_v24 = vpack.c.b16 %v3351_v62, %v3350_v35  ;;  %11752 = vmatmul.msk.bf16.gmra.mxu3 %vm645_vm0, %v13940_v37 }
 0x5a3   : > { %v3626_v50 = vpop.f32.mrf.mxu2  ;;  %11644 = vmatmul.msk.bf16.gmra.mxu1 %vm645_vm0, %v3372_v24  ;;  %v3983_v58 = vpop.f32.mrf.mxu0  ;;  %v3870_v46 = vrot.slane %v3372_v24, 1  ;;  %v3496_v48 = vshll.u32 %v3372_v24, 16  ;;  %v3500_v43 = vshrl.u32 %v3372_v24, 16  ;;  %v4570_v8 = vrot.slane %v3372_v24, 2 }
 0x5a4   : > { %v3774_v19 = vadd.f32 %v14227_v29, %v3626_v50  ;;  %v3208_v56 = vpop.f32.mrf.mxu3  ;;  %v5270_v15 = vrot.slane %v3372_v24, 3 }
 0x5a5   : > { %v14277_v10 = vsel %vm1307_vm10, %v3868_v59, %v3870_v46  ;;  %v3498_v62 = vrot.slane %v3496_v48, 1  ;;  %v14280_v27 = vsel %vm1979_vm12, %v4568_v20, %v4570_v8  ;;  %v4307_v49 = vrot.slane %v3500_v43, 1 }
 0x5a6   : > { %18983 = vst [vmem:[#allocation45_spill] sm:$0xff] %v14277_v10  ;;  %11673 = vmatmul.msk.bf16.gmra.mxu0 %vm645_vm0, %v14277_v10  ;;  %v4308_v35 = vrot.slane %v3496_v48, 2  ;;  %v14284_v17 = vadd.f32 %v3980_v51, %v3774_v19  ;;  %v14287_v14 = vsel %vm2603_vm14, %v5268_v42, %v5270_v15  ;;  %v5005_v24 = vrot.slane %v3500_v43, 2 }
 0x5a7   : > { %18985 = vst [vmem:[#allocation47_spill] sm:$0xff] %v14287_v14  ;;  %v3499_v29 = vsel %vm1057_vm11, %v3494_v61, %v3498_v62  ;;  %v5006_v20 = vrot.slane %v3496_v48, 3  ;;  %v3264_v10 = vpack.c.bf16 %v3208_v56, %v3208_v56 }
 0x5a8   : > { %18984 = vst [vmem:[#allocation46_spill] sm:$0xff] %v14284_v17  ;;  %11617 = vmatmul.msk.bf16.gmra.mxu2 %vm645_vm0, %v3499_v29  ;;  %v14291_v59 = vpop.f32.mrf.mxu1  ;;  %v4309_v22 = vor.u32 %v4308_v35, %v4307_v49 }
 0x5a9   : > { %v5007_v50 = vor.u32 %v5006_v20, %v5005_v24  ;;  %v3352_v29 = vunpack.c.l.b16 %v3264_v10  ;;  %v3502_v20 = vor.u32 %v3500_v43, %v3498_v62 }
 0x5aa   : > { %v14294_v23 = vsel %vm1704_vm13, %v4305_v5, %v4309_v22 }
 0x5ab   : > { %18986 = vst [vmem:[#allocation48_spill] sm:$0xff] %v14294_v23  ;;  %v3629_v6 = vpop.f32.mrf.mxu2  ;;  %v3985_v51 = vpop.f32.mrf.mxu0  ;;  %v14298_v14 = vsel %vm2368_vm15, %v5003_v45, %v5007_v50 }
 0x5ac   : > { %v3777_v19 = vadd.f32 %v14238_v54, %v3629_v6  ;;  %v3210_v42 = vpop.f32.mrf.mxu3  ;;  %18987 = vst [vmem:[#allocation49_spill] sm:$0xff] %v14298_v14 }
 0x5ad   : > { %v3265_v61 = vpack.c.bf16 %v3210_v42, %v3210_v42 }
 0x5ae   : > { %v14300_v17 = vadd.f32 %v3983_v58, %v3777_v19 }
 0x5af   : > { %v3353_v9 = vunpack.c.l.b16 %v3265_v61 }
 0x5b0   : > { %18988 = vst [vmem:[#allocation50_spill] sm:$0xff] %v14300_v17  ;;  %v14302_v49 = vpop.f32.mrf.mxu1 }
 0x5b1   : > { %v14304_v48 = vpack.c.b16 %v3353_v9, %v3352_v29  ;;  %11753 = vmatmul.msk.bf16.gmra.mxu3 %vm645_vm0, %v13964_v33 }
 0x5b3   : > { %v3631_v5 = vpop.f32.mrf.mxu2  ;;  %11645 = vmatmul.msk.bf16.gmra.mxu1 %vm645_vm0, %v14304_v48  ;;  %v3988_v54 = vpop.f32.mrf.mxu0  ;;  %v3872_v6 = vrot.slane %v14304_v48, 1  ;;  %v3504_v45 = vshll.u32 %v14304_v48, 16  ;;  %v3508_v58 = vshrl.u32 %v14304_v48, 16  ;;  %v4572_v56 = vrot.slane %v14304_v48, 2 }
 0x5b4   : > { %v3779_v10 = vadd.f32 %v14259_v13, %v3631_v5  ;;  %v3213_v9 = vpop.f32.mrf.mxu3  ;;  %v5272_v35 = vrot.slane %v14304_v48, 3 }
 0x5b5   : > { %v14317_v24 = vsel %vm1307_vm10, %v3870_v46, %v3872_v6  ;;  %v3506_v19 = vrot.slane %v3504_v45, 1  ;;  %v14320_v42 = vsel %vm1979_vm12, %v4570_v8, %v4572_v56  ;;  %v4311_v61 = vrot.slane %v3508_v58, 1 }
 0x5b6   : > { %18989 = vst [vmem:[#allocation51_spill] sm:$0xff] %v14317_v24  ;;  %11674 = vmatmul.msk.bf16.gmra.mxu0 %vm645_vm0, %v14317_v24  ;;  %v4312_v29 = vrot.slane %v3504_v45, 2  ;;  %v14324_v14 = vadd.f32 %v3985_v51, %v3779_v10  ;;  %v14327_v13 = vsel %vm2603_vm14, %v5270_v15, %v5272_v35  ;;  %v5009_v5 = vrot.slane %v3508_v58, 2 }
 0x5b7   : > { %18991 = vst [vmem:[#allocation53_spill] sm:$0xff] %v14327_v13  ;;  %v3507_v48 = vsel %vm1057_vm11, %v3502_v20, %v3506_v19  ;;  %v5010_v8 = vrot.slane %v3504_v45, 3  ;;  %v3266_v24 = vpack.c.bf16 %v3213_v9, %v3213_v9 }
 0x5b8   : > { %18990 = vst [vmem:[#allocation52_spill] sm:$0xff] %v14324_v14  ;;  %11618 = vmatmul.msk.bf16.gmra.mxu2 %vm645_vm0, %v3507_v48  ;;  %v14331_v46 = vpop.f32.mrf.mxu1  ;;  %v4313_v43 = vor.u32 %v4312_v29, %v4311_v61 }
 0x5b9   : > { %v5011_v17 = vor.u32 %v5010_v8, %v5009_v5  ;;  %v3354_v48 = vunpack.c.l.b16 %v3266_v24  ;;  %v3510_v5 = vor.u32 %v3508_v58, %v3506_v19  ;;  %v12492_v8 = vld [vmem:[%s18769_s11 + $0x60] sm:$0xff] }
 0x5ba   : > { %v14334_v62 = vsel %vm1704_vm13, %v4309_v22, %v4313_v43 }
 0x5bb   : > { %18992 = vst [vmem:[#allocation54_spill] sm:$0xff] %v14334_v62  ;;  %v3634_v23 = vpop.f32.mrf.mxu2  ;;  %v3990_v51 = vpop.f32.mrf.mxu0  ;;  %v14338_v13 = vsel %vm2368_vm15, %v5007_v50, %v5011_v17 }
 0x5bc   : > { %v3782_v10 = vadd.f32 %v14270_v32, %v3634_v23  ;;  %v3215_v15 = vpop.f32.mrf.mxu3  ;;  %18993 = vst [vmem:[#allocation55_spill] sm:$0xff] %v14338_v13  ;;  %v12493_v32 = vld [vmem:[%s18769_s11 + $0x68] sm:$0xff] }
 0x5bd   : > { %v3267_v20 = vpack.c.bf16 %v3215_v15, %v3215_v15  ;;  %4820 = vmatpush.bf16.msrb.mxu0 %v12493_v32 }
 0x5be   : > { %v14340_v14 = vadd.f32 %v3988_v54, %v3782_v10 }
 0x5bf   : > { %v3355_v52 = vunpack.c.l.b16 %v3267_v20 }
 0x5c0   : > { %18994 = vst [vmem:[#allocation56_spill] sm:$0xff] %v14340_v14  ;;  %v14342_v61 = vpop.f32.mrf.mxu1 }
 0x5c1   : > { %v14344_v45 = vpack.c.b16 %v3355_v52, %v3354_v48  ;;  %11754 = vmatmul.msk.bf16.gmra.mxu3 %vm645_vm0, %v13988_v3  ;;  %4821 = vmatpush.bf16.msrb.mxu0 %v12492_v8 }
 0x5c3   : > { %v3636_v22 = vpop.f32.mrf.mxu2  ;;  %11646 = vmatmul.msk.bf16.gmra.mxu1 %vm645_vm0, %v14344_v45  ;;  %v3993_v23 = vpop.f32.mrf.mxu0  ;;  %v3874_v50 = vrot.slane %v14344_v45, 1  ;;  %v3512_v54 = vshll.u32 %v14344_v45, 16  ;;  %v3516_v9 = vshrl.u32 %v14344_v45, 16  ;;  %v4574_v52 = vrot.slane %v14344_v45, 2 }
 0x5c4   : > { %v3784_v24 = vadd.f32 %v14291_v59, %v3636_v22  ;;  %v3218_v29 = vpop.f32.mrf.mxu3  ;;  %v5274_v10 = vrot.slane %v14344_v45, 3 }
 0x5c5   : > { %v3268_v15 = vpack.c.bf16 %v3218_v29, %v3218_v29  ;;  %v14363_v20 = vsel %vm1307_vm10, %v3872_v6, %v3874_v50  ;;  %v3514_v48 = vrot.slane %v3512_v54, 1  ;;  %v14366_v13 = vsel %vm1979_vm12, %v4572_v56, %v4574_v52 }
 0x5c6   : > { %18995 = vst [vmem:[#allocation57_spill] sm:$0xff] %v14363_v20  ;;  %11675 = vmatmul.msk.bf16.gmra.mxu0 %vm645_vm0, %v14363_v20  ;;  %v4315_v59 = vrot.slane %v3516_v9, 1  ;;  %v4316_v32 = vrot.slane %v3512_v54, 2  ;;  %v14370_v58 = vadd.f32 %v3990_v51, %v3784_v24  ;;  %v14373_v19 = vsel %vm2603_vm14, %v5272_v35, %v5274_v10 }
 0x5c7   : > { %18997 = vst [vmem:[#allocation59_spill] sm:$0xff] %v14373_v19  ;;  %v3356_v22 = vunpack.c.l.b16 %v3268_v15  ;;  %v3515_v45 = vsel %vm1057_vm11, %v3510_v5, %v3514_v48  ;;  %v5013_v6 = vrot.slane %v3516_v9, 2  ;;  %v5014_v14 = vrot.slane %v3512_v54, 3 }
 0x5c8   : > { %18996 = vst [vmem:[#allocation58_spill] sm:$0xff] %v14370_v58  ;;  %11619 = vmatmul.msk.bf16.gmra.mxu2 %vm645_vm0, %v3515_v45  ;;  %v14377_v29 = vpop.f32.mrf.mxu1  ;;  %v4317_v56 = vor.u32 %v4316_v32, %v4315_v59 }
 0x5c9   : > { %v3375_v62 = vpack.c.b16 %v3356_v22, %v3356_v22  ;;  %v5015_v51 = vor.u32 %v5014_v14, %v5013_v6 }
 0x5ca   : > { %v14380_v20 = vsel %vm1704_vm13, %v4313_v43, %v4317_v56 }
 0x5cb   : > { %18998 = vst [vmem:[#allocation60_spill] sm:$0xff] %v14380_v20  ;;  %v3639_v24 = vpop.f32.mrf.mxu2  ;;  %v3995_v58 = vpop.f32.mrf.mxu0  ;;  %v14384_v5 = vsel %vm2368_vm15, %v5011_v17, %v5015_v51  ;;  %v3520_v19 = vshll.u32 %v3375_v62, 16  ;;  %v3876_v59 = vrot.slane %v3375_v62, 1 }
 0x5cc   : > { %v3787_v35 = vadd.f32 %v14302_v49, %v3639_v24  ;;  %v3220_v15 = vpop.f32.mrf.mxu3  ;;  %18999 = vst [vmem:[#allocation61_spill] sm:$0xff] %v14384_v5 }
 0x5cd   : > { %v3269_v8 = vpack.c.bf16 %v3220_v15, %v3220_v15  ;;  %v3522_v14 = vrot.slane %v3520_v19, 1  ;;  %v3877_v24 = vsel %vm1307_vm10, %v3874_v50, %v3876_v59 }
 0x5ce   : > { %v14386_v45 = vadd.f32 %v3993_v23, %v3787_v35  ;;  %v3518_v35 = vor.u32 %v3516_v9, %v3514_v48 }
 0x5cf   : > { %v4086_v21 = vunpack.c.l.b16 %v3269_v8 }
 0x5d0   : > { %19000 = vst [vmem:[#allocation62_spill] sm:$0xff] %v14386_v45  ;;  %v14388_v54 = vpop.f32.mrf.mxu1  ;;  %v3523_v48 = vsel %vm1057_vm11, %v3518_v35, %v3522_v14 }
 0x5d1   : > { %v14390_v32 = vpack.c.b16 %v4086_v21, %v3356_v22  ;;  %11755 = vmatmul.msk.bf16.gmra.mxu3 %vm645_vm0, %v14014_v63 }
 0x5d3   : > { %v3641_v43 = vpop.f32.mrf.mxu2  ;;  %v3998_v49 = vpop.f32.mrf.mxu0  ;;  %11719 = vmatmul.msk.bf16.vlgmr.msra.gmra.mxu1 %vm645_vm0, %v13875_v34  ;;  %v4576_v17 = vrot.slane %v14390_v32, 2  ;;  %v4320_v23 = vshrl.u32 %v14390_v32, 16  ;;  %v4323_v6 = vshll.u32 %v14390_v32, 16  ;;  %v4090_v62 = vrot.slane %v14390_v32, 1 }
 0x5d4   : > { %v3789_v21 = vadd.f32 %v14331_v46, %v3641_v43  ;;  %v3223_v22 = vpop.f32.mrf.mxu3  ;;  %v5276_v19 = vrot.slane %v14390_v32, 3 }
 0x5d5   : > { %v3270_v15 = vpack.c.bf16 %v3223_v22, %v3223_v22  ;;  %v14404_v8 = vsel %vm1979_vm12, %v4574_v52, %v4576_v17  ;;  %v4322_v34 = vrot.slane %v4320_v23, 1  ;;  %v4325_v5 = vrot.slane %v4323_v6, 2 }
 0x5d6   : > { %11676 = vmatmul.msk.bf16.gmra.mxu0 %vm645_vm0, %v3877_v24  ;;  %v14408_v45 = vsel %vm1307_vm10, %v3874_v50, %v4090_v62  ;;  %v14410_v20 = vadd.f32 %v3995_v58, %v3789_v21  ;;  %v14413_v46 = vsel %vm2603_vm14, %v5274_v10, %v5276_v19  ;;  %v5017_v59 = vrot.slane %v4320_v23, 2 }
 0x5d7   : > { %19001 = vst [vmem:[#allocation63_spill] sm:$0xff] %v14408_v45  ;;  %v4087_v9 = vunpack.c.l.b16 %v3270_v15  ;;  %v4326_v32 = vor.u32 %v4325_v5, %v4322_v34  ;;  %v5018_v43 = vrot.slane %v4323_v6, 3 }
 0x5d8   : > { %19002 = vst [vmem:[#allocation64_spill] sm:$0xff] %v14410_v20  ;;  %11620 = vmatmul.msk.bf16.gmra.mxu2 %vm645_vm0, %v3523_v48  ;;  %v3798_v52 = vpop.f32.mrf.mxu1 }
 0x5d9   : > { %19003 = vst [vmem:[#allocation65_spill] sm:$0xff] %v14413_v46  ;;  %v4089_v22 = vpack.c.b16 %v4087_v9, %v4087_v9  ;;  %v14418_v24 = vsel %vm1704_vm13, %v4317_v56, %v4326_v32  ;;  %v5019_v50 = vor.u32 %v5018_v43, %v5017_v59 }
 0x5da   : > { %19004 = vst [vmem:[#allocation66_spill] sm:$0xff] %v14418_v24 }
 0x5db   : > { %v3644_v45 = vpop.f32.mrf.mxu2  ;;  %v4000_v58 = vpop.f32.mrf.mxu0  ;;  %v4578_v21 = vrot.slane %v4089_v22, 2  ;;  %v4329_v20 = vshrl.u32 %v4089_v22, 16  ;;  %v4332_v10 = vshll.u32 %v4089_v22, 16  ;;  %v4092_v46 = vrot.slane %v4089_v22, 1 }
 0x5dc   : > { %v3792_v23 = vadd.f32 %v14342_v61, %v3644_v45  ;;  %v3225_v15 = vpop.f32.mrf.mxu3  ;;  %v14422_v5 = vsel %vm2368_vm15, %v5015_v51, %v5019_v50 }
 0x5dd   : > { %v3271_v14 = vpack.c.bf16 %v3225_v15, %v3225_v15  ;;  %v14425_v6 = vsel %vm1979_vm12, %v4576_v17, %v4578_v21  ;;  %v4331_v35 = vrot.slane %v4329_v20, 1  ;;  %v4334_v56 = vrot.slane %v4332_v10, 2 }
 0x5de   : > { %v14428_v34 = vsel %vm1307_vm10, %v4090_v62, %v4092_v46  ;;  %v14430_v59 = vadd.f32 %v3998_v49, %v3792_v23 }
 0x5df   : > { %v4788_v48 = vunpack.c.l.b16 %v3271_v14  ;;  %v4335_v43 = vor.u32 %v4334_v56, %v4331_v35 }
 0x5e0   : > { %v3801_v22 = vpop.f32.mrf.mxu1 }
 0x5e1   : > { %v14432_v24 = vpack.c.b16 %v4788_v48, %v4087_v9  ;;  %11756 = vmatmul.msk.bf16.gmra.mxu3 %vm645_vm0, %v14052_v2  ;;  %v14437_v61 = vsel %vm1704_vm13, %v4326_v32, %v4335_v43 }
 0x5e3   : > { %v3646_v51 = vpop.f32.mrf.mxu2  ;;  %v4003_v45 = vpop.f32.mrf.mxu0  ;;  %11720 = vmatmul.msk.bf16.gmra.mxu1 %vm645_vm0, %v13899_v40  ;;  %v18794_v20 = vrot.slane %v14432_v24, 2  ;;  %v18793_v49 = vrot.slane %v14432_v24, 3  ;;  %v5022_v62 = vshrl.u32 %v14432_v24, 16  ;;  %v5025_v46 = vshll.u32 %v14432_v24, 16 }
 0x5e4   : > { %v3794_v9 = vadd.f32 %v14377_v29, %v3646_v51  ;;  %v14446_v21 = vpop.f32.mrf.mxu3 }
 0x5e5   : > { %v14451_v32 = vsel %vm1979_vm12, %v4576_v17, %v18794_v20  ;;  %v14456_v40 = vsel %vm2603_vm14, %v5276_v19, %v18793_v49  ;;  %v5024_v10 = vrot.slane %v5022_v62, 2  ;;  %v5027_v15 = vrot.slane %v5025_v46, 3 }
 0x5e6   : > { %11779 = vmatmul.msk.bf16.vlgmr.msrb.gmra.mxu0 %vm645_vm0, %v13886_v1  ;;  %v14460_v23 = vadd.f32 %v4000_v58, %v3794_v9 }
 0x5e7   : > { %v14464_v14 = vor.u32 %v5027_v15, %v5024_v10  ;;  %v12495_v15 = vld [vmem:[%s18769_s11 + $0x78] sm:$0xff] }
 0x5e8   : > { %v3803_v29 = vpop.f32.mrf.mxu1  ;;  %11689 = vmatmul.msk.bf16.vlgmr.msrb.gmra.mxu2 %vm645_vm0, %v13865_v57 }
 0x5e9   : > { %19005 = vst [vmem:[#allocation67_spill] sm:$0xff] %v14464_v14  ;;  %v14468_v17 = vsel %vm2368_vm15, %v5019_v50, %v14464_v14  ;;  %5111 = vmatpush.bf16.msra.mxu2 %v12495_v15 }
 0x5ea   : > { %19006 = vst [vmem:[#allocation68_spill] sm:$0xff] %v14468_v17 }
 0x5eb   : > { %v3649_v35 = vpop.f32.mrf.mxu2  ;;  %v4005_v19 = vpop.f32.mrf.mxu0 }
 0x5ec   : > { %v3797_v56 = vadd.f32 %v14388_v54, %v3649_v35  ;;  %v3230_v48 = vpop.f32.mrf.mxu3 }
 0x5ee   : > { %v14471_v43 = vadd.f32 %v4003_v45, %v3797_v56 }
 0x5f0   : > { %v3806_v1 = vpop.f32.mrf.mxu1 }
 0x5f1   : > { %11757 = vmatmul.msk.bf16.gmra.mxu3 %vm645_vm0, %v14096_v38 }
 0x5f3   : > { %v3651_v58 = vpop.f32.mrf.mxu2  ;;  %v4008_v51 = vpop.f32.mrf.mxu0  ;;  %11721 = vmatmul.msk.bf16.gmra.mxu1 %vm645_vm0, %v13926_v28 }
 0x5f4   : > { %v3799_v57 = vadd.f32 %v3798_v52, %v3651_v58 }
 0x5f6   : > { %11780 = vmatmul.msk.bf16.gmra.mxu0 %vm645_vm0, %v13916_v11  ;;  %v14479_v50 = vadd.f32 %v4005_v19, %v3799_v57 }
 0x5f8   : > { %v3808_v62 = vpop.f32.mrf.mxu1  ;;  %11690 = vmatmul.msk.bf16.gmra.mxu2 %vm645_vm0, %v13883_v39 }
 0x5fb   : > { %v3654_v54 = vpop.f32.mrf.mxu2  ;;  %v4010_v45 = vpop.f32.mrf.mxu0 }
 0x5fc   : > { %v3802_v46 = vadd.f32 %v3801_v22, %v3654_v54 }
 0x5fe   : > { %v14483_v9 = vadd.f32 %v4008_v51, %v3802_v46 }
 0x600   : > { %v3811_v10 = vpop.f32.mrf.mxu1 }
 0x601   : > { %11758 = vmatmul.msk.bf16.gmra.mxu3 %vm645_vm0, %v14130_v53 }
 0x603   : > { %v3656_v28 = vpop.f32.mrf.mxu2  ;;  %v4013_v52 = vpop.f32.mrf.mxu0  ;;  %11722 = vmatmul.msk.bf16.gmra.mxu1 %vm645_vm0, %v13950_v47  ;;  %v12497_v47 = vld [vmem:[%s18769_s11 + $0x88] sm:$0xff] }
 0x604   : > { %v3804_v11 = vadd.f32 %v3803_v29, %v3656_v28  ;;  %5354 = vmatpush.bf16.msrb.mxu1 %v12497_v47 }
 0x606   : > { %11781 = vmatmul.msk.bf16.gmra.mxu0 %vm645_vm0, %v13940_v37  ;;  %v14494_v39 = vadd.f32 %v4010_v45, %v3804_v11  ;;  %v14505_v37 = vpop.f32.mrf.mxu3 }
 0x608   : > { %v3813_v22 = vpop.f32.mrf.mxu1  ;;  %11691 = vmatmul.msk.bf16.gmra.mxu2 %vm645_vm0, %v13913_v0 }
 0x60b   : > { %v3659_v35 = vpop.f32.mrf.mxu2  ;;  %v4015_v19 = vpop.f32.mrf.mxu0 }
 0x60c   : > { %v3807_v56 = vadd.f32 %v3806_v1, %v3659_v35 }
 0x60e   : > { %v14501_v29 = vadd.f32 %v4013_v52, %v3807_v56  ;;  %v14515_v46 = vpop.f32.mrf.mxu3 }
 0x610   : > { %v3816_v48 = vpop.f32.mrf.mxu1 }
 0x611   : > { %11759 = vmatmul.msk.bf16.gmra.mxu3 %vm645_vm0, %v14170_v26 }
 0x613   : > { %v3661_v58 = vpop.f32.mrf.mxu2  ;;  %v4018_v51 = vpop.f32.mrf.mxu0  ;;  %11723 = vmatmul.msk.bf16.gmra.mxu1 %vm645_vm0, %v13974_v44 }
 0x614   : > { %v3809_v0 = vadd.f32 %v3808_v62, %v3661_v58 }
 0x616   : > { %11782 = vmatmul.msk.bf16.gmra.mxu0 %vm645_vm0, %v13964_v33  ;;  %v14511_v1 = vadd.f32 %v4015_v19, %v3809_v0  ;;  %v14523_v15 = vpop.f32.mrf.mxu3 }
 0x618   : > { %v3818_v57 = vpop.f32.mrf.mxu1  ;;  %11692 = vmatmul.msk.bf16.gmra.mxu2 %vm645_vm0, %v13937_v31 }
 0x61b   : > { %v3664_v54 = vpop.f32.mrf.mxu2  ;;  %v4020_v45 = vpop.f32.mrf.mxu0 }
 0x61c   : > { %v3812_v28 = vadd.f32 %v3811_v10, %v3664_v54 }
 0x61e   : > { %v14517_v52 = vadd.f32 %v4018_v51, %v3812_v28  ;;  %v14533_v58 = vpop.f32.mrf.mxu3 }
 0x620   : > { %v3821_v11 = vpop.f32.mrf.mxu1 }
 0x621   : > { %11760 = vmatmul.msk.bf16.gmra.mxu3 %vm645_vm0, %v14216_v60 }
 0x623   : > { %v3666_v44 = vpop.f32.mrf.mxu2  ;;  %v4023_v62 = vpop.f32.mrf.mxu0  ;;  %11724 = vmatmul.msk.bf16.gmra.mxu1 %vm645_vm0, %v13998_v41 }
 0x624   : > { %v3814_v33 = vadd.f32 %v3813_v22, %v3666_v44 }
 0x626   : > { %11783 = vmatmul.msk.bf16.gmra.mxu0 %vm645_vm0, %v13988_v3  ;;  %v14527_v31 = vadd.f32 %v4020_v45, %v3814_v33  ;;  %v14545_v0 = vpop.f32.mrf.mxu3 }
 0x628   : > { %v3823_v10 = vpop.f32.mrf.mxu1  ;;  %11693 = vmatmul.msk.bf16.gmra.mxu2 %vm645_vm0, %v13961_v36 }
 0x62b   : > { %v3669_v35 = vpop.f32.mrf.mxu2  ;;  %v4025_v19 = vpop.f32.mrf.mxu0 }
 0x62c   : > { %v3817_v56 = vadd.f32 %v3816_v48, %v3669_v35 }
 0x62e   : > { %v14531_v47 = vadd.f32 %v4023_v62, %v3817_v56 }
 0x630   : > { %v3826_v41 = vpop.f32.mrf.mxu1 }
 0x631   : > { %11761 = vmatmul.msk.bf16.gmra.mxu3 %vm645_vm0, %v14248_v55 }
 0x633   : > { %v3671_v22 = vpop.f32.mrf.mxu2  ;;  %v4028_v51 = vpop.f32.mrf.mxu0  ;;  %11725 = vmatmul.msk.bf16.gmra.mxu1 %vm645_vm0, %v14026_v16 }
 0x634   : > { %v3819_v3 = vadd.f32 %v3818_v57, %v3671_v22 }
 0x636   : > { %11784 = vmatmul.msk.bf16.gmra.mxu0 %vm645_vm0, %v14014_v63  ;;  %v14541_v36 = vadd.f32 %v4025_v19, %v3819_v3  ;;  %v14553_v63 = vpop.f32.mrf.mxu3 }
 0x638   : > { %v3828_v48 = vpop.f32.mrf.mxu1  ;;  %11694 = vmatmul.msk.bf16.gmra.mxu2 %vm645_vm0, %v13985_v18 }
 0x63b   : > { %v3674_v54 = vpop.f32.mrf.mxu2  ;;  %v4030_v45 = vpop.f32.mrf.mxu0 }
 0x63c   : > { %v3822_v28 = vadd.f32 %v3821_v11, %v3674_v54 }
 0x63e   : > { %v14547_v44 = vadd.f32 %v4028_v51, %v3822_v28  ;;  %v14561_v22 = vpop.f32.mrf.mxu3 }
 0x640   : > { %v3831_v62 = vpop.f32.mrf.mxu1 }
 0x641   : > { %11762 = vmatmul.msk.bf16.gmra.mxu3 %vm645_vm0, %v14280_v27 }
 0x643   : > { %v3676_v16 = vpop.f32.mrf.mxu2  ;;  %v4033_v57 = vpop.f32.mrf.mxu0  ;;  %11726 = vmatmul.msk.bf16.gmra.mxu1 %vm645_vm0, %v14065_v30 }
 0x644   : > { %v3824_v33 = vadd.f32 %v3823_v10, %v3676_v16 }
 0x646   : > { %11785 = vmatmul.msk.bf16.gmra.mxu0 %vm645_vm0, %v14052_v2  ;;  %v14557_v18 = vadd.f32 %v4030_v45, %v3824_v33 }
 0x648   : > { %v3833_v11 = vpop.f32.mrf.mxu1  ;;  %11695 = vmatmul.msk.bf16.gmra.mxu2 %vm645_vm0, %v14011_v25 }
 0x64b   : > { %v3679_v35 = vpop.f32.mrf.mxu2  ;;  %v4035_v19 = vpop.f32.mrf.mxu0 }
 0x64c   : > { %v3827_v56 = vadd.f32 %v3826_v41, %v3679_v35  ;;  %v14573_v41 = vpop.f32.mrf.mxu3 }
 0x64e   : > { %v14563_v51 = vadd.f32 %v4033_v57, %v3827_v56 }
 0x650   : > { %v4412_v30 = vpop.f32.mrf.mxu1 }
 0x651   : > { %11763 = vmatmul.msk.bf16.gmra.mxu3 %vm645_vm0, %v14320_v42 }
 0x653   : > { %v3681_v10 = vpop.f32.mrf.mxu2  ;;  %v4038_v3 = vpop.f32.mrf.mxu0  ;;  %11727 = vmatmul.msk.bf16.gmra.mxu1 %vm645_vm0, %v14113_v7 }
 0x654   : > { %v3829_v2 = vadd.f32 %v3828_v48, %v3681_v10  ;;  %v14581_v7 = vpop.f32.mrf.mxu3 }
 0x656   : > { %11786 = vmatmul.msk.bf16.gmra.mxu0 %vm645_vm0, %v14096_v38  ;;  %v14571_v25 = vadd.f32 %v4035_v19, %v3829_v2 }
 0x658   : > { %11696 = vmatmul.msk.bf16.gmra.mxu2 %vm645_vm0, %v14047_v4  ;;  %v4414_v54 = vpop.f32.mrf.mxu1 }
 0x65b   : > { %v3684_v45 = vpop.f32.mrf.mxu2  ;;  %v4040_v28 = vpop.f32.mrf.mxu0 }
 0x65c   : > { %v3832_v16 = vadd.f32 %v3831_v62, %v3684_v45  ;;  %v19007_v62 = vld [vmem:[#allocation17_spill] sm:$0xff]  ;;  %v14592_v45 = vpop.f32.mrf.mxu3 }
 0x65e   : > { %v14577_v57 = vadd.f32 %v4038_v3, %v3832_v16  ;;  %v19008_v3 = vld [vmem:[#allocation16_spill] sm:$0xff] }
 0x660   : > { %v4417_v33 = vpop.f32.mrf.mxu1 }
 0x661   : > { %11764 = vmatmul.msk.bf16.gmra.mxu3 %vm645_vm0, %v14366_v13 }
 0x663   : > { %v3686_v38 = vpop.f32.mrf.mxu2  ;;  %11728 = vmatmul.msk.bf16.gmra.mxu1 %vm645_vm0, %v14144_v12  ;;  %v4823_v48 = vpop.f32.mrf.mxu0 }
 0x664   : > { %v3834_v35 = vadd.f32 %v3833_v11, %v3686_v38 }
 0x666   : > { %11787 = vmatmul.msk.bf16.gmra.mxu0 %vm645_vm0, %v14130_v53  ;;  %v14587_v4 = vadd.f32 %v4040_v28, %v3834_v35  ;;  %v19009_v28 = vld [vmem:[#allocation30_spill] sm:$0xff] }
 0x667   : > { %v19010_v35 = vld [vmem:[#allocation18_spill] sm:$0xff] }
 0x668   : > { %11697 = vmatmul.msk.bf16.gmra.mxu2 %vm645_vm0, %v19007_v62  ;;  %v4419_v19 = vpop.f32.mrf.mxu1 }
 0x66b   : > { %v4121_v56 = vpop.f32.mrf.mxu2  ;;  %v4825_v10 = vpop.f32.mrf.mxu0 }
 0x66c   : > { %v4211_v2 = vadd.f32 %v4121_v56, %v19008_v3  ;;  %v19011_v56 = vld [vmem:[#allocation22_spill] sm:$0xff] }
 0x66e   : > { %v4502_v16 = vadd.f32 %v4412_v30, %v4211_v2  ;;  %v14604_v30 = vpop.f32.mrf.mxu3 }
 0x670   : > { %v4422_v49 = vpop.f32.mrf.mxu1  ;;  %v4745_v12 = vadd.f32 %v14505_v37, %v4502_v16 }
 0x671   : > { %11765 = vmatmul.msk.bf16.gmra.mxu3 %vm645_vm0, %v14404_v8 }
 0x672   : > { %v14597_v53 = vadd.f32 %v4823_v48, %v4745_v12  ;;  %v19012_v12 = vld [vmem:[#allocation21_spill] sm:$0xff] }
 0x673   : > { %v4123_v11 = vpop.f32.mrf.mxu2  ;;  %11729 = vmatmul.msk.bf16.gmra.mxu1 %vm645_vm0, %v19009_v28  ;;  %v4828_v38 = vpop.f32.mrf.mxu0 }
 0x674   : > { %v4212_v62 = vadd.f32 %v4123_v11, %v19010_v35 }
 0x676   : > { %v4503_v20 = vadd.f32 %v4414_v54, %v4212_v62  ;;  %11788 = vmatmul.msk.bf16.gmra.mxu0 %vm645_vm0, %v14170_v26  ;;  %v14613_v35 = vpop.f32.mrf.mxu3 }
 0x678   : > { %11698 = vmatmul.msk.bf16.gmra.mxu2 %vm645_vm0, %v19011_v56  ;;  %v4424_v37 = vpop.f32.mrf.mxu1  ;;  %v4746_v48 = vadd.f32 %v14515_v46, %v4503_v20  ;;  %v19013_v56 = vld [vmem:[#allocation36_spill] sm:$0xff]  ;;  %v19014_v46 = vld [vmem:[#allocation23_spill] sm:$0xff] }
 0x67a   : > { %v14609_v3 = vadd.f32 %v4825_v10, %v4746_v48 }
 0x67b   : > { %v4126_v2 = vpop.f32.mrf.mxu2  ;;  %v4830_v16 = vpop.f32.mrf.mxu0 }
 0x67c   : > { %v4213_v28 = vadd.f32 %v4126_v2, %v19012_v12  ;;  %v19016_v12 = vld [vmem:[#allocation26_spill] sm:$0xff] }
 0x67e   : > { %v4504_v14 = vadd.f32 %v4417_v33, %v4213_v28  ;;  %v19015_v33 = vld [vmem:[#allocation27_spill] sm:$0xff] }
 0x680   : > { %v4427_v11 = vpop.f32.mrf.mxu1  ;;  %v4747_v54 = vadd.f32 %v14523_v15, %v4504_v14 }
 0x681   : > { %11766 = vmatmul.msk.bf16.gmra.mxu3 %vm645_vm0, %v14425_v6 }
 0x682   : > { %v14617_v26 = vadd.f32 %v4828_v38, %v4747_v54 }
 0x683   : > { %v4128_v62 = vpop.f32.mrf.mxu2  ;;  %11730 = vmatmul.msk.bf16.gmra.mxu1 %vm645_vm0, %v19013_v56  ;;  %v4833_v20 = vpop.f32.mrf.mxu0 }
 0x684   : > { %v4214_v10 = vadd.f32 %v4128_v62, %v19014_v46 }
 0x686   : > { %v4505_v48 = vadd.f32 %v4419_v19, %v4214_v10  ;;  %11789 = vmatmul.msk.bf16.gmra.mxu0 %vm645_vm0, %v14216_v60  ;;  %v19017_v60 = vld [vmem:[#allocation42_spill] sm:$0xff] }
 0x688   : > { %11699 = vmatmul.msk.bf16.gmra.mxu2 %vm645_vm0, %v19015_v33  ;;  %v4429_v14 = vpop.f32.mrf.mxu1  ;;  %v4748_v15 = vadd.f32 %v14533_v58, %v4505_v48  ;;  %v19018_v33 = vld [vmem:[#allocation28_spill] sm:$0xff] }
 0x68a   : > { %v14627_v6 = vadd.f32 %v4830_v16, %v4748_v15  ;;  %v19019_v16 = vld [vmem:[#allocation33_spill] sm:$0xff] }
 0x68b   : > { %v4131_v38 = vpop.f32.mrf.mxu2  ;;  %v4835_v2 = vpop.f32.mrf.mxu0 }
 0x68c   : > { %v4215_v28 = vadd.f32 %v4131_v38, %v19016_v12  ;;  %v19020_v12 = vld [vmem:[#allocation32_spill] sm:$0xff] }
 0x68e   : > { %v4506_v54 = vadd.f32 %v4422_v49, %v4215_v28  ;;  %v12494_v49 = vld [vmem:[%s18769_s11 + $0x70] sm:$0xff] }
 0x68f   : > { %5112 = vmatpush.bf16.msra.mxu2 %v12494_v49  ;;  %v19022_v49 = vld [vmem:[#allocation34_spill] sm:$0xff] }
 0x690   : > { %v4432_v56 = vpop.f32.mrf.mxu1  ;;  %v4749_v62 = vadd.f32 %v14545_v0, %v4506_v54  ;;  %v12496_v54 = vld [vmem:[%s18769_s11 + $0x80] sm:$0xff] }
 0x691   : > { %5355 = vmatpush.bf16.msrb.mxu1 %v12496_v54  ;;  %v19024_v54 = vld [vmem:[#allocation38_spill] sm:$0xff] }
 0x692   : > { %v14631_v19 = vadd.f32 %v4833_v20, %v4749_v62 }
 0x693   : > { %v4133_v46 = vpop.f32.mrf.mxu2  ;;  %11731 = vmatmul.msk.bf16.gmra.mxu1 %vm645_vm0, %v19017_v60  ;;  %v4838_v10 = vpop.f32.mrf.mxu0 }
 0x694   : > { %v4216_v17 = vadd.f32 %v4133_v46, %v19018_v33  ;;  %v14657_v46 = vpop.f32.mrf.mxu3  ;;  %v19021_v33 = vld [vmem:[#allocation48_spill] sm:$0xff] }
 0x696   : > { %v4507_v58 = vadd.f32 %v4424_v37, %v4216_v17  ;;  %11790 = vmatmul.msk.bf16.gmra.mxu0 %vm645_vm0, %v14248_v55  ;;  %v12630_v37 = vmov 0   ;;  %v5705_v55 = vld [vmem:[%s18775_s17] sm:$0xff] }
 0x697   : > { %12607 = vset.pattern.permute.xlu0 %v12630_v37  ;;  %12608 = vset.pattern.permute.xlu1 %v12630_v37 }
 0x698   : > { %11700 = vmatmul.msk.bf16.gmra.mxu2 %vm645_vm0, %v19019_v16  ;;  %v4434_v0 = vpop.f32.mrf.mxu1  ;;  %v4750_v20 = vadd.f32 %v14553_v63, %v4507_v58  ;;  %5748 = vperm.xlu0 %12607, %v5705_v55   ;;  %v5707_v63 = vld [vmem:[%s18775_s17 + $0x10] sm:$0xff] }
 0x699   : > { %12609 = vset.pattern.permute.xlu2 %v12630_v37  ;;  %5758 = vperm.xlu1 %12608, %v5707_v63  }
 0x69a   : > { %v14644_v48 = vadd.f32 %v4835_v2, %v4750_v20  ;;  %v5706_v20 = vld [vmem:[%s18775_s17 + $0x8] sm:$0xff] }
 0x69b   : > { %v4136_v15 = vpop.f32.mrf.mxu2  ;;  %v4840_v38 = vpop.f32.mrf.mxu0 }
 0x69c   : > { %v4217_v17 = vadd.f32 %v4136_v15, %v19020_v12 }
 0x69e   : > { %v4508_v28 = vadd.f32 %v4427_v11, %v4217_v17  ;;  %v12501_v17 = vld [vmem:[%s18771_s13 + $0x18] sm:$0xff] }
 0x69f   : > { %6356 = vmatpush.bf16.msrb.mxu3 %v12501_v17 }
 0x6a0   : > { %v4437_v2 = vpop.f32.mrf.mxu1  ;;  %v4751_v62 = vadd.f32 %v14561_v22, %v4508_v28  ;;  %5753 = vperm.xlu0 %12607, %v5706_v20   ;;  %v5708_v22 = vld [vmem:[%s18775_s17 + $0x18] sm:$0xff]  ;;  %v14680_v28 = vpop.f32.mrf.mxu3  ;;  %v19025_v20 = vld [vmem:[#allocation54_spill] sm:$0xff] }
 0x6a1   : > { %5763 = vperm.xlu1 %12608, %v5708_v22   ;;  %v19026_v22 = vld [vmem:[#allocation40_spill] sm:$0xff] }
 0x6a2   : > { %v14659_v60 = vadd.f32 %v4838_v10, %v4751_v62  ;;  %v19023_v10 = vld [vmem:[#allocation39_spill] sm:$0xff]  ;;  %v5711_v62 = vld [vmem:[%s18775_s17 + $0x30] sm:$0xff] }
 0x6a3   : > { %v4138_v11 = vpop.f32.mrf.mxu2  ;;  %11732 = vmatmul.msk.bf16.gmra.mxu1 %vm645_vm0, %v19021_v33  ;;  %v4843_v58 = vpop.f32.mrf.mxu0  ;;  %v5712_v33 = vld [vmem:[%s18775_s17 + $0x38] sm:$0xff] }
 0x6a4   : > { %v4218_v16 = vadd.f32 %v4138_v11, %v19022_v49 }
 0x6a6   : > { %v4509_v15 = vadd.f32 %v4429_v14, %v4218_v16  ;;  %11791 = vmatmul.msk.bf16.gmra.mxu0 %vm645_vm0, %v14280_v27 }
 0x6a8   : > { %11701 = vmatmul.msk.bf16.gmra.mxu2 %vm645_vm0, %v19023_v10  ;;  %v4439_v12 = vpop.f32.mrf.mxu1  ;;  %v4752_v37 = vadd.f32 %v14573_v41, %v4509_v15  ;;  %5778 = vperm.xlu0 %12607, %v5711_v62   ;;  %v14698_v17 = vpop.f32.mrf.mxu3 }
 0x6a9   : > { %5783 = vperm.xlu1 %12608, %v5712_v33  }
 0x6aa   : > { %v14678_v14 = vadd.f32 %v4840_v38, %v4752_v37 }
 0x6ab   : > { %v4141_v27 = vpop.f32.mrf.mxu2  ;;  %v4845_v55 = vpop.f32.mrf.mxu0 }
 0x6ac   : > { %v4219_v63 = vadd.f32 %v4141_v27, %v19024_v54 }
 0x6ae   : > { %v4510_v11 = vadd.f32 %v4432_v56, %v4219_v63  ;;  %v5714_v56 = vld [vmem:[%s18775_s17 + $0x48] sm:$0xff] }
 0x6b0   : > { %v4442_v41 = vpop.f32.mrf.mxu1  ;;  %v4753_v38 = vadd.f32 %v14581_v7, %v4510_v11  ;;  %5793 = vperm.xlu0 %12607, %v5714_v56   ;;  %v5715_v7 = vld [vmem:[%s18775_s17 + $0x50] sm:$0xff] }
 0x6b1   : > { %5798 = vperm.xlu1 %12608, %v5715_v7   ;;  %v19029_v56 = vld [vmem:[#allocation60_spill] sm:$0xff]  ;;  %v19030_v7 = vld [vmem:[#allocation46_spill] sm:$0xff] }
 0x6b2   : > { %v14690_v49 = vadd.f32 %v4843_v58, %v4753_v38  ;;  %v19027_v58 = vld [vmem:[#allocation45_spill] sm:$0xff] }
 0x6b3   : > { %v4143_v16 = vpop.f32.mrf.mxu2  ;;  %11733 = vmatmul.msk.bf16.gmra.mxu1 %vm645_vm0, %v19025_v20  ;;  %v4848_v15 = vpop.f32.mrf.mxu0 }
 0x6b4   : > { %v4220_v10 = vadd.f32 %v4143_v16, %v19026_v22  ;;  %v5718_v16 = vld [vmem:[%s18775_s17 + $0x68] sm:$0xff]  ;;  %v14717_v20 = vpop.f32.mrf.mxu3 }
 0x6b6   : > { %v4511_v37 = vadd.f32 %v4434_v0, %v4220_v10  ;;  %11792 = vmatmul.msk.bf16.gmra.mxu0 %vm645_vm0, %v14320_v42  ;;  %v19028_v0 = vld [vmem:[#allocation44_spill] sm:$0xff]  ;;  %v5717_v42 = vld [vmem:[%s18775_s17 + $0x60] sm:$0xff] }
 0x6b8   : > { %11702 = vmatmul.msk.bf16.gmra.mxu2 %vm645_vm0, %v19027_v58  ;;  %v4444_v27 = vpop.f32.mrf.mxu1  ;;  %v4754_v54 = vadd.f32 %v14592_v45, %v4511_v37  ;;  %5808 = vperm.xlu0 %12607, %v5717_v42   ;;  %v5720_v58 = vld [vmem:[%s18775_s17 + $0x78] sm:$0xff] }
 0x6b9   : > { %5813 = vperm.xlu1 %12608, %v5718_v16  }
 0x6ba   : > { %v14708_v63 = vadd.f32 %v4845_v55, %v4754_v54 }
 0x6bb   : > { %v4146_v62 = vpop.f32.mrf.mxu2  ;;  %v4850_v11 = vpop.f32.mrf.mxu0 }
 0x6bc   : > { %v4221_v33 = vadd.f32 %v4146_v62, %v19028_v0 }
 0x6be   : > { %v4512_v38 = vadd.f32 %v4437_v2, %v4221_v33  ;;  %v14736_v33 = vpop.f32.mrf.mxu3 }
 0x6c0   : > { %v4447_v22 = vpop.f32.mrf.mxu1  ;;  %v4755_v45 = vadd.f32 %v14604_v30, %v4512_v38  ;;  %5823 = vperm.xlu0 %12607, %v5720_v58   ;;  %v5721_v30 = vld [vmem:[%s18775_s17 + $0x80] sm:$0xff] }
 0x6c1   : > { %5828 = vperm.xlu1 %12608, %v5721_v30  }
 0x6c2   : > { %v14720_v55 = vadd.f32 %v4848_v15, %v4755_v45  ;;  %v19031_v15 = vld [vmem:[#allocation51_spill] sm:$0xff]  ;;  %v5723_v45 = vld [vmem:[%s18775_s17 + $0x90] sm:$0xff] }
 0x6c3   : > { %v4148_v10 = vpop.f32.mrf.mxu2  ;;  %11734 = vmatmul.msk.bf16.gmra.mxu1 %vm645_vm0, %v19029_v56  ;;  %v4853_v37 = vpop.f32.mrf.mxu0  ;;  %v5709_v56 = vld [vmem:[%s18775_s17 + $0x20] sm:$0xff] }
 0x6c4   : > { %v4222_v2 = vadd.f32 %v4148_v10, %v19030_v7  ;;  %5768 = vperm.xlu2 %12609, %v5709_v56   ;;  %v19037_v56 = vld [vmem:[#allocation56_spill] sm:$0xff] }
 0x6c6   : > { %v4513_v54 = vadd.f32 %v4439_v12, %v4222_v2  ;;  %11793 = vmatmul.msk.bf16.gmra.mxu0 %vm645_vm0, %v14366_v13  ;;  %v19032_v13 = vld [vmem:[#allocation50_spill] sm:$0xff]  ;;  %v14757_v30 = vpop.f32.mrf.mxu3 }
 0x6c7   : > { %19034 = vst [vmem:[#allocation17_spill] sm:$0xff] %v14757_v30 }
 0x6c8   : > { %11703 = vmatmul.msk.bf16.gmra.mxu2 %vm645_vm0, %v19031_v15  ;;  %v4449_v62 = vpop.f32.mrf.mxu1  ;;  %v4756_v0 = vadd.f32 %v14613_v35, %v4513_v54  ;;  %5838 = vperm.xlu0 %12607, %v5723_v45   ;;  %v5724_v35 = vld [vmem:[%s18775_s17 + $0x98] sm:$0xff]  ;;  %v19033_v54 = vld [vmem:[#allocation66_spill] sm:$0xff]  ;;  %v19035_v15 = vld [vmem:[#allocation52_spill] sm:$0xff] }
 0x6c9   : > { %5843 = vperm.xlu1 %12608, %v5724_v35   ;;  %v5729_v35 = vld [vmem:[%s18775_s17 + $0xc0] sm:$0xff] }
 0x6ca   : > { %v14738_v42 = vadd.f32 %v4850_v11, %v4756_v0 }
 0x6cb   : > { %v4151_v12 = vpop.f32.mrf.mxu2  ;;  %v14740_v38 = vpop.f32.mrf.mxu0 }
 0x6cc   : > { %v4223_v16 = vadd.f32 %v4151_v12, %v19032_v13  ;;  %v5726_v12 = vld [vmem:[%s18775_s17 + $0xa8] sm:$0xff] }
 0x6ce   : > { %v4514_v10 = vadd.f32 %v4442_v41, %v4223_v16  ;;  %v19036_v16 = vld [vmem:[#allocation57_spill] sm:$0xff] }
 0x6d0   : > { %v4452_v11 = vpop.f32.mrf.mxu1  ;;  %v4757_v7 = vadd.f32 %v14657_v46, %v4514_v10  ;;  %5853 = vperm.xlu0 %12607, %v5726_v12   ;;  %v5710_v46 = vld [vmem:[%s18775_s17 + $0x28] sm:$0xff] }
 0x6d1   : > { %5773 = vperm.xlu2 %12609, %v5710_v46  }
 0x6d2   : > { %v14753_v2 = vadd.f32 %v4853_v37, %v4757_v7  ;;  %v5727_v37 = vld [vmem:[%s18775_s17 + $0xb0] sm:$0xff]  ;;  %v14781_v7 = vpop.f32.mrf.mxu3 }
 0x6d3   : > { %v4153_v58 = vpop.f32.mrf.mxu2  ;;  %11735 = vmatmul.msk.bf16.gmra.mxu1 %vm645_vm0, %v19033_v54  ;;  %v4858_v41 = vpop.f32.mrf.mxu0  ;;  %5858 = vperm.xlu1 %12608, %v5727_v37   ;;  %v5713_v54 = vld [vmem:[%s18775_s17 + $0x40] sm:$0xff]  ;;  %v3272_v37 = vpack.c.bf16 %v14446_v21, %v14446_v21  ;;  %v5716_v21 = vld [vmem:[%s18775_s17 + $0x58] sm:$0xff] }
 0x6d4   : > { %v4224_v0 = vadd.f32 %v4153_v58, %v19035_v15  ;;  %v5730_v15 = vld [vmem:[%s18775_s17 + $0xc8] sm:$0xff] }
 0x6d6   : > { %v14763_v13 = vadd.f32 %v4444_v27, %v4224_v0  ;;  %11794 = vmatmul.msk.bf16.gmra.mxu0 %vm645_vm0, %v14404_v8 }
 0x6d8   : > { %11704 = vmatmul.msk.bf16.gmra.mxu2 %vm645_vm0, %v19036_v16  ;;  %v4454_v45 = vpop.f32.mrf.mxu1  ;;  %5868 = vperm.xlu0 %12607, %v5729_v35  }
 0x6d9   : > { %5788 = vperm.xlu2 %12609, %v5713_v54  }
 0x6db   : > { %v4156_v27 = vpop.f32.mrf.mxu2  ;;  %v14775_v10 = vpop.f32.mrf.mxu0  ;;  %5873 = vperm.xlu1 %12608, %v5730_v15  }
 0x6dc   : > { %v4225_v8 = vadd.f32 %v4156_v27, %v19037_v56  ;;  %v19038_v27 = vld [vmem:[#allocation58_spill] sm:$0xff] }
 0x6de   : > { %v4516_v58 = vadd.f32 %v4447_v22, %v4225_v8  ;;  %v5732_v8 = vld [vmem:[%s18775_s17 + $0xd8] sm:$0xff] }
 0x6e0   : > { %v4457_v0 = vpop.f32.mrf.mxu1  ;;  %v4759_v12 = vadd.f32 %v14698_v17, %v4516_v58  ;;  %5883 = vperm.xlu0 %12607, %v5732_v8   ;;  %v4789_v17 = vunpack.c.l.b16 %v3272_v37  ;;  %v19040_v58 = vld [vmem:[#allocation63_spill] sm:$0xff]  ;;  %v5719_v8 = vld [vmem:[%s18775_s17 + $0x70] sm:$0xff] }
 0x6e1   : > { %5803 = vperm.xlu2 %12609, %v5716_v21  }
 0x6e2   : > { %v14790_v46 = vadd.f32 %v4858_v41, %v4759_v12  ;;  %v14810_v41 = vpop.f32.mrf.mxu3  ;;  %v14814_v54 = vpack.c.b16 %v4789_v17, %v4789_v17  ;;  %v19042_v12 = vld [vmem:[#allocation62_spill] sm:$0xff]  ;;  %v5736_v17 = vld [vmem:[%s18775_s17 + $0xf8] sm:$0xff] }
 0x6e3   : > { %v4158_v22 = vpop.f32.mrf.mxu2  ;;  %11736 = vmatmul.msk.bf16.gmra.mxu1 %vm645_vm0, %v14437_v61  ;;  %v4863_v16 = vpop.f32.mrf.mxu0  ;;  %v5733_v61 = vld [vmem:[%s18775_s17 + $0xe0] sm:$0xff]  ;;  %19039 = vst [vmem:[#allocation16_spill] sm:$0xff] %v14810_v41 }
 0x6e4   : > { %v4226_v56 = vadd.f32 %v4158_v22, %v19038_v27  ;;  %5888 = vperm.xlu1 %12608, %v5733_v61   ;;  %v5735_v22 = vld [vmem:[%s18775_s17 + $0xf0] sm:$0xff] }
 0x6e6   : > { %v14800_v35 = vadd.f32 %v4449_v62, %v4226_v56  ;;  %11795 = vmatmul.msk.bf16.gmra.mxu0 %vm645_vm0, %v14451_v32  ;;  %v4794_v56 = vrot.slane %v14814_v54, 2 }
 0x6e8   : > { %11705 = vmatmul.msk.bf16.gmra.mxu2 %vm645_vm0, %v19040_v58  ;;  %v4459_v62 = vpop.f32.mrf.mxu1  ;;  %5898 = vperm.xlu0 %12607, %v5735_v22   ;;  %v19044_v22 = vrot.slane %v14432_v24, 2 }
 0x6e9   : > { %5818 = vperm.xlu2 %12609, %v5719_v8   ;;  %v5738_v8 = vld [vmem:[%s18775_s17 + $0x108] sm:$0xff] }
 0x6ea   : > { %v4705_v58 = vpop.f32.mrf.mxu3  ;;  %v4795_v41 = vsel %vm1979_vm12, %v19044_v22, %v4794_v56 }
 0x6eb   : > { %v4161_v32 = vpop.f32.mrf.mxu2  ;;  %v14816_v15 = vpop.f32.mrf.mxu0 }
 0x6ec   : > { %19041 = vst [vmem:[#allocation30_spill] sm:$0xff] %v14816_v15  ;;  %v4227_v37 = vadd.f32 %v4161_v32, %v19042_v12  ;;  %5903 = vperm.xlu1 %12608, %v5736_v17   ;;  %v19045_v15 = vld [vmem:[#allocation64_spill] sm:$0xff]  ;;  %v5741_v17 = vld [vmem:[%s18775_s17 + $0x120] sm:$0xff] }
 0x6ee   : > { %v4518_v27 = vadd.f32 %v4452_v11, %v4227_v37  ;;  %v19043_v37 = vld [vmem:[#allocation3_spill] sm:$0xff] }
 0x6f0   : > { %v4462_v21 = vpop.f32.mrf.mxu1  ;;  %v4761_v61 = vadd.f32 %v14736_v33, %v4518_v27  ;;  %5913 = vperm.xlu0 %12607, %v5738_v8   ;;  %v5739_v27 = vld [vmem:[%s18775_s17 + $0x110] sm:$0xff] }
 0x6f2   : > { %v14830_v32 = vadd.f32 %v4863_v16, %v4761_v61  ;;  %v5722_v16 = vld [vmem:[%s18775_s17 + $0x88] sm:$0xff] }
 0x6f3   : > { %v4163_v11 = vpop.f32.mrf.mxu2  ;;  %v4868_v12 = vpop.f32.mrf.mxu0  ;;  %11839 = vmatmul.msk.bf16.vlgmr.msrb.gmra.mxu1 %vm645_vm0, %v19043_v37  ;;  %5833 = vperm.xlu2 %12609, %v5722_v16  }
 0x6f4   : > { %v4228_v30 = vadd.f32 %v4163_v11, %v19045_v15  ;;  %5918 = vperm.xlu1 %12608, %v5739_v27   ;;  %v5742_v11 = vld [vmem:[%s18775_s17 + $0x128] sm:$0xff]  ;;  %v19047_v27 = vld [vmem:[#allocation5_spill] sm:$0xff] }
 0x6f6   : > { %v14841_v33 = vadd.f32 %v4454_v45, %v4228_v30  ;;  %11796 = vmatmul.msk.bf16.gmra.mxu0 %vm645_vm0, %v4795_v41  ;;  %v14854_v45 = vpop.f32.mrf.mxu3 }
 0x6f7   : > { %19046 = vst [vmem:[#allocation18_spill] sm:$0xff] %v14854_v45 }
 0x6f8   : > { %11706 = vmatmul.msk.bf16.gmra.mxu2 %vm645_vm0, %v14428_v34  ;;  %v4464_v15 = vpop.f32.mrf.mxu1  ;;  %5928 = vperm.xlu0 %12607, %v5741_v17   ;;  %v5725_v34 = vld [vmem:[%s18775_s17 + $0xa0] sm:$0xff] }
 0x6fb   : > { %v4166_v56 = vpop.f32.mrf.mxu2  ;;  %v14852_v30 = vpop.f32.mrf.mxu0  ;;  %5848 = vperm.xlu2 %12609, %v5725_v34   ;;  %v19048_v34 = vld [vmem:[#allocation4_spill] sm:$0xff] }
 0x6fc   : > { %v4229_v41 = vadd.f32 %v4166_v56, %v14430_v59  ;;  %5933 = vperm.xlu1 %12608, %v5742_v11   ;;  %v5744_v56 = vld [vmem:[%s18775_s17 + $0x138] sm:$0xff] }
 0x6fe   : > { %v4520_v61 = vadd.f32 %v4457_v0, %v4229_v41  ;;  %v4710_v41 = vpop.f32.mrf.mxu3 }
 0x700   : > { %v4467_v37 = vpop.f32.mrf.mxu1  ;;  %v4763_v22 = vadd.f32 %v14781_v7, %v4520_v61  ;;  %5943 = vperm.xlu0 %12607, %v5744_v56   ;;  %v5728_v7 = vld [vmem:[%s18775_s17 + $0xb8] sm:$0xff] }
 0x702   : > { %v14867_v59 = vadd.f32 %v4868_v12, %v4763_v22  ;;  %v5745_v12 = vld [vmem:[%s18775_s17 + $0x140] sm:$0x3f] }
 0x703   : > { %v4168_v8 = vpop.f32.mrf.mxu2  ;;  %v4873_v16 = vpop.f32.mrf.mxu0  ;;  %11840 = vmatmul.msk.bf16.gmra.mxu1 %vm645_vm0, %v19047_v27  ;;  %5863 = vperm.xlu2 %12609, %v5728_v7  }
 0x704   : > { %v4230_v0 = vadd.f32 %v4168_v8, %v14460_v23  ;;  %5948 = vperm.xlu1 %12608, %v5745_v12   ;;  %v5731_v8 = vld [vmem:[%s18775_s17 + $0xd0] sm:$0xff]  ;;  %v19051_v12 = vld [vmem:[#allocation6_spill] sm:$0xff] }
 0x706   : > { %v14875_v17 = vadd.f32 %v4459_v62, %v4230_v0  ;;  %v14891_v27 = vpop.f32.mrf.mxu3 }
 0x707   : > { %19050 = vst [vmem:[#allocation21_spill] sm:$0xff] %v14891_v27 }
 0x708   : > { %v4469_v61 = vpop.f32.mrf.mxu1  ;;  %11809 = vmatmul.msk.bf16.vlgmr.msra.gmra.mxu2 %vm645_vm0, %v19048_v34 }
 0x70b   : > { %v4171_v23 = vpop.f32.mrf.mxu2  ;;  %v14885_v11 = vpop.f32.mrf.mxu0  ;;  %5878 = vperm.xlu2 %12609, %v5731_v8  }
 0x70c   : > { %19049 = vst [vmem:[#allocation22_spill] sm:$0xff] %v14885_v11  ;;  %v4231_v62 = vadd.f32 %v4171_v23, %v14471_v43 }
 0x70e   : > { %v4522_v22 = vadd.f32 %v4462_v21, %v4231_v62  ;;  %v5734_v21 = vld [vmem:[%s18775_s17 + $0xe8] sm:$0xff]  ;;  %v19052_v62 = vld [vmem:[#allocation2_spill] sm:$0xff] }
 0x710   : > { %v4472_v0 = vpop.f32.mrf.mxu1  ;;  %v4765_v56 = vadd.f32 %v4705_v58, %v4522_v22  ;;  %v4715_v58 = vpop.f32.mrf.mxu3 }
 0x712   : > { %v14893_v45 = vadd.f32 %v4873_v16, %v4765_v56 }
 0x713   : > { %v4173_v34 = vpop.f32.mrf.mxu2  ;;  %v4878_v7 = vpop.f32.mrf.mxu0  ;;  %11841 = vmatmul.msk.bf16.gmra.mxu1 %vm645_vm0, %v19051_v12  ;;  %5893 = vperm.xlu2 %12609, %v5734_v21  }
 0x714   : > { %v4232_v11 = vadd.f32 %v4173_v34, %v14479_v50  ;;  %v5737_v50 = vld [vmem:[%s18775_s17 + $0x100] sm:$0xff] }
 0x716   : > { %v14898_v43 = vadd.f32 %v4464_v15, %v4232_v11 }
 0x718   : > { %v4474_v23 = vpop.f32.mrf.mxu1  ;;  %11810 = vmatmul.msk.bf16.gmra.mxu2 %vm645_vm0, %v19052_v62  ;;  %v19054_v62 = vld [vmem:[#allocation8_spill] sm:$0xff] }
 0x71b   : > { %v4176_v16 = vpop.f32.mrf.mxu2  ;;  %v14905_v22 = vpop.f32.mrf.mxu0  ;;  %5908 = vperm.xlu2 %12609, %v5737_v50  }
 0x71c   : > { %19053 = vst [vmem:[#allocation36_spill] sm:$0xff] %v14905_v22  ;;  %v4233_v8 = vadd.f32 %v4176_v16, %v14483_v9  ;;  %v14916_v22 = vpop.f32.mrf.mxu3 }
 0x71d   : > { %19055 = vst [vmem:[#allocation23_spill] sm:$0xff] %v14916_v22 }
 0x71e   : > { %v4524_v56 = vadd.f32 %v4467_v37, %v4233_v8  ;;  %v5740_v37 = vld [vmem:[%s18775_s17 + $0x118] sm:$0xff]  ;;  %v19056_v8 = vld [vmem:[#allocation7_spill] sm:$0xff] }
 0x720   : > { %v4477_v15 = vpop.f32.mrf.mxu1  ;;  %v4767_v11 = vadd.f32 %v4710_v41, %v4524_v56 }
 0x722   : > { %v14911_v34 = vadd.f32 %v4878_v7, %v4767_v11 }
 0x723   : > { %v4178_v12 = vpop.f32.mrf.mxu2  ;;  %v4883_v27 = vpop.f32.mrf.mxu0  ;;  %11842 = vmatmul.msk.bf16.gmra.mxu1 %vm645_vm0, %v19054_v62  ;;  %5923 = vperm.xlu2 %12609, %v5740_v37  }
 0x724   : > { %v4234_v21 = vadd.f32 %v4178_v12, %v14494_v39  ;;  %v4720_v39 = vpop.f32.mrf.mxu3 }
 0x726   : > { %v14918_v9 = vadd.f32 %v4469_v61, %v4234_v21  ;;  %v5743_v61 = vld [vmem:[%s18775_s17 + $0x130] sm:$0xff] }
 0x728   : > { %v4479_v16 = vpop.f32.mrf.mxu1  ;;  %11811 = vmatmul.msk.bf16.gmra.mxu2 %vm645_vm0, %v19056_v8  ;;  %v19059_v8 = vld [vmem:[#allocation10_spill] sm:$0xff] }
 0x72b   : > { %v4181_v41 = vpop.f32.mrf.mxu2  ;;  %v14925_v7 = vpop.f32.mrf.mxu0  ;;  %5938 = vperm.xlu2 %12609, %v5743_v61  }
 0x72c   : > { %19057 = vst [vmem:[#allocation27_spill] sm:$0xff] %v14925_v7  ;;  %v4235_v56 = vadd.f32 %v4181_v41, %v14501_v29  ;;  %v12500_v41 = vld [vmem:[%s18771_s13 + $0x10] sm:$0xff] }
 0x72d   : > { %6357 = vmatpush.bf16.msrb.mxu3 %v12500_v41 }
 0x72e   : > { %v4526_v50 = vadd.f32 %v4472_v0, %v4235_v56  ;;  %v19061_v0 = vld [vmem:[#allocation9_spill] sm:$0xff] }
 0x730   : > { %v4482_v11 = vpop.f32.mrf.mxu1  ;;  %v4769_v12 = vadd.f32 %v4715_v58, %v4526_v50  ;;  %v14943_v58 = vpop.f32.mrf.mxu3 }
 0x731   : > { %19062 = vst [vmem:[#allocation28_spill] sm:$0xff] %v14943_v58 }
 0x732   : > { %v14931_v62 = vadd.f32 %v4883_v27, %v4769_v12 }
 0x733   : > { %v4183_v21 = vpop.f32.mrf.mxu2  ;;  %v4888_v22 = vpop.f32.mrf.mxu0  ;;  %11843 = vmatmul.msk.bf16.gmra.mxu1 %vm645_vm0, %v19059_v8 }
 0x734   : > { %19058 = vst [vmem:[#allocation26_spill] sm:$0xff] %v14931_v62  ;;  %v4236_v37 = vadd.f32 %v4183_v21, %v14511_v1  ;;  %v19065_v62 = vld [vmem:[#allocation11_spill] sm:$0xff] }
 0x736   : > { %v14936_v7 = vadd.f32 %v4474_v23, %v4236_v37  ;;  %v19064_v37 = vld [vmem:[#allocation12_spill] sm:$0xff] }
 0x738   : > { %19060 = vst [vmem:[#allocation42_spill] sm:$0xff] %v14936_v7  ;;  %v4484_v29 = vpop.f32.mrf.mxu1  ;;  %11812 = vmatmul.msk.bf16.gmra.mxu2 %vm645_vm0, %v19061_v0  ;;  %v4725_v21 = vpop.f32.mrf.mxu3 }
 0x73b   : > { %v4186_v27 = vpop.f32.mrf.mxu2  ;;  %v14945_v56 = vpop.f32.mrf.mxu0 }
 0x73c   : > { %19063 = vst [vmem:[#allocation33_spill] sm:$0xff] %v14945_v56  ;;  %v4237_v50 = vadd.f32 %v4186_v27, %v14517_v52  ;;  %v12499_v27 = vld [vmem:[%s18771_s13 + $0x8] sm:$0xff] }
 0x73d   : > { %6503 = vmatpush.bf16.msra.mxu0 %v12499_v27 }
 0x73e   : > { %v4528_v61 = vadd.f32 %v4477_v15, %v4237_v50 }
 0x740   : > { %v4487_v1 = vpop.f32.mrf.mxu1  ;;  %v4771_v23 = vadd.f32 %v4720_v39, %v4528_v61  ;;  %v14958_v39 = vpop.f32.mrf.mxu3 }
 0x741   : > { %19066 = vst [vmem:[#allocation32_spill] sm:$0xff] %v14958_v39 }
 0x742   : > { %v14948_v12 = vadd.f32 %v4888_v22, %v4771_v23 }
 0x743   : > { %v4188_v8 = vpop.f32.mrf.mxu2  ;;  %11844 = vmatmul.msk.bf16.gmra.mxu1 %vm645_vm0, %v19064_v37  ;;  %v4893_v7 = vpop.f32.mrf.mxu0 }
 0x744   : > { %v4238_v0 = vadd.f32 %v4188_v8, %v14527_v31  ;;  %v19069_v8 = vld [vmem:[#allocation14_spill] sm:$0xff] }
 0x746   : > { %v14953_v58 = vadd.f32 %v4479_v16, %v4238_v0  ;;  %v19071_v0 = vld [vmem:[#allocation13_spill] sm:$0xff] }
 0x748   : > { %v4489_v41 = vpop.f32.mrf.mxu1  ;;  %11813 = vmatmul.msk.bf16.gmra.mxu2 %vm645_vm0, %v19065_v62 }
 0x74b   : > { %v4191_v52 = vpop.f32.mrf.mxu2  ;;  %v14963_v50 = vpop.f32.mrf.mxu0 }
 0x74c   : > { %v4239_v15 = vadd.f32 %v4191_v52, %v14531_v47  ;;  %19067 = vst [vmem:[#allocation48_spill] sm:$0xff] %v14963_v50 }
 0x74e   : > { %v4530_v22 = vadd.f32 %v4482_v11, %v4239_v15  ;;  %v4730_v11 = vpop.f32.mrf.mxu3 }
 0x750   : > { %v4492_v31 = vpop.f32.mrf.mxu1  ;;  %v4773_v16 = vadd.f32 %v4725_v21, %v4530_v22 }
 0x752   : > { %v14965_v61 = vadd.f32 %v4893_v7, %v4773_v16  ;;  %v5749_v7 = vpop.permute.xlu0 %5748 }
 0x753   : > { %v4193_v23 = vpop.f32.mrf.mxu2  ;;  %11845 = vmatmul.msk.bf16.gmra.mxu1 %vm645_vm0, %v19069_v8  ;;  %v4898_v52 = vpop.f32.mrf.mxu0 }
 0x754   : > { %19068 = vst [vmem:[#allocation34_spill] sm:$0xff] %v14965_v61  ;;  %v4240_v47 = vadd.f32 %v4193_v23, %v14541_v36  ;;  %v19075_v23 = vld [vmem:[#allocation19_spill] sm:$0xff] }
 0x756   : > { %v14970_v62 = vadd.f32 %v4484_v29, %v4240_v47  ;;  %v14975_v50 = vpop.f32.mrf.mxu3 }
 0x757   : > { %19072 = vst [vmem:[#allocation38_spill] sm:$0xff] %v14975_v50 }
 0x758   : > { %19070 = vst [vmem:[#allocation39_spill] sm:$0xff] %v14970_v62  ;;  %v4494_v37 = vpop.f32.mrf.mxu1  ;;  %11814 = vmatmul.msk.bf16.gmra.mxu2 %vm645_vm0, %v19071_v0 }
 0x75b   : > { %v4196_v15 = vpop.f32.mrf.mxu2  ;;  %v14979_v36 = vpop.f32.mrf.mxu0 }
 0x75c   : > { %v4241_v27 = vadd.f32 %v4196_v15, %v14547_v44  ;;  %19074 = vst [vmem:[#allocation40_spill] sm:$0xff] %v14979_v36  ;;  %v19077_v44 = vld [vmem:[#allocation15_spill] sm:$0xff] }
 0x75e   : > { %v4532_v21 = vadd.f32 %v4487_v1, %v4241_v27  ;;  %v5754_v1 = vpop.permute.xlu0 %5753  ;;  %v4735_v27 = vpop.f32.mrf.mxu3 }
 0x75f   : > { %v5952_v15 = vmul.f32 0.0, %v5754_v1 }
 0x760   : > { %v4497_v22 = vpop.f32.mrf.mxu1  ;;  %v4775_v16 = vadd.f32 %v4730_v11, %v4532_v21  ;;  %v5951_v11 = vmul.f32 0.0, %v5749_v7 }
 0x761   : > { %v5993_v50 = vpack.c.bf16 %v5952_v15, %v5952_v15 }
 0x762   : > { %v14977_v8 = vadd.f32 %v4898_v52, %v4775_v16  ;;  %v5992_v36 = vpack.c.bf16 %v5951_v11, %v5951_v11 }
 0x763   : > { %v4198_v29 = vpop.f32.mrf.mxu2  ;;  %11846 = vmatmul.msk.bf16.gmra.mxu1 %vm645_vm0, %v19075_v23  ;;  %v4903_v16 = vpop.f32.mrf.mxu0 }
 0x764   : > { %19073 = vst [vmem:[#allocation54_spill] sm:$0xff] %v14977_v8  ;;  %v4242_v47 = vadd.f32 %v4198_v29, %v14557_v18  ;;  %v6080_v18 = vunpack.c.l.b16 %v5992_v36 }
 0x766   : > { %v14984_v0 = vadd.f32 %v4489_v41, %v4242_v47  ;;  %v6081_v41 = vunpack.c.l.b16 %v5993_v50 }
 0x768   : > { %19076 = vst [vmem:[#allocation45_spill] sm:$0xff] %v14984_v0  ;;  %v4499_v39 = vpop.f32.mrf.mxu1  ;;  %11815 = vmatmul.msk.bf16.gmra.mxu2 %vm645_vm0, %v19077_v44  ;;  %v19079_v0 = vld [vmem:[#allocation24_spill] sm:$0xff]  ;;  %v14997_v44 = vpop.f32.mrf.mxu3  ;;  %v14999_v1 = vpack.c.b16 %v6081_v41, %v6080_v18 }
 0x769   : > { %19080 = vst [vmem:[#allocation60_spill] sm:$0xff] %v14997_v44 }
 0x76a   : > { %19081 = vst [vmem:[#allocation46_spill] sm:$0xff] %v14999_v1 }
 0x76b   : > { %v4201_v52 = vpop.f32.mrf.mxu2  ;;  %v15003_v50 = vpop.f32.mrf.mxu0 }
 0x76c   : > { %v4243_v21 = vadd.f32 %v4201_v52, %v14563_v51  ;;  %v12498_v51 = vld [vmem:[%s18771_s13] sm:$0xff]  ;;  %19083 = vst [vmem:[#allocation50_spill] sm:$0xff] %v15003_v50 }
 0x76d   : > { %6504 = vmatpush.bf16.msra.mxu0 %v12498_v51  ;;  %v15023_v51 = vld [vmem:[%s18770_s12] ss:$0 sm:$0xff] }
 0x76e   : > { %v4534_v8 = vadd.f32 %v4492_v31, %v4243_v21 }
 0x770   : > { %v5357_v23 = vpop.f32.mrf.mxu1  ;;  %v4777_v62 = vadd.f32 %v4735_v27, %v4534_v8  ;;  %11895 = vmatmul.msk.bf16.vlgmr.msra.gmra.mxu0 %vm645_vm0, %v14999_v1  ;;  %v4740_v11 = vpop.f32.mrf.mxu3 }
 0x772   : > { %v14989_v29 = vadd.f32 %v4903_v16, %v4777_v62  ;;  %v19084_v62 = vld [vmem:[#allocation20_spill] sm:$0xff]  ;;  %v19086_v16 = vld [vmem:[#allocation29_spill] sm:$0xff] }
 0x773   : > { %v4203_v47 = vpop.f32.mrf.mxu2  ;;  %11847 = vmatmul.msk.bf16.gmra.mxu1 %vm645_vm0, %v19079_v0  ;;  %v4908_v52 = vpop.f32.mrf.mxu0 }
 0x774   : > { %19078 = vst [vmem:[#allocation44_spill] sm:$0xff] %v14989_v29  ;;  %v4244_v7 = vadd.f32 %v4203_v47, %v14571_v25  ;;  %v19088_v47 = vld [vmem:[#allocation25_spill] sm:$0xff] }
 0x776   : > { %v15001_v31 = vadd.f32 %v4494_v37, %v4244_v7 }
 0x778   : > { %19082 = vst [vmem:[#allocation51_spill] sm:$0xff] %v15001_v31  ;;  %11816 = vmatmul.msk.bf16.gmra.mxu2 %vm645_vm0, %v19084_v62  ;;  %v5359_v8 = vpop.f32.mrf.mxu1 }
 0x77b   : > { %v4206_v25 = vpop.f32.mrf.mxu2 }
 0x77c   : > { %v4245_v36 = vadd.f32 %v4206_v25, %v14577_v57 }
 0x77e   : > { %v4536_v0 = vadd.f32 %v4497_v22, %v4245_v36 }
 0x780   : > { %v5362_v15 = vpop.f32.mrf.mxu1  ;;  %v4779_v27 = vadd.f32 %v4740_v11, %v4536_v0  ;;  %v15028_v11 = vpop.permute.xlu1 %5758 }
 0x781   : > { %19090 = vst [vmem:[#allocation57_spill] sm:$0xff] %v15028_v11 }
 0x782   : > { %v15010_v37 = vadd.f32 %v4908_v52, %v4779_v27 }
 0x783   : > { %v4208_v21 = vpop.f32.mrf.mxu2  ;;  %11848 = vmatmul.msk.bf16.gmra.mxu1 %vm645_vm0, %v19086_v16 }
 0x784   : > { %19085 = vst [vmem:[#allocation66_spill] sm:$0xff] %v15010_v37  ;;  %v4246_v18 = vadd.f32 %v4208_v21, %v14587_v4 }
 0x786   : > { %v15015_v41 = vadd.f32 %v4499_v39, %v4246_v18  ;;  %v19089_v39 = vld [vmem:[#allocation35_spill] sm:$0xff] }
 0x788   : > { %19087 = vst [vmem:[#allocation52_spill] sm:$0xff] %v15015_v41  ;;  %11817 = vmatmul.msk.bf16.gmra.mxu2 %vm645_vm0, %v19088_v47  ;;  %v5364_v7 = vpop.f32.mrf.mxu1 }
 0x78b   : > { %v5114_v57 = vpop.f32.mrf.mxu2 }
 0x78c   : > { %v5204_v22 = vadd.f32 %v5114_v57, %v14597_v53 }
 0x78e   : > { %v5447_v62 = vadd.f32 %v5357_v23, %v5204_v22  ;;  %v19091_v23 = vld [vmem:[#allocation31_spill] sm:$0xff] }
 0x790   : > { %v5486_v25 = vadd.f32 %v15023_v51, %v5447_v62  ;;  %v5367_v36 = vpop.f32.mrf.mxu1 }
 0x792   : > { %v5522_v0 = vmax.f32 %v5486_v25, 0.0 }
 0x793   : > { %v5116_v4 = vpop.f32.mrf.mxu2  ;;  %11849 = vmatmul.msk.bf16.gmra.mxu1 %vm645_vm0, %v19089_v39 }
 0x794   : > { %v5595_v27 = vrot.slane %v5522_v0, 5  ;;  %v5205_v52 = vadd.f32 %v5116_v4, %v14609_v3  ;;  %v15039_v0 = vpop.permute.xlu1 %5763 }
 0x795   : > { %19092 = vst [vmem:[#allocation56_spill] sm:$0xff] %v15039_v0 }
 0x796   : > { %v5448_v53 = vadd.f32 %v5359_v8, %v5205_v52  ;;  %v5703_v21 = vsel %vm5594_vm3, 0.0, %v5595_v27 }
 0x797   : > { %v5953_v57 = vmul.f32 %v15028_v11, %v5703_v21 }
 0x798   : > { %v5487_v16 = vadd.f32 %v15023_v51, %v5448_v53  ;;  %11818 = vmatmul.msk.bf16.gmra.mxu2 %vm645_vm0, %v19091_v23  ;;  %v15035_v18 = vpop.f32.mrf.mxu1 }
 0x799   : > { %v5994_v4 = vpack.c.bf16 %v5953_v57, %v5953_v57 }
 0x79a   : > { %v5523_v47 = vmax.f32 %v5487_v16, 0.0  ;;  %v6139_v16 = vshll.u32 %v14999_v1, 16 }
 0x79b   : > { %v5119_v22 = vpop.f32.mrf.mxu2  ;;  %v6082_v11 = vunpack.c.l.b16 %v5994_v4 }
 0x79c   : > { %v5596_v62 = vrot.slane %v5523_v47, 5  ;;  %v5206_v25 = vadd.f32 %v5119_v22, %v14617_v26  ;;  %v19093_v26 = vld [vmem:[#allocation41_spill] sm:$0xff]  ;;  %v15049_v22 = vpop.permute.xlu2 %5768  ;;  %v15113_v56 = vpop.permute.xlu1 %5783 }
 0x79d   : > { %19094 = vst [vmem:[#allocation58_spill] sm:$0xff] %v15049_v22 }
 0x79e   : > { %v5597_v3 = vsel %vm5594_vm3, %v5595_v27, %v5596_v62  ;;  %v5449_v8 = vadd.f32 %v5362_v15, %v5206_v25  ;;  %v6137_v25 = vshrl.u32 %v14999_v1, 16  ;;  %19102 = vst [vmem:[#allocation5_spill] sm:$0xff] %v15113_v56 }
 0x79f   : > { %v5954_v39 = vmul.f32 %v15039_v0, %v5597_v3  ;;  %v6141_v3 = vrot.slane %v6139_v16, 1 }
 0x7a0   : > { %v5488_v52 = vadd.f32 %v15023_v51, %v5449_v8  ;;  %v15044_v53 = vpop.f32.mrf.mxu1 }
 0x7a1   : > { %v5995_v23 = vpack.c.bf16 %v5954_v39, %v5954_v39 }
 0x7a2   : > { %v5524_v21 = vmax.f32 %v5488_v52, 0.0 }
 0x7a3   : > { %v6083_v47 = vunpack.c.l.b16 %v5995_v23  ;;  %v5121_v41 = vpop.f32.mrf.mxu2  ;;  %11850 = vmatmul.msk.bf16.gmra.mxu1 %vm645_vm0, %v19093_v26 }
 0x7a4   : > { %v5598_v15 = vrot.slane %v5524_v21, 5  ;;  %v5207_v27 = vadd.f32 %v5121_v41, %v14627_v6  ;;  %v19095_v21 = vld [vmem:[#allocation37_spill] sm:$0xff]  ;;  %v15065_v41 = vor.u32 %v6141_v3, %v6137_v25  ;;  %v15072_v37 = vpop.permute.xlu2 %5773 }
 0x7a5   : > { %v15052_v57 = vpack.c.b16 %v6083_v47, %v6082_v11  ;;  %19097 = vst [vmem:[#allocation62_spill] sm:$0xff] %v15072_v37 }
 0x7a6   : > { %v5599_v8 = vsel %vm5594_vm3, %v5596_v62, %v5598_v15  ;;  %v5450_v39 = vadd.f32 %v5364_v7, %v5207_v27  ;;  %19096 = vst [vmem:[#allocation63_spill] sm:$0xff] %v15065_v41 }
 0x7a7   : > { %11896 = vmatmul.msk.bf16.gmra.mxu0 %vm645_vm0, %v15052_v57  ;;  %v6144_v4 = vshll.u32 %v15052_v57, 16  ;;  %v6148_v52 = vshrl.u32 %v15052_v57, 16  ;;  %v5955_v47 = vmul.f32 %v15049_v22, %v5599_v8 }
 0x7a8   : > { %v5489_v23 = vadd.f32 %v15023_v51, %v5450_v39  ;;  %11819 = vmatmul.msk.bf16.gmra.mxu2 %vm645_vm0, %v19095_v21  ;;  %v15063_v6 = vpop.f32.mrf.mxu1 }
 0x7a9   : > { %v6146_v11 = vrot.slane %v6144_v4, 1  ;;  %v7012_v16 = vrot.slane %v6148_v52, 1  ;;  %v7013_v7 = vrot.slane %v6144_v4, 2  ;;  %v5996_v50 = vpack.c.bf16 %v5955_v47, %v5955_v47 }
 0x7aa   : > { %v5525_v62 = vmax.f32 %v5489_v23, 0.0 }
 0x7ab   : > { %v5124_v26 = vpop.f32.mrf.mxu2  ;;  %v6147_v27 = vsel %vm1057_vm11, %v15065_v41, %v6146_v11  ;;  %v7014_v21 = vor.u32 %v7013_v7, %v7012_v16 }
 0x7ac   : > { %v5600_v0 = vrot.slane %v5525_v62, 5  ;;  %v5208_v39 = vadd.f32 %v5124_v26, %v14631_v19  ;;  %11869 = vmatmul.msk.bf16.vlgmr.msrb.gmra.mxu3 %vm645_vm0, %v6147_v27  ;;  %v6084_v62 = vunpack.c.l.b16 %v5996_v50  ;;  %v19098_v26 = vld [vmem:[#allocation47_spill] sm:$0xff] }
 0x7ae   : > { %v5601_v25 = vsel %vm5594_vm3, %v5598_v15, %v5600_v0  ;;  %v5451_v3 = vadd.f32 %v5367_v36, %v5208_v39 }
 0x7af   : > { %v5956_v4 = vmul.f32 %v15072_v37, %v5601_v25  ;;  %v6150_v25 = vor.u32 %v6148_v52, %v6146_v11 }
 0x7b0   : > { %v5490_v8 = vadd.f32 %v15023_v51, %v5451_v3  ;;  %v15077_v23 = vpop.f32.mrf.mxu1 }
 0x7b1   : > { %v5997_v22 = vpack.c.bf16 %v5956_v4, %v5956_v4 }
 0x7b2   : > { %v5526_v41 = vmax.f32 %v5490_v8, 0.0 }
 0x7b3   : > { %v6085_v44 = vunpack.c.l.b16 %v5997_v22  ;;  %v5126_v19 = vpop.f32.mrf.mxu2  ;;  %11851 = vmatmul.msk.bf16.gmra.mxu1 %vm645_vm0, %v19098_v26  ;;  %v18801_v22 = vrot.slane %v15052_v57, 1 }
 0x7b4   : > { %v5602_v16 = vrot.slane %v5526_v41, 5  ;;  %v5209_v7 = vadd.f32 %v5126_v19, %v14644_v48  ;;  %v19099_v48 = vld [vmem:[#allocation43_spill] sm:$0xff] }
 0x7b5   : > { %v15082_v15 = vpack.c.b16 %v6085_v44, %v6084_v62  ;;  %v15104_v62 = vpop.permute.xlu0 %5778 }
 0x7b6   : > { %v5603_v36 = vsel %vm5594_vm3, %v5600_v0, %v5602_v16  ;;  %v5452_v47 = vadd.f32 %v15035_v18, %v5209_v7  ;;  %v7303_v18 = vrot.slane %v15052_v57, 2  ;;  %19100 = vst [vmem:[#allocation3_spill] sm:$0xff] %v15104_v62 }
 0x7b7   : > { %11897 = vmatmul.msk.bf16.gmra.mxu0 %vm645_vm0, %v15082_v15  ;;  %v6152_v27 = vshll.u32 %v15082_v15, 16  ;;  %v6156_v50 = vshrl.u32 %v15082_v15, 16  ;;  %v6604_v39 = vrot.slane %v15082_v15, 1  ;;  %v7304_v0 = vrot.slane %v15082_v15, 2 }
 0x7b8   : > { %v5491_v41 = vadd.f32 %v15023_v51, %v5452_v47  ;;  %11820 = vmatmul.msk.bf16.gmra.mxu2 %vm645_vm0, %v19099_v48  ;;  %v15095_v44 = vpop.f32.mrf.mxu1  ;;  %v5957_v48 = vmul.f32 %v15104_v62, %v5603_v36 }
 0x7b9   : > { %v6154_v3 = vrot.slane %v6152_v27, 1  ;;  %v15102_v4 = vsel %vm1307_vm10, %v18801_v22, %v6604_v39  ;;  %v7015_v8 = vrot.slane %v6156_v50, 1  ;;  %v15107_v26 = vsel %vm1979_vm12, %v7303_v18, %v7304_v0 }
 0x7ba   : > { %v5527_v19 = vmax.f32 %v5491_v41, 0.0  ;;  %19101 = vst [vmem:[#allocation64_spill] sm:$0xff] %v15107_v26  ;;  %v7016_v7 = vrot.slane %v6152_v27, 2  ;;  %v7714_v47 = vrot.slane %v6156_v50, 2  ;;  %v7715_v11 = vrot.slane %v6152_v27, 3 }
 0x7bb   : > { %v5129_v37 = vpop.f32.mrf.mxu2  ;;  %v6155_v52 = vsel %vm1057_vm11, %v6150_v25, %v6154_v3  ;;  %v5998_v36 = vpack.c.bf16 %v5957_v48, %v5957_v48 }
 0x7bc   : > { %v5604_v31 = vrot.slane %v5527_v19, 5  ;;  %v5210_v29 = vadd.f32 %v5129_v37, %v14659_v60  ;;  %11870 = vmatmul.msk.bf16.gmra.mxu3 %vm645_vm0, %v6155_v52  ;;  %v7017_v22 = vor.u32 %v7016_v7, %v7015_v8  ;;  %v7716_v61 = vor.u32 %v7715_v11, %v7714_v47  ;;  %v19104_v52 = vld [vmem:[#allocation53_spill] sm:$0xff] }
 0x7bd   : > { %v6086_v8 = vunpack.c.l.b16 %v5998_v36 }
 0x7be   : > { %v5605_v41 = vsel %vm5594_vm3, %v5602_v16, %v5604_v31  ;;  %v5453_v18 = vadd.f32 %v15044_v53, %v5210_v29  ;;  %v15118_v26 = vsel %vm1704_vm13, %v7014_v21, %v7017_v22 }
 0x7bf   : > { %19103 = vst [vmem:[#allocation4_spill] sm:$0xff] %v15118_v26  ;;  %v5958_v25 = vmul.f32 %v15113_v56, %v5605_v41 }
 0x7c0   : > { %v5492_v27 = vadd.f32 %v15023_v51, %v5453_v18  ;;  %v15122_v19 = vpop.f32.mrf.mxu1 }
 0x7c1   : > { %v5999_v60 = vpack.c.bf16 %v5958_v25, %v5958_v25  ;;  %v19105_v25 = vld [vmem:[#allocation49_spill] sm:$0xff] }
 0x7c2   : > { %v5528_v37 = vmax.f32 %v5492_v27, 0.0 }
 0x7c3   : > { %v6087_v7 = vunpack.c.l.b16 %v5999_v60  ;;  %v5131_v47 = vpop.f32.mrf.mxu2  ;;  %11852 = vmatmul.msk.bf16.gmra.mxu1 %vm645_vm0, %v19104_v52  ;;  %v6158_v60 = vor.u32 %v6156_v50, %v6154_v3 }
 0x7c4   : > { %v5606_v16 = vrot.slane %v5528_v37, 5  ;;  %v5211_v29 = vadd.f32 %v5131_v47, %v14678_v14  ;;  %v15147_v47 = vpop.permute.xlu2 %5788 }
 0x7c5   : > { %v15127_v53 = vpack.c.b16 %v6087_v7, %v6086_v8  ;;  %19106 = vst [vmem:[#allocation6_spill] sm:$0xff] %v15147_v47 }
 0x7c6   : > { %v5607_v21 = vsel %vm5594_vm3, %v5604_v31, %v5606_v16  ;;  %v5454_v48 = vadd.f32 %v15063_v6, %v5211_v29  ;;  %v8005_v6 = vrot.slane %v15082_v15, 3 }
 0x7c7   : > { %11898 = vmatmul.msk.bf16.gmra.mxu0 %vm645_vm0, %v15127_v53  ;;  %v6160_v11 = vshll.u32 %v15127_v53, 16  ;;  %v6164_v41 = vshrl.u32 %v15127_v53, 16  ;;  %v6606_v18 = vrot.slane %v15127_v53, 1  ;;  %v7306_v31 = vrot.slane %v15127_v53, 2 }
 0x7c8   : > { %v5493_v36 = vadd.f32 %v15023_v51, %v5454_v48  ;;  %11821 = vmatmul.msk.bf16.gmra.mxu2 %vm645_vm0, %v19105_v25  ;;  %v15139_v14 = vpop.f32.mrf.mxu1  ;;  %v5959_v56 = vmul.f32 %v15147_v47, %v5607_v21  ;;  %v19108_v26 = vrot.slane %v15127_v53, 3 }
 0x7c9   : > { %v6162_v37 = vrot.slane %v6160_v11, 1  ;;  %v15145_v8 = vsel %vm1307_vm10, %v6604_v39, %v6606_v18  ;;  %v7019_v7 = vrot.slane %v6164_v41, 1  ;;  %v15150_v29 = vsel %vm1979_vm12, %v7304_v0, %v7306_v31 }
 0x7ca   : > { %v5529_v52 = vmax.f32 %v5493_v36, 0.0  ;;  %19107 = vst [vmem:[#allocation2_spill] sm:$0xff] %v15150_v29  ;;  %v7020_v48 = vrot.slane %v6160_v11, 2  ;;  %v7717_v25 = vrot.slane %v6164_v41, 2  ;;  %v7718_v27 = vrot.slane %v6160_v11, 3  ;;  %v15161_v29 = vpop.permute.xlu0 %5793 }
 0x7cb   : > { %v5134_v62 = vpop.f32.mrf.mxu2  ;;  %v6163_v15 = vsel %vm1057_vm11, %v6158_v60, %v6162_v37  ;;  %v15159_v36 = vsel %vm2603_vm14, %v8005_v6, %v19108_v26  ;;  %19110 = vst [vmem:[#allocation7_spill] sm:$0xff] %v15161_v29  ;;  %v6000_v60 = vpack.c.bf16 %v5959_v56, %v5959_v56 }
 0x7cc   : > { %v5608_v50 = vrot.slane %v5529_v52, 5  ;;  %v5212_v3 = vadd.f32 %v5134_v62, %v14690_v49  ;;  %11871 = vmatmul.msk.bf16.gmra.mxu3 %vm645_vm0, %v6163_v15  ;;  %v7021_v39 = vor.u32 %v7020_v48, %v7019_v7  ;;  %19109 = vst [vmem:[#allocation8_spill] sm:$0xff] %v15159_v36  ;;  %v7719_v0 = vor.u32 %v7718_v27, %v7717_v25  ;;  %v19113_v25 = vld [vmem:[#allocation59_spill] sm:$0xff] }
 0x7cd   : > { %v6088_v52 = vunpack.c.l.b16 %v6000_v60 }
 0x7ce   : > { %v5609_v21 = vsel %vm5594_vm3, %v5606_v16, %v5608_v50  ;;  %v5455_v47 = vadd.f32 %v15077_v23, %v5212_v3  ;;  %v15166_v11 = vsel %vm1704_vm13, %v7017_v22, %v7021_v39  ;;  %v15170_v62 = vsel %vm2368_vm15, %v7716_v61, %v7719_v0  ;;  %v12503_v61 = vld [vmem:[%s18771_s13 + $0x28] sm:$0xff] }
 0x7cf   : > { %19111 = vst [vmem:[#allocation10_spill] sm:$0xff] %v15166_v11  ;;  %v5960_v49 = vmul.f32 %v15161_v29, %v5609_v21  ;;  %6710 = vmatpush.bf16.msrb.mxu2 %v12503_v61 }
 0x7d0   : > { %19112 = vst [vmem:[#allocation9_spill] sm:$0xff] %v15170_v62  ;;  %v5494_v7 = vadd.f32 %v15023_v51, %v5455_v47  ;;  %v15173_v26 = vpop.f32.mrf.mxu1  ;;  %v12507_v47 = vld [vmem:[%s18771_s13 + $0x48] sm:$0xff]  ;;  %v19117_v62 = vrot.slane %v15127_v53, 3 }
 0x7d1   : > { %v6001_v6 = vpack.c.bf16 %v5960_v49, %v5960_v49  ;;  %7169 = vmatpush.bf16.msra.mxu3 %v12507_v47 }
 0x7d2   : > { %v5530_v27 = vmax.f32 %v5494_v7, 0.0  ;;  %v19114_v7 = vld [vmem:[#allocation55_spill] sm:$0xff] }
 0x7d3   : > { %v6089_v48 = vunpack.c.l.b16 %v6001_v6  ;;  %v5136_v16 = vpop.f32.mrf.mxu2  ;;  %11853 = vmatmul.msk.bf16.gmra.mxu1 %vm645_vm0, %v19113_v25  ;;  %v15203_v25 = vpop.permute.xlu1 %5798 }
 0x7d4   : > { %v5610_v23 = vrot.slane %v5530_v27, 5  ;;  %v5213_v56 = vadd.f32 %v5136_v16, %v14708_v63  ;;  %v6166_v27 = vor.u32 %v6164_v41, %v6162_v37  ;;  %19115 = vst [vmem:[#allocation12_spill] sm:$0xff] %v15203_v25  ;;  %v12505_v41 = vld [vmem:[%s18771_s13 + $0x38] sm:$0xff] }
 0x7d5   : > { %v15178_v22 = vpack.c.b16 %v6089_v48, %v6088_v52  ;;  %6878 = vmatpush.bf16.msra.mxu1 %v12505_v41 }
 0x7d6   : > { %v5611_v15 = vsel %vm5594_vm3, %v5608_v50, %v5610_v23  ;;  %v5456_v3 = vadd.f32 %v15095_v44, %v5213_v56 }
 0x7d7   : > { %11899 = vmatmul.msk.bf16.gmra.mxu0 %vm645_vm0, %v15178_v22  ;;  %v6168_v21 = vshll.u32 %v15178_v22, 16  ;;  %v6172_v63 = vshrl.u32 %v15178_v22, 16  ;;  %v6608_v60 = vrot.slane %v15178_v22, 1  ;;  %v7308_v44 = vrot.slane %v15178_v22, 2 }
 0x7d8   : > { %v5495_v49 = vadd.f32 %v15023_v51, %v5456_v3  ;;  %11822 = vmatmul.msk.bf16.gmra.mxu2 %vm645_vm0, %v19114_v7  ;;  %v15196_v6 = vpop.f32.mrf.mxu1  ;;  %v5961_v47 = vmul.f32 %v15203_v25, %v5611_v15  ;;  %v15222_v25 = vpop.permute.xlu2 %5803 }
 0x7d9   : > { %v6170_v52 = vrot.slane %v6168_v21, 1  ;;  %v15201_v48 = vsel %vm1307_vm10, %v6606_v18, %v6608_v60  ;;  %v7023_v16 = vrot.slane %v6172_v63, 1  ;;  %v15206_v61 = vsel %vm1979_vm12, %v7306_v31, %v7308_v44  ;;  %19119 = vst [vmem:[#allocation14_spill] sm:$0xff] %v15222_v25 }
 0x7da   : > { %v5531_v56 = vmax.f32 %v5495_v49, 0.0  ;;  %v7024_v3 = vrot.slane %v6168_v21, 2  ;;  %v7721_v7 = vrot.slane %v6172_v63, 2  ;;  %v7722_v18 = vrot.slane %v6168_v21, 3 }
 0x7db   : > { %v5139_v29 = vpop.f32.mrf.mxu2  ;;  %v6171_v36 = vsel %vm1057_vm11, %v6166_v27, %v6170_v52  ;;  %v19116_v31 = vrot.slane %v15178_v22, 3 }
 0x7dc   : > { %v5612_v37 = vrot.slane %v5531_v56, 5  ;;  %v5214_v50 = vadd.f32 %v5139_v29, %v14720_v55  ;;  %11872 = vmatmul.msk.bf16.gmra.mxu3 %vm645_vm0, %v6171_v36  ;;  %v7025_v49 = vor.u32 %v7024_v3, %v7023_v16  ;;  %v7723_v27 = vor.u32 %v7722_v18, %v7721_v7  ;;  %v19122_v18 = vld [vmem:[#allocation65_spill] sm:$0xff] }
 0x7dd   : > { %v15220_v15 = vsel %vm2603_vm14, %v19117_v62, %v19116_v31  ;;  %v6002_v29 = vpack.c.bf16 %v5961_v47, %v5961_v47 }
 0x7de   : > { %19118 = vst [vmem:[#allocation11_spill] sm:$0xff] %v15220_v15  ;;  %v5613_v11 = vsel %vm5594_vm3, %v5610_v23, %v5612_v37  ;;  %v5457_v21 = vadd.f32 %v15122_v19, %v5214_v50  ;;  %v15227_v55 = vsel %vm1704_vm13, %v7021_v39, %v7025_v49  ;;  %v15231_v16 = vsel %vm2368_vm15, %v7719_v0, %v7723_v27 }
 0x7df   : > { %19120 = vst [vmem:[#allocation13_spill] sm:$0xff] %v15227_v55  ;;  %v5962_v36 = vmul.f32 %v15222_v25, %v5613_v11  ;;  %v6090_v7 = vunpack.c.l.b16 %v6002_v29 }
 0x7e0   : > { %19121 = vst [vmem:[#allocation19_spill] sm:$0xff] %v15231_v16  ;;  %v5496_v53 = vadd.f32 %v15023_v51, %v5457_v21  ;;  %v15234_v62 = vpop.f32.mrf.mxu1 }
 0x7e1   : > { %v6003_v56 = vpack.c.bf16 %v5962_v36, %v5962_v36  ;;  %v19123_v36 = vld [vmem:[#allocation61_spill] sm:$0xff] }
 0x7e2   : > { %v5532_v3 = vmax.f32 %v5496_v53, 0.0  ;;  %v6174_v53 = vor.u32 %v6172_v63, %v6170_v52 }
 0x7e3   : > { %v6091_v41 = vunpack.c.l.b16 %v6003_v56  ;;  %v5141_v23 = vpop.f32.mrf.mxu2  ;;  %11854 = vmatmul.msk.bf16.gmra.mxu1 %vm645_vm0, %v19122_v18 }
 0x7e4   : > { %v5614_v19 = vrot.slane %v5532_v3, 5  ;;  %v5215_v39 = vadd.f32 %v5141_v23, %v14738_v42 }
 0x7e5   : > { %v15239_v50 = vpack.c.b16 %v6091_v41, %v6090_v7  ;;  %v15258_v41 = vpop.permute.xlu0 %5808 }
 0x7e6   : > { %v5615_v0 = vsel %vm5594_vm3, %v5612_v37, %v5614_v19  ;;  %v5458_v11 = vadd.f32 %v15139_v14, %v5215_v39  ;;  %19124 = vst [vmem:[#allocation15_spill] sm:$0xff] %v15258_v41 }
 0x7e7   : > { %11900 = vmatmul.msk.bf16.gmra.mxu0 %vm645_vm0, %v15239_v50  ;;  %v6176_v47 = vshll.u32 %v15239_v50, 16  ;;  %v6180_v31 = vshrl.u32 %v15239_v50, 16  ;;  %v6610_v21 = vrot.slane %v15239_v50, 1  ;;  %v7310_v37 = vrot.slane %v15239_v50, 2 }
 0x7e8   : > { %v5497_v29 = vadd.f32 %v15023_v51, %v5458_v11  ;;  %11823 = vmatmul.msk.bf16.gmra.mxu2 %vm645_vm0, %v19123_v36  ;;  %v15251_v42 = vpop.f32.mrf.mxu1  ;;  %v5963_v36 = vmul.f32 %v15258_v41, %v5615_v0  ;;  %v19126_v16 = vrot.slane %v15239_v50, 3 }
 0x7e9   : > { %v6178_v56 = vrot.slane %v6176_v47, 1  ;;  %v15256_v3 = vsel %vm1307_vm10, %v6608_v60, %v6610_v21  ;;  %v7027_v7 = vrot.slane %v6180_v31, 1  ;;  %v15261_v18 = vsel %vm1979_vm12, %v7308_v44, %v7310_v37 }
 0x7ea   : > { %v5533_v23 = vmax.f32 %v5497_v29, 0.0  ;;  %19125 = vst [vmem:[#allocation24_spill] sm:$0xff] %v15261_v18  ;;  %v7028_v39 = vrot.slane %v6176_v47, 2  ;;  %v7725_v11 = vrot.slane %v6180_v31, 2  ;;  %v7726_v14 = vrot.slane %v6176_v47, 3  ;;  %v15274_v18 = vpop.permute.xlu1 %5813 }
 0x7eb   : > { %v5144_v25 = vpop.f32.mrf.mxu2  ;;  %v6179_v15 = vsel %vm1057_vm11, %v6174_v53, %v6178_v56  ;;  %v19127_v29 = vrot.slane %v15178_v22, 3  ;;  %19129 = vst [vmem:[#allocation29_spill] sm:$0xff] %v15274_v18 }
 0x7ec   : > { %v5616_v63 = vrot.slane %v5533_v23, 5  ;;  %v5216_v52 = vadd.f32 %v5144_v25, %v14753_v2  ;;  %11873 = vmatmul.msk.bf16.gmra.mxu3 %vm645_vm0, %v6179_v15  ;;  %v7029_v60 = vor.u32 %v7028_v39, %v7027_v7  ;;  %v7727_v55 = vor.u32 %v7726_v14, %v7725_v11 }
 0x7ed   : > { %v15272_v44 = vsel %vm2603_vm14, %v19127_v29, %v19126_v16  ;;  %v4758_v2 = vadd.f32 %v14680_v28, %v14763_v13  ;;  %v6004_v15 = vpack.c.bf16 %v5963_v36, %v5963_v36  ;;  %v12504_v28 = vld [vmem:[%s18771_s13 + $0x30] sm:$0xff] }
 0x7ee   : > { %19128 = vst [vmem:[#allocation20_spill] sm:$0xff] %v15272_v44  ;;  %v5617_v0 = vsel %vm5594_vm3, %v5614_v19, %v5616_v63  ;;  %v5459_v47 = vadd.f32 %v15173_v26, %v5216_v52  ;;  %v15281_v25 = vsel %vm1704_vm13, %v7025_v49, %v7029_v60  ;;  %v15285_v22 = vsel %vm2368_vm15, %v7723_v27, %v7727_v55 }
 0x7ef   : > { %v5964_v53 = vmul.f32 %v15274_v18, %v5617_v0  ;;  %19130 = vst [vmem:[#allocation25_spill] sm:$0xff] %v15285_v22  ;;  %v4926_v26 = vadd.f32 %v14740_v38, %v4758_v2  ;;  %v6092_v13 = vunpack.c.l.b16 %v6004_v15  ;;  %6879 = vmatpush.bf16.msra.mxu1 %v12504_v28  ;;  %v6182_v2 = vor.u32 %v6180_v31, %v6178_v56 }
 0x7f0   : > { %v5498_v16 = vadd.f32 %v15023_v51, %v5459_v47  ;;  %v15288_v14 = vpop.f32.mrf.mxu1 }
 0x7f1   : > { %v6005_v7 = vpack.c.bf16 %v5964_v53, %v5964_v53 }
 0x7f2   : > { %v5534_v19 = vmax.f32 %v5498_v16, 0.0 }
 0x7f3   : > { %v6093_v49 = vunpack.c.l.b16 %v6005_v7  ;;  %v5146_v23 = vpop.f32.mrf.mxu2  ;;  %11855 = vmatmul.msk.bf16.gmra.mxu1 %vm645_vm0, %v14456_v40  ;;  %v15320_v7 = vpop.permute.xlu2 %5818 }
 0x7f4   : > { %v5618_v27 = vrot.slane %v5534_v19, 5  ;;  %v5217_v39 = vadd.f32 %v5146_v23, %v4926_v26  ;;  %19131 = vst [vmem:[#allocation35_spill] sm:$0xff] %v15320_v7 }
 0x7f5   : > { %v15296_v11 = vpack.c.b16 %v6093_v49, %v6092_v13 }
 0x7f6   : > { %v5619_v36 = vsel %vm5594_vm3, %v5616_v63, %v5618_v27  ;;  %v5460_v52 = vadd.f32 %v15196_v6, %v5217_v39 }
 0x7f7   : > { %11901 = vmatmul.msk.bf16.gmra.mxu0 %vm645_vm0, %v15296_v11  ;;  %v15303_v38 = vshll.u32 %v15296_v11, 16  ;;  %v6188_v29 = vshrl.u32 %v15296_v11, 16  ;;  %v6612_v0 = vrot.slane %v15296_v11, 1  ;;  %v7312_v63 = vrot.slane %v15296_v11, 2 }
 0x7f8   : > { %v5499_v40 = vadd.f32 %v15023_v51, %v5460_v52  ;;  %11824 = vmatmul.msk.bf16.gmra.mxu2 %vm645_vm0, %v14422_v5  ;;  %v15310_v47 = vpop.f32.mrf.mxu1  ;;  %v18811_v6 = vrot.slane %v15296_v11, 3  ;;  %v5965_v31 = vmul.f32 %v15320_v7, %v5619_v36  ;;  %v5280_v36 = vrot.slane %v14814_v54, 3 }
 0x7f9   : > { %v6186_v15 = vrot.slane %v15303_v38, 1  ;;  %v15318_v53 = vsel %vm1307_vm10, %v6610_v21, %v6612_v0  ;;  %v7031_v16 = vrot.slane %v6188_v29, 1  ;;  %v15325_v5 = vsel %vm1979_vm12, %v7310_v37, %v7312_v63 }
 0x7fa   : > { %v5535_v19 = vmax.f32 %v5499_v40, 0.0  ;;  %v7032_v26 = vrot.slane %v15303_v38, 2  ;;  %v7729_v28 = vrot.slane %v6188_v29, 2  ;;  %v7730_v21 = vrot.slane %v15303_v38, 3 }
 0x7fb   : > { %v5149_v56 = vpop.f32.mrf.mxu2  ;;  %v6187_v13 = vsel %vm1057_vm11, %v6182_v2, %v6186_v15  ;;  %v19132_v37 = vrot.slane %v15239_v50, 3  ;;  %v15345_v2 = vpop.permute.xlu0 %5823  ;;  %v6006_v50 = vpack.c.bf16 %v5965_v31, %v5965_v31 }
 0x7fc   : > { %v5620_v49 = vrot.slane %v5535_v19, 5  ;;  %v5218_v23 = vadd.f32 %v5149_v56, %v14790_v46  ;;  %11874 = vmatmul.msk.bf16.gmra.mxu3 %vm645_vm0, %v6187_v13  ;;  %v15333_v39 = vor.u32 %v7032_v26, %v7031_v16  ;;  %v15343_v40 = vor.u32 %v7730_v21, %v7729_v28  ;;  %19134 = vst [vmem:[#allocation41_spill] sm:$0xff] %v15345_v2 }
 0x7fd   : > { %v15340_v52 = vsel %vm2603_vm14, %v19132_v37, %v18811_v6  ;;  %v4760_v16 = vadd.f32 %v14717_v20, %v14800_v35  ;;  %v19136_v20 = vrot.slane %v14432_v24, 3 }
 0x7fe   : > { %19133 = vst [vmem:[#allocation31_spill] sm:$0xff] %v15340_v52  ;;  %v5621_v38 = vsel %vm5594_vm3, %v5618_v27, %v5620_v49  ;;  %v5461_v46 = vadd.f32 %v15234_v62, %v5218_v23  ;;  %v15353_v19 = vsel %vm1704_vm13, %v7029_v60, %v15333_v39  ;;  %v15358_v28 = vsel %vm2368_vm15, %v7727_v55, %v15343_v40 }
 0x7ff   : > { %v5966_v26 = vmul.f32 %v15345_v2, %v5621_v38  ;;  %19135 = vst [vmem:[#allocation37_spill] sm:$0xff] %v15358_v28  ;;  %v4928_v21 = vadd.f32 %v14775_v10, %v4760_v16  ;;  %v5281_v35 = vsel %vm2603_vm14, %v19136_v20, %v5280_v36  ;;  %v6094_v60 = vunpack.c.l.b16 %v6006_v50  ;;  %v12502_v36 = vld [vmem:[%s18771_s13 + $0x20] sm:$0xff] }
 0x800   : > { %v5500_v56 = vadd.f32 %v15023_v51, %v5461_v46  ;;  %v15361_v13 = vpop.f32.mrf.mxu1  ;;  %v5031_v50 = vshrl.u32 %v14814_v54, 16  ;;  %6711 = vmatpush.bf16.msrb.mxu2 %v12502_v36  ;;  %v19140_v2 = vrot.slane %v15296_v11, 3 }
 0x801   : > { %v6007_v27 = vpack.c.bf16 %v5966_v26, %v5966_v26 }
 0x802   : > { %v5536_v62 = vmax.f32 %v5500_v56, 0.0 }
 0x803   : > { %v6095_v31 = vunpack.c.l.b16 %v6007_v27  ;;  %v5151_v23 = vpop.f32.mrf.mxu2  ;;  %11856 = vmatmul.msk.bf16.gmra.mxu1 %vm645_vm0, %v5281_v35 }
 0x804   : > { %v5622_v37 = vrot.slane %v5536_v62, 5  ;;  %v5219_v55 = vadd.f32 %v5151_v23, %v4928_v21  ;;  %v6190_v21 = vor.u32 %v6188_v29, %v6186_v15  ;;  %v15403_v23 = vpop.permute.xlu1 %5828 }
 0x805   : > { %v15368_v38 = vpack.c.b16 %v6095_v31, %v6094_v60  ;;  %v15401_v31 = vpop.f32.mrf.mxu0  ;;  %19138 = vst [vmem:[#allocation47_spill] sm:$0xff] %v15403_v23 }
 0x806   : > { %v5623_v46 = vsel %vm5594_vm3, %v5620_v49, %v5622_v37  ;;  %v5462_v26 = vadd.f32 %v15251_v42, %v5219_v55  ;;  %v19137_v42 = vld [vmem:[#allocation68_spill] sm:$0xff] }
 0x807   : > { %11902 = vmatmul.msk.bf16.gmra.mxu0 %vm645_vm0, %v15368_v38  ;;  %v15375_v24 = vshll.u32 %v15368_v38, 16  ;;  %v15378_v10 = vshrl.u32 %v15368_v38, 16  ;;  %v18810_v16 = vrot.slane %v15368_v38, 1  ;;  %v18812_v27 = vrot.slane %v15368_v38, 2 }
 0x808   : > { %v5501_v49 = vadd.f32 %v15023_v51, %v5462_v26  ;;  %11825 = vmatmul.msk.bf16.gmra.mxu2 %vm645_vm0, %v19137_v42  ;;  %v15388_v56 = vpop.f32.mrf.mxu1  ;;  %v5967_v36 = vmul.f32 %v15403_v23, %v5623_v46  ;;  %v5033_v46 = vrot.slane %v5031_v50, 2 }
 0x809   : > { %v6194_v20 = vrot.slane %v15375_v24, 1  ;;  %v15398_v35 = vsel %vm1307_vm10, %v6612_v0, %v18810_v16  ;;  %v7035_v60 = vrot.slane %v15378_v10, 1  ;;  %v15410_v29 = vsel %vm1979_vm12, %v7312_v63, %v18812_v27 }
 0x80a   : > { %v5537_v55 = vmax.f32 %v5501_v49, 0.0  ;;  %v7036_v15 = vrot.slane %v15375_v24, 2  ;;  %v7733_v26 = vrot.slane %v15378_v10, 2  ;;  %v5034_v0 = vshll.u32 %v14814_v54, 16 }
 0x80b   : > { %v5154_v42 = vpop.f32.mrf.mxu2  ;;  %v6195_v16 = vsel %vm1057_vm11, %v6190_v21, %v6194_v20  ;;  %v7734_v49 = vrot.slane %v15375_v24, 3  ;;  %v19139_v27 = vrot.slane %v15368_v38, 3  ;;  %v15431_v21 = vpop.permute.xlu2 %5833  ;;  %v6008_v11 = vpack.c.bf16 %v5967_v36, %v5967_v36 }
 0x80c   : > { %v5624_v6 = vrot.slane %v5537_v55, 5  ;;  %v5220_v62 = vadd.f32 %v5154_v42, %v14830_v32  ;;  %11875 = vmatmul.msk.bf16.gmra.mxu3 %vm645_vm0, %v6195_v16  ;;  %v15420_v63 = vor.u32 %v7036_v15, %v7035_v60  ;;  %19142 = vst [vmem:[#allocation53_spill] sm:$0xff] %v15431_v21  ;;  %v19143_v16 = vld [vmem:[#allocation17_spill] sm:$0xff]  ;;  %v5036_v50 = vrot.slane %v5034_v0, 3  ;;  %v19146_v15 = vld [vmem:[#allocation30_spill] sm:$0xff] }
 0x80d   : > { %v15427_v54 = vsel %vm2603_vm14, %v19140_v2, %v19139_v27  ;;  %v15429_v23 = vor.u32 %v7734_v49, %v7733_v26  ;;  %v4762_v60 = vadd.f32 %v19143_v16, %v14841_v33  ;;  %v15452_v42 = vpop.f32.mrf.mxu0 }
 0x80e   : > { %19141 = vst [vmem:[#allocation43_spill] sm:$0xff] %v15427_v54  ;;  %v5625_v24 = vsel %vm5594_vm3, %v5622_v37, %v5624_v6  ;;  %v5463_v32 = vadd.f32 %v15288_v14, %v5220_v62  ;;  %v15440_v55 = vsel %vm1704_vm13, %v15333_v39, %v15420_v63  ;;  %v6096_v39 = vunpack.c.l.b16 %v6008_v11 }
 0x80f   : > { %19144 = vst [vmem:[#allocation49_spill] sm:$0xff] %v15440_v55  ;;  %v5968_v2 = vmul.f32 %v15431_v21, %v5625_v24  ;;  %v15446_v27 = vsel %vm2368_vm15, %v15343_v40, %v15429_v23  ;;  %v4930_v26 = vadd.f32 %v19146_v15, %v4762_v60  ;;  %v5037_v0 = vor.u32 %v5036_v50, %v5033_v46  ;;  %v19147_v60 = vld [vmem:[#allocation67_spill] sm:$0xff] }
 0x810   : > { %19145 = vst [vmem:[#allocation59_spill] sm:$0xff] %v15446_v27  ;;  %v5502_v37 = vadd.f32 %v15023_v51, %v5463_v32  ;;  %v15449_v14 = vpop.f32.mrf.mxu1  ;;  %v6198_v15 = vor.u32 %v15378_v10, %v6194_v20 }
 0x811   : > { %v6009_v62 = vpack.c.bf16 %v5968_v2, %v5968_v2  ;;  %v5038_v11 = vsel %vm2368_vm15, %v19147_v60, %v5037_v0  ;;  %v15484_v0 = vpop.permute.xlu0 %5838 }
 0x812   : > { %v5538_v33 = vmax.f32 %v5502_v37, 0.0  ;;  %19149 = vst [vmem:[#allocation55_spill] sm:$0xff] %v15484_v0 }
 0x813   : > { %v6097_v36 = vunpack.c.l.b16 %v6009_v62  ;;  %v5156_v49 = vpop.f32.mrf.mxu2  ;;  %11955 = vmatmul.msk.bf16.vlgmr.msra.gmra.mxu1 %vm645_vm0, %v15102_v4 }
 0x814   : > { %v5626_v24 = vrot.slane %v5538_v33, 5  ;;  %v5221_v40 = vadd.f32 %v5156_v49, %v4930_v26 }
 0x815   : > { %v15456_v16 = vpack.c.b16 %v6097_v36, %v6096_v39  ;;  %v19148_v39 = vrot.slane %v15368_v38, 1  ;;  %v15499_v7 = vpop.f32.mrf.mxu0 }
 0x816   : > { %v5627_v32 = vsel %vm5594_vm3, %v5624_v6, %v5626_v24  ;;  %v5464_v2 = vadd.f32 %v15310_v47, %v5221_v40 }
 0x817   : > { %11903 = vmatmul.msk.bf16.gmra.mxu0 %vm645_vm0, %v15456_v16  ;;  %v15465_v37 = vshll.u32 %v15456_v16, 16  ;;  %v6204_v62 = vshrl.u32 %v15456_v16, 16  ;;  %v18815_v46 = vrot.slane %v15456_v16, 1  ;;  %v18819_v47 = vrot.slane %v15456_v16, 2 }
 0x818   : > { %v5503_v50 = vadd.f32 %v15023_v51, %v5464_v2  ;;  %11826 = vmatmul.msk.bf16.gmra.mxu2 %vm645_vm0, %v5038_v11  ;;  %v15471_v6 = vpop.f32.mrf.mxu1  ;;  %v19150_v2 = vrot.slane %v15368_v38, 2  ;;  %v5969_v11 = vmul.f32 %v15484_v0, %v5627_v32  ;;  %v19165_v54 = vrot.slane %v15456_v16, 3 }
 0x819   : > { %v6202_v26 = vrot.slane %v15465_v37, 1  ;;  %v15482_v36 = vsel %vm1307_vm10, %v19148_v39, %v18815_v46  ;;  %v7039_v49 = vrot.slane %v6204_v62, 1  ;;  %v7040_v10 = vrot.slane %v15465_v37, 2 }
 0x81a   : > { %v5539_v40 = vmax.f32 %v5503_v50, 0.0  ;;  %v15491_v60 = vsel %vm1979_vm12, %v19150_v2, %v18819_v47  ;;  %v7737_v20 = vrot.slane %v6204_v62, 2  ;;  %v7738_v46 = vrot.slane %v15465_v37, 3 }
 0x81b   : > { %19151 = vst [vmem:[#allocation65_spill] sm:$0xff] %v15491_v60  ;;  %v5159_v33 = vpop.f32.mrf.mxu2  ;;  %v6203_v39 = vsel %vm1057_vm11, %v6198_v15, %v6202_v26  ;;  %v15501_v18 = vor.u32 %v7040_v10, %v7039_v49  ;;  %v19152_v2 = vrot.slane %v15456_v16, 3  ;;  %v19153_v47 = vrot.slane %v15368_v38, 3  ;;  %v15512_v15 = vpop.permute.xlu1 %5843 }
 0x81c   : > { %v5628_v21 = vrot.slane %v5539_v40, 5  ;;  %v5222_v50 = vadd.f32 %v5159_v33, %v14867_v59  ;;  %11876 = vmatmul.msk.bf16.gmra.mxu3 %vm645_vm0, %v6203_v39  ;;  %v15510_v0 = vor.u32 %v7738_v46, %v7737_v20  ;;  %19155 = vst [vmem:[#allocation68_spill] sm:$0xff] %v15512_v15  ;;  %v19156_v33 = vld [vmem:[#allocation16_spill] sm:$0xff]  ;;  %v6010_v38 = vpack.c.bf16 %v5969_v11, %v5969_v11 }
 0x81d   : > { %v15508_v32 = vsel %vm2603_vm14, %v19153_v47, %v19152_v2  ;;  %v4764_v40 = vadd.f32 %v19156_v33, %v14875_v17  ;;  %v15521_v49 = vsel %vm1704_vm13, %v15420_v63, %v15501_v18 }
 0x81e   : > { %19154 = vst [vmem:[#allocation61_spill] sm:$0xff] %v15508_v32  ;;  %v5629_v37 = vsel %vm5594_vm3, %v5626_v24, %v5628_v21  ;;  %v5465_v59 = vadd.f32 %v15361_v13, %v5222_v50  ;;  %v15527_v46 = vsel %vm2368_vm15, %v15429_v23, %v15510_v0  ;;  %v6098_v39 = vunpack.c.l.b16 %v6010_v38 }
 0x81f   : > { %19157 = vst [vmem:[#allocation17_spill] sm:$0xff] %v15521_v49  ;;  %v5970_v47 = vmul.f32 %v15512_v15, %v5629_v37  ;;  %v4932_v17 = vadd.f32 %v14852_v30, %v4764_v40  ;;  %v19159_v30 = vrot.slane %v15052_v57, 1 }
 0x820   : > { %19158 = vst [vmem:[#allocation30_spill] sm:$0xff] %v15527_v46  ;;  %v5504_v24 = vadd.f32 %v15023_v51, %v5465_v59  ;;  %v15530_v10 = vpop.f32.mrf.mxu1  ;;  %v18821_v59 = vrot.slane %v14999_v1, 1 }
 0x821   : > { %v6011_v13 = vpack.c.bf16 %v5970_v47, %v5970_v47 }
 0x822   : > { %v5540_v20 = vmax.f32 %v5504_v24, 0.0  ;;  %v15542_v24 = vpop.f32.mrf.mxu3  ;;  %v6603_v40 = vsel %vm1307_vm10, %v18821_v59, %v19159_v30  ;;  %v15573_v30 = vpop.permute.xlu2 %5848 }
 0x823   : > { %v6099_v50 = vunpack.c.l.b16 %v6011_v13  ;;  %v5161_v63 = vpop.f32.mrf.mxu2  ;;  %11956 = vmatmul.msk.bf16.gmra.mxu1 %vm645_vm0, %v15145_v8  ;;  %19161 = vst [vmem:[#allocation67_spill] sm:$0xff] %v15573_v30 }
 0x824   : > { %v5630_v11 = vrot.slane %v5540_v20, 5  ;;  %v5223_v2 = vadd.f32 %v5161_v63, %v4932_v17  ;;  %v15535_v37 = vpop.f32.mrf.mxu0  ;;  %v19160_v63 = vrot.slane %v15456_v16, 1 }
 0x825   : > { %v15537_v23 = vpack.c.b16 %v6099_v50, %v6098_v39  ;;  %v6206_v39 = vor.u32 %v6204_v62, %v6202_v26 }
 0x826   : > { %v5631_v33 = vsel %vm5594_vm3, %v5628_v21, %v5630_v11  ;;  %v5466_v47 = vadd.f32 %v15388_v56, %v5223_v2 }
 0x827   : > { %11904 = vmatmul.msk.bf16.gmra.mxu0 %vm645_vm0, %v15537_v23  ;;  %v15552_v38 = vshll.u32 %v15537_v23, 16  ;;  %v15555_v13 = vshrl.u32 %v15537_v23, 16  ;;  %v18823_v21 = vrot.slane %v15537_v23, 1  ;;  %v18827_v57 = vrot.slane %v15537_v23, 2 }
 0x828   : > { %v5505_v56 = vadd.f32 %v15023_v51, %v5466_v47  ;;  %v15559_v20 = vpop.f32.mrf.mxu1  ;;  %11925 = vmatmul.msk.bf16.vlgmr.msrb.gmra.mxu2 %vm645_vm0, %v6603_v40  ;;  %v19162_v40 = vrot.slane %v15456_v16, 2  ;;  %v5971_v15 = vmul.f32 %v15573_v30, %v5631_v33  ;;  %v19177_v44 = vrot.slane %v15537_v23, 3 }
 0x829   : > { %v6210_v50 = vrot.slane %v15552_v38, 1  ;;  %v15570_v2 = vsel %vm1307_vm10, %v19160_v63, %v18823_v21  ;;  %v7043_v47 = vrot.slane %v15555_v13, 1  ;;  %v7044_v26 = vrot.slane %v15552_v38, 2 }
 0x82a   : > { %v5541_v59 = vmax.f32 %v5505_v56, 0.0  ;;  %v15580_v62 = vsel %vm1979_vm12, %v19162_v40, %v18827_v57  ;;  %v7741_v17 = vrot.slane %v15555_v13, 2  ;;  %v7742_v41 = vrot.slane %v15552_v38, 3  ;;  %v19168_v38 = vld [vmem:[#allocation18_spill] sm:$0xff] }
 0x82b   : > { %19163 = vst [vmem:[#allocation16_spill] sm:$0xff] %v15580_v62  ;;  %v5164_v63 = vpop.f32.mrf.mxu2  ;;  %v6211_v21 = vsel %vm1057_vm11, %v6206_v39, %v6210_v50  ;;  %v15591_v40 = vor.u32 %v7044_v26, %v7043_v47  ;;  %v19164_v57 = vrot.slane %v15537_v23, 3  ;;  %v15602_v39 = vpop.permute.xlu0 %5853  ;;  %v6012_v16 = vpack.c.bf16 %v5971_v15, %v5971_v15  ;;  %v19256_v62 = vld [vmem:[#allocation66_spill] sm:$0xff] }
 0x82c   : > { %v5632_v1 = vrot.slane %v5541_v59, 5  ;;  %v5224_v56 = vadd.f32 %v5164_v63, %v14893_v45  ;;  %11877 = vmatmul.msk.bf16.gmra.mxu3 %vm645_vm0, %v6211_v21  ;;  %v15589_v32 = vpop.f32.mrf.mxu0  ;;  %v15600_v30 = vor.u32 %v7742_v41, %v7741_v17  ;;  %19167 = vst [vmem:[#allocation70_spill] sm:$0xff] %v15602_v39  ;;  %v4766_v21 = vadd.f32 %v19168_v38, %v14898_v43 }
 0x82d   : > { %v15598_v33 = vsel %vm2603_vm14, %v19165_v54, %v19164_v57  ;;  %v15611_v47 = vsel %vm1704_vm13, %v15501_v18, %v15591_v40  ;;  %v19171_v18 = vld [vmem:[#allocation22_spill] sm:$0xff]  ;;  %v6100_v15 = vunpack.c.l.b16 %v6012_v16 }
 0x82e   : > { %19166 = vst [vmem:[#allocation69_spill] sm:$0xff] %v15598_v33  ;;  %v5633_v59 = vsel %vm5594_vm3, %v5630_v11, %v5632_v1  ;;  %v5467_v45 = vadd.f32 %v15449_v14, %v5224_v56  ;;  %v15617_v41 = vsel %vm2368_vm15, %v15510_v0, %v15600_v30  ;;  %v4934_v63 = vadd.f32 %v19171_v18, %v4766_v21 }
 0x82f   : > { %19169 = vst [vmem:[#allocation18_spill] sm:$0xff] %v15611_v47  ;;  %v5972_v54 = vmul.f32 %v15602_v39, %v5633_v59  ;;  %v6359_v57 = vpop.f32.mrf.mxu3 }
 0x830   : > { %19170 = vst [vmem:[#allocation71_spill] sm:$0xff] %v15617_v41  ;;  %v5506_v11 = vadd.f32 %v15023_v51, %v5467_v45  ;;  %v15621_v14 = vadd.f32 %v15452_v42, %v6359_v57  ;;  %v15623_v43 = vpop.f32.mrf.mxu1 }
 0x831   : > { %v6013_v17 = vpack.c.bf16 %v5972_v54, %v5972_v54 }
 0x832   : > { %v5542_v26 = vmax.f32 %v5506_v11, 0.0 }
 0x833   : > { %v6101_v56 = vunpack.c.l.b16 %v6013_v17  ;;  %v5166_v59 = vpop.f32.mrf.mxu2  ;;  %11957 = vmatmul.msk.bf16.gmra.mxu1 %vm645_vm0, %v15201_v48 }
 0x834   : > { %v5634_v38 = vrot.slane %v5542_v26, 5  ;;  %v5225_v0 = vadd.f32 %v5166_v59, %v4934_v63  ;;  %v15628_v39 = vpop.f32.mrf.mxu0  ;;  %v6214_v63 = vor.u32 %v15555_v13, %v6210_v50  ;;  %v15663_v59 = vpop.permute.xlu1 %5858 }
 0x835   : > { %v15630_v45 = vpack.c.b16 %v6101_v56, %v6100_v15  ;;  %19173 = vst [vmem:[#allocation22_spill] sm:$0xff] %v15663_v59 }
 0x836   : > { %v5635_v42 = vsel %vm5594_vm3, %v5632_v1, %v5634_v38  ;;  %v5468_v57 = vadd.f32 %v15471_v6, %v5225_v0  ;;  %v19174_v0 = vrot.slane %v15537_v23, 2 }
 0x837   : > { %v6361_v54 = vpop.f32.mrf.mxu3  ;;  %11905 = vmatmul.msk.bf16.gmra.mxu0 %vm645_vm0, %v15630_v45  ;;  %v15637_v21 = vshll.u32 %v15630_v45, 16  ;;  %v15640_v16 = vshrl.u32 %v15630_v45, 16  ;;  %v18830_v11 = vrot.slane %v15630_v45, 1  ;;  %v18831_v6 = vrot.slane %v15630_v45, 2 }
 0x838   : > { %v5507_v17 = vadd.f32 %v15023_v51, %v5468_v57  ;;  %v15645_v26 = vadd.f32 %v15499_v7, %v6361_v54  ;;  %v15647_v1 = vpop.f32.mrf.mxu1  ;;  %11926 = vmatmul.msk.bf16.gmra.mxu2 %vm645_vm0, %v15102_v4  ;;  %v19172_v51 = vrot.slane %v15537_v23, 1  ;;  %v5973_v54 = vmul.f32 %v15663_v59, %v5635_v42 }
 0x839   : > { %v6218_v15 = vrot.slane %v15637_v21, 1  ;;  %v7047_v56 = vrot.slane %v15640_v16, 1  ;;  %v15670_v13 = vsel %vm1979_vm12, %v19174_v0, %v18831_v6  ;;  %v7048_v50 = vrot.slane %v15637_v21, 2 }
 0x83a   : > { %v15660_v7 = vsel %vm1307_vm10, %v19172_v51, %v18830_v11  ;;  %v5543_v4 = vmax.f32 %v5507_v17, 0.0  ;;  %19175 = vst [vmem:[#allocation72_spill] sm:$0xff] %v15670_v13  ;;  %v7745_v57 = vrot.slane %v15640_v16, 2  ;;  %v7746_v18 = vrot.slane %v15637_v21, 3 }
 0x83b   : > { %v5169_v51 = vpop.f32.mrf.mxu2  ;;  %v6219_v11 = vsel %vm1057_vm11, %v6214_v63, %v6218_v15  ;;  %v15681_v0 = vor.u32 %v7048_v50, %v7047_v56  ;;  %v19176_v6 = vrot.slane %v15630_v45, 3  ;;  %v15692_v63 = vpop.permute.xlu2 %5863  ;;  %v6014_v23 = vpack.c.bf16 %v5973_v54, %v5973_v54  ;;  %v19183_v54 = vld [vmem:[#allocation36_spill] sm:$0xff] }
 0x83c   : > { %v5636_v33 = vrot.slane %v5543_v4, 5  ;;  %v5226_v17 = vadd.f32 %v5169_v51, %v14911_v34  ;;  %11878 = vmatmul.msk.bf16.gmra.mxu3 %vm645_vm0, %v6219_v11  ;;  %v15679_v52 = vpop.f32.mrf.mxu0  ;;  %v15690_v59 = vor.u32 %v7746_v18, %v7745_v57  ;;  %19179 = vst [vmem:[#allocation74_spill] sm:$0xff] %v15692_v63  ;;  %v19180_v11 = vld [vmem:[#allocation21_spill] sm:$0xff]  ;;  %v19190_v28 = vrot.slane %v15630_v45, 3 }
 0x83d   : > { %v15688_v42 = vsel %vm2603_vm14, %v19177_v44, %v19176_v6  ;;  %v4768_v4 = vadd.f32 %v19180_v11, %v14918_v9  ;;  %v15701_v56 = vsel %vm1704_vm13, %v15591_v40, %v15681_v0 }
 0x83e   : > { %19178 = vst [vmem:[#allocation73_spill] sm:$0xff] %v15688_v42  ;;  %v5637_v21 = vsel %vm5594_vm3, %v5634_v38, %v5636_v33  ;;  %v5469_v34 = vadd.f32 %v15530_v10, %v5226_v17  ;;  %v15707_v18 = vsel %vm2368_vm15, %v15600_v30, %v15690_v59  ;;  %v15712_v10 = vld [vmem:[%s18770_s12] ss:$0 sm:$0xff]  ;;  %v6102_v17 = vunpack.c.l.b16 %v6014_v23 }
 0x83f   : > { %19181 = vst [vmem:[#allocation21_spill] sm:$0xff] %v15701_v56  ;;  %v5974_v44 = vmul.f32 %v15692_v63, %v5637_v21  ;;  %v6364_v6 = vpop.f32.mrf.mxu3  ;;  %v4936_v51 = vadd.f32 %v19183_v54, %v4768_v4  ;;  %v6222_v54 = vor.u32 %v15640_v16, %v6218_v15 }
 0x840   : > { %19182 = vst [vmem:[#allocation75_spill] sm:$0xff] %v15707_v18  ;;  %v5508_v9 = vadd.f32 %v15712_v10, %v5469_v34  ;;  %v15716_v38 = vadd.f32 %v15535_v37, %v6364_v6  ;;  %v15718_v40 = vpop.f32.mrf.mxu1 }
 0x841   : > { %v6015_v50 = vpack.c.bf16 %v5974_v44, %v5974_v44 }
 0x842   : > { %v5544_v57 = vmax.f32 %v5508_v9, 0.0 }
 0x843   : > { %v6103_v21 = vunpack.c.l.b16 %v6015_v50  ;;  %v5171_v30 = vpop.f32.mrf.mxu2  ;;  %11958 = vmatmul.msk.bf16.gmra.mxu1 %vm645_vm0, %v15256_v3 }
 0x844   : > { %v5638_v11 = vrot.slane %v5544_v57, 5  ;;  %v5227_v63 = vadd.f32 %v5171_v30, %v4936_v51  ;;  %v15723_v42 = vpop.f32.mrf.mxu0  ;;  %v15758_v30 = vpop.permute.xlu0 %5868 }
 0x845   : > { %v15725_v34 = vpack.c.b16 %v6103_v21, %v6102_v17  ;;  %v19184_v17 = vrot.slane %v15630_v45, 1  ;;  %19185 = vst [vmem:[#allocation36_spill] sm:$0xff] %v15758_v30 }
 0x846   : > { %v5639_v37 = vsel %vm5594_vm3, %v5636_v33, %v5638_v11  ;;  %v5470_v6 = vadd.f32 %v15559_v20, %v5227_v63 }
 0x847   : > { %v6366_v44 = vpop.f32.mrf.mxu3  ;;  %11906 = vmatmul.msk.bf16.gmra.mxu0 %vm645_vm0, %v15725_v34  ;;  %v15732_v4 = vshll.u32 %v15725_v34, 16  ;;  %v15735_v23 = vshrl.u32 %v15725_v34, 16  ;;  %v18834_v9 = vrot.slane %v15725_v34, 1  ;;  %v18835_v20 = vrot.slane %v15725_v34, 2 }
 0x848   : > { %v5509_v50 = vadd.f32 %v15712_v10, %v5470_v6  ;;  %v15740_v57 = vadd.f32 %v15589_v32, %v6366_v44  ;;  %v15742_v33 = vpop.f32.mrf.mxu1  ;;  %11927 = vmatmul.msk.bf16.gmra.mxu2 %vm645_vm0, %v15145_v8  ;;  %v19186_v6 = vrot.slane %v15630_v45, 2  ;;  %v5975_v63 = vmul.f32 %v15758_v30, %v5639_v37 }
 0x849   : > { %v6226_v51 = vrot.slane %v15732_v4, 1  ;;  %v15755_v32 = vsel %vm1307_vm10, %v19184_v17, %v18834_v9  ;;  %v7051_v21 = vrot.slane %v15735_v23, 1  ;;  %v7052_v15 = vrot.slane %v15732_v4, 2 }
 0x84a   : > { %v5545_v8 = vmax.f32 %v5509_v50, 0.0  ;;  %v15765_v16 = vsel %vm1979_vm12, %v19186_v6, %v18835_v20  ;;  %v7749_v44 = vrot.slane %v15735_v23, 2  ;;  %v7750_v18 = vrot.slane %v15732_v4, 3  ;;  %v19188_v50 = vld [vmem:[#allocation26_spill] sm:$0xff] }
 0x84b   : > { %19187 = vst [vmem:[#allocation76_spill] sm:$0xff] %v15765_v16  ;;  %v5174_v17 = vpop.f32.mrf.mxu2  ;;  %v6227_v9 = vsel %vm1057_vm11, %v6222_v54, %v6226_v51  ;;  %v15776_v6 = vor.u32 %v7052_v15, %v7051_v21  ;;  %v19189_v20 = vrot.slane %v15725_v34, 3  ;;  %v15787_v54 = vpop.permute.xlu1 %5873  ;;  %v6016_v45 = vpack.c.bf16 %v5975_v63, %v5975_v63  ;;  %v19228_v16 = vld [vmem:[#allocation54_spill] sm:$0xff] }
 0x84c   : > { %v5640_v41 = vrot.slane %v5545_v8, 5  ;;  %v5228_v46 = vadd.f32 %v5174_v17, %v19188_v50  ;;  %11879 = vmatmul.msk.bf16.gmra.mxu3 %vm645_vm0, %v6227_v9  ;;  %v15774_v27 = vpop.f32.mrf.mxu0  ;;  %v15785_v30 = vor.u32 %v7750_v18, %v7749_v44  ;;  %19192 = vst [vmem:[#allocation77_spill] sm:$0xff] %v15787_v54  ;;  %v19193_v9 = vld [vmem:[#allocation42_spill] sm:$0xff]  ;;  %v19194_v17 = vld [vmem:[#allocation23_spill] sm:$0xff] }
 0x84d   : > { %v15783_v37 = vsel %vm2603_vm14, %v19190_v28, %v19189_v20  ;;  %v4770_v50 = vadd.f32 %v19194_v17, %v19193_v9  ;;  %v15796_v21 = vsel %vm1704_vm13, %v15681_v0, %v15776_v6  ;;  %v19197_v0 = vld [vmem:[#allocation27_spill] sm:$0xff]  ;;  %v6104_v63 = vunpack.c.l.b16 %v6016_v45 }
 0x84e   : > { %19191 = vst [vmem:[#allocation26_spill] sm:$0xff] %v15783_v37  ;;  %v5641_v4 = vsel %vm5594_vm3, %v5638_v11, %v5640_v41  ;;  %v5471_v8 = vadd.f32 %v15623_v43, %v5228_v46  ;;  %v15802_v18 = vsel %vm2368_vm15, %v15690_v59, %v15785_v30 }
 0x84f   : > { %19195 = vst [vmem:[#allocation42_spill] sm:$0xff] %v15796_v21  ;;  %v5976_v28 = vmul.f32 %v15787_v54, %v5641_v4  ;;  %v6369_v20 = vpop.f32.mrf.mxu3  ;;  %v4938_v9 = vadd.f32 %v19197_v0, %v4770_v50 }
 0x850   : > { %19196 = vst [vmem:[#allocation23_spill] sm:$0xff] %v15802_v18  ;;  %v5510_v11 = vadd.f32 %v15712_v10, %v5471_v8  ;;  %v15806_v46 = vadd.f32 %v15628_v39, %v6369_v20  ;;  %v15808_v43 = vpop.f32.mrf.mxu1 }
 0x851   : > { %v6017_v15 = vpack.c.bf16 %v5976_v28, %v5976_v28 }
 0x852   : > { %v5546_v44 = vmax.f32 %v5510_v11, 0.0 }
 0x853   : > { %v6105_v17 = vunpack.c.l.b16 %v6017_v15  ;;  %v5176_v4 = vpop.f32.mrf.mxu2  ;;  %11959 = vmatmul.msk.bf16.gmra.mxu1 %vm645_vm0, %v15318_v53 }
 0x854   : > { %v5642_v54 = vrot.slane %v5546_v44, 5  ;;  %v5229_v59 = vadd.f32 %v5176_v4, %v4938_v9  ;;  %v15813_v37 = vpop.f32.mrf.mxu0  ;;  %v6230_v9 = vor.u32 %v15735_v23, %v6226_v51 }
 0x855   : > { %v15815_v8 = vpack.c.b16 %v6105_v17, %v6104_v63  ;;  %v19198_v17 = vrot.slane %v15725_v34, 1 }
 0x856   : > { %v5643_v39 = vsel %vm5594_vm3, %v5640_v41, %v5642_v54  ;;  %v5472_v20 = vadd.f32 %v15647_v1, %v5229_v59  ;;  %v15848_v59 = vpop.permute.xlu2 %5878 }
 0x857   : > { %v6371_v28 = vpop.f32.mrf.mxu3  ;;  %11907 = vmatmul.msk.bf16.gmra.mxu0 %vm645_vm0, %v15815_v8  ;;  %v15822_v50 = vshll.u32 %v15815_v8, 16  ;;  %v15825_v45 = vshrl.u32 %v15815_v8, 16  ;;  %v18838_v11 = vrot.slane %v15815_v8, 1  ;;  %v18839_v1 = vrot.slane %v15815_v8, 2  ;;  %19199 = vst [vmem:[#allocation27_spill] sm:$0xff] %v15848_v59 }
 0x858   : > { %v5511_v15 = vadd.f32 %v15712_v10, %v5472_v20  ;;  %v15830_v44 = vadd.f32 %v15679_v52, %v6371_v28  ;;  %v15832_v41 = vpop.f32.mrf.mxu1  ;;  %11928 = vmatmul.msk.bf16.gmra.mxu2 %vm645_vm0, %v15201_v48  ;;  %v19200_v20 = vrot.slane %v15725_v34, 2  ;;  %v5977_v0 = vmul.f32 %v15848_v59, %v5643_v39 }
 0x859   : > { %v6234_v63 = vrot.slane %v15822_v50, 1  ;;  %v15845_v52 = vsel %vm1307_vm10, %v19198_v17, %v18838_v11  ;;  %v7055_v4 = vrot.slane %v15825_v45, 1  ;;  %v7056_v51 = vrot.slane %v15822_v50, 2 }
 0x85a   : > { %v5547_v48 = vmax.f32 %v5511_v15, 0.0  ;;  %v15855_v23 = vsel %vm1979_vm12, %v19200_v20, %v18839_v1  ;;  %v7753_v28 = vrot.slane %v15825_v45, 2  ;;  %v7754_v18 = vrot.slane %v15822_v50, 3 }
 0x85b   : > { %19201 = vst [vmem:[#allocation78_spill] sm:$0xff] %v15855_v23  ;;  %v5179_v17 = vpop.f32.mrf.mxu2  ;;  %v6235_v11 = vsel %vm1057_vm11, %v6230_v9, %v6234_v63  ;;  %v15866_v20 = vor.u32 %v7056_v51, %v7055_v4  ;;  %v19202_v1 = vrot.slane %v15815_v8, 3  ;;  %v19203_v23 = vrot.slane %v15725_v34, 3  ;;  %v15877_v9 = vpop.permute.xlu0 %5883 }
 0x85c   : > { %v5644_v21 = vrot.slane %v5547_v48, 5  ;;  %v5230_v15 = vadd.f32 %v5179_v17, %v14948_v12  ;;  %11880 = vmatmul.msk.bf16.gmra.mxu3 %vm645_vm0, %v6235_v11  ;;  %v15864_v22 = vpop.f32.mrf.mxu0  ;;  %v15875_v59 = vor.u32 %v7754_v18, %v7753_v28  ;;  %19205 = vst [vmem:[#allocation80_spill] sm:$0xff] %v15877_v9  ;;  %v19206_v11 = vld [vmem:[#allocation28_spill] sm:$0xff]  ;;  %v6018_v34 = vpack.c.bf16 %v5977_v0, %v5977_v0 }
 0x85d   : > { %v15873_v39 = vsel %vm2603_vm14, %v19203_v23, %v19202_v1  ;;  %v4772_v48 = vadd.f32 %v19206_v11, %v14953_v58  ;;  %v15886_v4 = vsel %vm1704_vm13, %v15776_v6, %v15866_v20  ;;  %v19209_v6 = vld [vmem:[#allocation33_spill] sm:$0xff] }
 0x85e   : > { %19204 = vst [vmem:[#allocation79_spill] sm:$0xff] %v15873_v39  ;;  %v5645_v50 = vsel %vm5594_vm3, %v5642_v54, %v5644_v21  ;;  %v5473_v12 = vadd.f32 %v15718_v40, %v5230_v15  ;;  %v15892_v18 = vsel %vm2368_vm15, %v15785_v30, %v15875_v59  ;;  %v6106_v0 = vunpack.c.l.b16 %v6018_v34 }
 0x85f   : > { %19207 = vst [vmem:[#allocation28_spill] sm:$0xff] %v15886_v4  ;;  %v5978_v1 = vmul.f32 %v15877_v9, %v5645_v50  ;;  %v6374_v23 = vpop.f32.mrf.mxu3  ;;  %v4940_v17 = vadd.f32 %v19209_v6, %v4772_v48 }
 0x860   : > { %19208 = vst [vmem:[#allocation81_spill] sm:$0xff] %v15892_v18  ;;  %v5512_v54 = vadd.f32 %v15712_v10, %v5473_v12  ;;  %v15896_v40 = vadd.f32 %v15723_v42, %v6374_v23  ;;  %v15898_v58 = vpop.f32.mrf.mxu1  ;;  %v12506_v42 = vld [vmem:[%s18771_s13 + $0x40] sm:$0xff] }
 0x861   : > { %v6019_v51 = vpack.c.bf16 %v5978_v1, %v5978_v1  ;;  %7170 = vmatpush.bf16.msra.mxu3 %v12506_v42  ;;  %v15941_v42 = vpop.permute.xlu1 %5888 }
 0x862   : > { %v5548_v28 = vmax.f32 %v5512_v54, 0.0  ;;  %19211 = vst [vmem:[#allocation33_spill] sm:$0xff] %v15941_v42 }
 0x863   : > { %v6107_v15 = vunpack.c.l.b16 %v6019_v51  ;;  %v5181_v50 = vpop.f32.mrf.mxu2  ;;  %11960 = vmatmul.msk.bf16.gmra.mxu1 %vm645_vm0, %v15398_v35 }
 0x864   : > { %v5646_v11 = vrot.slane %v5548_v28, 5  ;;  %v5231_v30 = vadd.f32 %v5181_v50, %v4940_v17  ;;  %v15903_v9 = vpop.f32.mrf.mxu0  ;;  %v19210_v50 = vrot.slane %v15815_v8, 1 }
 0x865   : > { %v15905_v12 = vpack.c.b16 %v6107_v15, %v6106_v0  ;;  %v6238_v0 = vor.u32 %v15825_v45, %v6234_v63 }
 0x866   : > { %v5647_v1 = vsel %vm5594_vm3, %v5644_v21, %v5646_v11  ;;  %v5474_v48 = vadd.f32 %v15742_v33, %v5231_v30 }
 0x867   : > { %v6376_v34 = vpop.f32.mrf.mxu3  ;;  %11908 = vmatmul.msk.bf16.gmra.mxu0 %vm645_vm0, %v15905_v12  ;;  %v15915_v23 = vshll.u32 %v15905_v12, 16  ;;  %v15918_v54 = vshrl.u32 %v15905_v12, 16  ;;  %v18843_v51 = vrot.slane %v15905_v12, 1  ;;  %v18844_v33 = vrot.slane %v15905_v12, 2 }
 0x868   : > { %v5513_v28 = vadd.f32 %v15712_v10, %v5474_v48  ;;  %v15923_v6 = vadd.f32 %v15774_v27, %v6376_v34  ;;  %v15925_v21 = vpop.f32.mrf.mxu1  ;;  %11929 = vmatmul.msk.bf16.gmra.mxu2 %vm645_vm0, %v15256_v3  ;;  %v19212_v48 = vrot.slane %v15815_v8, 2  ;;  %v5979_v17 = vmul.f32 %v15941_v42, %v5647_v1 }
 0x869   : > { %v6242_v15 = vrot.slane %v15915_v23, 1  ;;  %v15938_v27 = vsel %vm1307_vm10, %v19210_v50, %v18843_v51  ;;  %v7059_v30 = vrot.slane %v15918_v54, 1  ;;  %v7060_v63 = vrot.slane %v15915_v23, 2 }
 0x86a   : > { %v5549_v3 = vmax.f32 %v5513_v28, 0.0  ;;  %v15948_v45 = vsel %vm1979_vm12, %v19212_v48, %v18844_v33  ;;  %v7757_v34 = vrot.slane %v15918_v54, 2  ;;  %v7758_v39 = vrot.slane %v15915_v23, 3  ;;  %v19214_v28 = vld [vmem:[#allocation34_spill] sm:$0xff] }
 0x86b   : > { %19213 = vst [vmem:[#allocation82_spill] sm:$0xff] %v15948_v45  ;;  %v5184_v50 = vpop.f32.mrf.mxu2  ;;  %v6243_v51 = vsel %vm1057_vm11, %v6238_v0, %v6242_v15  ;;  %v15959_v48 = vor.u32 %v7060_v63, %v7059_v30  ;;  %v19215_v33 = vrot.slane %v15905_v12, 3  ;;  %v19216_v45 = vrot.slane %v15815_v8, 3  ;;  %v15970_v0 = vpop.permute.xlu2 %5893 }
 0x86c   : > { %v5648_v18 = vrot.slane %v5549_v3, 5  ;;  %v5232_v4 = vadd.f32 %v5184_v50, %v19214_v28  ;;  %11881 = vmatmul.msk.bf16.gmra.mxu3 %vm645_vm0, %v6243_v51  ;;  %v15957_v56 = vpop.f32.mrf.mxu0  ;;  %v15968_v42 = vor.u32 %v7758_v39, %v7757_v34  ;;  %19218 = vst [vmem:[#allocation83_spill] sm:$0xff] %v15970_v0  ;;  %v19219_v51 = vld [vmem:[#allocation39_spill] sm:$0xff]  ;;  %v19220_v50 = vld [vmem:[#allocation32_spill] sm:$0xff]  ;;  %v6020_v8 = vpack.c.bf16 %v5979_v17, %v5979_v17 }
 0x86d   : > { %v15966_v1 = vsel %vm2603_vm14, %v19216_v45, %v19215_v33  ;;  %v4774_v28 = vadd.f32 %v19220_v50, %v19219_v51  ;;  %v15979_v30 = vsel %vm1704_vm13, %v15866_v20, %v15959_v48  ;;  %v19223_v20 = vld [vmem:[#allocation48_spill] sm:$0xff] }
 0x86e   : > { %19217 = vst [vmem:[#allocation34_spill] sm:$0xff] %v15966_v1  ;;  %v5649_v23 = vsel %vm5594_vm3, %v5646_v11, %v5648_v18  ;;  %v5475_v3 = vadd.f32 %v15808_v43, %v5232_v4  ;;  %v15985_v39 = vsel %vm2368_vm15, %v15875_v59, %v15968_v42  ;;  %v6108_v17 = vunpack.c.l.b16 %v6020_v8 }
 0x86f   : > { %19221 = vst [vmem:[#allocation39_spill] sm:$0xff] %v15979_v30  ;;  %v5980_v33 = vmul.f32 %v15970_v0, %v5649_v23  ;;  %v6379_v45 = vpop.f32.mrf.mxu3  ;;  %v4942_v51 = vadd.f32 %v19223_v20, %v4774_v28 }
 0x870   : > { %19222 = vst [vmem:[#allocation32_spill] sm:$0xff] %v15985_v39  ;;  %v5514_v11 = vadd.f32 %v15712_v10, %v5475_v3  ;;  %v15989_v43 = vadd.f32 %v15813_v37, %v6379_v45  ;;  %v15991_v4 = vpop.f32.mrf.mxu1 }
 0x871   : > { %v6021_v63 = vpack.c.bf16 %v5980_v33, %v5980_v33 }
 0x872   : > { %v5550_v34 = vmax.f32 %v5514_v11, 0.0 }
 0x873   : > { %v6109_v50 = vunpack.c.l.b16 %v6021_v63  ;;  %v5186_v23 = vpop.f32.mrf.mxu2  ;;  %11961 = vmatmul.msk.bf16.gmra.mxu1 %vm645_vm0, %v15482_v36 }
 0x874   : > { %v5650_v0 = vrot.slane %v5550_v34, 5  ;;  %v5233_v59 = vadd.f32 %v5186_v23, %v4942_v51  ;;  %v15996_v1 = vpop.f32.mrf.mxu0  ;;  %v6246_v51 = vor.u32 %v15918_v54, %v6242_v15 }
 0x875   : > { %v15998_v3 = vpack.c.b16 %v6109_v50, %v6108_v17  ;;  %v19224_v50 = vrot.slane %v15905_v12, 1 }
 0x876   : > { %v5651_v37 = vsel %vm5594_vm3, %v5648_v18, %v5650_v0  ;;  %v5476_v45 = vadd.f32 %v15832_v41, %v5233_v59  ;;  %v16031_v59 = vpop.permute.xlu0 %5898 }
 0x877   : > { %v6381_v33 = vpop.f32.mrf.mxu3  ;;  %11909 = vmatmul.msk.bf16.gmra.mxu0 %vm645_vm0, %v15998_v3  ;;  %v16005_v28 = vshll.u32 %v15998_v3, 16  ;;  %v16008_v8 = vshrl.u32 %v15998_v3, 16  ;;  %v18848_v11 = vrot.slane %v15998_v3, 1  ;;  %v18850_v41 = vrot.slane %v15998_v3, 2  ;;  %19225 = vst [vmem:[#allocation48_spill] sm:$0xff] %v16031_v59 }
 0x878   : > { %v5515_v63 = vadd.f32 %v15712_v10, %v5476_v45  ;;  %v16013_v34 = vadd.f32 %v15864_v22, %v6381_v33  ;;  %v16015_v18 = vpop.f32.mrf.mxu1  ;;  %11930 = vmatmul.msk.bf16.gmra.mxu2 %vm645_vm0, %v15318_v53  ;;  %v19226_v45 = vrot.slane %v15905_v12, 2  ;;  %v5981_v20 = vmul.f32 %v16031_v59, %v5651_v37 }
 0x879   : > { %v6250_v17 = vrot.slane %v16005_v28, 1  ;;  %v16028_v22 = vsel %vm1307_vm10, %v19224_v50, %v18848_v11  ;;  %v7063_v23 = vrot.slane %v16008_v8, 1  ;;  %v7064_v15 = vrot.slane %v16005_v28, 2 }
 0x87a   : > { %v5551_v53 = vmax.f32 %v5515_v63, 0.0  ;;  %v16038_v54 = vsel %vm1979_vm12, %v19226_v45, %v18850_v41  ;;  %v7761_v33 = vrot.slane %v16008_v8, 2  ;;  %v12509_v63 = vld [vmem:[%s18771_s13 + $0x58] sm:$0xff]  ;;  %v7762_v39 = vrot.slane %v16005_v28, 3  ;;  %v16063_v28 = vpop.permute.xlu1 %5903 }
 0x87b   : > { %19227 = vst [vmem:[#allocation84_spill] sm:$0xff] %v16038_v54  ;;  %v5189_v50 = vpop.f32.mrf.mxu2  ;;  %v6251_v11 = vsel %vm1057_vm11, %v6246_v51, %v6250_v17  ;;  %v16052_v41 = vor.u32 %v7064_v15, %v7063_v23  ;;  %v19229_v37 = vrot.slane %v15998_v3, 3  ;;  %v19230_v59 = vrot.slane %v15905_v12, 3  ;;  %7412 = vmatpush.bf16.msrb.mxu0 %v12509_v63 }
 0x87c   : > { %v5652_v30 = vrot.slane %v5551_v53, 5  ;;  %v5234_v47 = vadd.f32 %v5189_v50, %v19228_v16  ;;  %11882 = vmatmul.msk.bf16.gmra.mxu3 %vm645_vm0, %v6251_v11  ;;  %v16050_v45 = vpop.f32.mrf.mxu0  ;;  %v16061_v54 = vor.u32 %v7762_v39, %v7761_v33  ;;  %19232 = vst [vmem:[#allocation85_spill] sm:$0xff] %v16063_v28  ;;  %v19233_v53 = vld [vmem:[#allocation45_spill] sm:$0xff]  ;;  %v19234_v50 = vld [vmem:[#allocation38_spill] sm:$0xff]  ;;  %v6022_v12 = vpack.c.bf16 %v5981_v20, %v5981_v20 }
 0x87d   : > { %v16059_v51 = vsel %vm2603_vm14, %v19230_v59, %v19229_v37  ;;  %v4776_v23 = vadd.f32 %v19234_v50, %v19233_v53  ;;  %v16072_v15 = vsel %vm1704_vm13, %v15959_v48, %v16052_v41  ;;  %v19237_v48 = vld [vmem:[#allocation40_spill] sm:$0xff] }
 0x87e   : > { %19231 = vst [vmem:[#allocation54_spill] sm:$0xff] %v16059_v51  ;;  %v5653_v16 = vsel %vm5594_vm3, %v5650_v0, %v5652_v30  ;;  %v5477_v11 = vadd.f32 %v15898_v58, %v5234_v47  ;;  %v16078_v39 = vsel %vm2368_vm15, %v15968_v42, %v16061_v54  ;;  %v6110_v20 = vunpack.c.l.b16 %v6022_v12 }
 0x87f   : > { %19235 = vst [vmem:[#allocation45_spill] sm:$0xff] %v16072_v15  ;;  %v5982_v59 = vmul.f32 %v16063_v28, %v5653_v16  ;;  %v6384_v63 = vpop.f32.mrf.mxu3  ;;  %v4944_v53 = vadd.f32 %v19237_v48, %v4776_v23 }
 0x880   : > { %19236 = vst [vmem:[#allocation38_spill] sm:$0xff] %v16078_v39  ;;  %v5516_v0 = vadd.f32 %v15712_v10, %v5477_v11  ;;  %v16082_v47 = vadd.f32 %v15903_v9, %v6384_v63  ;;  %v16084_v58 = vpop.f32.mrf.mxu1 }
 0x881   : > { %v6023_v33 = vpack.c.bf16 %v5982_v59, %v5982_v59 }
 0x882   : > { %v5552_v37 = vmax.f32 %v5516_v0, 0.0 }
 0x883   : > { %v6111_v50 = vunpack.c.l.b16 %v6023_v33  ;;  %v5191_v16 = vpop.f32.mrf.mxu2  ;;  %11962 = vmatmul.msk.bf16.gmra.mxu1 %vm645_vm0, %v15570_v2 }
 0x884   : > { %v5654_v28 = vrot.slane %v5552_v37, 5  ;;  %v5235_v42 = vadd.f32 %v5191_v16, %v4944_v53  ;;  %v16089_v51 = vpop.f32.mrf.mxu0  ;;  %v6254_v53 = vor.u32 %v16008_v8, %v6250_v17 }
 0x885   : > { %v16091_v11 = vpack.c.b16 %v6111_v50, %v6110_v20  ;;  %v19238_v50 = vrot.slane %v15998_v3, 1 }
 0x886   : > { %v5655_v9 = vsel %vm5594_vm3, %v5652_v30, %v5654_v28  ;;  %v5478_v63 = vadd.f32 %v15925_v21, %v5235_v42  ;;  %v16124_v42 = vpop.permute.xlu2 %5908 }
 0x887   : > { %v6386_v59 = vpop.f32.mrf.mxu3  ;;  %11910 = vmatmul.msk.bf16.gmra.mxu0 %vm645_vm0, %v16091_v11  ;;  %v16098_v23 = vshll.u32 %v16091_v11, 16  ;;  %v16101_v12 = vshrl.u32 %v16091_v11, 16  ;;  %v18854_v0 = vrot.slane %v16091_v11, 1  ;;  %v18856_v21 = vrot.slane %v16091_v11, 2  ;;  %19239 = vst [vmem:[#allocation40_spill] sm:$0xff] %v16124_v42 }
 0x888   : > { %v5517_v33 = vadd.f32 %v15712_v10, %v5478_v63  ;;  %v16106_v37 = vadd.f32 %v15957_v56, %v6386_v59  ;;  %v16108_v30 = vpop.f32.mrf.mxu1  ;;  %11931 = vmatmul.msk.bf16.gmra.mxu2 %vm645_vm0, %v15398_v35  ;;  %v19240_v63 = vrot.slane %v15998_v3, 2  ;;  %v5983_v48 = vmul.f32 %v16124_v42, %v5655_v9 }
 0x889   : > { %v6258_v20 = vrot.slane %v16098_v23, 1  ;;  %v16121_v56 = vsel %vm1307_vm10, %v19238_v50, %v18854_v0  ;;  %v7067_v16 = vrot.slane %v16101_v12, 1  ;;  %v7068_v17 = vrot.slane %v16098_v23, 2 }
 0x88a   : > { %v5553_v35 = vmax.f32 %v5517_v33, 0.0  ;;  %v16131_v8 = vsel %vm1979_vm12, %v19240_v63, %v18856_v21  ;;  %v7765_v59 = vrot.slane %v16101_v12, 2  ;;  %v7766_v39 = vrot.slane %v16098_v23, 3  ;;  %v19242_v33 = vld [vmem:[#allocation44_spill] sm:$0xff] }
 0x88b   : > { %19241 = vst [vmem:[#allocation86_spill] sm:$0xff] %v16131_v8  ;;  %v5194_v50 = vpop.f32.mrf.mxu2  ;;  %v6259_v0 = vsel %vm1057_vm11, %v6254_v53, %v6258_v20  ;;  %v16142_v63 = vor.u32 %v7068_v17, %v7067_v16  ;;  %v19243_v21 = vrot.slane %v16091_v11, 3  ;;  %v19244_v8 = vrot.slane %v15998_v3, 3  ;;  %v16153_v53 = vpop.permute.xlu0 %5913 }
 0x88c   : > { %v5656_v15 = vrot.slane %v5553_v35, 5  ;;  %v5236_v13 = vadd.f32 %v5194_v50, %v19242_v33  ;;  %11883 = vmatmul.msk.bf16.gmra.mxu3 %vm645_vm0, %v6259_v0  ;;  %v16140_v49 = vpop.f32.mrf.mxu0  ;;  %v16151_v42 = vor.u32 %v7766_v39, %v7765_v59  ;;  %19246 = vst [vmem:[#allocation87_spill] sm:$0xff] %v16153_v53  ;;  %v19247_v0 = vld [vmem:[#allocation51_spill] sm:$0xff]  ;;  %v19248_v50 = vld [vmem:[#allocation60_spill] sm:$0xff]  ;;  %v6024_v3 = vpack.c.bf16 %v5983_v48, %v5983_v48 }
 0x88d   : > { %v16149_v9 = vsel %vm2603_vm14, %v19244_v8, %v19243_v21  ;;  %v4778_v33 = vadd.f32 %v19248_v50, %v19247_v0  ;;  %v16162_v16 = vsel %vm1704_vm13, %v16052_v41, %v16142_v63  ;;  %v19251_v41 = vld [vmem:[#allocation50_spill] sm:$0xff] }
 0x88e   : > { %19245 = vst [vmem:[#allocation44_spill] sm:$0xff] %v16149_v9  ;;  %v5657_v23 = vsel %vm5594_vm3, %v5654_v28, %v5656_v15  ;;  %v5479_v35 = vadd.f32 %v15991_v4, %v5236_v13  ;;  %v16168_v39 = vsel %vm2368_vm15, %v16061_v54, %v16151_v42  ;;  %v6112_v48 = vunpack.c.l.b16 %v6024_v3 }
 0x88f   : > { %19249 = vst [vmem:[#allocation51_spill] sm:$0xff] %v16162_v16  ;;  %v5984_v21 = vmul.f32 %v16153_v53, %v5657_v23  ;;  %v6389_v8 = vpop.f32.mrf.mxu3  ;;  %v4946_v0 = vadd.f32 %v19251_v41, %v4778_v33 }
 0x890   : > { %19250 = vst [vmem:[#allocation60_spill] sm:$0xff] %v16168_v39  ;;  %v5518_v28 = vadd.f32 %v15712_v10, %v5479_v35  ;;  %v16172_v13 = vadd.f32 %v15996_v1, %v6389_v8  ;;  %v16174_v4 = vpop.f32.mrf.mxu1  ;;  %v12508_v1 = vld [vmem:[%s18771_s13 + $0x50] sm:$0xff] }
 0x891   : > { %v6025_v17 = vpack.c.bf16 %v5984_v21, %v5984_v21  ;;  %7413 = vmatpush.bf16.msrb.mxu0 %v12508_v1  ;;  %v19254_v1 = vrot.slane %v16091_v11, 2 }
 0x892   : > { %v5554_v59 = vmax.f32 %v5518_v28, 0.0 }
 0x893   : > { %v6113_v50 = vunpack.c.l.b16 %v6025_v17  ;;  %v5196_v23 = vpop.f32.mrf.mxu2  ;;  %11963 = vmatmul.msk.bf16.gmra.mxu1 %vm645_vm0, %v15660_v7 }
 0x894   : > { %v5658_v53 = vrot.slane %v5554_v59, 5  ;;  %v5237_v54 = vadd.f32 %v5196_v23, %v4946_v0  ;;  %v16179_v9 = vpop.f32.mrf.mxu0  ;;  %v19252_v23 = vrot.slane %v16091_v11, 1 }
 0x895   : > { %v16181_v35 = vpack.c.b16 %v6113_v50, %v6112_v48  ;;  %v6262_v48 = vor.u32 %v16101_v12, %v6258_v20 }
 0x896   : > { %v5659_v21 = vsel %vm5594_vm3, %v5656_v15, %v5658_v53  ;;  %v5480_v33 = vadd.f32 %v16015_v18, %v5237_v54 }
 0x897   : > { %v6391_v3 = vpop.f32.mrf.mxu3  ;;  %11911 = vmatmul.msk.bf16.gmra.mxu0 %vm645_vm0, %v16181_v35  ;;  %v6264_v8 = vshll.u32 %v16181_v35, 16  ;;  %v6268_v28 = vshrl.u32 %v16181_v35, 16  ;;  %v18860_v17 = vrot.slane %v16181_v35, 1  ;;  %v18863_v18 = vrot.slane %v16181_v35, 2 }
 0x898   : > { %v5519_v59 = vadd.f32 %v15712_v10, %v5480_v33  ;;  %v16195_v41 = vadd.f32 %v16050_v45, %v6391_v3  ;;  %11932 = vmatmul.msk.bf16.gmra.mxu2 %vm645_vm0, %v15482_v36  ;;  %v16199_v15 = vpop.f32.mrf.mxu1  ;;  %v16211_v33 = vpop.permute.xlu1 %5918 }
 0x899   : > { %v6266_v50 = vrot.slane %v6264_v8, 1  ;;  %v16209_v45 = vsel %vm1307_vm10, %v19252_v23, %v18860_v17  ;;  %v7071_v54 = vrot.slane %v6268_v28, 1  ;;  %19253 = vst [vmem:[#allocation50_spill] sm:$0xff] %v16211_v33  ;;  %v16218_v3 = vsel %vm1979_vm12, %v19254_v1, %v18863_v18 }
 0x89a   : > { %v5555_v36 = vmax.f32 %v5519_v59, 0.0  ;;  %19255 = vst [vmem:[#allocation88_spill] sm:$0xff] %v16218_v3  ;;  %v7072_v12 = vrot.slane %v6264_v8, 2  ;;  %v7769_v20 = vrot.slane %v6268_v28, 2  ;;  %v5985_v0 = vmul.f32 %v16211_v33, %v5659_v21 }
 0x89b   : > { %v5199_v39 = vpop.f32.mrf.mxu2  ;;  %v6267_v16 = vsel %vm1057_vm11, %v6262_v48, %v6266_v50  ;;  %v7770_v23 = vrot.slane %v6264_v8, 3  ;;  %v19257_v1 = vrot.slane %v16181_v35, 3  ;;  %v19258_v18 = vrot.slane %v16091_v11, 3  ;;  %v19260_v48 = vld [vmem:[#allocation52_spill] sm:$0xff] }
 0x89c   : > { %v5660_v17 = vrot.slane %v5555_v36, 5  ;;  %v5238_v55 = vadd.f32 %v5199_v39, %v19256_v62  ;;  %11884 = vmatmul.msk.bf16.gmra.mxu3 %vm645_vm0, %v6267_v16  ;;  %v16224_v59 = vpop.f32.mrf.mxu0  ;;  %v16226_v60 = vor.u32 %v7072_v12, %v7071_v54  ;;  %v4780_v8 = vadd.f32 %v15542_v24, %v19260_v48  ;;  %v16239_v36 = vpop.permute.xlu0 %5928 }
 0x89d   : > { %v16233_v3 = vsel %vm2603_vm14, %v19258_v18, %v19257_v1  ;;  %v16235_v21 = vor.u32 %v7770_v23, %v7769_v20  ;;  %19261 = vst [vmem:[#allocation52_spill] sm:$0xff] %v16239_v36  ;;  %v16241_v62 = vpop.permute.xlu2 %5923  ;;  %v6026_v18 = vpack.c.bf16 %v5985_v0, %v5985_v0 }
 0x89e   : > { %19259 = vst [vmem:[#allocation66_spill] sm:$0xff] %v16233_v3  ;;  %v5661_v16 = vsel %vm5594_vm3, %v5658_v53, %v5660_v17  ;;  %v5481_v39 = vadd.f32 %v16084_v58, %v5238_v55  ;;  %v16248_v11 = vsel %vm1704_vm13, %v16142_v63, %v16226_v60  ;;  %v4948_v63 = vadd.f32 %v15401_v31, %v4780_v8 }
 0x89f   : > { %19262 = vst [vmem:[#allocation89_spill] sm:$0xff] %v16241_v62  ;;  %v5986_v54 = vmul.f32 %v16241_v62, %v5661_v16  ;;  %v6394_v12 = vpop.f32.mrf.mxu3  ;;  %v16254_v24 = vsel %vm2368_vm15, %v16151_v42, %v16235_v21  ;;  %v6114_v0 = vunpack.c.l.b16 %v6026_v18 }
 0x8a0   : > { %19263 = vst [vmem:[#allocation90_spill] sm:$0xff] %v16248_v11  ;;  %v5520_v20 = vadd.f32 %v15712_v10, %v5481_v39  ;;  %v16258_v53 = vadd.f32 %v16089_v51, %v6394_v12  ;;  %v16260_v55 = vpop.f32.mrf.mxu1 }
 0x8a1   : > { %19264 = vst [vmem:[#allocation91_spill] sm:$0xff] %v16254_v24  ;;  %v6027_v58 = vpack.c.bf16 %v5986_v54, %v5986_v54  ;;  %v6270_v54 = vor.u32 %v6268_v28, %v6266_v50 }
 0x8a2   : > { %v5556_v23 = vmax.f32 %v5520_v20, 0.0 }
 0x8a3   : > { %v6115_v1 = vunpack.c.l.b16 %v6027_v58  ;;  %v5201_v48 = vpop.f32.mrf.mxu2  ;;  %11964 = vmatmul.msk.bf16.gmra.mxu1 %vm645_vm0, %v15755_v32 }
 0x8a4   : > { %v5662_v16 = vrot.slane %v5556_v23, 5  ;;  %v5239_v42 = vadd.f32 %v5201_v48, %v4948_v63  ;;  %v16265_v62 = vpop.f32.mrf.mxu0  ;;  %v5944_v63 = vpop.permute.xlu0 %5943  ;;  %v19265_v48 = vrot.slane %v16181_v35, 1 }
 0x8a5   : > { %v16267_v39 = vpack.c.b16 %v6115_v1, %v6114_v0  ;;  %v5990_v50 = vmul.f32 0.0, %v5944_v63 }
 0x8a6   : > { %v5663_v51 = vsel %vm5594_vm3, %v5660_v17, %v5662_v16  ;;  %v5482_v12 = vadd.f32 %v16108_v30, %v5239_v42 }
 0x8a7   : > { %v5987_v31 = vmul.f32 %v16239_v36, %v5663_v51  ;;  %v6396_v8 = vpop.f32.mrf.mxu3  ;;  %11912 = vmatmul.msk.bf16.gmra.mxu0 %vm645_vm0, %v16267_v39  ;;  %v6272_v18 = vshll.u32 %v16267_v39, 16  ;;  %v6276_v20 = vshrl.u32 %v16267_v39, 16  ;;  %v16277_v58 = vrot.slane %v16267_v39, 1 }
 0x8a8   : > { %v5521_v23 = vadd.f32 %v15712_v10, %v5482_v12  ;;  %v16281_v17 = vadd.f32 %v16140_v49, %v6396_v8  ;;  %11933 = vmatmul.msk.bf16.gmra.mxu2 %vm645_vm0, %v15570_v2  ;;  %v16285_v30 = vpop.f32.mrf.mxu1  ;;  %v18868_v28 = vrot.slane %v16267_v39, 2  ;;  %v19266_v2 = vrot.slane %v16181_v35, 2 }
 0x8a9   : > { %v6028_v0 = vpack.c.bf16 %v5987_v31, %v5987_v31  ;;  %v6274_v1 = vrot.slane %v6272_v18, 1  ;;  %v16293_v42 = vsel %vm1307_vm10, %v19265_v48, %v16277_v58  ;;  %v7075_v10 = vrot.slane %v6276_v20, 1 }
 0x8aa   : > { %v5557_v49 = vmax.f32 %v5521_v23, 0.0  ;;  %v16300_v51 = vsel %vm1979_vm12, %v19266_v2, %v18868_v28  ;;  %v7076_v12 = vrot.slane %v6272_v18, 2  ;;  %v7773_v8 = vrot.slane %v6276_v20, 2 }
 0x8ab   : > { %19267 = vst [vmem:[#allocation92_spill] sm:$0xff] %v16300_v51  ;;  %v6116_v31 = vunpack.c.l.b16 %v6028_v0  ;;  %v6713_v36 = vpop.f32.mrf.mxu2  ;;  %v6275_v33 = vsel %vm1057_vm11, %v6270_v54, %v6274_v1  ;;  %v7774_v3 = vrot.slane %v6272_v18, 3  ;;  %v19268_v2 = vrot.slane %v16267_v39, 3  ;;  %v16318_v54 = vpop.permute.xlu1 %5933 }
 0x8ac   : > { %v5664_v24 = vrot.slane %v5557_v49, 5  ;;  %v6803_v48 = vadd.f32 %v6713_v36, %v15621_v14  ;;  %11885 = vmatmul.msk.bf16.gmra.mxu3 %vm645_vm0, %v6275_v33  ;;  %v16305_v23 = vpop.f32.mrf.mxu0  ;;  %v16307_v11 = vor.u32 %v7076_v12, %v7075_v10  ;;  %v19269_v28 = vrot.slane %v16181_v35, 3  ;;  %19271 = vst [vmem:[#allocation94_spill] sm:$0xff] %v16318_v54  ;;  %v16320_v18 = vpop.permute.xlu2 %5938 }
 0x8ad   : > { %v6135_v0 = vpack.c.b16 %v6116_v31, %v6116_v31  ;;  %v16316_v51 = vor.u32 %v7774_v3, %v7773_v8  ;;  %19272 = vst [vmem:[#allocation95_spill] sm:$0xff] %v16320_v18  ;;  %v6031_v8 = vpack.c.bf16 %v5990_v50, %v5990_v50 }
 0x8ae   : > { %v16314_v63 = vsel %vm2603_vm14, %v19269_v28, %v19268_v2  ;;  %v5665_v14 = vsel %vm5594_vm3, %v5662_v16, %v5664_v24  ;;  %v5704_v33 = vsel %vm5594_vm3, %v5664_v24, 0.0  ;;  %v16325_v36 = vadd.f32 %v16174_v4, %v6803_v48 }
 0x8af   : > { %19270 = vst [vmem:[#allocation93_spill] sm:$0xff] %v16314_v63  ;;  %v16330_v35 = vsel %vm1704_vm13, %v16226_v60, %v16307_v11  ;;  %v5988_v28 = vmul.f32 %v16318_v54, %v5665_v14  ;;  %v5989_v3 = vmul.f32 %v16320_v18, %v5704_v33  ;;  %v6399_v10 = vpop.f32.mrf.mxu3  ;;  %v6280_v49 = vshll.u32 %v6135_v0, 16 }
 0x8b0   : > { %19273 = vst [vmem:[#allocation96_spill] sm:$0xff] %v16325_v36  ;;  %v6636_v12 = vrot.slane %v6135_v0, 1  ;;  %v16335_v16 = vadd.f32 %v16179_v9, %v6399_v10  ;;  %v16337_v24 = vpop.f32.mrf.mxu1  ;;  %v6278_v4 = vor.u32 %v6276_v20, %v6274_v1  ;;  %v16342_v48 = vsel %vm2368_vm15, %v16235_v21, %v16316_v51 }
 0x8b1   : > { %19274 = vst [vmem:[#allocation97_spill] sm:$0xff] %v16330_v35  ;;  %v6029_v60 = vpack.c.bf16 %v5988_v28, %v5988_v28  ;;  %v6030_v2 = vpack.c.bf16 %v5989_v3, %v5989_v3  ;;  %v6282_v14 = vrot.slane %v6280_v49, 1  ;;  %v16351_v20 = vunpack.c.l.b16 %v6031_v8 }
 0x8b2   : > { %19275 = vst [vmem:[#allocation98_spill] sm:$0xff] %v16342_v48  ;;  %v16346_v33 = vsel %vm1307_vm10, %v16277_v58, %v6636_v12 }
 0x8b3   : > { %19276 = vst [vmem:[#allocation99_spill] sm:$0xff] %v16346_v33  ;;  %v6846_v0 = vunpack.c.l.b16 %v6029_v60  ;;  %v6847_v50 = vunpack.c.l.b16 %v6030_v2  ;;  %v6715_v18 = vpop.f32.mrf.mxu2  ;;  %11965 = vmatmul.msk.bf16.gmra.mxu1 %vm645_vm0, %v15845_v52  ;;  %v6283_v9 = vsel %vm1057_vm11, %v6278_v4, %v6282_v14  ;;  %v19280_v60 = vld [vmem:[#allocation64_spill] sm:$0xff] }
 0x8b4   : > { %19277 = vst [vmem:[#allocation100_spill] sm:$0xff] %v16351_v20  ;;  %v6804_v21 = vadd.f32 %v6715_v18, %v15645_v26  ;;  %v16354_v1 = vpop.f32.mrf.mxu0 }
 0x8b5   : > { %v6848_v28 = vpack.c.b16 %v6846_v0, %v6116_v31  ;;  %v6849_v3 = vpack.c.b16 %v6847_v50, %v6847_v50  ;;  %v16357_v10 = vpack.c.b16 %v16351_v20, %v6847_v50 }
 0x8b6   : > { %v16360_v49 = vadd.f32 %v16199_v15, %v6804_v21 }
 0x8b7   : > { %19278 = vst [vmem:[#allocation101_spill] sm:$0xff] %v16357_v10  ;;  %v6401_v12 = vpop.f32.mrf.mxu3  ;;  %12015 = vmatmul.msk.bf16.vlgmr.msrb.gmra.mxu0 %vm645_vm0, %v19280_v60  ;;  %v6850_v2 = vrot.slane %v6848_v28, 1  ;;  %v6852_v4 = vrot.slane %v6849_v3, 1  ;;  %v7336_v8 = vrot.slane %v6848_v28, 2  ;;  %v7338_v14 = vrot.slane %v6849_v3, 2 }
 0x8b8   : > { %19279 = vst [vmem:[#allocation102_spill] sm:$0xff] %v16360_v49  ;;  %v16365_v26 = vadd.f32 %v16224_v59, %v6401_v12  ;;  %11934 = vmatmul.msk.bf16.gmra.mxu2 %vm645_vm0, %v15660_v7  ;;  %v16369_v31 = vpop.f32.mrf.mxu1  ;;  %v7080_v18 = vshrl.u32 %v6848_v28, 16  ;;  %v7083_v0 = vshll.u32 %v6848_v28, 16  ;;  %v7089_v15 = vshrl.u32 %v6849_v3, 16 }
 0x8b9   : > { %v16373_v50 = vsel %vm1307_vm10, %v16277_v58, %v6850_v2  ;;  %v16376_v21 = vsel %vm1307_vm10, %v6850_v2, %v6852_v4  ;;  %v19282_v60 = vrot.slane %v16267_v39, 2  ;;  %v16384_v12 = vsel %vm1979_vm12, %v7336_v8, %v7338_v14 }
 0x8ba   : > { %19281 = vst [vmem:[#allocation64_spill] sm:$0xff] %v16365_v26  ;;  %v7082_v7 = vrot.slane %v7080_v18, 1  ;;  %v7085_v20 = vrot.slane %v7083_v0, 2  ;;  %v7091_v54 = vrot.slane %v7089_v15, 1  ;;  %v7092_v63 = vshll.u32 %v6849_v3, 16 }
 0x8bb   : > { %v16381_v59 = vsel %vm1979_vm12, %v19282_v60, %v7336_v8  ;;  %19284 = vst [vmem:[#allocation104_spill] sm:$0xff] %v16384_v12  ;;  %v6718_v48 = vpop.f32.mrf.mxu2  ;;  %v7777_v35 = vrot.slane %v7080_v18, 2  ;;  %v7778_v49 = vrot.slane %v7083_v0, 3  ;;  %v7782_v58 = vshrl.u32 %v16357_v10, 16 }
 0x8bc   : > { %19283 = vst [vmem:[#allocation103_spill] sm:$0xff] %v16381_v59  ;;  %v7785_v2 = vshll.u32 %v16357_v10, 16  ;;  %v6805_v4 = vadd.f32 %v6718_v48, %v15716_v38  ;;  %11886 = vmatmul.msk.bf16.gmra.mxu3 %vm645_vm0, %v6283_v9  ;;  %v6558_v60 = vpop.f32.mrf.mxu0  ;;  %v7086_v59 = vor.u32 %v7085_v20, %v7082_v7  ;;  %v7094_v36 = vrot.slane %v7092_v63, 2 }
 0x8bd   : > { %v18875_v14 = vrot.slane %v16357_v10, 2  ;;  %v7779_v12 = vor.u32 %v7778_v49, %v7777_v35  ;;  %v7784_v33 = vrot.slane %v7782_v58, 2  ;;  %v8036_v3 = vrot.slane %v6848_v28, 3 }
 0x8be   : > { %v7787_v15 = vrot.slane %v7785_v2, 3  ;;  %v16392_v18 = vadd.f32 %v16260_v55, %v6805_v4  ;;  %v16396_v0 = vsel %vm1704_vm13, %v16307_v11, %v7086_v59  ;;  %v7095_v26 = vor.u32 %v7094_v36, %v7091_v54 }
 0x8bf   : > { %v16401_v38 = vsel %vm1979_vm12, %v7336_v8, %v18875_v14  ;;  %v6404_v63 = vpop.f32.mrf.mxu3  ;;  %v16405_v35 = vsel %vm2368_vm15, %v16316_v51, %v7779_v12  ;;  %v19288_v55 = vrot.slane %v16267_v39, 3  ;;  %v18874_v20 = vrot.slane %v16357_v10, 3  ;;  %v19305_v10 = vld [vmem:[#allocation18_spill] sm:$0xff] }
 0x8c0   : > { %19285 = vst [vmem:[#allocation105_spill] sm:$0xff] %v16401_v38  ;;  %v16407_v48 = vor.u32 %v7787_v15, %v7784_v33  ;;  %v16415_v11 = vadd.f32 %v16265_v62, %v6404_v63  ;;  %v6896_v54 = vpop.f32.mrf.mxu1  ;;  %v16418_v36 = vsel %vm1704_vm13, %v7086_v59, %v7095_v26  ;;  %v19292_v26 = vld [vmem:[#allocation2_spill] sm:$0xff] }
 0x8c1   : > { %19286 = vst [vmem:[#allocation106_spill] sm:$0xff] %v16405_v35  ;;  %v16412_v9 = vsel %vm2603_vm14, %v19288_v55, %v8036_v3  ;;  %v16428_v39 = vsel %vm2603_vm14, %v8036_v3, %v18874_v20 }
 0x8c2   : > { %19287 = vst [vmem:[#allocation107_spill] sm:$0xff] %v16407_v48  ;;  %v16423_v51 = vsel %vm2368_vm15, %v7779_v12, %v16407_v48 }
 0x8c3   : > { %19289 = vst [vmem:[#allocation108_spill] sm:$0xff] %v16412_v9  ;;  %v6720_v33 = vpop.f32.mrf.mxu2  ;;  %11966 = vmatmul.msk.bf16.gmra.mxu1 %vm645_vm0, %v15938_v27 }
 0x8c4   : > { %19290 = vst [vmem:[#allocation109_spill] sm:$0xff] %v16423_v51  ;;  %v6806_v62 = vadd.f32 %v6720_v33, %v15740_v57  ;;  %v6561_v28 = vpop.f32.mrf.mxu0  ;;  %v19293_v57 = vld [vmem:[#allocation4_spill] sm:$0xff] }
 0x8c5   : > { %19291 = vst [vmem:[#allocation110_spill] sm:$0xff] %v16428_v39 }
 0x8c6   : > { %v16434_v49 = vadd.f32 %v16285_v30, %v6806_v62 }
 0x8c7   : > { %v6406_v8 = vpop.f32.mrf.mxu3  ;;  %12016 = vmatmul.msk.bf16.gmra.mxu0 %vm645_vm0, %v19292_v26 }
 0x8c8   : > { %v16439_v59 = vadd.f32 %v16305_v23, %v6406_v8  ;;  %11935 = vmatmul.msk.bf16.gmra.mxu2 %vm645_vm0, %v15755_v32  ;;  %v6898_v12 = vpop.f32.mrf.mxu1 }
 0x8cb   : > { %v6723_v7 = vpop.f32.mrf.mxu2 }
 0x8cc   : > { %v6807_v58 = vadd.f32 %v6723_v7, %v15806_v46  ;;  %v6563_v2 = vpop.f32.mrf.mxu0  ;;  %11985 = vmatmul.msk.bf16.vlgmr.msra.gmra.mxu3 %vm645_vm0, %v19293_v57  ;;  %v19294_v7 = vld [vmem:[#allocation10_spill] sm:$0xff] }
 0x8ce   : > { %v16447_v30 = vadd.f32 %v16337_v24, %v6807_v58 }
 0x8cf   : > { %v6409_v4 = vpop.f32.mrf.mxu3 }
 0x8d0   : > { %v16450_v15 = vadd.f32 %v16354_v1, %v6409_v4  ;;  %v6901_v23 = vpop.f32.mrf.mxu1 }
 0x8d3   : > { %v6725_v3 = vpop.f32.mrf.mxu2  ;;  %11967 = vmatmul.msk.bf16.gmra.mxu1 %vm645_vm0, %v16028_v22 }
 0x8d4   : > { %v6808_v32 = vadd.f32 %v6725_v3, %v15830_v44  ;;  %v6566_v63 = vpop.f32.mrf.mxu0 }
 0x8d6   : > { %v16456_v46 = vadd.f32 %v16369_v31, %v6808_v32  ;;  %v19295_v32 = vld [vmem:[#allocation24_spill] sm:$0xff] }
 0x8d7   : > { %v6411_v55 = vpop.f32.mrf.mxu3  ;;  %12017 = vmatmul.msk.bf16.gmra.mxu0 %vm645_vm0, %v15206_v61 }
 0x8d8   : > { %v16460_v24 = vadd.f32 %v6558_v60, %v6411_v55  ;;  %11936 = vmatmul.msk.bf16.gmra.mxu2 %vm645_vm0, %v15845_v52  ;;  %v6903_v1 = vpop.f32.mrf.mxu1 }
 0x8db   : > { %v6728_v33 = vpop.f32.mrf.mxu2 }
 0x8dc   : > { %v6809_v62 = vadd.f32 %v6728_v33, %v15896_v40  ;;  %v6568_v8 = vpop.f32.mrf.mxu0  ;;  %11986 = vmatmul.msk.bf16.gmra.mxu3 %vm645_vm0, %v19294_v7  ;;  %v12511_v40 = vld [vmem:[%s18771_s13 + $0x68] sm:$0xff]  ;;  %v19296_v7 = vld [vmem:[#allocation13_spill] sm:$0xff] }
 0x8dd   : > { %7580 = vmatpush.bf16.msra.mxu2 %v12511_v40 }
 0x8de   : > { %v16467_v44 = vadd.f32 %v6896_v54, %v6809_v62 }
 0x8df   : > { %v6414_v31 = vpop.f32.mrf.mxu3 }
 0x8e0   : > { %v16469_v58 = vadd.f32 %v6561_v28, %v6414_v31  ;;  %v6906_v57 = vpop.f32.mrf.mxu1 }
 0x8e3   : > { %v6730_v4 = vpop.f32.mrf.mxu2  ;;  %11968 = vmatmul.msk.bf16.gmra.mxu1 %vm645_vm0, %v16121_v56 }
 0x8e4   : > { %v6810_v52 = vadd.f32 %v6730_v4, %v15923_v6  ;;  %v6571_v60 = vpop.f32.mrf.mxu0  ;;  %v12515_v6 = vld [vmem:[%s18771_s13 + $0x88] sm:$0xff] }
 0x8e5   : > { %8114 = vmatpush.bf16.msrb.mxu3 %v12515_v6 }
 0x8e6   : > { %v16477_v3 = vadd.f32 %v6898_v12, %v6810_v52 }
 0x8e7   : > { %v6416_v54 = vpop.f32.mrf.mxu3  ;;  %12018 = vmatmul.msk.bf16.gmra.mxu0 %vm645_vm0, %v19295_v32 }
 0x8e8   : > { %v16481_v28 = vadd.f32 %v6563_v2, %v6416_v54  ;;  %11937 = vmatmul.msk.bf16.gmra.mxu2 %vm645_vm0, %v15938_v27  ;;  %v6908_v55 = vpop.f32.mrf.mxu1  ;;  %v12513_v2 = vld [vmem:[%s18771_s13 + $0x78] sm:$0xff] }
 0x8e9   : > { %7871 = vmatpush.bf16.msrb.mxu1 %v12513_v2 }
 0x8eb   : > { %v6733_v33 = vpop.f32.mrf.mxu2 }
 0x8ec   : > { %v6811_v62 = vadd.f32 %v6733_v33, %v15989_v43  ;;  %v6573_v12 = vpop.f32.mrf.mxu0  ;;  %11987 = vmatmul.msk.bf16.gmra.mxu3 %vm645_vm0, %v19296_v7 }
 0x8ee   : > { %v16494_v31 = vadd.f32 %v6901_v23, %v6811_v62 }
 0x8ef   : > { %v6419_v27 = vpop.f32.mrf.mxu3 }
 0x8f0   : > { %v16496_v4 = vadd.f32 %v6566_v63, %v6419_v27  ;;  %v6911_v52 = vpop.f32.mrf.mxu1 }
 0x8f3   : > { %v6735_v40 = vpop.f32.mrf.mxu2  ;;  %11969 = vmatmul.msk.bf16.gmra.mxu1 %vm645_vm0, %v16209_v45 }
 0x8f4   : > { %v6812_v43 = vadd.f32 %v6735_v40, %v16013_v34  ;;  %v6576_v54 = vpop.f32.mrf.mxu0 }
 0x8f6   : > { %v16501_v6 = vadd.f32 %v6903_v1, %v6812_v43 }
 0x8f7   : > { %v6421_v33 = vpop.f32.mrf.mxu3  ;;  %12019 = vmatmul.msk.bf16.gmra.mxu0 %vm645_vm0, %v15325_v5 }
 0x8f8   : > { %v16505_v7 = vadd.f32 %v6568_v8, %v6421_v33  ;;  %11938 = vmatmul.msk.bf16.gmra.mxu2 %vm645_vm0, %v16028_v22  ;;  %v6913_v23 = vpop.f32.mrf.mxu1 }
 0x8fb   : > { %v6738_v63 = vpop.f32.mrf.mxu2 }
 0x8fc   : > { %v6813_v62 = vadd.f32 %v6738_v63, %v16082_v47  ;;  %v6578_v2 = vpop.f32.mrf.mxu0  ;;  %11988 = vmatmul.msk.bf16.gmra.mxu3 %vm645_vm0, %v15281_v25 }
 0x8fe   : > { %v16512_v34 = vadd.f32 %v6906_v57, %v6813_v62 }
 0x8ff   : > { %v6424_v1 = vpop.f32.mrf.mxu3 }
 0x900   : > { %v16514_v27 = vadd.f32 %v6571_v60, %v6424_v1  ;;  %v6916_v40 = vpop.f32.mrf.mxu1 }
 0x903   : > { %v6740_v43 = vpop.f32.mrf.mxu2  ;;  %11970 = vmatmul.msk.bf16.gmra.mxu1 %vm645_vm0, %v16293_v42 }
 0x904   : > { %v6814_v22 = vadd.f32 %v6740_v43, %v16106_v37  ;;  %v6581_v8 = vpop.f32.mrf.mxu0 }
 0x906   : > { %v16519_v33 = vadd.f32 %v6908_v55, %v6814_v22 }
 0x907   : > { %v6426_v47 = vpop.f32.mrf.mxu3  ;;  %12020 = vmatmul.msk.bf16.gmra.mxu0 %vm645_vm0, %v15410_v29 }
 0x908   : > { %v16523_v25 = vadd.f32 %v6573_v12, %v6426_v47  ;;  %11939 = vmatmul.msk.bf16.gmra.mxu2 %vm645_vm0, %v16121_v56  ;;  %v6918_v57 = vpop.f32.mrf.mxu1  ;;  %v12512_v12 = vld [vmem:[%s18771_s13 + $0x70] sm:$0xff] }
 0x909   : > { %7872 = vmatpush.bf16.msrb.mxu1 %v12512_v12 }
 0x90b   : > { %v6743_v60 = vpop.f32.mrf.mxu2 }
 0x90c   : > { %v6815_v63 = vadd.f32 %v6743_v60, %v16172_v13  ;;  %v6583_v62 = vpop.f32.mrf.mxu0  ;;  %11989 = vmatmul.msk.bf16.gmra.mxu3 %vm645_vm0, %v15353_v19 }
 0x90e   : > { %v16530_v37 = vadd.f32 %v6911_v52, %v6815_v63  ;;  %v19297_v52 = vld [vmem:[#allocation65_spill] sm:$0xff] }
 0x90f   : > { %v6429_v55 = vpop.f32.mrf.mxu3 }
 0x910   : > { %v16532_v1 = vadd.f32 %v6576_v54, %v6429_v55  ;;  %v6921_v43 = vpop.f32.mrf.mxu1 }
 0x913   : > { %v6745_v56 = vpop.f32.mrf.mxu2  ;;  %11971 = vmatmul.msk.bf16.gmra.mxu1 %vm645_vm0, %v16373_v50  ;;  %v19298_v50 = vld [vmem:[#allocation49_spill] sm:$0xff] }
 0x914   : > { %v6816_v13 = vadd.f32 %v6745_v56, %v16195_v41  ;;  %v6586_v22 = vpop.f32.mrf.mxu0 }
 0x916   : > { %v16540_v47 = vadd.f32 %v6913_v23, %v6816_v13 }
 0x917   : > { %v6431_v19 = vpop.f32.mrf.mxu3  ;;  %12021 = vmatmul.msk.bf16.gmra.mxu0 %vm645_vm0, %v19297_v52 }
 0x918   : > { %v16544_v54 = vadd.f32 %v6578_v2, %v6431_v19  ;;  %11940 = vmatmul.msk.bf16.gmra.mxu2 %vm645_vm0, %v16209_v45  ;;  %v6923_v60 = vpop.f32.mrf.mxu1 }
 0x91b   : > { %v6748_v63 = vpop.f32.mrf.mxu2 }
 0x91c   : > { %v6817_v55 = vadd.f32 %v6748_v63, %v16258_v53  ;;  %v6588_v12 = vpop.f32.mrf.mxu0  ;;  %11990 = vmatmul.msk.bf16.gmra.mxu3 %vm645_vm0, %v19298_v50  ;;  %v12510_v53 = vld [vmem:[%s18771_s13 + $0x60] sm:$0xff]  ;;  %v19299_v63 = vld [vmem:[#allocation16_spill] sm:$0xff]  ;;  %v19300_v50 = vld [vmem:[#allocation17_spill] sm:$0xff] }
 0x91d   : > { %7581 = vmatpush.bf16.msra.mxu2 %v12510_v53 }
 0x91e   : > { %v16551_v41 = vadd.f32 %v6916_v40, %v6817_v55 }
 0x91f   : > { %v6434_v23 = vpop.f32.mrf.mxu3 }
 0x920   : > { %v16553_v56 = vadd.f32 %v6581_v8, %v6434_v23  ;;  %v6926_v13 = vpop.f32.mrf.mxu1 }
 0x923   : > { %v6750_v20 = vpop.f32.mrf.mxu2  ;;  %11972 = vmatmul.msk.bf16.gmra.mxu1 %vm645_vm0, %v16376_v21 }
 0x924   : > { %v6818_v45 = vadd.f32 %v6750_v20, %v16281_v17  ;;  %v6591_v2 = vpop.f32.mrf.mxu0 }
 0x926   : > { %v16561_v19 = vadd.f32 %v6918_v57, %v6818_v45 }
 0x927   : > { %v6436_v40 = vpop.f32.mrf.mxu3  ;;  %12022 = vmatmul.msk.bf16.gmra.mxu0 %vm645_vm0, %v19299_v63 }
 0x928   : > { %v16565_v8 = vadd.f32 %v6583_v62, %v6436_v40  ;;  %11941 = vmatmul.msk.bf16.gmra.mxu2 %vm645_vm0, %v16293_v42  ;;  %v6928_v21 = vpop.f32.mrf.mxu1  ;;  %v19301_v62 = vld [vmem:[#allocation9_spill] sm:$0xff]  ;;  %v19302_v40 = vld [vmem:[#allocation64_spill] sm:$0xff] }
 0x92b   : > { %v6753_v55 = vpop.f32.mrf.mxu2 }
 0x92c   : > { %v6819_v17 = vadd.f32 %v6753_v55, %v16335_v16  ;;  %v6593_v20 = vpop.f32.mrf.mxu0  ;;  %11991 = vmatmul.msk.bf16.gmra.mxu3 %vm645_vm0, %v19300_v50  ;;  %v19303_v55 = vld [vmem:[#allocation72_spill] sm:$0xff] }
 0x92e   : > { %v16572_v23 = vadd.f32 %v6921_v43, %v6819_v17  ;;  %v19304_v43 = vld [vmem:[#allocation99_spill] sm:$0xff] }
 0x92f   : > { %v6439_v57 = vpop.f32.mrf.mxu3 }
 0x930   : > { %v16574_v45 = vadd.f32 %v6586_v22, %v6439_v57  ;;  %v6931_v53 = vpop.f32.mrf.mxu1 }
 0x933   : > { %v6755_v14 = vpop.f32.mrf.mxu2  ;;  %12075 = vmatmul.msk.bf16.vlgmr.msrb.gmra.mxu1 %vm645_vm0, %v19301_v62 }
 0x934   : > { %v6820_v42 = vadd.f32 %v6755_v14, %v19302_v40  ;;  %v7415_v39 = vpop.f32.mrf.mxu0 }
 0x936   : > { %v16579_v9 = vadd.f32 %v6923_v60, %v6820_v42 }
 0x937   : > { %v6441_v16 = vpop.f32.mrf.mxu3  ;;  %12023 = vmatmul.msk.bf16.gmra.mxu0 %vm645_vm0, %v19303_v55 }
 0x938   : > { %v16583_v50 = vadd.f32 %v6588_v12, %v6441_v16  ;;  %11942 = vmatmul.msk.bf16.gmra.mxu2 %vm645_vm0, %v19304_v43  ;;  %v6933_v22 = vpop.f32.mrf.mxu1  ;;  %v19306_v12 = vld [vmem:[#allocation19_spill] sm:$0xff] }
 0x93b   : > { %v6758_v17 = vpop.f32.mrf.mxu2 }
 0x93c   : > { %v6821_v57 = vadd.f32 %v6758_v17, %v16415_v11  ;;  %11992 = vmatmul.msk.bf16.gmra.mxu3 %vm645_vm0, %v19305_v10  ;;  %v7417_v14 = vpop.f32.mrf.mxu0  ;;  %v19308_v17 = vld [vmem:[#allocation76_spill] sm:$0xff] }
 0x93e   : > { %v16590_v62 = vadd.f32 %v6926_v13, %v6821_v57 }
 0x93f   : > { %v6444_v60 = vpop.f32.mrf.mxu3 }
 0x940   : > { %v16592_v40 = vadd.f32 %v6591_v2, %v6444_v60  ;;  %v6936_v42 = vpop.f32.mrf.mxu1  ;;  %v19309_v60 = vld [vmem:[#allocation21_spill] sm:$0xff] }
 0x943   : > { %v6760_v38 = vpop.f32.mrf.mxu2  ;;  %12076 = vmatmul.msk.bf16.gmra.mxu1 %vm645_vm0, %v19306_v12  ;;  %v19311_v12 = vld [vmem:[#allocation96_spill] sm:$0xff] }
 0x944   : > { %v6822_v16 = vadd.f32 %v6760_v38, %v16439_v59  ;;  %v7420_v43 = vpop.f32.mrf.mxu0 }
 0x946   : > { %v16597_v48 = vadd.f32 %v6928_v21, %v6822_v16 }
 0x947   : > { %v6446_v11 = vpop.f32.mrf.mxu3  ;;  %12024 = vmatmul.msk.bf16.gmra.mxu0 %vm645_vm0, %v19308_v17 }
 0x948   : > { %19307 = vst [vmem:[#allocation2_spill] sm:$0xff] %v16597_v48  ;;  %v16601_v10 = vadd.f32 %v6593_v20, %v6446_v11  ;;  %v6938_v13 = vpop.f32.mrf.mxu1  ;;  %12045 = vmatmul.msk.bf16.vlgmr.msra.gmra.mxu2 %vm645_vm0, %v19292_v26  ;;  %v19312_v11 = vld [vmem:[#allocation25_spill] sm:$0xff] }
 0x94b   : > { %v6763_v2 = vpop.f32.mrf.mxu2 }
 0x94c   : > { %v6823_v57 = vadd.f32 %v6763_v2, %v16450_v15  ;;  %11993 = vmatmul.msk.bf16.gmra.mxu3 %vm645_vm0, %v19309_v60  ;;  %v7422_v38 = vpop.f32.mrf.mxu0  ;;  %v19314_v60 = vld [vmem:[#allocation78_spill] sm:$0xff] }
 0x94e   : > { %v16608_v59 = vadd.f32 %v6931_v53, %v6823_v57  ;;  %v19315_v53 = vld [vmem:[#allocation102_spill] sm:$0xff] }
 0x94f   : > { %v7172_v21 = vpop.f32.mrf.mxu3 }
 0x950   : > { %19310 = vst [vmem:[#allocation4_spill] sm:$0xff] %v16608_v59  ;;  %v7262_v16 = vadd.f32 %v7172_v21, %v19311_v12  ;;  %v6941_v51 = vpop.f32.mrf.mxu1 }
 0x952   : > { %v16611_v35 = vadd.f32 %v7415_v39, %v7262_v16  ;;  %v19316_v16 = vld [vmem:[#allocation42_spill] sm:$0xff] }
 0x953   : > { %v6765_v20 = vpop.f32.mrf.mxu2  ;;  %12077 = vmatmul.msk.bf16.gmra.mxu1 %vm645_vm0, %v19312_v11 }
 0x954   : > { %v6824_v26 = vadd.f32 %v6765_v20, %v16460_v24  ;;  %v7425_v48 = vpop.f32.mrf.mxu0 }
 0x956   : > { %v16616_v15 = vadd.f32 %v6933_v22, %v6824_v26 }
 0x957   : > { %v7174_v2 = vpop.f32.mrf.mxu3  ;;  %12025 = vmatmul.msk.bf16.gmra.mxu0 %vm645_vm0, %v19314_v60 }
 0x958   : > { %19313 = vst [vmem:[#allocation10_spill] sm:$0xff] %v16616_v15  ;;  %v7263_v57 = vadd.f32 %v7174_v2, %v19315_v53  ;;  %v6943_v59 = vpop.f32.mrf.mxu1  ;;  %12046 = vmatmul.msk.bf16.gmra.mxu2 %vm645_vm0, %v15206_v61  ;;  %v19317_v15 = vld [vmem:[#allocation37_spill] sm:$0xff] }
 0x95a   : > { %v16623_v39 = vadd.f32 %v7417_v14, %v7263_v57 }
 0x95b   : > { %v6768_v21 = vpop.f32.mrf.mxu2 }
 0x95c   : > { %v6825_v12 = vadd.f32 %v6768_v21, %v16469_v58  ;;  %11994 = vmatmul.msk.bf16.gmra.mxu3 %vm645_vm0, %v19316_v16  ;;  %v7427_v24 = vpop.f32.mrf.mxu0  ;;  %v19318_v21 = vld [vmem:[#allocation82_spill] sm:$0xff]  ;;  %v19319_v16 = vld [vmem:[#allocation28_spill] sm:$0xff] }
 0x95e   : > { %v16628_v22 = vadd.f32 %v6936_v42, %v6825_v12 }
 0x95f   : > { %v7177_v20 = vpop.f32.mrf.mxu3 }
 0x960   : > { %v7264_v11 = vadd.f32 %v7177_v20, %v16392_v18  ;;  %v6946_v26 = vpop.f32.mrf.mxu1 }
 0x962   : > { %v16631_v2 = vadd.f32 %v7420_v43, %v7264_v11 }
 0x963   : > { %v6770_v53 = vpop.f32.mrf.mxu2  ;;  %12078 = vmatmul.msk.bf16.gmra.mxu1 %vm645_vm0, %v19317_v15 }
 0x964   : > { %v6826_v61 = vadd.f32 %v6770_v53, %v16481_v28  ;;  %v7430_v14 = vpop.f32.mrf.mxu0 }
 0x966   : > { %v16636_v58 = vadd.f32 %v6938_v13, %v6826_v61 }
 0x967   : > { %v7179_v57 = vpop.f32.mrf.mxu3  ;;  %12026 = vmatmul.msk.bf16.gmra.mxu0 %vm645_vm0, %v19318_v21 }
 0x968   : > { %v7265_v42 = vadd.f32 %v7179_v57, %v16434_v49  ;;  %v6948_v12 = vpop.f32.mrf.mxu1  ;;  %12047 = vmatmul.msk.bf16.gmra.mxu2 %vm645_vm0, %v19295_v32  ;;  %v19320_v57 = vld [vmem:[#allocation59_spill] sm:$0xff] }
 0x96a   : > { %v16643_v18 = vadd.f32 %v7422_v38, %v7265_v42 }
 0x96b   : > { %v6773_v43 = vpop.f32.mrf.mxu2 }
 0x96c   : > { %v6827_v15 = vadd.f32 %v6773_v43, %v16496_v4  ;;  %11995 = vmatmul.msk.bf16.gmra.mxu3 %vm645_vm0, %v19319_v16  ;;  %v7432_v28 = vpop.f32.mrf.mxu0  ;;  %v19321_v43 = vld [vmem:[#allocation84_spill] sm:$0xff]  ;;  %v19322_v16 = vld [vmem:[#allocation39_spill] sm:$0xff] }
 0x96e   : > { %v16648_v13 = vadd.f32 %v6941_v51, %v6827_v15 }
 0x96f   : > { %v7182_v20 = vpop.f32.mrf.mxu3 }
 0x970   : > { %v7266_v11 = vadd.f32 %v7182_v20, %v16447_v30  ;;  %v6951_v53 = vpop.f32.mrf.mxu1 }
 0x972   : > { %v16651_v49 = vadd.f32 %v7425_v48, %v7266_v11  ;;  %v12514_v48 = vld [vmem:[%s18771_s13 + $0x80] sm:$0xff] }
 0x973   : > { %v6775_v61 = vpop.f32.mrf.mxu2  ;;  %12079 = vmatmul.msk.bf16.gmra.mxu1 %vm645_vm0, %v19320_v57  ;;  %8115 = vmatpush.bf16.msrb.mxu3 %v12514_v48 }
 0x974   : > { %v6828_v32 = vadd.f32 %v6775_v61, %v16505_v7  ;;  %v7435_v38 = vpop.f32.mrf.mxu0 }
 0x976   : > { %v16656_v4 = vadd.f32 %v6943_v59, %v6828_v32 }
 0x977   : > { %v7184_v42 = vpop.f32.mrf.mxu3  ;;  %12027 = vmatmul.msk.bf16.gmra.mxu0 %vm645_vm0, %v19321_v43 }
 0x978   : > { %v7267_v51 = vadd.f32 %v7184_v42, %v16456_v46  ;;  %v6953_v15 = vpop.f32.mrf.mxu1  ;;  %12048 = vmatmul.msk.bf16.gmra.mxu2 %vm645_vm0, %v15325_v5  ;;  %v19323_v42 = vld [vmem:[#allocation30_spill] sm:$0xff] }
 0x97a   : > { %v16666_v30 = vadd.f32 %v7427_v24, %v7267_v51 }
 0x97b   : > { %v6778_v7 = vpop.f32.mrf.mxu2 }
 0x97c   : > { %v6829_v59 = vadd.f32 %v6778_v7, %v16514_v27  ;;  %11996 = vmatmul.msk.bf16.gmra.mxu3 %vm645_vm0, %v19322_v16  ;;  %v7437_v20 = vpop.f32.mrf.mxu0  ;;  %v19324_v7 = vld [vmem:[#allocation86_spill] sm:$0xff] }
 0x97e   : > { %v16671_v11 = vadd.f32 %v6946_v26, %v6829_v59 }
 0x97f   : > { %v7187_v46 = vpop.f32.mrf.mxu3 }
 0x980   : > { %v7268_v61 = vadd.f32 %v7187_v46, %v16467_v44  ;;  %v6956_v5 = vpop.f32.mrf.mxu1  ;;  %v19325_v46 = vld [vmem:[#allocation45_spill] sm:$0xff] }
 0x982   : > { %v16674_v57 = vadd.f32 %v7430_v14, %v7268_v61 }
 0x983   : > { %v6780_v32 = vpop.f32.mrf.mxu2  ;;  %12080 = vmatmul.msk.bf16.gmra.mxu1 %vm645_vm0, %v19323_v42 }
 0x984   : > { %v6830_v24 = vadd.f32 %v6780_v32, %v16523_v25  ;;  %v7440_v51 = vpop.f32.mrf.mxu0 }
 0x986   : > { %v16679_v27 = vadd.f32 %v6948_v12, %v6830_v24  ;;  %v12519_v12 = vld [vmem:[%s18773_s15 + $0x18] sm:$0xff]  ;;  %v19326_v24 = vld [vmem:[#allocation71_spill] sm:$0xff] }
 0x987   : > { %v7189_v48 = vpop.f32.mrf.mxu3  ;;  %12028 = vmatmul.msk.bf16.gmra.mxu0 %vm645_vm0, %v19324_v7 }
 0x988   : > { %v7269_v26 = vadd.f32 %v7189_v48, %v16477_v3  ;;  %v6958_v59 = vpop.f32.mrf.mxu1  ;;  %12049 = vmatmul.msk.bf16.gmra.mxu2 %vm645_vm0, %v15410_v29  ;;  %8849 = vmatpush.bf16.msra.mxu0 %v12519_v12 }
 0x98a   : > { %v16686_v44 = vadd.f32 %v7432_v28, %v7269_v26 }
 0x98b   : > { %v6783_v14 = vpop.f32.mrf.mxu2 }
 0x98c   : > { %v6831_v16 = vadd.f32 %v6783_v14, %v16532_v1  ;;  %11997 = vmatmul.msk.bf16.gmra.mxu3 %vm645_vm0, %v19325_v46  ;;  %v7442_v25 = vpop.f32.mrf.mxu0  ;;  %v19327_v46 = vld [vmem:[#allocation88_spill] sm:$0xff] }
 0x98e   : > { %v16694_v61 = vadd.f32 %v6951_v53, %v6831_v16 }
 0x98f   : > { %v7192_v3 = vpop.f32.mrf.mxu3 }
 0x990   : > { %v7270_v32 = vadd.f32 %v7192_v3, %v16494_v31  ;;  %v6961_v29 = vpop.f32.mrf.mxu1  ;;  %v19328_v3 = vld [vmem:[#allocation51_spill] sm:$0xff] }
 0x992   : > { %v16697_v28 = vadd.f32 %v7435_v38, %v7270_v32 }
 0x993   : > { %v6785_v42 = vpop.f32.mrf.mxu2  ;;  %12081 = vmatmul.msk.bf16.gmra.mxu1 %vm645_vm0, %v19326_v24 }
 0x994   : > { %v6832_v1 = vadd.f32 %v6785_v42, %v16544_v54  ;;  %v7445_v48 = vpop.f32.mrf.mxu0 }
 0x996   : > { %v16702_v26 = vadd.f32 %v6953_v15, %v6832_v1 }
 0x997   : > { %v7194_v14 = vpop.f32.mrf.mxu3  ;;  %12029 = vmatmul.msk.bf16.gmra.mxu0 %vm645_vm0, %v19327_v46 }
 0x998   : > { %v7271_v53 = vadd.f32 %v7194_v14, %v16501_v6  ;;  %v6963_v16 = vpop.f32.mrf.mxu1  ;;  %12050 = vmatmul.msk.bf16.gmra.mxu2 %vm645_vm0, %v19297_v52  ;;  %v19329_v52 = vld [vmem:[#allocation75_spill] sm:$0xff] }
 0x99a   : > { %v16709_v31 = vadd.f32 %v7437_v20, %v7271_v53 }
 0x99b   : > { %v6788_v38 = vpop.f32.mrf.mxu2 }
 0x99c   : > { %v6833_v12 = vadd.f32 %v6788_v38, %v16553_v56  ;;  %11998 = vmatmul.msk.bf16.gmra.mxu3 %vm645_vm0, %v19328_v3  ;;  %v16714_v54 = vpop.f32.mrf.mxu0  ;;  %v19330_v38 = vld [vmem:[#allocation92_spill] sm:$0xff] }
 0x99e   : > { %v16716_v15 = vadd.f32 %v6956_v5, %v6833_v12 }
 0x99f   : > { %v7197_v32 = vpop.f32.mrf.mxu3 }
 0x9a0   : > { %v7272_v42 = vadd.f32 %v7197_v32, %v16512_v34  ;;  %v6966_v6 = vpop.f32.mrf.mxu1  ;;  %v19331_v32 = vld [vmem:[#allocation90_spill] sm:$0xff] }
 0x9a2   : > { %v16719_v24 = vadd.f32 %v7440_v51, %v7272_v42 }
 0x9a3   : > { %v6790_v1 = vpop.f32.mrf.mxu2  ;;  %12082 = vmatmul.msk.bf16.gmra.mxu1 %vm645_vm0, %v19329_v52 }
 0x9a4   : > { %v6834_v20 = vadd.f32 %v6790_v1, %v16565_v8  ;;  %v7450_v56 = vpop.f32.mrf.mxu0 }
 0x9a6   : > { %v16724_v14 = vadd.f32 %v6958_v59, %v6834_v20 }
 0x9a7   : > { %v7199_v53 = vpop.f32.mrf.mxu3  ;;  %12030 = vmatmul.msk.bf16.gmra.mxu0 %vm645_vm0, %v19330_v38 }
 0x9a8   : > { %v7273_v5 = vadd.f32 %v7199_v53, %v16519_v33  ;;  %v6968_v12 = vpop.f32.mrf.mxu1  ;;  %12051 = vmatmul.msk.bf16.gmra.mxu2 %vm645_vm0, %v19299_v63  ;;  %v19332_v63 = vld [vmem:[#allocation23_spill] sm:$0xff] }
 0x9aa   : > { %v16731_v34 = vadd.f32 %v7442_v25, %v7273_v5 }
 0x9ab   : > { %v6793_v51 = vpop.f32.mrf.mxu2 }
 0x9ac   : > { %v6835_v3 = vadd.f32 %v6793_v51, %v16574_v45  ;;  %11999 = vmatmul.msk.bf16.gmra.mxu3 %vm645_vm0, %v19331_v32  ;;  %v16736_v8 = vpop.f32.mrf.mxu0  ;;  %v19333_v51 = vld [vmem:[#allocation103_spill] sm:$0xff]  ;;  %v19334_v32 = vld [vmem:[#allocation97_spill] sm:$0xff] }
 0x9ae   : > { %v16738_v59 = vadd.f32 %v6961_v29, %v6835_v3 }
 0x9af   : > { %v7202_v42 = vpop.f32.mrf.mxu3 }
 0x9b0   : > { %v7274_v1 = vadd.f32 %v7202_v42, %v16530_v37  ;;  %v7874_v33 = vpop.f32.mrf.mxu1 }
 0x9b2   : > { %v16741_v52 = vadd.f32 %v7445_v48, %v7274_v1 }
 0x9b3   : > { %v6795_v20 = vpop.f32.mrf.mxu2  ;;  %12083 = vmatmul.msk.bf16.gmra.mxu1 %vm645_vm0, %v19332_v63 }
 0x9b4   : > { %v6836_v25 = vadd.f32 %v6795_v20, %v16583_v50  ;;  %v7455_v45 = vpop.f32.mrf.mxu0 }
 0x9b6   : > { %v16746_v53 = vadd.f32 %v6963_v16, %v6836_v25  ;;  %v19335_v25 = vld [vmem:[#allocation81_spill] sm:$0xff] }
 0x9b7   : > { %v7204_v5 = vpop.f32.mrf.mxu3  ;;  %12031 = vmatmul.msk.bf16.gmra.mxu0 %vm645_vm0, %v19333_v51 }
 0x9b8   : > { %v16751_v29 = vadd.f32 %v7204_v5, %v16540_v47  ;;  %12052 = vmatmul.msk.bf16.gmra.mxu2 %vm645_vm0, %v19303_v55  ;;  %v7876_v37 = vpop.f32.mrf.mxu1 }
 0x9bb   : > { %v6798_v48 = vpop.f32.mrf.mxu2 }
 0x9bc   : > { %v6837_v3 = vadd.f32 %v6798_v48, %v16592_v40  ;;  %12000 = vmatmul.msk.bf16.gmra.mxu3 %vm645_vm0, %v19334_v32  ;;  %v16758_v50 = vpop.f32.mrf.mxu0  ;;  %v19336_v32 = vld [vmem:[#allocation104_spill] sm:$0xff] }
 0x9be   : > { %v16760_v16 = vadd.f32 %v6966_v6, %v6837_v3 }
 0x9bf   : > { %v7207_v42 = vpop.f32.mrf.mxu3 }
 0x9c0   : > { %v7276_v1 = vadd.f32 %v7207_v42, %v16551_v41  ;;  %v7879_v20 = vpop.f32.mrf.mxu1 }
 0x9c2   : > { %v16763_v47 = vadd.f32 %v7450_v56, %v7276_v1 }
 0x9c3   : > { %v6800_v63 = vpop.f32.mrf.mxu2  ;;  %12084 = vmatmul.msk.bf16.gmra.mxu1 %vm645_vm0, %v19335_v25 }
 0x9c4   : > { %v6838_v55 = vadd.f32 %v6800_v63, %v16601_v10  ;;  %v7460_v40 = vpop.f32.mrf.mxu0 }
 0x9c6   : > { %v16768_v5 = vadd.f32 %v6968_v12, %v6838_v55  ;;  %v19337_v55 = vld [vmem:[#allocation32_spill] sm:$0xff] }
 0x9c7   : > { %v7209_v48 = vpop.f32.mrf.mxu3  ;;  %12032 = vmatmul.msk.bf16.gmra.mxu0 %vm645_vm0, %v19336_v32 }
 0x9c8   : > { %v16773_v6 = vadd.f32 %v7209_v48, %v16561_v19  ;;  %12053 = vmatmul.msk.bf16.gmra.mxu2 %vm645_vm0, %v19308_v17  ;;  %v7881_v41 = vpop.f32.mrf.mxu1 }
 0x9cb   : > { %v7583_v56 = vpop.f32.mrf.mxu2 }
 0x9cc   : > { %v7673_v3 = vadd.f32 %v7583_v56, %v16611_v35  ;;  %12001 = vmatmul.msk.bf16.gmra.mxu3 %vm645_vm0, %v16396_v0  ;;  %v16780_v10 = vpop.f32.mrf.mxu0 }
 0x9ce   : > { %v16782_v12 = vadd.f32 %v7874_v33, %v7673_v3 }
 0x9cf   : > { %v7212_v42 = vpop.f32.mrf.mxu3 }
 0x9d0   : > { %v7278_v1 = vadd.f32 %v7212_v42, %v16572_v23  ;;  %v7884_v63 = vpop.f32.mrf.mxu1 }
 0x9d2   : > { %v16785_v19 = vadd.f32 %v7455_v45, %v7278_v1 }
 0x9d3   : > { %v7585_v25 = vpop.f32.mrf.mxu2  ;;  %12085 = vmatmul.msk.bf16.gmra.mxu1 %vm645_vm0, %v19337_v55 }
 0x9d4   : > { %v7674_v17 = vadd.f32 %v7585_v25, %v16623_v39  ;;  %v7465_v35 = vpop.f32.mrf.mxu0  ;;  %v19338_v25 = vld [vmem:[#allocation38_spill] sm:$0xff] }
 0x9d6   : > { %v16790_v48 = vadd.f32 %v7876_v37, %v7674_v17 }
 0x9d7   : > { %v7214_v0 = vpop.f32.mrf.mxu3 }
 0x9d8   : > { %v16793_v32 = vadd.f32 %v7214_v0, %v16579_v9  ;;  %12054 = vmatmul.msk.bf16.gmra.mxu2 %vm645_vm0, %v19314_v60  ;;  %v7886_v23 = vpop.f32.mrf.mxu1 }
 0x9db   : > { %v7588_v33 = vpop.f32.mrf.mxu2 }
 0x9dc   : > { %v7675_v45 = vadd.f32 %v7588_v33, %v16631_v2  ;;  %12002 = vmatmul.msk.bf16.gmra.mxu3 %vm645_vm0, %v16418_v36  ;;  %v16802_v39 = vpop.f32.mrf.mxu0  ;;  %v19339_v36 = vld [vmem:[#allocation2_spill] sm:$0xff]  ;;  %v19340_v33 = vld [vmem:[#allocation8_spill] sm:$0xff] }
 0x9de   : > { %v16800_v56 = vadd.f32 %v7879_v20, %v7675_v45 }
 0x9df   : > { %v7217_v37 = vpop.f32.mrf.mxu3 }
 0x9e0   : > { %v7280_v3 = vadd.f32 %v7217_v37, %v16590_v62  ;;  %v7889_v42 = vpop.f32.mrf.mxu1 }
 0x9e2   : > { %v16805_v9 = vadd.f32 %v7460_v40, %v7280_v3 }
 0x9e3   : > { %v7590_v1 = vpop.f32.mrf.mxu2  ;;  %12086 = vmatmul.msk.bf16.gmra.mxu1 %vm645_vm0, %v19338_v25 }
 0x9e4   : > { %v7676_v60 = vadd.f32 %v7590_v1, %v16643_v18  ;;  %v7470_v62 = vpop.f32.mrf.mxu0 }
 0x9e6   : > { %v16810_v2 = vadd.f32 %v7881_v41, %v7676_v60  ;;  %v19341_v41 = vld [vmem:[#allocation4_spill] sm:$0xff] }
 0x9e7   : > { %v7219_v55 = vpop.f32.mrf.mxu3 }
 0x9e8   : > { %v16813_v20 = vadd.f32 %v7219_v55, %v19339_v36  ;;  %12055 = vmatmul.msk.bf16.gmra.mxu2 %vm645_vm0, %v19318_v21  ;;  %v7891_v17 = vpop.f32.mrf.mxu1  ;;  %v19343_v21 = vld [vmem:[#allocation60_spill] sm:$0xff] }
 0x9eb   : > { %v7593_v0 = vpop.f32.mrf.mxu2 }
 0x9ec   : > { %v7677_v40 = vadd.f32 %v7593_v0, %v16651_v49  ;;  %12105 = vmatmul.msk.bf16.vlgmr.msrb.gmra.mxu3 %vm645_vm0, %v19340_v33  ;;  %v16825_v25 = vpop.f32.mrf.mxu0  ;;  %v19344_v0 = vld [vmem:[#allocation10_spill] sm:$0xff] }
 0x9ed   : > { %19342 = vst [vmem:[#allocation24_spill] sm:$0xff] %v16825_v25  ;;  %v19382_v25 = vld [vmem:[#allocation56_spill] sm:$0xff] }
 0x9ee   : > { %v16820_v45 = vadd.f32 %v7884_v63, %v7677_v40 }
 0x9ef   : > { %v7222_v18 = vpop.f32.mrf.mxu3 }
 0x9f0   : > { %v7282_v37 = vadd.f32 %v7222_v18, %v19341_v41  ;;  %v7894_v3 = vpop.f32.mrf.mxu1  ;;  %v19345_v18 = vld [vmem:[#allocation11_spill] sm:$0xff] }
 0x9f2   : > { %v16823_v1 = vadd.f32 %v7465_v35, %v7282_v37 }
 0x9f3   : > { %v7595_v60 = vpop.f32.mrf.mxu2  ;;  %12087 = vmatmul.msk.bf16.gmra.mxu1 %vm645_vm0, %v19343_v21 }
 0x9f4   : > { %v7678_v55 = vadd.f32 %v7595_v60, %v16666_v30  ;;  %v7475_v41 = vpop.f32.mrf.mxu0 }
 0x9f6   : > { %v16830_v49 = vadd.f32 %v7886_v23, %v7678_v55 }
 0x9f7   : > { %v7224_v36 = vpop.f32.mrf.mxu3 }
 0x9f8   : > { %v16833_v63 = vadd.f32 %v7224_v36, %v19344_v0  ;;  %12056 = vmatmul.msk.bf16.gmra.mxu2 %vm645_vm0, %v19321_v43  ;;  %v7896_v40 = vpop.f32.mrf.mxu1  ;;  %v19346_v36 = vld [vmem:[#allocation91_spill] sm:$0xff] }
 0x9fb   : > { %v7598_v35 = vpop.f32.mrf.mxu2 }
 0x9fc   : > { %v7679_v33 = vadd.f32 %v7598_v35, %v16674_v57  ;;  %12106 = vmatmul.msk.bf16.gmra.mxu3 %vm645_vm0, %v19345_v18  ;;  %v16850_v57 = vpop.f32.mrf.mxu0  ;;  %v19349_v18 = vld [vmem:[#allocation20_spill] sm:$0xff] }
 0x9fd   : > { %19347 = vst [vmem:[#allocation13_spill] sm:$0xff] %v16850_v57 }
 0x9fe   : > { %v16840_v37 = vadd.f32 %v7889_v42, %v7679_v33 }
 0x9ff   : > { %v7227_v30 = vpop.f32.mrf.mxu3 }
 0xa00   : > { %v7284_v23 = vadd.f32 %v7227_v30, %v16628_v22  ;;  %v7899_v60 = vpop.f32.mrf.mxu1 }
 0xa02   : > { %v16843_v21 = vadd.f32 %v7470_v62, %v7284_v23 }
 0xa03   : > { %v7600_v55 = vpop.f32.mrf.mxu2  ;;  %12088 = vmatmul.msk.bf16.gmra.mxu1 %vm645_vm0, %v19346_v36 }
 0xa04   : > { %v7680_v43 = vadd.f32 %v7600_v55, %v16686_v44  ;;  %v7480_v55 = vpop.f32.mrf.mxu0 }
 0xa06   : > { %v16848_v0 = vadd.f32 %v7891_v17, %v7680_v43  ;;  %v19350_v43 = vld [vmem:[#allocation98_spill] sm:$0xff] }
 0xa07   : > { %v7229_v35 = vpop.f32.mrf.mxu3 }
 0xa08   : > { %v16853_v42 = vadd.f32 %v7229_v35, %v16636_v58  ;;  %12057 = vmatmul.msk.bf16.gmra.mxu2 %vm645_vm0, %v19324_v7  ;;  %v7901_v22 = vpop.f32.mrf.mxu1 }
 0xa0a   : > { %19348 = vst [vmem:[#allocation65_spill] sm:$0xff] %v16853_v42 }
 0xa0b   : > { %v7603_v62 = vpop.f32.mrf.mxu2 }
 0xa0c   : > { %v7681_v33 = vadd.f32 %v7603_v62, %v16697_v28  ;;  %12107 = vmatmul.msk.bf16.gmra.mxu3 %vm645_vm0, %v19349_v18  ;;  %v19353_v18 = vld [vmem:[#allocation31_spill] sm:$0xff] }
 0xa0e   : > { %v16860_v30 = vadd.f32 %v7894_v3, %v7681_v33  ;;  %v16877_v3 = vpop.f32.mrf.mxu0 }
 0xa0f   : > { %v7232_v44 = vpop.f32.mrf.mxu3  ;;  %19352 = vst [vmem:[#allocation16_spill] sm:$0xff] %v16877_v3 }
 0xa10   : > { %v7286_v17 = vadd.f32 %v7232_v44, %v16648_v13  ;;  %v7904_v23 = vpop.f32.mrf.mxu1 }
 0xa12   : > { %v16863_v36 = vadd.f32 %v7475_v41, %v7286_v17 }
 0xa13   : > { %v7605_v58 = vpop.f32.mrf.mxu2  ;;  %12089 = vmatmul.msk.bf16.gmra.mxu1 %vm645_vm0, %v19350_v43  ;;  %v19354_v43 = vld [vmem:[#allocation106_spill] sm:$0xff] }
 0xa14   : > { %v7682_v7 = vadd.f32 %v7605_v58, %v16709_v31  ;;  %v12518_v31 = vld [vmem:[%s18773_s15 + $0x10] sm:$0xff] }
 0xa15   : > { %8850 = vmatpush.bf16.msra.mxu0 %v12518_v31 }
 0xa16   : > { %v16868_v35 = vadd.f32 %v7896_v40, %v7682_v7  ;;  %v5949_v7 = vpop.permute.xlu1 %5948 }
 0xa17   : > { %v7234_v28 = vpop.f32.mrf.mxu3  ;;  %v5991_v31 = vmul.f32 0.0, %v5949_v7 }
 0xa18   : > { %v16871_v62 = vadd.f32 %v7234_v28, %v16656_v4  ;;  %12058 = vmatmul.msk.bf16.gmra.mxu2 %vm645_vm0, %v19327_v46  ;;  %v16875_v13 = vpop.f32.mrf.mxu1  ;;  %v7485_v28 = vpop.f32.mrf.mxu0 }
 0xa1a   : > { %19351 = vst [vmem:[#allocation49_spill] sm:$0xff] %v16871_v62  ;;  %v19379_v62 = vld [vmem:[#allocation79_spill] sm:$0xff] }
 0xa1b   : > { %v7608_v41 = vpop.f32.mrf.mxu2 }
 0xa1c   : > { %v7683_v33 = vadd.f32 %v7608_v41, %v16719_v24  ;;  %12108 = vmatmul.msk.bf16.gmra.mxu3 %vm645_vm0, %v19353_v18 }
 0xa1e   : > { %v16885_v4 = vadd.f32 %v7899_v60, %v7683_v33  ;;  %v6032_v33 = vpack.c.bf16 %v5991_v31, %v5991_v31  ;;  %v19358_v31 = vld [vmem:[#allocation109_spill] sm:$0xff] }
 0xa1f   : > { %v7237_v40 = vpop.f32.mrf.mxu3 }
 0xa20   : > { %v7288_v46 = vadd.f32 %v7237_v40, %v16671_v11  ;;  %v7909_v44 = vpop.f32.mrf.mxu1 }
 0xa22   : > { %v16888_v17 = vadd.f32 %v7480_v55, %v7288_v46  ;;  %v19356_v46 = vld [vmem:[#allocation43_spill] sm:$0xff] }
 0xa23   : > { %v7610_v58 = vpop.f32.mrf.mxu2  ;;  %12090 = vmatmul.msk.bf16.gmra.mxu1 %vm645_vm0, %v19354_v43  ;;  %v7549_v43 = vunpack.c.l.b16 %v6032_v33 }
 0xa24   : > { %v7684_v24 = vadd.f32 %v7610_v58, %v16731_v34 }
 0xa26   : > { %v16893_v41 = vadd.f32 %v7901_v22, %v7684_v24  ;;  %v16907_v22 = vpop.f32.mrf.mxu0 }
 0xa27   : > { %v7239_v18 = vpop.f32.mrf.mxu3  ;;  %19357 = vst [vmem:[#allocation9_spill] sm:$0xff] %v16907_v22  ;;  %v19363_v22 = vld [vmem:[#allocation107_spill] sm:$0xff] }
 0xa28   : > { %v16896_v60 = vadd.f32 %v7239_v18, %v16679_v27  ;;  %12059 = vmatmul.msk.bf16.gmra.mxu2 %vm645_vm0, %v19330_v38  ;;  %v16900_v11 = vpop.f32.mrf.mxu1  ;;  %v7518_v38 = vadd.f32 %v16714_v54, %v16751_v29 }
 0xa2a   : > { %19355 = vst [vmem:[#allocation17_spill] sm:$0xff] %v16896_v60 }
 0xa2b   : > { %v7613_v55 = vpop.f32.mrf.mxu2 }
 0xa2c   : > { %v7685_v40 = vadd.f32 %v7613_v55, %v16741_v52  ;;  %12109 = vmatmul.msk.bf16.gmra.mxu3 %vm645_vm0, %v19356_v46  ;;  %v16916_v52 = vpack.c.b16 %v7549_v43, %v7549_v43 }
 0xa2e   : > { %v16905_v34 = vadd.f32 %v7904_v23, %v7685_v40  ;;  %19359 = vst [vmem:[#allocation64_spill] sm:$0xff] %v16916_v52  ;;  %v7791_v40 = vshrl.u32 %v16916_v52, 16  ;;  %v7794_v33 = vshll.u32 %v16916_v52, 16  ;;  %v7490_v29 = vpop.f32.mrf.mxu0 }
 0xa2f   : > { %v7242_v58 = vpop.f32.mrf.mxu3 }
 0xa30   : > { %v7290_v27 = vadd.f32 %v7242_v58, %v16694_v61  ;;  %v7914_v24 = vpop.f32.mrf.mxu1  ;;  %v19361_v58 = vld [vmem:[#allocation61_spill] sm:$0xff]  ;;  %v7793_v43 = vrot.slane %v7791_v40, 2 }
 0xa32   : > { %v16912_v7 = vadd.f32 %v7485_v28, %v7290_v27  ;;  %v7796_v27 = vrot.slane %v7794_v33, 3 }
 0xa33   : > { %v7615_v18 = vpop.f32.mrf.mxu2  ;;  %12091 = vmatmul.msk.bf16.gmra.mxu1 %vm645_vm0, %v19358_v31 }
 0xa34   : > { %v16918_v23 = vadd.f32 %v7615_v18, %v7518_v38 }
 0xa36   : > { %v16945_v40 = vpop.f32.mrf.mxu0 }
 0xa37   : > { %v7244_v55 = vpop.f32.mrf.mxu3  ;;  %19364 = vst [vmem:[#allocation18_spill] sm:$0xff] %v16945_v40 }
 0xa38   : > { %v16923_v61 = vadd.f32 %v7244_v55, %v16702_v26  ;;  %12060 = vmatmul.msk.bf16.gmra.mxu2 %vm645_vm0, %v19333_v51  ;;  %v16927_v54 = vpop.f32.mrf.mxu1  ;;  %v16935_v55 = vor.u32 %v7796_v27, %v7793_v43  ;;  %v12517_v51 = vld [vmem:[%s18773_s15 + $0x8] sm:$0xff]  ;;  %v19367_v27 = vld [vmem:[#allocation69_spill] sm:$0xff] }
 0xa39   : > { %8994 = vmatpush.bf16.msrb.mxu2 %v12517_v51 }
 0xa3a   : > { %19360 = vst [vmem:[#allocation72_spill] sm:$0xff] %v16923_v61 }
 0xa3b   : > { %v7618_v28 = vpop.f32.mrf.mxu2  ;;  %19362 = vst [vmem:[#allocation99_spill] sm:$0xff] %v16935_v55 }
 0xa3c   : > { %v7687_v46 = vadd.f32 %v7618_v28, %v16763_v47  ;;  %12110 = vmatmul.msk.bf16.gmra.mxu3 %vm645_vm0, %v19361_v58  ;;  %v7798_v47 = vsel %vm2368_vm15, %v19363_v22, %v16935_v55  ;;  %v19366_v58 = vld [vmem:[#allocation105_spill] sm:$0xff] }
 0xa3e   : > { %v16932_v38 = vadd.f32 %v7909_v44, %v7687_v46 }
 0xa3f   : > { %v7247_v18 = vpop.f32.mrf.mxu3 }
 0xa40   : > { %v7292_v26 = vadd.f32 %v7247_v18, %v16716_v15  ;;  %v7919_v31 = vpop.f32.mrf.mxu1  ;;  %v12516_v15 = vld [vmem:[%s18773_s15] sm:$0xff]  ;;  %v7495_v18 = vpop.f32.mrf.mxu0 }
 0xa41   : > { %8995 = vmatpush.bf16.msrb.mxu2 %v12516_v15 }
 0xa42   : > { %v16943_v28 = vadd.f32 %v7490_v29, %v7292_v26 }
 0xa43   : > { %v16947_v44 = vpop.f32.mrf.mxu2  ;;  %12092 = vmatmul.msk.bf16.gmra.mxu1 %vm645_vm0, %v7798_v47 }
 0xa47   : > { %v7249_v33 = vpop.f32.mrf.mxu3 }
 0xa48   : > { %v16954_v46 = vadd.f32 %v7249_v33, %v16724_v14  ;;  %12061 = vmatmul.msk.bf16.gmra.mxu2 %vm645_vm0, %v19366_v58  ;;  %v16958_v22 = vpop.f32.mrf.mxu1  ;;  %v18880_v58 = vrot.slane %v16916_v52, 2  ;;  %v16971_v55 = vpop.f32.mrf.mxu0 }
 0xa49   : > { %19368 = vst [vmem:[#allocation76_spill] sm:$0xff] %v16971_v55 }
 0xa4a   : > { %19365 = vst [vmem:[#allocation19_spill] sm:$0xff] %v16954_v46 }
 0xa4b   : > { %v7623_v29 = vpop.f32.mrf.mxu2 }
 0xa4c   : > { %v7689_v43 = vadd.f32 %v7623_v29, %v16785_v19  ;;  %12111 = vmatmul.msk.bf16.gmra.mxu3 %vm645_vm0, %v19367_v27  ;;  %v19369_v19 = vld [vmem:[#allocation101_spill] sm:$0xff] }
 0xa4d   : > { %v19370_v29 = vrot.slane %v19369_v19, 2 }
 0xa4e   : > { %v16963_v26 = vadd.f32 %v7914_v24, %v7689_v43 }
 0xa4f   : > { %v7252_v51 = vpop.f32.mrf.mxu3  ;;  %v7555_v24 = vsel %vm1979_vm12, %v19370_v29, %v18880_v58 }
 0xa50   : > { %v7294_v47 = vadd.f32 %v7252_v51, %v16738_v59  ;;  %v7924_v15 = vpop.f32.mrf.mxu1  ;;  %v19373_v51 = vld [vmem:[#allocation73_spill] sm:$0xff]  ;;  %v7500_v61 = vpop.f32.mrf.mxu0 }
 0xa52   : > { %v16966_v14 = vadd.f32 %v7495_v18, %v7294_v47 }
 0xa53   : > { %v16968_v33 = vpop.f32.mrf.mxu2 }
 0xa57   : > { %v7254_v40 = vpop.f32.mrf.mxu3 }
 0xa58   : > { %v16979_v43 = vadd.f32 %v7254_v40, %v16746_v53  ;;  %12062 = vmatmul.msk.bf16.gmra.mxu2 %vm645_vm0, %v7555_v24  ;;  %v16982_v59 = vpop.f32.mrf.mxu1 }
 0xa59   : > { %19372 = vst [vmem:[#allocation96_spill] sm:$0xff] %v16982_v59 }
 0xa5a   : > { %19371 = vst [vmem:[#allocation21_spill] sm:$0xff] %v16979_v43  ;;  %v19375_v43 = vld [vmem:[#allocation46_spill] sm:$0xff] }
 0xa5b   : > { %v7628_v27 = vpop.f32.mrf.mxu2 }
 0xa5c   : > { %v7691_v18 = vadd.f32 %v7628_v27, %v16805_v9  ;;  %12112 = vmatmul.msk.bf16.gmra.mxu3 %vm645_vm0, %v19373_v51  ;;  %v12521_v9 = vld [vmem:[%s18773_s15 + $0x28] sm:$0xff] }
 0xa5d   : > { %9200 = vmatpush.bf16.msra.mxu1 %v12521_v9 }
 0xa5e   : > { %v16987_v47 = vadd.f32 %v7919_v31, %v7691_v18 }
 0xa5f   : > { %v7257_v55 = vpop.f32.mrf.mxu3 }
 0xa60   : > { %v7296_v46 = vadd.f32 %v7257_v55, %v16760_v16  ;;  %v7929_v40 = vpop.f32.mrf.mxu1  ;;  %v12520_v55 = vld [vmem:[%s18773_s15 + $0x20] sm:$0xff] }
 0xa61   : > { %9201 = vmatpush.bf16.msra.mxu1 %v12520_v55 }
 0xa62   : > { %v16990_v29 = vadd.f32 %v7500_v61, %v7296_v46  ;;  %v19376_v61 = vld [vmem:[#allocation26_spill] sm:$0xff] }
 0xa63   : > { %v16992_v53 = vpop.f32.mrf.mxu2 }
 0xa67   : > { %v7259_v24 = vpop.f32.mrf.mxu3 }
 0xa68   : > { %v16995_v58 = vadd.f32 %v7259_v24, %v16768_v5  ;;  %12161 = vmatmul.msk.bf16.vlgmr.msrb.gmra.mxu2 %vm645_vm0, %v19375_v43  ;;  %v17011_v5 = vld [vmem:[%s18772_s14] ss:$0 sm:$0xff]  ;;  %v17015_v27 = vpop.f32.mrf.mxu1 }
 0xa69   : > { %19377 = vst [vmem:[#allocation78_spill] sm:$0xff] %v17015_v27 }
 0xa6a   : > { %19374 = vst [vmem:[#allocation25_spill] sm:$0xff] %v16995_v58 }
 0xa6b   : > { %v7633_v31 = vpop.f32.mrf.mxu2 }
 0xa6c   : > { %v7693_v16 = vadd.f32 %v7633_v31, %v16823_v1  ;;  %12113 = vmatmul.msk.bf16.gmra.mxu3 %vm645_vm0, %v19376_v61 }
 0xa6e   : > { %v17013_v46 = vadd.f32 %v7924_v15, %v7693_v16 }
 0xa6f   : > { %v8117_v18 = vpop.f32.mrf.mxu3 }
 0xa70   : > { %v8207_v1 = vadd.f32 %v8117_v18, %v16782_v12  ;;  %v7934_v3 = vpop.f32.mrf.mxu1  ;;  %v19380_v12 = vld [vmem:[#allocation57_spill] sm:$0xff] }
 0xa72   : > { %v8246_v51 = vadd.f32 %v17011_v5, %v8207_v1 }
 0xa73   : > { %v17019_v24 = vpop.f32.mrf.mxu2 }
 0xa74   : > { %19378 = vst [vmem:[#allocation102_spill] sm:$0xff] %v17019_v24  ;;  %v8282_v9 = vmax.f32 %v8246_v51, 0.0 }
 0xa76   : > { %v8354_v31 = vrot.slane %v8282_v9, 5 }
 0xa77   : > { %v8119_v61 = vpop.f32.mrf.mxu3 }
 0xa78   : > { %v8208_v58 = vadd.f32 %v8119_v61, %v16790_v48  ;;  %v8462_v60 = vsel %vm5594_vm3, 0.0, %v8354_v31 }
 0xa79   : > { %v8464_v18 = vmul.f32 %v8462_v60, %v19380_v12 }
 0xa7a   : > { %v8247_v15 = vadd.f32 %v17011_v5, %v8208_v58 }
 0xa7b   : > { %v7638_v16 = vpop.f32.mrf.mxu2  ;;  %v8501_v27 = vpack.c.bf16 %v8464_v18, %v8464_v18 }
 0xa7c   : > { %v8283_v57 = vmax.f32 %v8247_v15, 0.0  ;;  %v7695_v55 = vadd.f32 %v7638_v16, %v16843_v21  ;;  %12114 = vmatmul.msk.bf16.gmra.mxu3 %vm645_vm0, %v19379_v62  ;;  %v17034_v21 = vpop.f32.mrf.mxu1 }
 0xa7d   : > { %19383 = vst [vmem:[#allocation37_spill] sm:$0xff] %v17034_v21  ;;  %v8583_v60 = vunpack.c.l.b16 %v8501_v27 }
 0xa7e   : > { %v8355_v1 = vrot.slane %v8283_v57, 5  ;;  %v17028_v51 = vadd.f32 %v7929_v40, %v7695_v55 }
 0xa7f   : > { %v8122_v9 = vpop.f32.mrf.mxu3 }
 0xa80   : > { %19381 = vst [vmem:[#allocation42_spill] sm:$0xff] %v17028_v51  ;;  %v8356_v48 = vsel %vm5594_vm3, %v8354_v31, %v8355_v1  ;;  %v8209_v61 = vadd.f32 %v8122_v9, %v16800_v56 }
 0xa81   : > { %v8465_v58 = vmul.f32 %v8356_v48, %v19382_v25 }
 0xa82   : > { %v8248_v15 = vadd.f32 %v17011_v5, %v8209_v61 }
 0xa83   : > { %v8502_v42 = vpack.c.bf16 %v8465_v58, %v8465_v58  ;;  %v17036_v16 = vpop.f32.mrf.mxu2  ;;  %v19385_v58 = vrot.slane %v19375_v43, 1 }
 0xa84   : > { %19384 = vst [vmem:[#allocation82_spill] sm:$0xff] %v17036_v16  ;;  %v8284_v62 = vmax.f32 %v8248_v15, 0.0  ;;  %v7939_v21 = vpop.f32.mrf.mxu1 }
 0xa85   : > { %v8584_v57 = vunpack.c.l.b16 %v8502_v42 }
 0xa86   : > { %v8357_v40 = vrot.slane %v8284_v62, 5 }
 0xa87   : > { %v8124_v55 = vpop.f32.mrf.mxu3  ;;  %v8618_v12 = vpack.c.b16 %v8584_v57, %v8583_v60  ;;  %v19387_v57 = vld [vmem:[#allocation58_spill] sm:$0xff] }
 0xa88   : > { %v8358_v31 = vsel %vm5594_vm3, %v8355_v1, %v8357_v40  ;;  %v8210_v56 = vadd.f32 %v8124_v55, %v16810_v2  ;;  %v19386_v1 = vld [vmem:[#allocation34_spill] sm:$0xff] }
 0xa89   : > { %12162 = vmatmul.msk.bf16.gmra.mxu2 %vm645_vm0, %v8618_v12  ;;  %v9092_v25 = vrot.slane %v8618_v12, 1  ;;  %v8637_v18 = vshll.u32 %v8618_v12, 16  ;;  %v8641_v9 = vshrl.u32 %v8618_v12, 16  ;;  %v8466_v55 = vmul.f32 %v8358_v31, %v19387_v57 }
 0xa8a   : > { %v8249_v48 = vadd.f32 %v17011_v5, %v8210_v56  ;;  %v19388_v56 = vld [vmem:[#allocation63_spill] sm:$0xff] }
 0xa8b   : > { %v7643_v61 = vpop.f32.mrf.mxu2  ;;  %v9093_v27 = vsel %vm1307_vm10, %v19385_v58, %v9092_v25  ;;  %v8639_v42 = vrot.slane %v8637_v18, 1  ;;  %v9502_v15 = vrot.slane %v8641_v9, 1  ;;  %v9503_v2 = vrot.slane %v8637_v18, 2 }
 0xa8c   : > { %v8285_v62 = vmax.f32 %v8249_v48, 0.0  ;;  %v7697_v60 = vadd.f32 %v7643_v61, %v16863_v36  ;;  %12115 = vmatmul.msk.bf16.gmra.mxu3 %vm645_vm0, %v19386_v1  ;;  %12191 = vmatmul.msk.bf16.vlgmr.msra.gmra.mxu1 %vm645_vm0, %v9093_v27  ;;  %v8503_v1 = vpack.c.bf16 %v8466_v55, %v8466_v55  ;;  %v19390_v27 = vld [vmem:[#allocation62_spill] sm:$0xff] }
 0xa8d   : > { %v8640_v16 = vsel %vm1057_vm11, %v19388_v56, %v8639_v42  ;;  %v9504_v48 = vor.u32 %v9503_v2, %v9502_v15  ;;  %v17063_v15 = vpop.f32.mrf.mxu1 }
 0xa8e   : > { %v8359_v43 = vrot.slane %v8285_v62, 5  ;;  %12135 = vmatmul.msk.bf16.vlgmr.msra.gmra.mxu0 %vm645_vm0, %v8640_v16  ;;  %v17053_v58 = vadd.f32 %v7934_v3, %v7697_v60  ;;  %v8585_v62 = vunpack.c.l.b16 %v8503_v1  ;;  %19392 = vst [vmem:[#allocation84_spill] sm:$0xff] %v17063_v15 }
 0xa8f   : > { %v8127_v51 = vpop.f32.mrf.mxu3 }
 0xa90   : > { %19389 = vst [vmem:[#allocation28_spill] sm:$0xff] %v17053_v58  ;;  %v8360_v36 = vsel %vm5594_vm3, %v8357_v40, %v8359_v43  ;;  %v8211_v61 = vadd.f32 %v8127_v51, %v16820_v45 }
 0xa91   : > { %v8467_v18 = vmul.f32 %v8360_v36, %v19390_v27 }
 0xa92   : > { %v8250_v31 = vadd.f32 %v17011_v5, %v8211_v61 }
 0xa93   : > { %v8504_v57 = vpack.c.bf16 %v8467_v18, %v8467_v18  ;;  %v17059_v59 = vpop.f32.mrf.mxu2 }
 0xa94   : > { %19391 = vst [vmem:[#allocation59_spill] sm:$0xff] %v17059_v59  ;;  %v8286_v56 = vmax.f32 %v8250_v31, 0.0 }
 0xa95   : > { %v8586_v24 = vunpack.c.l.b16 %v8504_v57 }
 0xa96   : > { %v8361_v16 = vrot.slane %v8286_v56, 5  ;;  %v19393_v56 = vld [vmem:[#allocation54_spill] sm:$0xff] }
 0xa97   : > { %v17061_v3 = vpack.c.b16 %v8586_v24, %v8585_v62  ;;  %v8129_v60 = vpop.f32.mrf.mxu3  ;;  %v9793_v24 = vrot.slane %v8618_v12, 2 }
 0xa98   : > { %v8362_v40 = vsel %vm5594_vm3, %v8359_v43, %v8361_v16  ;;  %v8212_v45 = vadd.f32 %v8129_v60, %v16830_v49  ;;  %v8643_v43 = vor.u32 %v8641_v9, %v8639_v42  ;;  %v19395_v60 = vld [vmem:[#allocation3_spill] sm:$0xff] }
 0xa99   : > { %12163 = vmatmul.msk.bf16.gmra.mxu2 %vm645_vm0, %v17061_v3  ;;  %v9094_v51 = vrot.slane %v17061_v3, 1  ;;  %v8645_v2 = vshll.u32 %v17061_v3, 16  ;;  %v8649_v55 = vshrl.u32 %v17061_v3, 16  ;;  %v9794_v61 = vrot.slane %v17061_v3, 2 }
 0xa9a   : > { %v8251_v36 = vadd.f32 %v17011_v5, %v8212_v45  ;;  %v8468_v45 = vmul.f32 %v8362_v40, %v19395_v60  ;;  %v7944_v60 = vpop.f32.mrf.mxu1 }
 0xa9b   : > { %v7648_v1 = vpop.f32.mrf.mxu2  ;;  %v17075_v27 = vsel %vm1307_vm10, %v9092_v25, %v9094_v51  ;;  %v8647_v49 = vrot.slane %v8645_v2, 1  ;;  %v9505_v18 = vrot.slane %v8649_v55, 1  ;;  %v17083_v12 = vsel %vm1979_vm12, %v9793_v24, %v9794_v61 }
 0xa9c   : > { %v8287_v31 = vmax.f32 %v8251_v36, 0.0  ;;  %v7699_v57 = vadd.f32 %v7648_v1, %v16888_v17  ;;  %12116 = vmatmul.msk.bf16.gmra.mxu3 %vm645_vm0, %v19393_v56  ;;  %12192 = vmatmul.msk.bf16.gmra.mxu1 %vm645_vm0, %v17075_v27  ;;  %19394 = vst [vmem:[#allocation39_spill] sm:$0xff] %v17083_v12  ;;  %v9506_v62 = vrot.slane %v8645_v2, 2  ;;  %v10198_v9 = vrot.slane %v8649_v55, 2 }
 0xa9d   : > { %v8648_v25 = vsel %vm1057_vm11, %v8643_v43, %v8647_v49  ;;  %v10199_v1 = vrot.slane %v8645_v2, 3  ;;  %v8505_v40 = vpack.c.bf16 %v8468_v45, %v8468_v45  ;;  %v19397_v43 = vld [vmem:[#allocation5_spill] sm:$0xff] }
 0xa9e   : > { %v8363_v42 = vrot.slane %v8287_v31, 5  ;;  %12136 = vmatmul.msk.bf16.gmra.mxu0 %vm645_vm0, %v8648_v25  ;;  %v17088_v36 = vadd.f32 %v7939_v21, %v7699_v57  ;;  %v9507_v17 = vor.u32 %v9506_v62, %v9505_v18 }
 0xa9f   : > { %v8132_v56 = vpop.f32.mrf.mxu3  ;;  %v10200_v12 = vor.u32 %v10199_v1, %v10198_v9  ;;  %v8587_v2 = vunpack.c.l.b16 %v8505_v40  ;;  %v8651_v1 = vor.u32 %v8649_v55, %v8647_v49  ;;  %v19401_v49 = vld [vmem:[#allocation6_spill] sm:$0xff] }
 0xaa0   : > { %v8364_v15 = vsel %vm5594_vm3, %v8361_v16, %v8363_v42  ;;  %v8213_v59 = vadd.f32 %v8132_v56, %v16840_v37  ;;  %v17093_v24 = vsel %vm1704_vm13, %v9504_v48, %v9507_v17 }
 0xaa1   : > { %19396 = vst [vmem:[#allocation30_spill] sm:$0xff] %v17093_v24  ;;  %v8469_v58 = vmul.f32 %v8364_v15, %v19397_v43 }
 0xaa2   : > { %v8252_v31 = vadd.f32 %v17011_v5, %v8213_v59  ;;  %v17110_v40 = vpop.f32.mrf.mxu1 }
 0xaa3   : > { %v8506_v25 = vpack.c.bf16 %v8469_v58, %v8469_v58  ;;  %v17097_v21 = vpop.f32.mrf.mxu2  ;;  %19398 = vst [vmem:[#allocation86_spill] sm:$0xff] %v17110_v40 }
 0xaa4   : > { %v8288_v18 = vmax.f32 %v8252_v31, 0.0 }
 0xaa5   : > { %v8588_v57 = vunpack.c.l.b16 %v8506_v25 }
 0xaa6   : > { %v8365_v62 = vrot.slane %v8288_v18, 5 }
 0xaa7   : > { %v17099_v16 = vpack.c.b16 %v8588_v57, %v8587_v2  ;;  %v8134_v37 = vpop.f32.mrf.mxu3  ;;  %v19399_v57 = vld [vmem:[#allocation44_spill] sm:$0xff] }
 0xaa8   : > { %v8366_v48 = vsel %vm5594_vm3, %v8363_v42, %v8365_v62  ;;  %v8214_v9 = vadd.f32 %v8134_v37, %v16848_v0 }
 0xaa9   : > { %12164 = vmatmul.msk.bf16.gmra.mxu2 %vm645_vm0, %v17099_v16  ;;  %v9096_v15 = vrot.slane %v17099_v16, 1  ;;  %v8653_v59 = vshll.u32 %v17099_v16, 16  ;;  %v8657_v58 = vshrl.u32 %v17099_v16, 16  ;;  %v18881_v56 = vrot.slane %v17099_v16, 2 }
 0xaaa   : > { %v8253_v45 = vadd.f32 %v17011_v5, %v8214_v9  ;;  %v8470_v37 = vmul.f32 %v8366_v48, %v19401_v49  ;;  %v19402_v48 = vrot.slane %v17099_v16, 3 }
 0xaab   : > { %v7653_v43 = vpop.f32.mrf.mxu2  ;;  %v17113_v42 = vsel %vm1307_vm10, %v9094_v51, %v9096_v15  ;;  %v8655_v0 = vrot.slane %v8653_v59, 1  ;;  %v9509_v31 = vrot.slane %v8657_v58, 1  ;;  %v17124_v55 = vsel %vm1979_vm12, %v9794_v61, %v18881_v56 }
 0xaac   : > { %v8289_v18 = vmax.f32 %v8253_v45, 0.0  ;;  %v7701_v2 = vadd.f32 %v7653_v43, %v16912_v7  ;;  %12117 = vmatmul.msk.bf16.gmra.mxu3 %vm645_vm0, %v19399_v57  ;;  %12193 = vmatmul.msk.bf16.gmra.mxu1 %vm645_vm0, %v17113_v42  ;;  %19400 = vst [vmem:[#allocation45_spill] sm:$0xff] %v17124_v55  ;;  %v9510_v51 = vrot.slane %v8653_v59, 2  ;;  %v12523_v7 = vld [vmem:[%s18773_s15 + $0x38] sm:$0xff]  ;;  %v10201_v45 = vrot.slane %v8657_v58, 2 }
 0xaad   : > { %v8656_v9 = vsel %vm1057_vm11, %v8651_v1, %v8655_v0  ;;  %v10481_v43 = vrot.slane %v17061_v3, 3  ;;  %v10202_v61 = vrot.slane %v8653_v59, 3  ;;  %9368 = vmatpush.bf16.msra.mxu3 %v12523_v7 }
 0xaae   : > { %v8367_v57 = vrot.slane %v8289_v18, 5  ;;  %12137 = vmatmul.msk.bf16.gmra.mxu0 %vm645_vm0, %v8656_v9  ;;  %v17133_v25 = vadd.f32 %v7944_v60, %v7701_v2  ;;  %v9511_v24 = vor.u32 %v9510_v51, %v9509_v31  ;;  %v8507_v9 = vpack.c.bf16 %v8470_v37, %v8470_v37  ;;  %v19405_v60 = vld [vmem:[#allocation7_spill] sm:$0xff] }
 0xaaf   : > { %v8137_v56 = vpop.f32.mrf.mxu3  ;;  %v17138_v1 = vsel %vm2603_vm14, %v10481_v43, %v19402_v48  ;;  %v10203_v18 = vor.u32 %v10202_v61, %v10201_v45  ;;  %v12525_v37 = vld [vmem:[%s18773_s15 + $0x48] sm:$0xff] }
 0xab0   : > { %19403 = vst [vmem:[#allocation71_spill] sm:$0xff] %v17138_v1  ;;  %v8368_v49 = vsel %vm5594_vm3, %v8365_v62, %v8367_v57  ;;  %v8215_v55 = vadd.f32 %v8137_v56, %v16860_v30  ;;  %v17143_v3 = vsel %vm1704_vm13, %v9507_v17, %v9511_v24  ;;  %v8589_v48 = vunpack.c.l.b16 %v8507_v9  ;;  %v7949_v62 = vpop.f32.mrf.mxu1  ;;  %9659 = vmatpush.bf16.msrb.mxu0 %v12525_v37  ;;  %v19411_v37 = vld [vmem:[#allocation12_spill] sm:$0xff] }
 0xab1   : > { %19404 = vst [vmem:[#allocation88_spill] sm:$0xff] %v17143_v3  ;;  %v8471_v2 = vmul.f32 %v8368_v49, %v19405_v60  ;;  %v17148_v31 = vsel %vm2368_vm15, %v10200_v12, %v10203_v18  ;;  %v8659_v9 = vor.u32 %v8657_v58, %v8655_v0  ;;  %v19409_v58 = vrot.slane %v17099_v16, 2 }
 0xab2   : > { %v8254_v59 = vadd.f32 %v17011_v5, %v8215_v55  ;;  %19406 = vst [vmem:[#allocation51_spill] sm:$0xff] %v17148_v31 }
 0xab3   : > { %v8508_v51 = vpack.c.bf16 %v8471_v2, %v8471_v2  ;;  %v17150_v7 = vpop.f32.mrf.mxu2 }
 0xab4   : > { %19407 = vst [vmem:[#allocation75_spill] sm:$0xff] %v17150_v7  ;;  %v8290_v43 = vmax.f32 %v8254_v59, 0.0 }
 0xab5   : > { %v8590_v1 = vunpack.c.l.b16 %v8508_v51 }
 0xab6   : > { %v8369_v30 = vrot.slane %v8290_v43, 5 }
 0xab7   : > { %v17152_v56 = vpack.c.b16 %v8590_v1, %v8589_v48  ;;  %v8139_v17 = vpop.f32.mrf.mxu3 }
 0xab8   : > { %v8370_v55 = vsel %vm5594_vm3, %v8367_v57, %v8369_v30  ;;  %v8216_v12 = vadd.f32 %v8139_v17, %v16868_v35  ;;  %v19408_v17 = vld [vmem:[#allocation66_spill] sm:$0xff]  ;;  %v17185_v3 = vpop.f32.mrf.mxu1 }
 0xab9   : > { %12165 = vmatmul.msk.bf16.gmra.mxu2 %vm645_vm0, %v17152_v56  ;;  %v9098_v45 = vrot.slane %v17152_v56, 1  ;;  %v8661_v61 = vshll.u32 %v17152_v56, 16  ;;  %v8665_v1 = vshrl.u32 %v17152_v56, 16  ;;  %v9798_v60 = vrot.slane %v17152_v56, 2  ;;  %19412 = vst [vmem:[#allocation90_spill] sm:$0xff] %v17185_v3 }
 0xaba   : > { %v8255_v49 = vadd.f32 %v17011_v5, %v8216_v12  ;;  %v8472_v12 = vmul.f32 %v8370_v55, %v19411_v37  ;;  %v19413_v7 = vrot.slane %v17152_v56, 3  ;;  %v19421_v3 = vrot.slane %v17152_v56, 3 }
 0xabb   : > { %v7658_v2 = vpop.f32.mrf.mxu2  ;;  %v17167_v57 = vsel %vm1307_vm10, %v9096_v15, %v9098_v45  ;;  %v8663_v35 = vrot.slane %v8661_v61, 1  ;;  %v9513_v59 = vrot.slane %v8665_v1, 1  ;;  %v17178_v0 = vsel %vm1979_vm12, %v19409_v58, %v9798_v60 }
 0xabc   : > { %v8291_v43 = vmax.f32 %v8255_v49, 0.0  ;;  %v7703_v48 = vadd.f32 %v7658_v2, %v16943_v28  ;;  %12118 = vmatmul.msk.bf16.gmra.mxu3 %vm645_vm0, %v19408_v17  ;;  %12194 = vmatmul.msk.bf16.gmra.mxu1 %vm645_vm0, %v17167_v57  ;;  %19410 = vst [vmem:[#allocation92_spill] sm:$0xff] %v17178_v0  ;;  %v9514_v15 = vrot.slane %v8661_v61, 2  ;;  %v10205_v51 = vrot.slane %v8665_v1, 2 }
 0xabd   : > { %v8664_v31 = vsel %vm1057_vm11, %v8659_v9, %v8663_v35  ;;  %v10206_v17 = vrot.slane %v8661_v61, 3  ;;  %v19414_v58 = vrot.slane %v17099_v16, 3  ;;  %v19417_v61 = vld [vmem:[#allocation14_spill] sm:$0xff] }
 0xabe   : > { %v8371_v49 = vrot.slane %v8291_v43, 5  ;;  %12138 = vmatmul.msk.bf16.gmra.mxu0 %vm645_vm0, %v8664_v31  ;;  %v17183_v28 = vadd.f32 %v7949_v62, %v7703_v48  ;;  %v9515_v2 = vor.u32 %v9514_v15, %v9513_v59  ;;  %v8509_v59 = vpack.c.bf16 %v8472_v12, %v8472_v12 }
 0xabf   : > { %v8142_v40 = vpop.f32.mrf.mxu3  ;;  %v17192_v0 = vsel %vm2603_vm14, %v19414_v58, %v19413_v7  ;;  %v10207_v62 = vor.u32 %v10206_v17, %v10205_v51 }
 0xac0   : > { %19415 = vst [vmem:[#allocation23_spill] sm:$0xff] %v17192_v0  ;;  %v8372_v55 = vsel %vm5594_vm3, %v8369_v30, %v8371_v49  ;;  %v8217_v9 = vadd.f32 %v8142_v40, %v16885_v4  ;;  %v17197_v31 = vsel %vm1704_vm13, %v9511_v24, %v9515_v2  ;;  %v8591_v58 = vunpack.c.l.b16 %v8509_v59  ;;  %v7954_v12 = vpop.f32.mrf.mxu1 }
 0xac1   : > { %19416 = vst [vmem:[#allocation103_spill] sm:$0xff] %v17197_v31  ;;  %v8473_v43 = vmul.f32 %v8372_v55, %v19417_v61  ;;  %v17202_v15 = vsel %vm2368_vm15, %v10203_v18, %v10207_v62  ;;  %v8667_v59 = vor.u32 %v8665_v1, %v8663_v35 }
 0xac2   : > { %v8256_v48 = vadd.f32 %v17011_v5, %v8217_v9  ;;  %19418 = vst [vmem:[#allocation97_spill] sm:$0xff] %v17202_v15 }
 0xac3   : > { %v8510_v16 = vpack.c.bf16 %v8473_v43, %v8473_v43  ;;  %v17204_v37 = vpop.f32.mrf.mxu2 }
 0xac4   : > { %v8292_v7 = vmax.f32 %v8256_v48, 0.0 }
 0xac5   : > { %v8592_v30 = vunpack.c.l.b16 %v8510_v16 }
 0xac6   : > { %v8373_v0 = vrot.slane %v8292_v7, 5 }
 0xac7   : > { %v17206_v4 = vpack.c.b16 %v8592_v30, %v8591_v58  ;;  %v8144_v24 = vpop.f32.mrf.mxu3  ;;  %v19419_v30 = vld [vmem:[#allocation93_spill] sm:$0xff] }
 0xac8   : > { %v8374_v40 = vsel %vm5594_vm3, %v8371_v49, %v8373_v0  ;;  %v8218_v51 = vadd.f32 %v8144_v24, %v16893_v41  ;;  %v19420_v24 = vld [vmem:[#allocation15_spill] sm:$0xff]  ;;  %v17251_v56 = vpop.f32.mrf.mxu1 }
 0xac9   : > { %12166 = vmatmul.msk.bf16.gmra.mxu2 %vm645_vm0, %v17206_v4  ;;  %v9100_v18 = vrot.slane %v17206_v4, 1  ;;  %v8669_v17 = vshll.u32 %v17206_v4, 16  ;;  %v8673_v55 = vshrl.u32 %v17206_v4, 16  ;;  %v9800_v61 = vrot.slane %v17206_v4, 2 }
 0xaca   : > { %v8257_v9 = vadd.f32 %v17011_v5, %v8218_v51  ;;  %v18884_v16 = vrot.slane %v17206_v4, 3 }
 0xacb   : > { %v7663_v43 = vpop.f32.mrf.mxu2  ;;  %v17218_v49 = vsel %vm1307_vm10, %v9098_v45, %v9100_v18  ;;  %v8671_v41 = vrot.slane %v8669_v17, 1  ;;  %v9517_v48 = vrot.slane %v8673_v55, 1  ;;  %v17227_v1 = vsel %vm1979_vm12, %v9798_v60, %v9800_v61 }
 0xacc   : > { %v8293_v7 = vmax.f32 %v8257_v9, 0.0  ;;  %v7705_v58 = vadd.f32 %v7663_v43, %v16966_v14  ;;  %12119 = vmatmul.msk.bf16.gmra.mxu3 %vm645_vm0, %v19419_v30  ;;  %12195 = vmatmul.msk.bf16.gmra.mxu1 %vm645_vm0, %v17218_v49  ;;  %v9518_v35 = vrot.slane %v8669_v17, 2  ;;  %v8474_v45 = vmul.f32 %v8374_v40, %v19420_v24 }
 0xacd   : > { %v8672_v51 = vsel %vm1057_vm11, %v8667_v59, %v8671_v41  ;;  %v10209_v15 = vrot.slane %v8673_v55, 2  ;;  %v10210_v43 = vrot.slane %v8669_v17, 3  ;;  %v17239_v60 = vsel %vm2603_vm14, %v19421_v3, %v18884_v16 }
 0xace   : > { %v8375_v31 = vrot.slane %v8293_v7, 5  ;;  %12139 = vmatmul.msk.bf16.gmra.mxu0 %vm645_vm0, %v8672_v51  ;;  %v17232_v9 = vadd.f32 %v7954_v12, %v7705_v58  ;;  %v9519_v14 = vor.u32 %v9518_v35, %v9517_v48  ;;  %19422 = vst [vmem:[#allocation81_spill] sm:$0xff] %v17239_v60  ;;  %v8511_v12 = vpack.c.bf16 %v8474_v45, %v8474_v45  ;;  %v19424_v58 = vld [vmem:[#allocation29_spill] sm:$0xff] }
 0xacf   : > { %v8147_v30 = vpop.f32.mrf.mxu3  ;;  %v10211_v24 = vor.u32 %v10210_v43, %v10209_v15 }
 0xad0   : > { %v8376_v40 = vsel %vm5594_vm3, %v8373_v0, %v8375_v31  ;;  %v8219_v59 = vadd.f32 %v8147_v30, %v16905_v34  ;;  %v17244_v7 = vsel %vm1704_vm13, %v9515_v2, %v9519_v14  ;;  %v8593_v16 = vunpack.c.l.b16 %v8511_v12 }
 0xad1   : > { %19423 = vst [vmem:[#allocation104_spill] sm:$0xff] %v17244_v7  ;;  %v8475_v48 = vmul.f32 %v8376_v40, %v19424_v58  ;;  %v17249_v35 = vsel %vm2368_vm15, %v10207_v62, %v10211_v24  ;;  %v7977_v2 = vadd.f32 %v16875_v13, %v16918_v23 }
 0xad2   : > { %v8258_v17 = vadd.f32 %v17011_v5, %v8219_v59  ;;  %19425 = vst [vmem:[#allocation32_spill] sm:$0xff] %v17249_v35 }
 0xad3   : > { %v8512_v3 = vpack.c.bf16 %v8475_v48, %v8475_v48  ;;  %v17253_v51 = vpop.f32.mrf.mxu2  ;;  %v8675_v48 = vor.u32 %v8673_v55, %v8671_v41 }
 0xad4   : > { %v8294_v0 = vmax.f32 %v8258_v17, 0.0 }
 0xad5   : > { %v8594_v34 = vunpack.c.l.b16 %v8512_v3 }
 0xad6   : > { %v8377_v30 = vrot.slane %v8294_v0, 5 }
 0xad7   : > { %v17257_v15 = vpack.c.b16 %v8594_v34, %v8593_v16  ;;  %v8149_v45 = vpop.f32.mrf.mxu3 }
 0xad8   : > { %v8378_v43 = vsel %vm5594_vm3, %v8375_v31, %v8377_v30  ;;  %v8220_v40 = vadd.f32 %v8149_v45, %v7977_v2  ;;  %v19426_v2 = vld [vmem:[#allocation108_spill] sm:$0xff]  ;;  %v7959_v45 = vpop.f32.mrf.mxu1 }
 0xad9   : > { %12167 = vmatmul.msk.bf16.gmra.mxu2 %vm645_vm0, %v17257_v15  ;;  %v9102_v62 = vrot.slane %v17257_v15, 1  ;;  %v8677_v59 = vshll.u32 %v17257_v15, 16  ;;  %v8681_v12 = vshrl.u32 %v17257_v15, 16  ;;  %v9802_v13 = vrot.slane %v17257_v15, 2 }
 0xada   : > { %v8259_v58 = vadd.f32 %v17011_v5, %v8220_v40  ;;  %v10488_v3 = vrot.slane %v17257_v15, 3 }
 0xadb   : > { %v7668_v23 = vpop.f32.mrf.mxu2  ;;  %v17268_v16 = vsel %vm1307_vm10, %v9100_v18, %v9102_v62  ;;  %v8679_v31 = vrot.slane %v8677_v59, 1  ;;  %v9521_v17 = vrot.slane %v8681_v12, 1  ;;  %v17277_v55 = vsel %vm1979_vm12, %v9800_v61, %v9802_v13  ;;  %v19428_v18 = vld [vmem:[#allocation35_spill] sm:$0xff] }
 0xadc   : > { %v8295_v0 = vmax.f32 %v8259_v58, 0.0  ;;  %v7707_v34 = vadd.f32 %v7668_v23, %v16990_v29  ;;  %12120 = vmatmul.msk.bf16.gmra.mxu3 %vm645_vm0, %v19426_v2  ;;  %12196 = vmatmul.msk.bf16.gmra.mxu1 %vm645_vm0, %v17268_v16  ;;  %19427 = vst [vmem:[#allocation38_spill] sm:$0xff] %v17277_v55  ;;  %v9522_v41 = vrot.slane %v8677_v59, 2  ;;  %v8476_v40 = vmul.f32 %v8378_v43, %v19428_v18 }
 0xadd   : > { %v8680_v60 = vsel %vm1057_vm11, %v8675_v48, %v8679_v31  ;;  %v10213_v35 = vrot.slane %v8681_v12, 2  ;;  %v10214_v23 = vrot.slane %v8677_v59, 3  ;;  %v7520_v2 = vadd.f32 %v16736_v8, %v16773_v6 }
 0xade   : > { %v8379_v15 = vrot.slane %v8295_v0, 5  ;;  %12140 = vmatmul.msk.bf16.gmra.mxu0 %vm645_vm0, %v8680_v60  ;;  %v17282_v29 = vadd.f32 %v7959_v45, %v7707_v34  ;;  %v9523_v58 = vor.u32 %v9522_v41, %v9521_v17  ;;  %v19429_v61 = vrot.slane %v17206_v4, 3  ;;  %v19431_v17 = vld [vmem:[#allocation41_spill] sm:$0xff] }
 0xadf   : > { %v8152_v7 = vpop.f32.mrf.mxu3  ;;  %v10215_v60 = vor.u32 %v10214_v23, %v10213_v35  ;;  %v8513_v34 = vpack.c.bf16 %v8476_v40, %v8476_v40  ;;  %v7688_v41 = vadd.f32 %v16947_v44, %v7520_v2 }
 0xae0   : > { %v17289_v55 = vsel %vm2603_vm14, %v19429_v61, %v10488_v3  ;;  %v8380_v43 = vsel %vm5594_vm3, %v8377_v30, %v8379_v15  ;;  %v8221_v48 = vadd.f32 %v8152_v7, %v16932_v38  ;;  %v17294_v0 = vsel %vm1704_vm13, %v9519_v14, %v9523_v58 }
 0xae1   : > { %19430 = vst [vmem:[#allocation2_spill] sm:$0xff] %v17289_v55  ;;  %v8477_v59 = vmul.f32 %v8380_v43, %v19431_v17  ;;  %v17300_v6 = vsel %vm2368_vm15, %v10211_v24, %v10215_v60  ;;  %v8595_v18 = vunpack.c.l.b16 %v8513_v34  ;;  %v7979_v38 = vadd.f32 %v16900_v11, %v7688_v41  ;;  %v19433_v41 = vld [vmem:[#allocation110_spill] sm:$0xff]  ;;  %v19460_v55 = vld [vmem:[#allocation24_spill] sm:$0xff] }
 0xae2   : > { %v8260_v8 = vadd.f32 %v17011_v5, %v8221_v48  ;;  %19432 = vst [vmem:[#allocation8_spill] sm:$0xff] %v17300_v6  ;;  %v19475_v6 = vld [vmem:[#allocation13_spill] sm:$0xff] }
 0xae3   : > { %v8514_v4 = vpack.c.bf16 %v8477_v59, %v8477_v59 }
 0xae4   : > { %v8296_v45 = vmax.f32 %v8260_v8, 0.0 }
 0xae5   : > { %v8596_v30 = vunpack.c.l.b16 %v8514_v4 }
 0xae6   : > { %v8381_v61 = vrot.slane %v8296_v45, 5 }
 0xae7   : > { %v17303_v14 = vpack.c.b16 %v8596_v30, %v8595_v18  ;;  %v8154_v7 = vpop.f32.mrf.mxu3  ;;  %v19434_v18 = vld [vmem:[#allocation47_spill] sm:$0xff] }
 0xae8   : > { %v8382_v35 = vsel %vm5594_vm3, %v8379_v15, %v8381_v61  ;;  %v8222_v40 = vadd.f32 %v8154_v7, %v7979_v38  ;;  %v8683_v15 = vor.u32 %v8681_v12, %v8679_v31 }
 0xae9   : > { %12168 = vmatmul.msk.bf16.gmra.mxu2 %vm645_vm0, %v17303_v14  ;;  %v9104_v44 = vrot.slane %v17303_v14, 1  ;;  %v8685_v24 = vshll.u32 %v17303_v14, 16  ;;  %v8689_v23 = vshrl.u32 %v17303_v14, 16  ;;  %v9804_v43 = vrot.slane %v17303_v14, 2 }
 0xaea   : > { %v8261_v2 = vadd.f32 %v17011_v5, %v8222_v40  ;;  %v18887_v11 = vrot.slane %v17303_v14, 3  ;;  %v8478_v30 = vmul.f32 %v8382_v35, %v19434_v18 }
 0xaeb   : > { %v17315_v48 = vsel %vm1307_vm10, %v9102_v62, %v9104_v44  ;;  %v8687_v34 = vrot.slane %v8685_v24, 1  ;;  %v9525_v17 = vrot.slane %v8689_v23, 1  ;;  %v17322_v8 = vsel %vm1979_vm12, %v9802_v13, %v9804_v43 }
 0xaec   : > { %v8297_v59 = vmax.f32 %v8261_v2, 0.0  ;;  %12121 = vmatmul.msk.bf16.gmra.mxu3 %vm645_vm0, %v19433_v41  ;;  %12197 = vmatmul.msk.bf16.gmra.mxu1 %vm645_vm0, %v17315_v48  ;;  %v9526_v4 = vrot.slane %v8685_v24, 2  ;;  %v10217_v45 = vrot.slane %v8689_v23, 2  ;;  %v10218_v38 = vrot.slane %v8685_v24, 3  ;;  %v17334_v41 = vpop.f32.mrf.mxu2 }
 0xaed   : > { %v8688_v62 = vsel %vm1057_vm11, %v8683_v15, %v8687_v34  ;;  %v17330_v7 = vsel %vm2603_vm14, %v10488_v3, %v18887_v11  ;;  %v7522_v13 = vadd.f32 %v16758_v50, %v16793_v32  ;;  %v12522_v15 = vld [vmem:[%s18773_s15 + $0x30] sm:$0xff]  ;;  %v8515_v3 = vpack.c.bf16 %v8478_v30, %v8478_v30 }
 0xaee   : > { %v8383_v12 = vrot.slane %v8297_v59, 5  ;;  %12141 = vmatmul.msk.bf16.gmra.mxu0 %vm645_vm0, %v8688_v62  ;;  %v9527_v31 = vor.u32 %v9526_v4, %v9525_v17  ;;  %19435 = vst [vmem:[#allocation4_spill] sm:$0xff] %v17330_v7  ;;  %v10219_v2 = vor.u32 %v10218_v38, %v10217_v45  ;;  %v19436_v59 = vld [vmem:[#allocation53_spill] sm:$0xff]  ;;  %9369 = vmatpush.bf16.msra.mxu3 %v12522_v15 }
 0xaef   : > { %v8157_v40 = vpop.f32.mrf.mxu3  ;;  %v7690_v50 = vadd.f32 %v16968_v33, %v7522_v13  ;;  %v8597_v18 = vunpack.c.l.b16 %v8515_v3  ;;  %v19438_v3 = vrot.slane %v19369_v19, 3 }
 0xaf0   : > { %v8384_v35 = vsel %vm5594_vm3, %v8381_v61, %v8383_v12  ;;  %v8223_v24 = vadd.f32 %v8157_v40, %v16963_v26  ;;  %v17342_v17 = vsel %vm1704_vm13, %v9523_v58, %v9527_v31  ;;  %v17346_v45 = vsel %vm2368_vm15, %v10215_v60, %v10219_v2 }
 0xaf1   : > { %v8479_v4 = vmul.f32 %v8384_v35, %v19436_v59  ;;  %19437 = vst [vmem:[#allocation60_spill] sm:$0xff] %v17346_v45  ;;  %v7981_v40 = vadd.f32 %v16927_v54, %v7690_v50  ;;  %v18886_v60 = vrot.slane %v16916_v52, 3 }
 0xaf2   : > { %v8262_v32 = vadd.f32 %v17011_v5, %v8223_v24 }
 0xaf3   : > { %v8516_v61 = vpack.c.bf16 %v8479_v4, %v8479_v4 }
 0xaf4   : > { %v8298_v26 = vmax.f32 %v8262_v32, 0.0  ;;  %v8997_v15 = vpop.f32.mrf.mxu2 }
 0xaf5   : > { %v8598_v62 = vunpack.c.l.b16 %v8516_v61  ;;  %v8691_v61 = vor.u32 %v8689_v23, %v8687_v34  ;;  %v19440_v34 = vrot.slane %v17303_v14, 3  ;;  %v19443_v14 = vld [vmem:[#allocation68_spill] sm:$0xff] }
 0xaf6   : > { %v8385_v38 = vrot.slane %v8298_v26, 5 }
 0xaf7   : > { %v17351_v58 = vpack.c.b16 %v8598_v62, %v8597_v18  ;;  %v8159_v30 = vpop.f32.mrf.mxu3 }
 0xaf8   : > { %v8386_v35 = vsel %vm5594_vm3, %v8383_v12, %v8385_v38  ;;  %v8224_v59 = vadd.f32 %v8159_v30, %v7981_v40  ;;  %v8041_v12 = vsel %vm2603_vm14, %v19438_v3, %v18886_v60 }
 0xaf9   : > { %12169 = vmatmul.msk.bf16.gmra.mxu2 %vm645_vm0, %v17351_v58  ;;  %v9106_v33 = vrot.slane %v17351_v58, 1  ;;  %v8693_v13 = vshll.u32 %v17351_v58, 16  ;;  %v8697_v24 = vshrl.u32 %v17351_v58, 16  ;;  %v9806_v4 = vrot.slane %v17351_v58, 2 }
 0xafa   : > { %v8263_v54 = vadd.f32 %v17011_v5, %v8224_v59  ;;  %v18888_v50 = vrot.slane %v17351_v58, 3  ;;  %v19439_v59 = vld [vmem:[#allocation55_spill] sm:$0xff] }
 0xafb   : > { %v17369_v32 = vsel %vm1307_vm10, %v9104_v44, %v9106_v33  ;;  %v8695_v26 = vrot.slane %v8693_v13, 1  ;;  %v9529_v18 = vrot.slane %v8697_v24, 1  ;;  %v17375_v19 = vsel %vm1979_vm12, %v9804_v43, %v9806_v4 }
 0xafc   : > { %v8299_v62 = vmax.f32 %v8263_v54, 0.0  ;;  %12122 = vmatmul.msk.bf16.gmra.mxu3 %vm645_vm0, %v8041_v12  ;;  %12198 = vmatmul.msk.bf16.gmra.mxu1 %vm645_vm0, %v17369_v32  ;;  %v9530_v40 = vrot.slane %v8693_v13, 2  ;;  %v10221_v30 = vrot.slane %v8697_v24, 2  ;;  %v8480_v3 = vmul.f32 %v8386_v35, %v19439_v59 }
 0xafd   : > { %v8696_v60 = vsel %vm1057_vm11, %v8691_v61, %v8695_v26  ;;  %v10222_v44 = vrot.slane %v8693_v13, 3  ;;  %v17385_v54 = vsel %vm2603_vm14, %v19440_v34, %v18888_v50  ;;  %v7524_v35 = vadd.f32 %v16780_v10, %v16813_v20  ;;  %v17405_v20 = vpop.f32.mrf.mxu0 }
 0xafe   : > { %v8387_v11 = vrot.slane %v8299_v62, 5  ;;  %12142 = vmatmul.msk.bf16.gmra.mxu0 %vm645_vm0, %v8696_v60  ;;  %v9531_v23 = vor.u32 %v9530_v40, %v9529_v18  ;;  %19441 = vst [vmem:[#allocation10_spill] sm:$0xff] %v17385_v54  ;;  %v17396_v18 = vpop.f32.mrf.mxu1  ;;  %v8517_v62 = vpack.c.bf16 %v8480_v3, %v8480_v3 }
 0xaff   : > { %v8162_v43 = vpop.f32.mrf.mxu3  ;;  %v17387_v12 = vor.u32 %v10222_v44, %v10221_v30  ;;  %v7692_v30 = vadd.f32 %v16992_v53, %v7524_v35 }
 0xb00   : > { %v8388_v61 = vsel %vm5594_vm3, %v8385_v38, %v8387_v11  ;;  %v8225_v13 = vadd.f32 %v8162_v43, %v16987_v47  ;;  %v17394_v60 = vsel %vm1704_vm13, %v9527_v31, %v9531_v23  ;;  %v8999_v47 = vpop.f32.mrf.mxu2  ;;  %v8599_v31 = vunpack.c.l.b16 %v8517_v62 }
 0xb01   : > { %19442 = vst [vmem:[#allocation11_spill] sm:$0xff] %v17394_v60  ;;  %v8481_v40 = vmul.f32 %v8388_v61, %v19443_v14  ;;  %v17401_v59 = vsel %vm2368_vm15, %v10219_v2, %v17387_v12  ;;  %v7983_v3 = vadd.f32 %v16958_v22, %v7692_v30 }
 0xb02   : > { %19444 = vst [vmem:[#allocation91_spill] sm:$0xff] %v17401_v59  ;;  %v8264_v10 = vadd.f32 %v17011_v5, %v8225_v13 }
 0xb03   : > { %v8518_v38 = vpack.c.bf16 %v8481_v40, %v8481_v40 }
 0xb04   : > { %v8300_v44 = vmax.f32 %v8264_v10, 0.0  ;;  %v8699_v10 = vor.u32 %v8697_v24, %v8695_v26  ;;  %v19446_v26 = vld [vmem:[#allocation67_spill] sm:$0xff] }
 0xb05   : > { %v8600_v34 = vunpack.c.l.b16 %v8518_v38 }
 0xb06   : > { %v8389_v43 = vrot.slane %v8300_v44, 5 }
 0xb07   : > { %v17408_v50 = vpack.c.b16 %v8600_v34, %v8599_v31  ;;  %v8164_v61 = vpop.f32.mrf.mxu3 }
 0xb08   : > { %v8390_v2 = vsel %vm5594_vm3, %v8387_v11, %v8389_v43  ;;  %v8226_v14 = vadd.f32 %v8164_v61, %v7983_v3 }
 0xb09   : > { %12170 = vmatmul.msk.bf16.gmra.mxu2 %vm645_vm0, %v17408_v50  ;;  %v9203_v53 = vpop.f32.mrf.mxu1  ;;  %v18889_v35 = vrot.slane %v17408_v50, 1  ;;  %v8701_v13 = vshll.u32 %v17408_v50, 16  ;;  %v8705_v62 = vshrl.u32 %v17408_v50, 16  ;;  %v18890_v22 = vrot.slane %v17408_v50, 2 }
 0xb0a   : > { %v8265_v40 = vadd.f32 %v17011_v5, %v8226_v14  ;;  %v8482_v14 = vmul.f32 %v8390_v2, %v19446_v26 }
 0xb0b   : > { %v8852_v30 = vpop.f32.mrf.mxu0  ;;  %v17421_v11 = vsel %vm1307_vm10, %v9106_v33, %v18889_v35  ;;  %v8703_v38 = vrot.slane %v8701_v13, 1  ;;  %v9533_v44 = vrot.slane %v8705_v62, 1  ;;  %v17431_v24 = vsel %vm1979_vm12, %v9806_v4, %v18890_v22 }
 0xb0c   : > { %v8301_v34 = vmax.f32 %v8265_v40, 0.0  ;;  %v8998_v3 = vadd.f32 %v8997_v15, %v8852_v30  ;;  %v9002_v61 = vpop.f32.mrf.mxu2  ;;  %12199 = vmatmul.msk.bf16.gmra.mxu1 %vm645_vm0, %v17421_v11  ;;  %12221 = vmatmul.msk.bf16.vlgmr.msra.gmra.mxu3 %vm645_vm0, %v17075_v27  ;;  %19445 = vst [vmem:[#allocation20_spill] sm:$0xff] %v17431_v24  ;;  %v9534_v33 = vrot.slane %v8701_v13, 2  ;;  %v10225_v31 = vrot.slane %v8705_v62, 2 }
 0xb0d   : > { %v8704_v35 = vsel %vm1057_vm11, %v8699_v10, %v8703_v38  ;;  %v10226_v54 = vrot.slane %v8701_v13, 3  ;;  %v7526_v27 = vadd.f32 %v16802_v39, %v16833_v63  ;;  %v19447_v4 = vrot.slane %v17408_v50, 3  ;;  %v19451_v39 = vld [vmem:[#allocation70_spill] sm:$0xff] }
 0xb0e   : > { %v8391_v40 = vrot.slane %v8301_v34, 5  ;;  %12143 = vmatmul.msk.bf16.gmra.mxu0 %vm645_vm0, %v8704_v35  ;;  %v17436_v15 = vadd.f32 %v9203_v53, %v8998_v3  ;;  %v17438_v30 = vor.u32 %v9534_v33, %v9533_v44  ;;  %v19448_v22 = vrot.slane %v17351_v58, 3  ;;  %v19452_v3 = vld [vmem:[#allocation102_spill] sm:$0xff] }
 0xb0f   : > { %v8167_v7 = vpop.f32.mrf.mxu3  ;;  %v17455_v13 = vor.u32 %v10226_v54, %v10225_v31  ;;  %v8519_v44 = vpack.c.bf16 %v8482_v14, %v8482_v14  ;;  %v7694_v33 = vadd.f32 %v19452_v3, %v7526_v27 }
 0xb10   : > { %v17447_v2 = vsel %vm2603_vm14, %v19448_v22, %v19447_v4  ;;  %v8392_v10 = vsel %vm5594_vm3, %v8389_v43, %v8391_v40  ;;  %v8227_v35 = vadd.f32 %v8167_v7, %v17013_v46  ;;  %v17453_v53 = vsel %vm1704_vm13, %v9531_v23, %v17438_v30  ;;  %v19454_v4 = vld [vmem:[#allocation96_spill] sm:$0xff] }
 0xb11   : > { %19449 = vst [vmem:[#allocation98_spill] sm:$0xff] %v17447_v2  ;;  %v8483_v63 = vmul.f32 %v8392_v10, %v19451_v39  ;;  %v9205_v34 = vpop.f32.mrf.mxu1  ;;  %v17463_v43 = vsel %vm2368_vm15, %v17387_v12, %v17455_v13  ;;  %v8601_v54 = vunpack.c.l.b16 %v8519_v44  ;;  %v7985_v10 = vadd.f32 %v19454_v4, %v7694_v33 }
 0xb12   : > { %19450 = vst [vmem:[#allocation31_spill] sm:$0xff] %v17453_v53  ;;  %v8266_v58 = vadd.f32 %v17011_v5, %v8227_v35 }
 0xb13   : > { %19453 = vst [vmem:[#allocation106_spill] sm:$0xff] %v17463_v43  ;;  %v8520_v46 = vpack.c.bf16 %v8483_v63, %v8483_v63  ;;  %v8854_v7 = vpop.f32.mrf.mxu0 }
 0xb14   : > { %v8302_v22 = vmax.f32 %v8266_v58, 0.0  ;;  %v9000_v23 = vadd.f32 %v8999_v47, %v8854_v7  ;;  %v9004_v26 = vpop.f32.mrf.mxu2 }
 0xb15   : > { %v8602_v31 = vunpack.c.l.b16 %v8520_v46 }
 0xb16   : > { %v8393_v14 = vrot.slane %v8302_v22, 5  ;;  %v17466_v39 = vadd.f32 %v9205_v34, %v9000_v23  ;;  %v8707_v34 = vor.u32 %v8705_v62, %v8703_v38 }
 0xb17   : > { %v17468_v27 = vpack.c.b16 %v8602_v31, %v8601_v54  ;;  %v8169_v35 = vpop.f32.mrf.mxu3  ;;  %v19459_v54 = vld [vmem:[#allocation65_spill] sm:$0xff] }
 0xb18   : > { %v8394_v3 = vsel %vm5594_vm3, %v8391_v40, %v8393_v14  ;;  %v8228_v2 = vadd.f32 %v8169_v35, %v7985_v10  ;;  %v19455_v40 = vrot.slane %v17408_v50, 1  ;;  %v7528_v52 = vadd.f32 %v19460_v55, %v19459_v54 }
 0xb19   : > { %12171 = vmatmul.msk.bf16.gmra.mxu2 %vm645_vm0, %v17468_v27  ;;  %v9208_v12 = vpop.f32.mrf.mxu1  ;;  %v18891_v47 = vrot.slane %v17468_v27, 1  ;;  %v8709_v44 = vshll.u32 %v17468_v27, 16  ;;  %v8713_v63 = vshrl.u32 %v17468_v27, 16  ;;  %v18894_v58 = vrot.slane %v17468_v27, 2 }
 0xb1a   : > { %v8267_v33 = vadd.f32 %v17011_v5, %v8228_v2  ;;  %v19456_v5 = vrot.slane %v17408_v50, 2  ;;  %v19458_v2 = vld [vmem:[#allocation22_spill] sm:$0xff] }
 0xb1b   : > { %v8857_v46 = vpop.f32.mrf.mxu0  ;;  %v17483_v7 = vsel %vm1307_vm10, %v19455_v40, %v18891_v47  ;;  %v8711_v22 = vrot.slane %v8709_v44, 1  ;;  %v9537_v23 = vrot.slane %v8713_v63, 1  ;;  %v9538_v38 = vrot.slane %v8709_v44, 2 }
 0xb1c   : > { %v8303_v31 = vmax.f32 %v8267_v33, 0.0  ;;  %v9003_v4 = vadd.f32 %v9002_v61, %v8857_v46  ;;  %v9007_v10 = vpop.f32.mrf.mxu2  ;;  %12200 = vmatmul.msk.bf16.gmra.mxu1 %vm645_vm0, %v17483_v7  ;;  %12222 = vmatmul.msk.bf16.gmra.mxu3 %vm645_vm0, %v17113_v42  ;;  %v17495_v62 = vsel %vm1979_vm12, %v19456_v5, %v18894_v58  ;;  %v8484_v35 = vmul.f32 %v8394_v3, %v19458_v2 }
 0xb1d   : > { %19457 = vst [vmem:[#allocation43_spill] sm:$0xff] %v17495_v62  ;;  %v8712_v33 = vsel %vm1057_vm11, %v8707_v34, %v8711_v22  ;;  %v10229_v61 = vrot.slane %v8713_v63, 2  ;;  %v17502_v47 = vor.u32 %v9538_v38, %v9537_v23  ;;  %v10230_v42 = vrot.slane %v8709_v44, 3  ;;  %v19466_v23 = vld [vmem:[#allocation74_spill] sm:$0xff] }
 0xb1e   : > { %v8395_v46 = vrot.slane %v8303_v31, 5  ;;  %12144 = vmatmul.msk.bf16.gmra.mxu0 %vm645_vm0, %v8712_v33  ;;  %v17500_v40 = vadd.f32 %v9208_v12, %v9003_v4  ;;  %v19461_v5 = vrot.slane %v17468_v27, 3  ;;  %v19462_v58 = vrot.slane %v17408_v50, 3  ;;  %v19464_v31 = vld [vmem:[#allocation42_spill] sm:$0xff] }
 0xb1f   : > { %v8172_v43 = vpop.f32.mrf.mxu3  ;;  %v17518_v12 = vsel %vm1704_vm13, %v17438_v30, %v17502_v47  ;;  %v17520_v44 = vor.u32 %v10230_v42, %v10229_v61  ;;  %v8521_v55 = vpack.c.bf16 %v8484_v35, %v8484_v35  ;;  %v19467_v38 = vld [vmem:[#allocation82_spill] sm:$0xff] }
 0xb20   : > { %v17511_v3 = vsel %vm2603_vm14, %v19462_v58, %v19461_v5  ;;  %v8396_v34 = vsel %vm5594_vm3, %v8393_v14, %v8395_v46  ;;  %v8229_v2 = vadd.f32 %v8172_v43, %v19464_v31  ;;  %19465 = vst [vmem:[#allocation61_spill] sm:$0xff] %v17518_v12  ;;  %v7696_v50 = vadd.f32 %v19467_v38, %v7528_v52  ;;  %v17527_v58 = vld [vmem:[%s18772_s14] ss:$0 sm:$0xff] }
 0xb21   : > { %19463 = vst [vmem:[#allocation109_spill] sm:$0xff] %v17511_v3  ;;  %v8485_v54 = vmul.f32 %v8396_v34, %v19466_v23  ;;  %v9210_v4 = vpop.f32.mrf.mxu1  ;;  %v17533_v30 = vsel %vm2368_vm15, %v17455_v13, %v17520_v44  ;;  %v8603_v5 = vunpack.c.l.b16 %v8521_v55  ;;  %v19469_v31 = vld [vmem:[#allocation78_spill] sm:$0xff] }
 0xb22   : > { %v8268_v43 = vadd.f32 %v17527_v58, %v8229_v2  ;;  %19468 = vst [vmem:[#allocation107_spill] sm:$0xff] %v17533_v30  ;;  %v7987_v23 = vadd.f32 %v19469_v31, %v7696_v50  ;;  %v19474_v30 = vld [vmem:[#allocation49_spill] sm:$0xff] }
 0xb23   : > { %v8522_v14 = vpack.c.bf16 %v8485_v54, %v8485_v54  ;;  %v8859_v33 = vpop.f32.mrf.mxu0  ;;  %v7530_v12 = vadd.f32 %v19475_v6, %v19474_v30  ;;  %v19481_v6 = vld [vmem:[#allocation77_spill] sm:$0xff] }
 0xb24   : > { %v8304_v35 = vmax.f32 %v8268_v43, 0.0  ;;  %v9005_v61 = vadd.f32 %v9004_v26, %v8859_v33  ;;  %v9009_v42 = vpop.f32.mrf.mxu2 }
 0xb25   : > { %v8604_v34 = vunpack.c.l.b16 %v8522_v14 }
 0xb26   : > { %v8397_v52 = vrot.slane %v8304_v35, 5  ;;  %v17536_v38 = vadd.f32 %v9210_v4, %v9005_v61  ;;  %v8715_v4 = vor.u32 %v8713_v63, %v8711_v22 }
 0xb27   : > { %v17538_v3 = vpack.c.b16 %v8604_v34, %v8603_v5  ;;  %v8174_v2 = vpop.f32.mrf.mxu3 }
 0xb28   : > { %v8398_v59 = vsel %vm5594_vm3, %v8395_v46, %v8397_v52  ;;  %v8230_v45 = vadd.f32 %v8174_v2, %v7987_v23  ;;  %v19470_v46 = vrot.slane %v17468_v27, 1  ;;  %v19473_v2 = vld [vmem:[#allocation36_spill] sm:$0xff] }
 0xb29   : > { %12172 = vmatmul.msk.bf16.gmra.mxu2 %vm645_vm0, %v17538_v3  ;;  %v9213_v13 = vpop.f32.mrf.mxu1  ;;  %v18895_v26 = vrot.slane %v17538_v3, 1  ;;  %v8717_v55 = vshll.u32 %v17538_v3, 16  ;;  %v8721_v54 = vshrl.u32 %v17538_v3, 16  ;;  %v18896_v43 = vrot.slane %v17538_v3, 2 }
 0xb2a   : > { %v8269_v50 = vadd.f32 %v17527_v58, %v8230_v45  ;;  %v19471_v45 = vrot.slane %v17468_v27, 2 }
 0xb2b   : > { %v8862_v14 = vpop.f32.mrf.mxu0  ;;  %v17553_v33 = vsel %vm1307_vm10, %v19470_v46, %v18895_v26  ;;  %v8719_v35 = vrot.slane %v8717_v55, 1  ;;  %v9541_v61 = vrot.slane %v8721_v54, 1  ;;  %v9542_v22 = vrot.slane %v8717_v55, 2 }
 0xb2c   : > { %v8305_v34 = vmax.f32 %v8269_v50, 0.0  ;;  %v9008_v31 = vadd.f32 %v9007_v10, %v8862_v14  ;;  %v9012_v23 = vpop.f32.mrf.mxu2  ;;  %12201 = vmatmul.msk.bf16.gmra.mxu1 %vm645_vm0, %v17553_v33  ;;  %12223 = vmatmul.msk.bf16.gmra.mxu3 %vm645_vm0, %v17167_v57  ;;  %v17565_v63 = vsel %vm1979_vm12, %v19471_v45, %v18896_v43  ;;  %v8486_v46 = vmul.f32 %v8398_v59, %v19473_v2 }
 0xb2d   : > { %19472 = vst [vmem:[#allocation105_spill] sm:$0xff] %v17565_v63  ;;  %v8720_v50 = vsel %vm1057_vm11, %v8715_v4, %v8719_v35  ;;  %v10233_v10 = vrot.slane %v8721_v54, 2  ;;  %v17572_v5 = vor.u32 %v9542_v22, %v9541_v61  ;;  %v10234_v57 = vrot.slane %v8717_v55, 3  ;;  %v19482_v22 = vld [vmem:[#allocation59_spill] sm:$0xff]  ;;  %v19490_v63 = vld [vmem:[#allocation16_spill] sm:$0xff] }
 0xb2e   : > { %v8399_v14 = vrot.slane %v8305_v34, 5  ;;  %12145 = vmatmul.msk.bf16.gmra.mxu0 %vm645_vm0, %v8720_v50  ;;  %v17570_v26 = vadd.f32 %v9213_v13, %v9008_v31  ;;  %v19476_v45 = vrot.slane %v17538_v3, 3  ;;  %v19477_v43 = vrot.slane %v17468_v27, 3  ;;  %v19479_v34 = vld [vmem:[#allocation28_spill] sm:$0xff] }
 0xb2f   : > { %v8177_v53 = vpop.f32.mrf.mxu3  ;;  %v17588_v13 = vsel %vm1704_vm13, %v17502_v47, %v17572_v5  ;;  %v10235_v55 = vor.u32 %v10234_v57, %v10233_v10  ;;  %v8523_v61 = vpack.c.bf16 %v8486_v46, %v8486_v46  ;;  %v7698_v50 = vadd.f32 %v19482_v22, %v7530_v12  ;;  %v19484_v46 = vld [vmem:[#allocation37_spill] sm:$0xff] }
 0xb30   : > { %v17581_v59 = vsel %vm2603_vm14, %v19477_v43, %v19476_v45  ;;  %v8400_v4 = vsel %vm5594_vm3, %v8397_v52, %v8399_v14  ;;  %v8231_v2 = vadd.f32 %v8177_v53, %v19479_v34  ;;  %19480 = vst [vmem:[#allocation101_spill] sm:$0xff] %v17588_v13 }
 0xb31   : > { %19478 = vst [vmem:[#allocation69_spill] sm:$0xff] %v17581_v59  ;;  %v8487_v30 = vmul.f32 %v8400_v4, %v19481_v6  ;;  %v9215_v31 = vpop.f32.mrf.mxu1  ;;  %v17595_v43 = vsel %vm2368_vm15, %v17520_v44, %v10235_v55  ;;  %v8605_v47 = vunpack.c.l.b16 %v8523_v61  ;;  %v7989_v57 = vadd.f32 %v19484_v46, %v7698_v50 }
 0xb32   : > { %v8270_v27 = vadd.f32 %v17527_v58, %v8231_v2  ;;  %19483 = vst [vmem:[#allocation73_spill] sm:$0xff] %v17595_v43  ;;  %v19489_v43 = vld [vmem:[#allocation17_spill] sm:$0xff] }
 0xb33   : > { %v8524_v52 = vpack.c.bf16 %v8487_v30, %v8487_v30  ;;  %v8864_v53 = vpop.f32.mrf.mxu0  ;;  %v7532_v62 = vadd.f32 %v19490_v63, %v19489_v43  ;;  %v19495_v43 = vld [vmem:[#allocation80_spill] sm:$0xff] }
 0xb34   : > { %v8306_v45 = vmax.f32 %v8270_v27, 0.0  ;;  %v9010_v34 = vadd.f32 %v9009_v42, %v8864_v53  ;;  %v9014_v59 = vpop.f32.mrf.mxu2 }
 0xb35   : > { %v8606_v13 = vunpack.c.l.b16 %v8524_v52 }
 0xb36   : > { %v8401_v10 = vrot.slane %v8306_v45, 5  ;;  %v17598_v4 = vadd.f32 %v9215_v31, %v9010_v34  ;;  %v8723_v31 = vor.u32 %v8721_v54, %v8719_v35  ;;  %v19486_v54 = vrot.slane %v17538_v3, 2 }
 0xb37   : > { %v17600_v6 = vpack.c.b16 %v8606_v13, %v8605_v47  ;;  %v8179_v12 = vpop.f32.mrf.mxu3 }
 0xb38   : > { %v8402_v2 = vsel %vm5594_vm3, %v8399_v14, %v8401_v10  ;;  %v8232_v22 = vadd.f32 %v8179_v12, %v7989_v57  ;;  %v19485_v14 = vrot.slane %v17538_v3, 1 }
 0xb39   : > { %12173 = vmatmul.msk.bf16.gmra.mxu2 %vm645_vm0, %v17600_v6  ;;  %v9218_v44 = vpop.f32.mrf.mxu1  ;;  %v18897_v42 = vrot.slane %v17600_v6, 1  ;;  %v8725_v61 = vshll.u32 %v17600_v6, 16  ;;  %v8729_v30 = vshrl.u32 %v17600_v6, 16  ;;  %v18900_v13 = vrot.slane %v17600_v6, 2 }
 0xb3a   : > { %v8271_v50 = vadd.f32 %v17527_v58, %v8232_v22  ;;  %v19488_v22 = vld [vmem:[#allocation27_spill] sm:$0xff] }
 0xb3b   : > { %v8867_v27 = vpop.f32.mrf.mxu0  ;;  %v17615_v52 = vsel %vm1307_vm10, %v19485_v14, %v18897_v42  ;;  %v8727_v53 = vrot.slane %v8725_v61, 1  ;;  %v9545_v45 = vrot.slane %v8729_v30, 1  ;;  %v17627_v35 = vsel %vm1979_vm12, %v19486_v54, %v18900_v13 }
 0xb3c   : > { %v8307_v47 = vmax.f32 %v8271_v50, 0.0  ;;  %v9013_v46 = vadd.f32 %v9012_v23, %v8867_v27  ;;  %v9017_v57 = vpop.f32.mrf.mxu2  ;;  %12202 = vmatmul.msk.bf16.gmra.mxu1 %vm645_vm0, %v17615_v52  ;;  %12224 = vmatmul.msk.bf16.gmra.mxu3 %vm645_vm0, %v17218_v49  ;;  %19487 = vst [vmem:[#allocation46_spill] sm:$0xff] %v17627_v35  ;;  %v9546_v12 = vrot.slane %v8725_v61, 2  ;;  %v8488_v14 = vmul.f32 %v8402_v2, %v19488_v22 }
 0xb3d   : > { %v8728_v50 = vsel %vm1057_vm11, %v8723_v31, %v8727_v53  ;;  %v10237_v23 = vrot.slane %v8729_v30, 2  ;;  %v10238_v49 = vrot.slane %v8725_v61, 3  ;;  %v19491_v54 = vrot.slane %v17600_v6, 3 }
 0xb3e   : > { %v8403_v27 = vrot.slane %v8307_v47, 5  ;;  %12146 = vmatmul.msk.bf16.gmra.mxu0 %vm645_vm0, %v8728_v50  ;;  %v17632_v42 = vadd.f32 %v9218_v44, %v9013_v46  ;;  %v17634_v34 = vor.u32 %v9546_v12, %v9545_v45  ;;  %v19492_v13 = vrot.slane %v17538_v3, 3 }
 0xb3f   : > { %v8182_v60 = vpop.f32.mrf.mxu3  ;;  %v17652_v61 = vor.u32 %v10238_v49, %v10237_v23  ;;  %v8525_v63 = vpack.c.bf16 %v8488_v14, %v8488_v14  ;;  %v7700_v3 = vadd.f32 %v17097_v21, %v7532_v62  ;;  %v19497_v14 = vld [vmem:[#allocation84_spill] sm:$0xff]  ;;  %v12524_v62 = vld [vmem:[%s18773_s15 + $0x40] sm:$0xff] }
 0xb40   : > { %v17643_v2 = vsel %vm2603_vm14, %v19492_v13, %v19491_v54  ;;  %v8404_v31 = vsel %vm5594_vm3, %v8401_v10, %v8403_v27  ;;  %v8233_v47 = vadd.f32 %v8182_v60, %v17088_v36  ;;  %v17650_v44 = vsel %vm1704_vm13, %v17572_v5, %v17634_v34  ;;  %9660 = vmatpush.bf16.msrb.mxu0 %v12524_v62 }
 0xb41   : > { %19493 = vst [vmem:[#allocation26_spill] sm:$0xff] %v17643_v2  ;;  %v8489_v45 = vmul.f32 %v8404_v31, %v19495_v43  ;;  %v9220_v46 = vpop.f32.mrf.mxu1  ;;  %v17659_v10 = vsel %vm2368_vm15, %v10235_v55, %v17652_v61  ;;  %v8607_v50 = vunpack.c.l.b16 %v8525_v63  ;;  %v7991_v54 = vadd.f32 %v19497_v14, %v7700_v3  ;;  %v19502_v2 = vld [vmem:[#allocation72_spill] sm:$0xff] }
 0xb42   : > { %19494 = vst [vmem:[#allocation79_spill] sm:$0xff] %v17650_v44  ;;  %v8272_v13 = vadd.f32 %v17527_v58, %v8233_v47 }
 0xb43   : > { %19496 = vst [vmem:[#allocation57_spill] sm:$0xff] %v17659_v10  ;;  %v8526_v36 = vpack.c.bf16 %v8489_v45, %v8489_v45  ;;  %v8869_v60 = vpop.f32.mrf.mxu0  ;;  %v19503_v10 = vld [vmem:[#allocation9_spill] sm:$0xff] }
 0xb44   : > { %v8308_v12 = vmax.f32 %v8272_v13, 0.0  ;;  %v9015_v22 = vadd.f32 %v9014_v59, %v8869_v60  ;;  %v9019_v5 = vpop.f32.mrf.mxu2  ;;  %v8731_v13 = vor.u32 %v8729_v30, %v8727_v53  ;;  %v19499_v30 = vrot.slane %v17600_v6, 2 }
 0xb45   : > { %v8608_v23 = vunpack.c.l.b16 %v8526_v36  ;;  %v7534_v44 = vadd.f32 %v19503_v10, %v19502_v2  ;;  %v19508_v2 = vld [vmem:[#allocation83_spill] sm:$0xff] }
 0xb46   : > { %v8405_v49 = vrot.slane %v8308_v12, 5  ;;  %v17662_v31 = vadd.f32 %v9220_v46, %v9015_v22 }
 0xb47   : > { %v17664_v43 = vpack.c.b16 %v8608_v23, %v8607_v50  ;;  %v8184_v21 = vpop.f32.mrf.mxu3 }
 0xb48   : > { %v8406_v55 = vsel %vm5594_vm3, %v8403_v27, %v8405_v49  ;;  %v8234_v47 = vadd.f32 %v8184_v21, %v7991_v54  ;;  %v19498_v27 = vrot.slane %v17600_v6, 1 }
 0xb49   : > { %12174 = vmatmul.msk.bf16.gmra.mxu2 %vm645_vm0, %v17664_v43  ;;  %v9223_v59 = vpop.f32.mrf.mxu1  ;;  %v18901_v63 = vrot.slane %v17664_v43, 1  ;;  %v8733_v45 = vshll.u32 %v17664_v43, 16  ;;  %v8737_v46 = vshrl.u32 %v17664_v43, 16  ;;  %v18903_v36 = vrot.slane %v17664_v43, 2 }
 0xb4a   : > { %v8273_v3 = vadd.f32 %v17527_v58, %v8234_v47  ;;  %v19501_v47 = vld [vmem:[#allocation33_spill] sm:$0xff] }
 0xb4b   : > { %v8872_v60 = vpop.f32.mrf.mxu0  ;;  %v17682_v12 = vsel %vm1307_vm10, %v19498_v27, %v18901_v63  ;;  %v8735_v22 = vrot.slane %v8733_v45, 1  ;;  %v9549_v50 = vrot.slane %v8737_v46, 1  ;;  %v17694_v53 = vsel %vm1979_vm12, %v19499_v30, %v18903_v36 }
 0xb4c   : > { %v8309_v14 = vmax.f32 %v8273_v3, 0.0  ;;  %v9018_v54 = vadd.f32 %v9017_v57, %v8872_v60  ;;  %v9022_v21 = vpop.f32.mrf.mxu2  ;;  %12203 = vmatmul.msk.bf16.gmra.mxu1 %vm645_vm0, %v17682_v12  ;;  %12225 = vmatmul.msk.bf16.gmra.mxu3 %vm645_vm0, %v17268_v16  ;;  %19500 = vst [vmem:[#allocation56_spill] sm:$0xff] %v17694_v53  ;;  %v9550_v62 = vrot.slane %v8733_v45, 2  ;;  %v8490_v27 = vmul.f32 %v8406_v55, %v19501_v47 }
 0xb4d   : > { %v8736_v3 = vsel %vm1057_vm11, %v8731_v13, %v8735_v22  ;;  %v10241_v57 = vrot.slane %v8737_v46, 2  ;;  %v10242_v16 = vrot.slane %v8733_v45, 3  ;;  %v19504_v30 = vrot.slane %v17664_v43, 3 }
 0xb4e   : > { %v8407_v60 = vrot.slane %v8309_v14, 5  ;;  %12147 = vmatmul.msk.bf16.gmra.mxu0 %vm645_vm0, %v8736_v3  ;;  %v17699_v63 = vadd.f32 %v9223_v59, %v9018_v54  ;;  %v17701_v23 = vor.u32 %v9550_v62, %v9549_v50  ;;  %v19505_v36 = vrot.slane %v17600_v6, 3  ;;  %v19509_v62 = vld [vmem:[#allocation75_spill] sm:$0xff] }
 0xb4f   : > { %v8187_v35 = vpop.f32.mrf.mxu3  ;;  %v10243_v45 = vor.u32 %v10242_v16, %v10241_v57  ;;  %v8527_v50 = vpack.c.bf16 %v8490_v27, %v8490_v27  ;;  %v7702_v47 = vadd.f32 %v19509_v62, %v7534_v44  ;;  %v19511_v27 = vld [vmem:[#allocation86_spill] sm:$0xff] }
 0xb50   : > { %v17710_v55 = vsel %vm2603_vm14, %v19505_v36, %v19504_v30  ;;  %v8408_v13 = vsel %vm5594_vm3, %v8405_v49, %v8407_v60  ;;  %v8235_v14 = vadd.f32 %v8187_v35, %v17133_v25  ;;  %v17717_v59 = vsel %vm1704_vm13, %v17634_v34, %v17701_v23 }
 0xb51   : > { %19506 = vst [vmem:[#allocation34_spill] sm:$0xff] %v17710_v55  ;;  %v8491_v10 = vmul.f32 %v8408_v13, %v19508_v2  ;;  %v9225_v54 = vpop.f32.mrf.mxu1  ;;  %v17724_v36 = vsel %vm2368_vm15, %v17652_v61, %v10243_v45  ;;  %v8609_v34 = vunpack.c.l.b16 %v8527_v50  ;;  %v7993_v16 = vadd.f32 %v19511_v27, %v7702_v47 }
 0xb52   : > { %19507 = vst [vmem:[#allocation58_spill] sm:$0xff] %v17717_v59  ;;  %v8274_v6 = vadd.f32 %v17527_v58, %v8235_v14  ;;  %v19517_v59 = vld [vmem:[#allocation18_spill] sm:$0xff] }
 0xb53   : > { %19510 = vst [vmem:[#allocation63_spill] sm:$0xff] %v17724_v36  ;;  %v8528_v49 = vpack.c.bf16 %v8491_v10, %v8491_v10  ;;  %v8874_v25 = vpop.f32.mrf.mxu0  ;;  %v19516_v36 = vld [vmem:[#allocation19_spill] sm:$0xff] }
 0xb54   : > { %v8310_v35 = vmax.f32 %v8274_v6, 0.0  ;;  %v9020_v3 = vadd.f32 %v9019_v5, %v8874_v25  ;;  %v9024_v30 = vpop.f32.mrf.mxu2  ;;  %v7536_v53 = vadd.f32 %v19517_v59, %v19516_v36  ;;  %v19522_v59 = vld [vmem:[#allocation85_spill] sm:$0xff] }
 0xb55   : > { %v8610_v55 = vunpack.c.l.b16 %v8528_v49 }
 0xb56   : > { %v8409_v57 = vrot.slane %v8310_v35, 5  ;;  %v17727_v13 = vadd.f32 %v9225_v54, %v9020_v3  ;;  %v8739_v54 = vor.u32 %v8737_v46, %v8735_v22  ;;  %v19513_v46 = vrot.slane %v17664_v43, 2 }
 0xb57   : > { %v17729_v2 = vpack.c.b16 %v8610_v55, %v8609_v34  ;;  %v8189_v44 = vpop.f32.mrf.mxu3 }
 0xb58   : > { %v8410_v14 = vsel %vm5594_vm3, %v8407_v60, %v8409_v57  ;;  %v8236_v62 = vadd.f32 %v8189_v44, %v7993_v16  ;;  %v19512_v60 = vrot.slane %v17664_v43, 1 }
 0xb59   : > { %12175 = vmatmul.msk.bf16.gmra.mxu2 %vm645_vm0, %v17729_v2  ;;  %v9228_v61 = vpop.f32.mrf.mxu1  ;;  %v18904_v5 = vrot.slane %v17729_v2, 1  ;;  %v8741_v50 = vshll.u32 %v17729_v2, 16  ;;  %v8745_v10 = vshrl.u32 %v17729_v2, 16  ;;  %v18907_v55 = vrot.slane %v17729_v2, 2 }
 0xb5a   : > { %v8275_v47 = vadd.f32 %v17527_v58, %v8236_v62  ;;  %v19515_v62 = vld [vmem:[#allocation48_spill] sm:$0xff] }
 0xb5b   : > { %v8877_v6 = vpop.f32.mrf.mxu0  ;;  %v17744_v49 = vsel %vm1307_vm10, %v19512_v60, %v18904_v5  ;;  %v8743_v25 = vrot.slane %v8741_v50, 1  ;;  %v9553_v35 = vrot.slane %v8745_v10, 1  ;;  %v17756_v22 = vsel %vm1979_vm12, %v19513_v46, %v18907_v55 }
 0xb5c   : > { %v8311_v34 = vmax.f32 %v8275_v47, 0.0  ;;  %v9023_v27 = vadd.f32 %v9022_v21, %v8877_v6  ;;  %v9027_v16 = vpop.f32.mrf.mxu2  ;;  %12204 = vmatmul.msk.bf16.gmra.mxu1 %vm645_vm0, %v17744_v49  ;;  %12226 = vmatmul.msk.bf16.gmra.mxu3 %vm645_vm0, %v17315_v48  ;;  %19514 = vst [vmem:[#allocation62_spill] sm:$0xff] %v17756_v22  ;;  %v9554_v44 = vrot.slane %v8741_v50, 2  ;;  %v8492_v60 = vmul.f32 %v8410_v14, %v19515_v62 }
 0xb5d   : > { %v8744_v47 = vsel %vm1057_vm11, %v8739_v54, %v8743_v25  ;;  %v10245_v21 = vrot.slane %v8745_v10, 2  ;;  %v10246_v48 = vrot.slane %v8741_v50, 3  ;;  %v19518_v46 = vrot.slane %v17729_v2, 3 }
 0xb5e   : > { %v8411_v6 = vrot.slane %v8311_v34, 5  ;;  %12148 = vmatmul.msk.bf16.gmra.mxu0 %vm645_vm0, %v8744_v47  ;;  %v17761_v5 = vadd.f32 %v9228_v61, %v9023_v27  ;;  %v17763_v3 = vor.u32 %v9554_v44, %v9553_v35  ;;  %v19519_v55 = vrot.slane %v17664_v43, 3 }
 0xb5f   : > { %v8192_v24 = vpop.f32.mrf.mxu3  ;;  %v10247_v50 = vor.u32 %v10246_v48, %v10245_v21  ;;  %v8529_v35 = vpack.c.bf16 %v8492_v60, %v8492_v60  ;;  %v7704_v44 = vadd.f32 %v17204_v37, %v7536_v53  ;;  %v19524_v21 = vld [vmem:[#allocation90_spill] sm:$0xff] }
 0xb60   : > { %v17772_v14 = vsel %vm2603_vm14, %v19519_v55, %v19518_v46  ;;  %v8412_v54 = vsel %vm5594_vm3, %v8409_v57, %v8411_v6  ;;  %v8237_v34 = vadd.f32 %v8192_v24, %v17183_v28  ;;  %v17779_v61 = vsel %vm1704_vm13, %v17701_v23, %v17763_v3 }
 0xb61   : > { %19520 = vst [vmem:[#allocation54_spill] sm:$0xff] %v17772_v14  ;;  %v8493_v36 = vmul.f32 %v8412_v54, %v19522_v59  ;;  %v9230_v27 = vpop.f32.mrf.mxu1  ;;  %v17785_v55 = vsel %vm2368_vm15, %v10243_v45, %v10247_v50  ;;  %v8611_v46 = vunpack.c.l.b16 %v8529_v35  ;;  %v7995_v60 = vadd.f32 %v19524_v21, %v7704_v44 }
 0xb62   : > { %19521 = vst [vmem:[#allocation3_spill] sm:$0xff] %v17779_v61  ;;  %v8276_v43 = vadd.f32 %v17527_v58, %v8237_v34 }
 0xb63   : > { %19523 = vst [vmem:[#allocation5_spill] sm:$0xff] %v17785_v55  ;;  %v8530_v57 = vpack.c.bf16 %v8493_v36, %v8493_v36  ;;  %v8879_v62 = vpop.f32.mrf.mxu0  ;;  %v19529_v55 = vld [vmem:[#allocation76_spill] sm:$0xff] }
 0xb64   : > { %v8312_v28 = vmax.f32 %v8276_v43, 0.0  ;;  %v9025_v24 = vadd.f32 %v9024_v30, %v8879_v62  ;;  %v9029_v47 = vpop.f32.mrf.mxu2 }
 0xb65   : > { %v8612_v23 = vunpack.c.l.b16 %v8530_v57 }
 0xb66   : > { %v8413_v14 = vrot.slane %v8312_v28, 5  ;;  %v17788_v48 = vadd.f32 %v9230_v27, %v9025_v24  ;;  %v8747_v27 = vor.u32 %v8745_v10, %v8743_v25  ;;  %v19526_v10 = vrot.slane %v17729_v2, 2  ;;  %v19528_v24 = vld [vmem:[#allocation21_spill] sm:$0xff] }
 0xb67   : > { %v17790_v54 = vpack.c.b16 %v8612_v23, %v8611_v46  ;;  %v8194_v37 = vpop.f32.mrf.mxu3  ;;  %v7538_v61 = vadd.f32 %v19529_v55, %v19528_v24 }
 0xb68   : > { %v8414_v53 = vsel %vm5594_vm3, %v8411_v6, %v8413_v14  ;;  %v8238_v34 = vadd.f32 %v8194_v37, %v7995_v60  ;;  %v19525_v6 = vrot.slane %v17729_v2, 1  ;;  %v19527_v37 = vld [vmem:[#allocation40_spill] sm:$0xff] }
 0xb69   : > { %12176 = vmatmul.msk.bf16.gmra.mxu2 %vm645_vm0, %v17790_v54  ;;  %v9233_v45 = vpop.f32.mrf.mxu1  ;;  %v18908_v30 = vrot.slane %v17790_v54, 1  ;;  %v8749_v35 = vshll.u32 %v17790_v54, 16  ;;  %v8753_v59 = vshrl.u32 %v17790_v54, 16  ;;  %v18910_v44 = vrot.slane %v17790_v54, 2 }
 0xb6a   : > { %v8277_v36 = vadd.f32 %v17527_v58, %v8238_v34  ;;  %v8494_v34 = vmul.f32 %v8414_v53, %v19527_v37 }
 0xb6b   : > { %v8882_v43 = vpop.f32.mrf.mxu0  ;;  %v17805_v57 = vsel %vm1307_vm10, %v19525_v6, %v18908_v30  ;;  %v8751_v62 = vrot.slane %v8749_v35, 1  ;;  %v9557_v28 = vrot.slane %v8753_v59, 1  ;;  %v17817_v25 = vsel %vm1979_vm12, %v19526_v10, %v18910_v44 }
 0xb6c   : > { %v8313_v46 = vmax.f32 %v8277_v36, 0.0  ;;  %v9028_v23 = vadd.f32 %v9027_v16, %v8882_v43  ;;  %v9032_v21 = vpop.f32.mrf.mxu2  ;;  %12205 = vmatmul.msk.bf16.gmra.mxu1 %vm645_vm0, %v17805_v57  ;;  %12227 = vmatmul.msk.bf16.gmra.mxu3 %vm645_vm0, %v17369_v32  ;;  %v9558_v60 = vrot.slane %v8749_v35, 2  ;;  %v10249_v16 = vrot.slane %v8753_v59, 2 }
 0xb6d   : > { %v8752_v36 = vsel %vm1057_vm11, %v8747_v27, %v8751_v62  ;;  %v10250_v32 = vrot.slane %v8749_v35, 3  ;;  %v19530_v10 = vrot.slane %v17790_v54, 3  ;;  %v19531_v44 = vrot.slane %v17729_v2, 3 }
 0xb6e   : > { %v8415_v43 = vrot.slane %v8313_v46, 5  ;;  %12149 = vmatmul.msk.bf16.gmra.mxu0 %vm645_vm0, %v8752_v36  ;;  %v17822_v6 = vadd.f32 %v9233_v45, %v9028_v23  ;;  %v17824_v30 = vor.u32 %v9558_v60, %v9557_v28  ;;  %v8531_v55 = vpack.c.bf16 %v8494_v34, %v8494_v34  ;;  %v19533_v28 = vld [vmem:[#allocation87_spill] sm:$0xff] }
 0xb6f   : > { %v8197_v22 = vpop.f32.mrf.mxu3  ;;  %v17833_v53 = vsel %vm2603_vm14, %v19531_v44, %v19530_v10  ;;  %v17842_v35 = vor.u32 %v10250_v32, %v10249_v16  ;;  %v7706_v2 = vadd.f32 %v17253_v51, %v7538_v61  ;;  %v12527_v61 = vld [vmem:[%s18773_s15 + $0x58] sm:$0xff] }
 0xb70   : > { %19532 = vst [vmem:[#allocation44_spill] sm:$0xff] %v17833_v53  ;;  %v8416_v27 = vsel %vm5594_vm3, %v8413_v14, %v8415_v43  ;;  %v8239_v46 = vadd.f32 %v8197_v22, %v17232_v9  ;;  %v17840_v45 = vsel %vm1704_vm13, %v17763_v3, %v17824_v30  ;;  %v8613_v36 = vunpack.c.l.b16 %v8531_v55  ;;  %9902 = vmatpush.bf16.msra.mxu2 %v12527_v61 }
 0xb71   : > { %v8495_v24 = vmul.f32 %v8416_v27, %v19533_v28  ;;  %v9235_v23 = vpop.f32.mrf.mxu1  ;;  %v17849_v14 = vsel %vm2368_vm15, %v10247_v50, %v17842_v35  ;;  %v7997_v34 = vadd.f32 %v17251_v56, %v7706_v2 }
 0xb72   : > { %v8278_v44 = vadd.f32 %v17527_v58, %v8239_v46  ;;  %19534 = vst [vmem:[#allocation6_spill] sm:$0xff] %v17849_v14 }
 0xb73   : > { %v8532_v9 = vpack.c.bf16 %v8495_v24, %v8495_v24  ;;  %v8884_v22 = vpop.f32.mrf.mxu0 }
 0xb74   : > { %v8314_v60 = vmax.f32 %v8278_v44, 0.0  ;;  %v9030_v37 = vadd.f32 %v9029_v47, %v8884_v22  ;;  %v9034_v3 = vpop.f32.mrf.mxu2 }
 0xb75   : > { %v8614_v16 = vunpack.c.l.b16 %v8532_v9  ;;  %v19535_v9 = vrot.slane %v17790_v54, 1 }
 0xb76   : > { %v8417_v32 = vrot.slane %v8314_v60, 5  ;;  %v17852_v10 = vadd.f32 %v9235_v23, %v9030_v37  ;;  %v8755_v23 = vor.u32 %v8753_v59, %v8751_v62 }
 0xb77   : > { %v17854_v27 = vpack.c.b16 %v8614_v16, %v8613_v36  ;;  %v8199_v51 = vpop.f32.mrf.mxu3 }
 0xb78   : > { %v8418_v50 = vsel %vm5594_vm3, %v8415_v43, %v8417_v32  ;;  %v8240_v46 = vadd.f32 %v8199_v51, %v7997_v34  ;;  %v12526_v43 = vld [vmem:[%s18773_s15 + $0x50] sm:$0xff]  ;;  %v19536_v34 = vrot.slane %v17790_v54, 2 }
 0xb79   : > { %12177 = vmatmul.msk.bf16.gmra.mxu2 %vm645_vm0, %v17854_v27  ;;  %v9238_v47 = vpop.f32.mrf.mxu1  ;;  %v18911_v55 = vrot.slane %v17854_v27, 1  ;;  %v17864_v56 = vshll.u32 %v17854_v27, 16  ;;  %v17867_v28 = vshrl.u32 %v17854_v27, 16  ;;  %v18912_v2 = vrot.slane %v17854_v27, 2 }
 0xb7a   : > { %v8279_v24 = vadd.f32 %v17527_v58, %v8240_v46  ;;  %v19537_v46 = vld [vmem:[#allocation50_spill] sm:$0xff]  ;;  %9903 = vmatpush.bf16.msra.mxu2 %v12526_v43 }
 0xb7b   : > { %v8887_v44 = vpop.f32.mrf.mxu0  ;;  %v17879_v22 = vsel %vm1307_vm10, %v19535_v9, %v18911_v55  ;;  %v8759_v60 = vrot.slane %v17864_v56, 1  ;;  %v9561_v37 = vrot.slane %v17867_v28, 1  ;;  %v17893_v51 = vsel %vm1979_vm12, %v19536_v34, %v18912_v2  ;;  %v19538_v34 = vld [vmem:[#allocation25_spill] sm:$0xff] }
 0xb7c   : > { %v8315_v62 = vmax.f32 %v8279_v24, 0.0  ;;  %v9033_v36 = vadd.f32 %v9032_v21, %v8887_v44  ;;  %v9037_v16 = vpop.f32.mrf.mxu2  ;;  %12206 = vmatmul.msk.bf16.gmra.mxu1 %vm645_vm0, %v17879_v22  ;;  %12228 = vmatmul.msk.bf16.gmra.mxu3 %vm645_vm0, %v17421_v11  ;;  %v9562_v61 = vrot.slane %v17864_v56, 2  ;;  %v8496_v9 = vmul.f32 %v8418_v50, %v19537_v46 }
 0xb7d   : > { %v8760_v21 = vsel %vm1057_vm11, %v8755_v23, %v8759_v60  ;;  %v10253_v24 = vrot.slane %v17867_v28, 2  ;;  %v10254_v59 = vrot.slane %v17864_v56, 3  ;;  %v7540_v2 = vadd.f32 %v17405_v20, %v19538_v34 }
 0xb7e   : > { %v8419_v44 = vrot.slane %v8315_v62, 5  ;;  %12150 = vmatmul.msk.bf16.gmra.mxu0 %vm645_vm0, %v8760_v21  ;;  %v17900_v11 = vadd.f32 %v9238_v47, %v9033_v36  ;;  %v17902_v55 = vor.u32 %v9562_v61, %v9561_v37  ;;  %v19539_v50 = vrot.slane %v17854_v27, 3  ;;  %v19543_v37 = vld [vmem:[#allocation89_spill] sm:$0xff] }
 0xb7f   : > { %v8202_v53 = vpop.f32.mrf.mxu3  ;;  %v19540_v23 = vrot.slane %v17790_v54, 3  ;;  %v17921_v56 = vor.u32 %v10254_v59, %v10253_v24  ;;  %v8533_v20 = vpack.c.bf16 %v8496_v9, %v8496_v9  ;;  %v7708_v54 = vadd.f32 %v17334_v41, %v7540_v2  ;;  %v12529_v59 = vld [vmem:[%s18773_s15 + $0x68] sm:$0xff] }
 0xb80   : > { %v8420_v62 = vsel %vm5594_vm3, %v8417_v32, %v8419_v44  ;;  %v8241_v47 = vadd.f32 %v8202_v53, %v17282_v29  ;;  %v17919_v43 = vsel %vm1704_vm13, %v17824_v30, %v17902_v55  ;;  %10064 = vmatpush.bf16.msrb.mxu1 %v12529_v59 }
 0xb81   : > { %v17912_v46 = vsel %vm2603_vm14, %v19540_v23, %v19539_v50  ;;  %19542 = vst [vmem:[#allocation66_spill] sm:$0xff] %v17919_v43  ;;  %v8497_v36 = vmul.f32 %v8420_v62, %v19543_v37  ;;  %v9240_v61 = vpop.f32.mrf.mxu1  ;;  %v17929_v32 = vsel %vm2368_vm15, %v17842_v35, %v17921_v56  ;;  %v8615_v9 = vunpack.c.l.b16 %v8533_v20  ;;  %v19545_v37 = vld [vmem:[#allocation52_spill] sm:$0xff] }
 0xb82   : > { %19541 = vst [vmem:[#allocation7_spill] sm:$0xff] %v17912_v46  ;;  %v8280_v21 = vadd.f32 %v17527_v58, %v8241_v47  ;;  %v7999_v2 = vadd.f32 %v17396_v18, %v7708_v54  ;;  %v12528_v54 = vld [vmem:[%s18773_s15 + $0x60] sm:$0xff] }
 0xb83   : > { %19544 = vst [vmem:[#allocation12_spill] sm:$0xff] %v17929_v32  ;;  %v8534_v29 = vpack.c.bf16 %v8497_v36, %v8497_v36  ;;  %v8889_v53 = vpop.f32.mrf.mxu0 }
 0xb84   : > { %v8316_v34 = vmax.f32 %v8280_v21, 0.0  ;;  %v9035_v30 = vadd.f32 %v9034_v3, %v8889_v53  ;;  %v17931_v50 = vpop.f32.mrf.mxu2  ;;  %10065 = vmatpush.bf16.msrb.mxu1 %v12528_v54 }
 0xb85   : > { %v8616_v24 = vunpack.c.l.b16 %v8534_v29  ;;  %v8763_v29 = vor.u32 %v17867_v28, %v8759_v60  ;;  %v19547_v28 = vrot.slane %v17854_v27, 2 }
 0xb86   : > { %v8421_v41 = vrot.slane %v8316_v34, 5  ;;  %v17937_v23 = vadd.f32 %v9240_v61, %v9035_v30 }
 0xb87   : > { %v17939_v35 = vpack.c.b16 %v8616_v24, %v8615_v9  ;;  %v8204_v62 = vpop.f32.mrf.mxu3  ;;  %v19546_v9 = vrot.slane %v17854_v27, 1 }
 0xb88   : > { %v8422_v47 = vsel %vm5594_vm3, %v8419_v44, %v8421_v41  ;;  %v8242_v3 = vadd.f32 %v8204_v62, %v7999_v2 }
 0xb89   : > { %v8498_v36 = vmul.f32 %v8422_v47, %v19545_v37  ;;  %12178 = vmatmul.msk.bf16.gmra.mxu2 %vm645_vm0, %v17939_v35  ;;  %v9243_v21 = vpop.f32.mrf.mxu1  ;;  %v17946_v20 = vrot.slane %v17939_v35, 1  ;;  %v8765_v18 = vshll.u32 %v17939_v35, 16  ;;  %v8769_v61 = vshrl.u32 %v17939_v35, 16 }
 0xb8a   : > { %v8281_v44 = vadd.f32 %v17527_v58, %v8242_v3  ;;  %v18913_v53 = vrot.slane %v17939_v35, 2  ;;  %v19549_v32 = vrot.slane %v17939_v35, 3 }
 0xb8b   : > { %v8535_v30 = vpack.c.bf16 %v8498_v36, %v8498_v36  ;;  %v8892_v59 = vpop.f32.mrf.mxu0  ;;  %v17961_v24 = vsel %vm1307_vm10, %v19546_v9, %v17946_v20  ;;  %v8767_v2 = vrot.slane %v8765_v18, 1  ;;  %v9565_v62 = vrot.slane %v8769_v61, 1 }
 0xb8c   : > { %v8317_v47 = vmax.f32 %v8281_v44, 0.0  ;;  %v9038_v37 = vadd.f32 %v9037_v16, %v8892_v59  ;;  %v9042_v58 = vpop.f32.mrf.mxu2  ;;  %12207 = vmatmul.msk.bf16.gmra.mxu1 %vm645_vm0, %v17961_v24  ;;  %12229 = vmatmul.msk.bf16.gmra.mxu3 %vm645_vm0, %v17483_v7  ;;  %v17972_v60 = vsel %vm1979_vm12, %v19547_v28, %v18913_v53  ;;  %v9566_v3 = vrot.slane %v8765_v18, 2 }
 0xb8d   : > { %19548 = vst [vmem:[#allocation14_spill] sm:$0xff] %v17972_v60  ;;  %v8617_v36 = vunpack.c.l.b16 %v8535_v30  ;;  %v8768_v54 = vsel %vm1057_vm11, %v8763_v29, %v8767_v2  ;;  %v10257_v44 = vrot.slane %v8769_v61, 2  ;;  %v10258_v7 = vrot.slane %v8765_v18, 3  ;;  %v19553_v18 = vld [vmem:[#allocation94_spill] sm:$0xff] }
 0xb8e   : > { %v8423_v16 = vrot.slane %v8317_v47, 5  ;;  %12151 = vmatmul.msk.bf16.gmra.mxu0 %vm645_vm0, %v8768_v54  ;;  %v17976_v59 = vadd.f32 %v9243_v21, %v9038_v37  ;;  %v17978_v9 = vor.u32 %v9566_v3, %v9565_v62  ;;  %v19550_v28 = vrot.slane %v17854_v27, 3  ;;  %v19554_v37 = vld [vmem:[#allocation95_spill] sm:$0xff] }
 0xb8f   : > { %v9371_v34 = vpop.f32.mrf.mxu3  ;;  %v8635_v46 = vpack.c.b16 %v8617_v36, %v8617_v36 }
 0xb90   : > { %v17985_v53 = vsel %vm2603_vm14, %v19550_v28, %v19549_v32  ;;  %v8424_v29 = vsel %vm5594_vm3, %v8421_v41, %v8423_v16  ;;  %v8463_v30 = vsel %vm5594_vm3, %v8423_v16, 0.0  ;;  %v17990_v47 = vadd.f32 %v9371_v34, %v17436_v15 }
 0xb91   : > { %19551 = vst [vmem:[#allocation93_spill] sm:$0xff] %v17985_v53  ;;  %v17995_v21 = vsel %vm1704_vm13, %v17902_v55, %v17978_v9  ;;  %v8499_v62 = vmul.f32 %v8424_v29, %v19553_v18  ;;  %v8500_v3 = vmul.f32 %v8463_v30, %v19554_v37  ;;  %v9245_v27 = vpop.f32.mrf.mxu1  ;;  %v9126_v54 = vrot.slane %v8635_v46, 1  ;;  %v19556_v18 = vld [vmem:[#allocation100_spill] sm:$0xff] }
 0xb92   : > { %19552 = vst [vmem:[#allocation15_spill] sm:$0xff] %v17995_v21  ;;  %v8773_v32 = vshll.u32 %v8635_v46, 16  ;;  %v8771_v28 = vor.u32 %v8769_v61, %v8767_v2  ;;  %v17999_v53 = vor.u32 %v10258_v7, %v10257_v44 }
 0xb93   : > { %v8536_v41 = vpack.c.bf16 %v8499_v62, %v8499_v62  ;;  %v8537_v16 = vpack.c.bf16 %v8500_v3, %v8500_v3  ;;  %v8894_v14 = vpop.f32.mrf.mxu0  ;;  %v9127_v15 = vsel %vm1307_vm10, %v17946_v20, %v9126_v54  ;;  %v19557_v3 = vld [vmem:[#allocation39_spill] sm:$0xff] }
 0xb94   : > { %v8775_v34 = vrot.slane %v8773_v32, 1  ;;  %v9040_v55 = vadd.f32 %v17931_v50, %v8894_v14  ;;  %v9044_v21 = vpop.f32.mrf.mxu2  ;;  %v18007_v29 = vsel %vm2368_vm15, %v17921_v56, %v17999_v53 }
 0xb95   : > { %19555 = vst [vmem:[#allocation29_spill] sm:$0xff] %v18007_v29  ;;  %v9336_v30 = vunpack.c.l.b16 %v8536_v41  ;;  %v9337_v46 = vunpack.c.l.b16 %v8537_v16 }
 0xb96   : > { %v8776_v61 = vsel %vm1057_vm11, %v8771_v28, %v8775_v34  ;;  %v18010_v2 = vadd.f32 %v9245_v27, %v9040_v55  ;;  %vm10930_vm11 = vcmask 1048320  }
 0xb97   : > { %v9338_v44 = vpack.c.b16 %v9336_v30, %v8617_v36  ;;  %v9339_v7 = vpack.c.b16 %v9337_v46, %v9337_v46  ;;  %v18013_v62 = vpack.c.b16 %v19556_v18, %v9337_v46  ;;  %v9373_v37 = vpop.f32.mrf.mxu3  ;;  %v19558_v30 = vrot.slane %v17939_v35, 2 }
 0xb98   : > { %v18016_v14 = vadd.f32 %v9373_v37, %v17466_v39 }
 0xb99   : > { %v9248_v50 = vpop.f32.mrf.mxu1  ;;  %12281 = vmatmul.msk.bf16.vlgmr.msra.gmra.mxu2 %vm645_vm0, %v19557_v3  ;;  %v9340_v56 = vrot.slane %v9338_v44, 1  ;;  %v9342_v54 = vrot.slane %v9339_v7, 1  ;;  %v9826_v32 = vrot.slane %v9338_v44, 2  ;;  %v9828_v41 = vrot.slane %v9339_v7, 2 }
 0xb9a   : > { %v18916_v27 = vrot.slane %v18013_v62, 2  ;;  %v9570_v28 = vshrl.u32 %v9338_v44, 16  ;;  %v9573_v36 = vshll.u32 %v9338_v44, 16  ;;  %v9579_v16 = vshrl.u32 %v9339_v7, 16 }
 0xb9b   : > { %v8897_v34 = vpop.f32.mrf.mxu0  ;;  %v18023_v55 = vsel %vm1307_vm10, %v17946_v20, %v9340_v56  ;;  %v18026_v39 = vsel %vm1307_vm10, %v9340_v56, %v9342_v54  ;;  %v18031_v46 = vsel %vm1979_vm12, %v19558_v30, %v9826_v32  ;;  %v18034_v18 = vsel %vm1979_vm12, %v9826_v32, %v9828_v41 }
 0xb9c   : > { %19559 = vst [vmem:[#allocation108_spill] sm:$0xff] %v18031_v46  ;;  %v9043_v37 = vadd.f32 %v9042_v58, %v8897_v34  ;;  %v9047_v3 = vpop.f32.mrf.mxu2  ;;  %12208 = vmatmul.msk.bf16.gmra.mxu1 %vm645_vm0, %v9127_v15  ;;  %12230 = vmatmul.msk.bf16.gmra.mxu3 %vm645_vm0, %v17553_v33  ;;  %v18042_v20 = vsel %vm1979_vm12, %v9826_v32, %v18916_v27  ;;  %v9572_v56 = vrot.slane %v9570_v28, 1  ;;  %v9575_v54 = vrot.slane %v9573_v36, 2 }
 0xb9d   : > { %19560 = vst [vmem:[#allocation35_spill] sm:$0xff] %v18034_v18  ;;  %v9581_v29 = vrot.slane %v9579_v16, 1  ;;  %v9582_v30 = vshll.u32 %v9339_v7, 16  ;;  %v10261_v46 = vrot.slane %v9570_v28, 2  ;;  %v10262_v34 = vrot.slane %v9573_v36, 3 }
 0xb9e   : > { %12152 = vmatmul.msk.bf16.gmra.mxu0 %vm645_vm0, %v8776_v61  ;;  %v18045_v41 = vadd.f32 %v9248_v50, %v9043_v37  ;;  %v9576_v58 = vor.u32 %v9575_v54, %v9572_v56  ;;  %v10266_v15 = vshrl.u32 %v18013_v62, 16  ;;  %v10269_v43 = vshll.u32 %v18013_v62, 16 }
 0xb9f   : > { %v9376_v18 = vpop.f32.mrf.mxu3  ;;  %v9584_v33 = vrot.slane %v9582_v30, 2  ;;  %v10512_v60 = vrot.slane %v9338_v44, 3  ;;  %v18917_v32 = vrot.slane %v18013_v62, 3  ;;  %v10263_v61 = vor.u32 %v10262_v34, %v10261_v46  ;;  %v19563_v34 = vld [vmem:[#allocation45_spill] sm:$0xff] }
 0xba0   : > { %v18051_v27 = vadd.f32 %v9376_v18, %v17500_v40  ;;  %v18055_v7 = vsel %vm1704_vm13, %v17978_v9, %v9576_v58  ;;  %v10268_v50 = vrot.slane %v10266_v15, 2  ;;  %v10271_v16 = vrot.slane %v10269_v43, 3 }
 0xba1   : > { %v9250_v28 = vpop.f32.mrf.mxu1  ;;  %v9585_v36 = vor.u32 %v9584_v33, %v9581_v29  ;;  %v19561_v37 = vrot.slane %v17939_v35, 3  ;;  %v18065_v44 = vsel %vm2603_vm14, %v10512_v60, %v18917_v32  ;;  %v18069_v40 = vsel %vm2368_vm15, %v17999_v53, %v10263_v61 }
 0xba2   : > { %19562 = vst [vmem:[#allocation41_spill] sm:$0xff] %v18065_v44  ;;  %v18074_v29 = vor.u32 %v10271_v16, %v10268_v50  ;;  %vm10884_vm10 = vcmask 785920  }
 0xba3   : > { %v18060_v56 = vsel %vm2603_vm14, %v19561_v37, %v10512_v60  ;;  %v8899_v9 = vpop.f32.mrf.mxu0  ;;  %v18072_v46 = vsel %vm1704_vm13, %v9576_v58, %v9585_v36 }
 0xba4   : > { %v9045_v43 = vadd.f32 %v9044_v21, %v8899_v9  ;;  %v9049_v35 = vpop.f32.mrf.mxu2  ;;  %v18078_v18 = vsel %vm2368_vm15, %v10263_v61, %v18074_v29  ;;  %v19564_v21 = vld [vmem:[#allocation30_spill] sm:$0xff] }
 0xba6   : > { %v18080_v54 = vadd.f32 %v9250_v28, %v9045_v43 }
 0xba7   : > { %v9378_v60 = vpop.f32.mrf.mxu3 }
 0xba8   : > { %v18083_v30 = vadd.f32 %v9378_v60, %v17536_v38  ;;  %v19565_v60 = vld [vmem:[#allocation92_spill] sm:$0xff] }
 0xba9   : > { %v9253_v53 = vpop.f32.mrf.mxu1  ;;  %12282 = vmatmul.msk.bf16.gmra.mxu2 %vm645_vm0, %v19563_v34 }
 0xbab   : > { %v8902_v58 = vpop.f32.mrf.mxu0 }
 0xbac   : > { %v9048_v15 = vadd.f32 %v9047_v3, %v8902_v58  ;;  %v9052_v33 = vpop.f32.mrf.mxu2  ;;  %12231 = vmatmul.msk.bf16.gmra.mxu3 %vm645_vm0, %v17615_v52  ;;  %12311 = vmatmul.msk.bf16.vlgmr.msrb.gmra.mxu1 %vm645_vm0, %v19563_v34 }
 0xbae   : > { %12251 = vmatmul.msk.bf16.vlgmr.msrb.gmra.mxu0 %vm645_vm0, %v19564_v21  ;;  %v18093_v61 = vadd.f32 %v9253_v53, %v9048_v15 }
 0xbaf   : > { %v9381_v38 = vpop.f32.mrf.mxu3 }
 0xbb0   : > { %v18096_v50 = vadd.f32 %v9381_v38, %v17570_v26  ;;  %v19566_v26 = vld [vmem:[#allocation88_spill] sm:$0xff] }
 0xbb1   : > { %v9255_v28 = vpop.f32.mrf.mxu1 }
 0xbb3   : > { %v8904_v36 = vpop.f32.mrf.mxu0 }
 0xbb4   : > { %v9050_v16 = vadd.f32 %v9049_v35, %v8904_v36  ;;  %v9054_v3 = vpop.f32.mrf.mxu2 }
 0xbb6   : > { %v18098_v37 = vadd.f32 %v9255_v28, %v9050_v16 }
 0xbb7   : > { %v9383_v9 = vpop.f32.mrf.mxu3 }
 0xbb8   : > { %v18101_v52 = vadd.f32 %v9383_v9, %v17598_v4 }
 0xbb9   : > { %v9258_v43 = vpop.f32.mrf.mxu1  ;;  %12283 = vmatmul.msk.bf16.gmra.mxu2 %vm645_vm0, %v19565_v60 }
 0xbbb   : > { %v8907_v53 = vpop.f32.mrf.mxu0 }
 0xbbc   : > { %v9053_v34 = vadd.f32 %v9052_v33, %v8907_v53  ;;  %v9057_v58 = vpop.f32.mrf.mxu2  ;;  %12232 = vmatmul.msk.bf16.gmra.mxu3 %vm645_vm0, %v17682_v12  ;;  %12312 = vmatmul.msk.bf16.gmra.mxu1 %vm645_vm0, %v19565_v60  ;;  %v12531_v12 = vld [vmem:[%s18773_s15 + $0x78] sm:$0xff] }
 0xbbd   : > { %10347 = vmatpush.bf16.msrb.mxu3 %v12531_v12 }
 0xbbe   : > { %12252 = vmatmul.msk.bf16.gmra.mxu0 %vm645_vm0, %v19566_v26  ;;  %v18111_v35 = vadd.f32 %v9258_v43, %v9053_v34  ;;  %v19567_v34 = vld [vmem:[#allocation103_spill] sm:$0xff] }
 0xbbf   : > { %v9386_v4 = vpop.f32.mrf.mxu3 }
 0xbc0   : > { %v18114_v15 = vadd.f32 %v9386_v4, %v17632_v42 }
 0xbc1   : > { %v9260_v21 = vpop.f32.mrf.mxu1 }
 0xbc3   : > { %v8909_v38 = vpop.f32.mrf.mxu0 }
 0xbc4   : > { %v9055_v28 = vadd.f32 %v9054_v3, %v8909_v38  ;;  %v9059_v33 = vpop.f32.mrf.mxu2  ;;  %v12533_v3 = vld [vmem:[%s18773_s15 + $0x88] sm:$0xff] }
 0xbc5   : > { %10589 = vmatpush.bf16.msra.mxu0 %v12533_v3 }
 0xbc6   : > { %v18119_v36 = vadd.f32 %v9260_v21, %v9055_v28 }
 0xbc7   : > { %v9388_v16 = vpop.f32.mrf.mxu3 }
 0xbc8   : > { %v18122_v9 = vadd.f32 %v9388_v16, %v17662_v31 }
 0xbc9   : > { %v9263_v43 = vpop.f32.mrf.mxu1  ;;  %12284 = vmatmul.msk.bf16.gmra.mxu2 %vm645_vm0, %v17227_v1 }
 0xbcb   : > { %v8912_v42 = vpop.f32.mrf.mxu0 }
 0xbcc   : > { %v9058_v60 = vadd.f32 %v9057_v58, %v8912_v42  ;;  %v9062_v53 = vpop.f32.mrf.mxu2  ;;  %12233 = vmatmul.msk.bf16.gmra.mxu3 %vm645_vm0, %v17744_v49  ;;  %12313 = vmatmul.msk.bf16.gmra.mxu1 %vm645_vm0, %v17227_v1  ;;  %v19568_v42 = vld [vmem:[#allocation38_spill] sm:$0xff] }
 0xbce   : > { %12253 = vmatmul.msk.bf16.gmra.mxu0 %vm645_vm0, %v19567_v34  ;;  %v18135_v31 = vadd.f32 %v9263_v43, %v9058_v60 }
 0xbcf   : > { %v9391_v26 = vpop.f32.mrf.mxu3 }
 0xbd0   : > { %v18138_v58 = vadd.f32 %v9391_v26, %v17699_v63  ;;  %v19569_v63 = vld [vmem:[#allocation104_spill] sm:$0xff] }
 0xbd1   : > { %v9265_v4 = vpop.f32.mrf.mxu1 }
 0xbd3   : > { %v8914_v21 = vpop.f32.mrf.mxu0 }
 0xbd4   : > { %v9060_v49 = vadd.f32 %v9059_v33, %v8914_v21  ;;  %v9064_v38 = vpop.f32.mrf.mxu2 }
 0xbd6   : > { %v18140_v28 = vadd.f32 %v9265_v4, %v9060_v49 }
 0xbd7   : > { %v9393_v1 = vpop.f32.mrf.mxu3 }
 0xbd8   : > { %v18143_v12 = vadd.f32 %v9393_v1, %v17727_v13 }
 0xbd9   : > { %v9268_v16 = vpop.f32.mrf.mxu1  ;;  %12285 = vmatmul.msk.bf16.gmra.mxu2 %vm645_vm0, %v19568_v42 }
 0xbdb   : > { %v8917_v43 = vpop.f32.mrf.mxu0 }
 0xbdc   : > { %v9063_v60 = vadd.f32 %v9062_v53, %v8917_v43  ;;  %v9067_v3 = vpop.f32.mrf.mxu2  ;;  %12234 = vmatmul.msk.bf16.gmra.mxu3 %vm645_vm0, %v17805_v57  ;;  %12314 = vmatmul.msk.bf16.gmra.mxu1 %vm645_vm0, %v19568_v42 }
 0xbde   : > { %12254 = vmatmul.msk.bf16.gmra.mxu0 %vm645_vm0, %v19569_v63  ;;  %v18153_v33 = vadd.f32 %v9268_v16, %v9063_v60 }
 0xbdf   : > { %v9396_v13 = vpop.f32.mrf.mxu3 }
 0xbe0   : > { %v18156_v34 = vadd.f32 %v9396_v13, %v17761_v5 }
 0xbe1   : > { %v9270_v26 = vpop.f32.mrf.mxu1 }
 0xbe3   : > { %v8919_v4 = vpop.f32.mrf.mxu0 }
 0xbe4   : > { %v9065_v21 = vadd.f32 %v9064_v38, %v8919_v4  ;;  %v9069_v53 = vpop.f32.mrf.mxu2 }
 0xbe6   : > { %v18158_v49 = vadd.f32 %v9270_v26, %v9065_v21 }
 0xbe7   : > { %v9398_v1 = vpop.f32.mrf.mxu3 }
 0xbe8   : > { %v18161_v57 = vadd.f32 %v9398_v1, %v17788_v48 }
 0xbe9   : > { %v9273_v42 = vpop.f32.mrf.mxu1  ;;  %12286 = vmatmul.msk.bf16.gmra.mxu2 %vm645_vm0, %v17322_v8 }
 0xbeb   : > { %v8922_v16 = vpop.f32.mrf.mxu0 }
 0xbec   : > { %v9068_v43 = vadd.f32 %v9067_v3, %v8922_v16  ;;  %v9072_v60 = vpop.f32.mrf.mxu2  ;;  %12235 = vmatmul.msk.bf16.gmra.mxu3 %vm645_vm0, %v17879_v22  ;;  %12315 = vmatmul.msk.bf16.gmra.mxu1 %vm645_vm0, %v17322_v8 }
 0xbee   : > { %12255 = vmatmul.msk.bf16.gmra.mxu0 %vm645_vm0, %v17294_v0  ;;  %v18171_v5 = vadd.f32 %v9273_v42, %v9068_v43 }
 0xbef   : > { %v9401_v48 = vpop.f32.mrf.mxu3 }
 0xbf0   : > { %v18174_v38 = vadd.f32 %v9401_v48, %v17822_v6 }
 0xbf1   : > { %v9275_v63 = vpop.f32.mrf.mxu1 }
 0xbf3   : > { %v8924_v13 = vpop.f32.mrf.mxu0 }
 0xbf4   : > { %v9070_v26 = vadd.f32 %v9069_v53, %v8924_v13  ;;  %v9074_v3 = vpop.f32.mrf.mxu2 }
 0xbf6   : > { %v18176_v4 = vadd.f32 %v9275_v63, %v9070_v26  ;;  %v19570_v26 = vld [vmem:[#allocation20_spill] sm:$0xff] }
 0xbf7   : > { %v9403_v21 = vpop.f32.mrf.mxu3 }
 0xbf8   : > { %v18179_v22 = vadd.f32 %v9403_v21, %v17852_v10 }
 0xbf9   : > { %v9278_v8 = vpop.f32.mrf.mxu1  ;;  %12287 = vmatmul.msk.bf16.gmra.mxu2 %vm645_vm0, %v17375_v19 }
 0xbfb   : > { %v8927_v0 = vpop.f32.mrf.mxu0 }
 0xbfc   : > { %v9073_v1 = vadd.f32 %v9072_v60, %v8927_v0  ;;  %v9077_v42 = vpop.f32.mrf.mxu2  ;;  %12236 = vmatmul.msk.bf16.gmra.mxu3 %vm645_vm0, %v17961_v24  ;;  %12316 = vmatmul.msk.bf16.gmra.mxu1 %vm645_vm0, %v17375_v19 }
 0xbfe   : > { %12256 = vmatmul.msk.bf16.gmra.mxu0 %vm645_vm0, %v17342_v17  ;;  %v18189_v6 = vadd.f32 %v9278_v8, %v9073_v1  ;;  %v12530_v17 = vld [vmem:[%s18773_s15 + $0x70] sm:$0xff] }
 0xbff   : > { %v9406_v10 = vpop.f32.mrf.mxu3  ;;  %10348 = vmatpush.bf16.msrb.mxu3 %v12530_v17  ;;  %v19572_v17 = vld [vmem:[#allocation43_spill] sm:$0xff] }
 0xc00   : > { %v18192_v53 = vadd.f32 %v9406_v10, %v17900_v11 }
 0xc01   : > { %v9280_v16 = vpop.f32.mrf.mxu1 }
 0xc03   : > { %v8929_v43 = vpop.f32.mrf.mxu0 }
 0xc04   : > { %v9075_v48 = vadd.f32 %v9074_v3, %v8929_v43  ;;  %v9079_v60 = vpop.f32.mrf.mxu2 }
 0xc06   : > { %v18194_v63 = vadd.f32 %v9280_v16, %v9075_v48 }
 0xc07   : > { %v9408_v13 = vpop.f32.mrf.mxu3 }
 0xc08   : > { %v18197_v24 = vadd.f32 %v9408_v13, %v17937_v23  ;;  %v19571_v23 = vld [vmem:[#allocation11_spill] sm:$0xff] }
 0xc09   : > { %v9283_v19 = vpop.f32.mrf.mxu1  ;;  %12288 = vmatmul.msk.bf16.gmra.mxu2 %vm645_vm0, %v19570_v26 }
 0xc0b   : > { %v8932_v11 = vpop.f32.mrf.mxu0 }
 0xc0c   : > { %v9078_v21 = vadd.f32 %v9077_v42, %v8932_v11  ;;  %v9082_v8 = vpop.f32.mrf.mxu2  ;;  %12237 = vmatmul.msk.bf16.gmra.mxu3 %vm645_vm0, %v18023_v55  ;;  %12317 = vmatmul.msk.bf16.gmra.mxu1 %vm645_vm0, %v19570_v26 }
 0xc0e   : > { %12257 = vmatmul.msk.bf16.gmra.mxu0 %vm645_vm0, %v19571_v23  ;;  %v18210_v3 = vadd.f32 %v9283_v19, %v9078_v21 }
 0xc0f   : > { %v9411_v0 = vpop.f32.mrf.mxu3 }
 0xc10   : > { %v18213_v1 = vadd.f32 %v9411_v0, %v17976_v59 }
 0xc11   : > { %v9285_v10 = vpop.f32.mrf.mxu1 }
 0xc13   : > { %v8934_v16 = vpop.f32.mrf.mxu0 }
 0xc14   : > { %v9080_v43 = vadd.f32 %v9079_v60, %v8934_v16  ;;  %v9084_v42 = vpop.f32.mrf.mxu2  ;;  %v19573_v60 = vld [vmem:[#allocation31_spill] sm:$0xff] }
 0xc16   : > { %v18215_v48 = vadd.f32 %v9285_v10, %v9080_v43 }
 0xc17   : > { %v9413_v13 = vpop.f32.mrf.mxu3 }
 0xc18   : > { %v18218_v55 = vadd.f32 %v9413_v13, %v18010_v2 }
 0xc19   : > { %v9288_v26 = vpop.f32.mrf.mxu1  ;;  %12289 = vmatmul.msk.bf16.gmra.mxu2 %vm645_vm0, %v19572_v17 }
 0xc1b   : > { %v8937_v19 = vpop.f32.mrf.mxu0 }
 0xc1c   : > { %v9083_v11 = vadd.f32 %v9082_v8, %v8937_v19  ;;  %12238 = vmatmul.msk.bf16.gmra.mxu3 %vm645_vm0, %v18026_v39  ;;  %v9905_v59 = vpop.f32.mrf.mxu2  ;;  %12318 = vmatmul.msk.bf16.gmra.mxu1 %vm645_vm0, %v19572_v17  ;;  %v19574_v17 = vld [vmem:[#allocation105_spill] sm:$0xff] }
 0xc1e   : > { %12258 = vmatmul.msk.bf16.gmra.mxu0 %vm645_vm0, %v19573_v60  ;;  %v18228_v21 = vadd.f32 %v9288_v26, %v9083_v11 }
 0xc1f   : > { %v9416_v2 = vpop.f32.mrf.mxu3 }
 0xc20   : > { %v18231_v23 = vadd.f32 %v9416_v2, %v18045_v41  ;;  %v19575_v41 = vld [vmem:[#allocation51_spill] sm:$0xff]  ;;  %v19576_v2 = vld [vmem:[#allocation61_spill] sm:$0xff] }
 0xc21   : > { %v9290_v0 = vpop.f32.mrf.mxu1 }
 0xc23   : > { %v8939_v10 = vpop.f32.mrf.mxu0 }
 0xc24   : > { %v9085_v16 = vadd.f32 %v9084_v42, %v8939_v10  ;;  %v9907_v8 = vpop.f32.mrf.mxu2 }
 0xc26   : > { %v18233_v43 = vadd.f32 %v9290_v0, %v9085_v16 }
 0xc27   : > { %v9418_v39 = vpop.f32.mrf.mxu3 }
 0xc28   : > { %v18236_v13 = vadd.f32 %v9418_v39, %v18080_v54 }
 0xc29   : > { %12290 = vmatmul.msk.bf16.gmra.mxu2 %vm645_vm0, %v19574_v17  ;;  %v10067_v19 = vpop.f32.mrf.mxu1 }
 0xc2b   : > { %v9662_v26 = vpop.f32.mrf.mxu0 }
 0xc2c   : > { %v9752_v11 = vadd.f32 %v9662_v26, %v17990_v47  ;;  %v9910_v60 = vpop.f32.mrf.mxu2  ;;  %12319 = vmatmul.msk.bf16.gmra.mxu1 %vm645_vm0, %v19574_v17  ;;  %12341 = vmatmul.msk.bf16.vlgmr.msrb.gmra.mxu3 %vm645_vm0, %v19575_v41 }
 0xc2e   : > { %v9995_v42 = vadd.f32 %v9905_v59, %v9752_v11  ;;  %12259 = vmatmul.msk.bf16.gmra.mxu0 %vm645_vm0, %v19576_v2  ;;  %v19577_v11 = vld [vmem:[#allocation46_spill] sm:$0xff] }
 0xc2f   : > { %v9421_v54 = vpop.f32.mrf.mxu3 }
 0xc30   : > { %v18248_v0 = vadd.f32 %v9421_v54, %v18093_v61  ;;  %v18250_v10 = vadd.f32 %v10067_v19, %v9995_v42  ;;  %v19578_v42 = vld [vmem:[#allocation97_spill] sm:$0xff] }
 0xc31   : > { %v10069_v16 = vpop.f32.mrf.mxu1 }
 0xc33   : > { %v9664_v39 = vpop.f32.mrf.mxu0 }
 0xc34   : > { %v9753_v47 = vadd.f32 %v9664_v39, %v18016_v14  ;;  %v9912_v26 = vpop.f32.mrf.mxu2 }
 0xc36   : > { %v9996_v32 = vadd.f32 %v9907_v8, %v9753_v47  ;;  %v19579_v8 = vld [vmem:[#allocation101_spill] sm:$0xff] }
 0xc37   : > { %v9423_v17 = vpop.f32.mrf.mxu3 }
 0xc38   : > { %v18254_v44 = vadd.f32 %v9423_v17, %v18098_v37  ;;  %v18256_v59 = vadd.f32 %v10069_v16, %v9996_v32 }
 0xc39   : > { %12291 = vmatmul.msk.bf16.gmra.mxu2 %vm645_vm0, %v19577_v11  ;;  %v10072_v41 = vpop.f32.mrf.mxu1 }
 0xc3b   : > { %v9667_v61 = vpop.f32.mrf.mxu0 }
 0xc3c   : > { %v9754_v19 = vadd.f32 %v9667_v61, %v18051_v27  ;;  %12320 = vmatmul.msk.bf16.gmra.mxu1 %vm645_vm0, %v19577_v11  ;;  %12342 = vmatmul.msk.bf16.gmra.mxu3 %vm645_vm0, %v19578_v42  ;;  %v9915_v37 = vpop.f32.mrf.mxu2 }
 0xc3e   : > { %v9997_v14 = vadd.f32 %v9910_v60, %v9754_v19  ;;  %12260 = vmatmul.msk.bf16.gmra.mxu0 %vm645_vm0, %v19579_v8  ;;  %v19580_v19 = vld [vmem:[#allocation56_spill] sm:$0xff] }
 0xc3f   : > { %v9426_v32 = vpop.f32.mrf.mxu3 }
 0xc40   : > { %v18268_v2 = vadd.f32 %v9426_v32, %v18111_v35  ;;  %v18270_v54 = vadd.f32 %v10072_v41, %v9997_v14  ;;  %v19581_v14 = vld [vmem:[#allocation32_spill] sm:$0xff] }
 0xc41   : > { %v10074_v16 = vpop.f32.mrf.mxu1 }
 0xc43   : > { %v9669_v39 = vpop.f32.mrf.mxu0 }
 0xc44   : > { %v9755_v27 = vadd.f32 %v9669_v39, %v18083_v30  ;;  %v9917_v61 = vpop.f32.mrf.mxu2 }
 0xc46   : > { %v9998_v47 = vadd.f32 %v9912_v26, %v9755_v27  ;;  %v19582_v26 = vld [vmem:[#allocation79_spill] sm:$0xff] }
 0xc47   : > { %v9428_v17 = vpop.f32.mrf.mxu3 }
 0xc48   : > { %v18274_v11 = vadd.f32 %v9428_v17, %v18119_v36  ;;  %v18276_v60 = vadd.f32 %v10074_v16, %v9998_v47 }
 0xc49   : > { %12292 = vmatmul.msk.bf16.gmra.mxu2 %vm645_vm0, %v19580_v19  ;;  %v10077_v42 = vpop.f32.mrf.mxu1 }
 0xc4b   : > { %v9672_v35 = vpop.f32.mrf.mxu0 }
 0xc4c   : > { %v9756_v41 = vadd.f32 %v9672_v35, %v18096_v50  ;;  %12321 = vmatmul.msk.bf16.gmra.mxu1 %vm645_vm0, %v19580_v19  ;;  %12343 = vmatmul.msk.bf16.gmra.mxu3 %vm645_vm0, %v19581_v14  ;;  %v9920_v39 = vpop.f32.mrf.mxu2  ;;  %v19583_v35 = vld [vmem:[#allocation62_spill] sm:$0xff]  ;;  %v19584_v14 = vld [vmem:[#allocation8_spill] sm:$0xff] }
 0xc4e   : > { %v9999_v30 = vadd.f32 %v9915_v37, %v9756_v41  ;;  %12261 = vmatmul.msk.bf16.gmra.mxu0 %vm645_vm0, %v19582_v26 }
 0xc4f   : > { %v9431_v36 = vpop.f32.mrf.mxu3 }
 0xc50   : > { %v18288_v8 = vadd.f32 %v9431_v36, %v18135_v31  ;;  %v18290_v32 = vadd.f32 %v10077_v42, %v9999_v30  ;;  %v19585_v30 = vld [vmem:[#allocation58_spill] sm:$0xff] }
 0xc51   : > { %v10079_v16 = vpop.f32.mrf.mxu1 }
 0xc53   : > { %v9674_v27 = vpop.f32.mrf.mxu0 }
 0xc54   : > { %v9757_v50 = vadd.f32 %v9674_v27, %v18101_v52  ;;  %v9922_v52 = vpop.f32.mrf.mxu2 }
 0xc56   : > { %v10000_v47 = vadd.f32 %v9917_v61, %v9757_v50 }
 0xc57   : > { %v9433_v17 = vpop.f32.mrf.mxu3 }
 0xc58   : > { %v18294_v19 = vadd.f32 %v9433_v17, %v18140_v28  ;;  %v18296_v37 = vadd.f32 %v10079_v16, %v10000_v47  ;;  %v12532_v28 = vld [vmem:[%s18773_s15 + $0x80] sm:$0xff] }
 0xc59   : > { %12293 = vmatmul.msk.bf16.gmra.mxu2 %vm645_vm0, %v19583_v35  ;;  %v10082_v41 = vpop.f32.mrf.mxu1  ;;  %10590 = vmatpush.bf16.msra.mxu0 %v12532_v28 }
 0xc5b   : > { %v9677_v31 = vpop.f32.mrf.mxu0 }
 0xc5c   : > { %v9758_v42 = vadd.f32 %v9677_v31, %v18114_v15  ;;  %12322 = vmatmul.msk.bf16.gmra.mxu1 %vm645_vm0, %v19583_v35  ;;  %12344 = vmatmul.msk.bf16.gmra.mxu3 %vm645_vm0, %v19584_v14  ;;  %v19586_v14 = vld [vmem:[#allocation60_spill] sm:$0xff] }
 0xc5e   : > { %v10001_v61 = vadd.f32 %v9920_v39, %v9758_v42  ;;  %12262 = vmatmul.msk.bf16.gmra.mxu0 %vm645_vm0, %v19585_v30  ;;  %v9925_v39 = vpop.f32.mrf.mxu2 }
 0xc5f   : > { %v9436_v26 = vpop.f32.mrf.mxu3 }
 0xc60   : > { %v18311_v36 = vadd.f32 %v9436_v26, %v18153_v33  ;;  %v18313_v15 = vadd.f32 %v10082_v41, %v10001_v61 }
 0xc61   : > { %v10084_v16 = vpop.f32.mrf.mxu1 }
 0xc63   : > { %v9679_v27 = vpop.f32.mrf.mxu0 }
 0xc64   : > { %v9759_v50 = vadd.f32 %v9679_v27, %v18122_v9 }
 0xc66   : > { %v10002_v47 = vadd.f32 %v9922_v52, %v9759_v50  ;;  %v19587_v52 = vld [vmem:[#allocation3_spill] sm:$0xff]  ;;  %v9927_v28 = vpop.f32.mrf.mxu2 }
 0xc67   : > { %v9438_v17 = vpop.f32.mrf.mxu3 }
 0xc68   : > { %v18317_v35 = vadd.f32 %v9438_v17, %v18158_v49  ;;  %v18319_v31 = vadd.f32 %v10084_v16, %v10002_v47 }
 0xc69   : > { %12294 = vmatmul.msk.bf16.gmra.mxu2 %vm645_vm0, %v17817_v25  ;;  %v10087_v33 = vpop.f32.mrf.mxu1 }
 0xc6b   : > { %v9682_v42 = vpop.f32.mrf.mxu0 }
 0xc6c   : > { %v9760_v41 = vadd.f32 %v9682_v42, %v18138_v58  ;;  %12323 = vmatmul.msk.bf16.gmra.mxu1 %vm645_vm0, %v17817_v25  ;;  %12345 = vmatmul.msk.bf16.gmra.mxu3 %vm645_vm0, %v19586_v14 }
 0xc6e   : > { %v10003_v9 = vadd.f32 %v9925_v39, %v9760_v41  ;;  %12263 = vmatmul.msk.bf16.gmra.mxu0 %vm645_vm0, %v19587_v52  ;;  %v9930_v39 = vpop.f32.mrf.mxu2 }
 0xc6f   : > { %v9441_v49 = vpop.f32.mrf.mxu3 }
 0xc70   : > { %v18331_v61 = vadd.f32 %v9441_v49, %v18171_v5  ;;  %v18333_v30 = vadd.f32 %v10087_v33, %v10003_v9  ;;  %v19588_v33 = vld [vmem:[#allocation91_spill] sm:$0xff] }
 0xc71   : > { %v10089_v26 = vpop.f32.mrf.mxu1 }
 0xc73   : > { %v9684_v16 = vpop.f32.mrf.mxu0 }
 0xc74   : > { %v9761_v58 = vadd.f32 %v9684_v16, %v18143_v12 }
 0xc76   : > { %v10004_v27 = vadd.f32 %v9927_v28, %v9761_v58  ;;  %v9932_v52 = vpop.f32.mrf.mxu2  ;;  %v19589_v58 = vld [vmem:[#allocation14_spill] sm:$0xff] }
 0xc77   : > { %v9443_v25 = vpop.f32.mrf.mxu3 }
 0xc78   : > { %v18337_v50 = vadd.f32 %v9443_v25, %v18176_v4  ;;  %v18339_v47 = vadd.f32 %v10089_v26, %v10004_v27  ;;  %v19591_v27 = vld [vmem:[#allocation66_spill] sm:$0xff] }
 0xc79   : > { %12295 = vmatmul.msk.bf16.gmra.mxu2 %vm645_vm0, %v17893_v51  ;;  %v10092_v12 = vpop.f32.mrf.mxu1 }
 0xc7b   : > { %v9687_v5 = vpop.f32.mrf.mxu0 }
 0xc7c   : > { %v9762_v17 = vadd.f32 %v9687_v5, %v18156_v34  ;;  %12324 = vmatmul.msk.bf16.gmra.mxu1 %vm645_vm0, %v17893_v51  ;;  %12346 = vmatmul.msk.bf16.gmra.mxu3 %vm645_vm0, %v19588_v33  ;;  %v19592_v33 = vld [vmem:[#allocation108_spill] sm:$0xff] }
 0xc7e   : > { %v10005_v42 = vadd.f32 %v9930_v39, %v9762_v17  ;;  %12264 = vmatmul.msk.bf16.gmra.mxu0 %vm645_vm0, %v17840_v45 }
 0xc7f   : > { %v9446_v4 = vpop.f32.mrf.mxu3 }
 0xc80   : > { %v18351_v41 = vadd.f32 %v9446_v4, %v18189_v6  ;;  %v18353_v14 = vadd.f32 %v10092_v12, %v10005_v42  ;;  %v19594_v4 = vld [vmem:[#allocation15_spill] sm:$0xff] }
 0xc81   : > { %v10094_v51 = vpop.f32.mrf.mxu1 }
 0xc83   : > { %v9689_v9 = vpop.f32.mrf.mxu0 }
 0xc84   : > { %v9763_v34 = vadd.f32 %v9689_v9, %v18161_v57  ;;  %v19590_v57 = vld [vmem:[#allocation106_spill] sm:$0xff] }
 0xc86   : > { %v10006_v49 = vadd.f32 %v9932_v52, %v9763_v34 }
 0xc87   : > { %v9448_v28 = vpop.f32.mrf.mxu3 }
 0xc88   : > { %v18357_v26 = vadd.f32 %v9448_v28, %v18194_v63  ;;  %v18359_v16 = vadd.f32 %v10094_v51, %v10006_v49  ;;  %v19595_v49 = vld [vmem:[#allocation35_spill] sm:$0xff] }
 0xc89   : > { %12296 = vmatmul.msk.bf16.gmra.mxu2 %vm645_vm0, %v19589_v58 }
 0xc8b   : > { %v9692_v45 = vpop.f32.mrf.mxu0 }
 0xc8c   : > { %v18364_v6 = vadd.f32 %v9692_v45, %v18174_v38  ;;  %12325 = vmatmul.msk.bf16.gmra.mxu1 %vm645_vm0, %v19589_v58  ;;  %12347 = vmatmul.msk.bf16.gmra.mxu3 %vm645_vm0, %v19590_v57 }
 0xc8e   : > { %12265 = vmatmul.msk.bf16.gmra.mxu0 %vm645_vm0, %v19591_v27 }
 0xc8f   : > { %v9451_v63 = vpop.f32.mrf.mxu3 }
 0xc90   : > { %v18373_v25 = vadd.f32 %v9451_v63, %v18210_v3  ;;  %v19593_v3 = vld [vmem:[#allocation107_spill] sm:$0xff] }
 0xc93   : > { %v9694_v39 = vpop.f32.mrf.mxu0 }
 0xc94   : > { %v18376_v5 = vadd.f32 %v9694_v39, %v18179_v22  ;;  %v19599_v39 = vrot.slane %v18013_v62, 2 }
 0xc97   : > { %v9453_v17 = vpop.f32.mrf.mxu3 }
 0xc98   : > { %v18379_v38 = vadd.f32 %v9453_v17, %v18215_v48 }
 0xc99   : > { %12297 = vmatmul.msk.bf16.gmra.mxu2 %vm645_vm0, %v19592_v33 }
 0xc9b   : > { %v9697_v12 = vpop.f32.mrf.mxu0 }
 0xc9c   : > { %v18384_v42 = vadd.f32 %v9697_v12, %v18192_v53  ;;  %12326 = vmatmul.msk.bf16.gmra.mxu1 %vm645_vm0, %v19592_v33  ;;  %12348 = vmatmul.msk.bf16.gmra.mxu3 %vm645_vm0, %v19593_v3 }
 0xc9e   : > { %12266 = vmatmul.msk.bf16.gmra.mxu0 %vm645_vm0, %v19594_v4 }
 0xc9f   : > { %v9456_v22 = vpop.f32.mrf.mxu3 }
 0xca0   : > { %v18393_v48 = vadd.f32 %v9456_v22, %v18228_v21  ;;  %v19596_v21 = vld [vmem:[#allocation73_spill] sm:$0xff] }
 0xca3   : > { %v9699_v9 = vpop.f32.mrf.mxu0 }
 0xca4   : > { %v18396_v34 = vadd.f32 %v9699_v9, %v18197_v24  ;;  %v19601_v9 = vld [vmem:[#allocation63_spill] sm:$0xff] }
 0xca7   : > { %v9458_v52 = vpop.f32.mrf.mxu3 }
 0xca8   : > { %v18399_v53 = vadd.f32 %v9458_v52, %v18233_v43 }
 0xca9   : > { %12298 = vmatmul.msk.bf16.gmra.mxu2 %vm645_vm0, %v19595_v49 }
 0xcab   : > { %v9702_v51 = vpop.f32.mrf.mxu0 }
 0xcac   : > { %v18404_v28 = vadd.f32 %v9702_v51, %v18213_v1  ;;  %12327 = vmatmul.msk.bf16.gmra.mxu1 %vm645_vm0, %v18042_v20  ;;  %12349 = vmatmul.msk.bf16.gmra.mxu3 %vm645_vm0, %v19596_v21  ;;  %v19597_v20 = vld [vmem:[#allocation64_spill] sm:$0xff] }
 0xcad   : > { %v19598_v63 = vrot.slane %v19597_v20, 2 }
 0xcae   : > { %12267 = vmatmul.msk.bf16.gmra.mxu0 %vm645_vm0, %v18055_v7 }
 0xcaf   : > { %v10350_v24 = vpop.f32.mrf.mxu3  ;;  %v10039_v17 = vsel %vm1979_vm12, %v19599_v39, %v19598_v63 }
 0xcb0   : > { %v18413_v43 = vadd.f32 %v10350_v24, %v18250_v10  ;;  %v19600_v10 = vld [vmem:[#allocation57_spill] sm:$0xff] }
 0xcb1   : > { %v19603_v24 = vld [vmem:[#allocation5_spill] sm:$0xff] }
 0xcb3   : > { %v9704_v58 = vpop.f32.mrf.mxu0 }
 0xcb4   : > { %v18416_v45 = vadd.f32 %v9704_v58, %v18218_v55  ;;  %v19604_v58 = vld [vmem:[#allocation23_spill] sm:$0xff] }
 0xcb7   : > { %v10352_v57 = vpop.f32.mrf.mxu3 }
 0xcb8   : > { %v18419_v1 = vadd.f32 %v10352_v57, %v18256_v59 }
 0xcbb   : > { %v9707_v27 = vpop.f32.mrf.mxu0 }
 0xcbc   : > { %v18427_v7 = vadd.f32 %v9707_v27, %v18231_v23  ;;  %12328 = vmatmul.msk.bf16.gmra.mxu1 %vm645_vm0, %v10039_v17  ;;  %12350 = vmatmul.msk.bf16.gmra.mxu3 %vm645_vm0, %v19600_v10  ;;  %v19605_v17 = vld [vmem:[#allocation6_spill] sm:$0xff]  ;;  %v19606_v10 = vld [vmem:[#allocation81_spill] sm:$0xff] }
 0xcbe   : > { %12268 = vmatmul.msk.bf16.gmra.mxu0 %vm645_vm0, %v18072_v46  ;;  %v19602_v46 = vld [vmem:[#allocation71_spill] sm:$0xff] }
 0xcbf   : > { %v10355_v55 = vpop.f32.mrf.mxu3 }
 0xcc0   : > { %v18435_v59 = vadd.f32 %v10355_v55, %v18270_v54 }
 0xcc3   : > { %v9709_v33 = vpop.f32.mrf.mxu0 }
 0xcc4   : > { %v18438_v12 = vadd.f32 %v9709_v33, %v18236_v13 }
 0xcc7   : > { %v10357_v3 = vpop.f32.mrf.mxu3 }
 0xcc8   : > { %v18441_v23 = vadd.f32 %v10357_v3, %v18276_v60 }
 0xccb   : > { %v9712_v4 = vpop.f32.mrf.mxu0 }
 0xccc   : > { %v18444_v22 = vadd.f32 %v9712_v4, %v18248_v0  ;;  %12351 = vmatmul.msk.bf16.gmra.mxu3 %vm645_vm0, %v19601_v9  ;;  %v19607_v9 = vld [vmem:[#allocation12_spill] sm:$0xff] }
 0xcce   : > { %12371 = vmatmul.msk.bf16.vlgmr.msra.gmra.mxu0 %vm645_vm0, %v19602_v46  ;;  %v19608_v46 = vld [vmem:[#allocation2_spill] sm:$0xff] }
 0xccf   : > { %v10360_v54 = vpop.f32.mrf.mxu3 }
 0xcd0   : > { %v18451_v52 = vadd.f32 %v10360_v54, %v18290_v32 }
 0xcd3   : > { %v9714_v13 = vpop.f32.mrf.mxu0 }
 0xcd4   : > { %v18454_v49 = vadd.f32 %v9714_v13, %v18254_v44 }
 0xcd7   : > { %v10362_v60 = vpop.f32.mrf.mxu3 }
 0xcd8   : > { %v18457_v51 = vadd.f32 %v10362_v60, %v18296_v37 }
 0xcdb   : > { %v9717_v0 = vpop.f32.mrf.mxu0 }
 0xcdc   : > { %v18460_v21 = vadd.f32 %v9717_v0, %v18268_v2  ;;  %12352 = vmatmul.msk.bf16.gmra.mxu3 %vm645_vm0, %v19603_v24  ;;  %v19609_v24 = vld [vmem:[#allocation29_spill] sm:$0xff] }
 0xcde   : > { %12372 = vmatmul.msk.bf16.gmra.mxu0 %vm645_vm0, %v19604_v58  ;;  %v19610_v58 = vld [vmem:[#allocation4_spill] sm:$0xff] }
 0xcdf   : > { %v10365_v32 = vpop.f32.mrf.mxu3 }
 0xce0   : > { %v18467_v57 = vadd.f32 %v10365_v32, %v18313_v15 }
 0xce3   : > { %v9719_v44 = vpop.f32.mrf.mxu0 }
 0xce4   : > { %v18470_v27 = vadd.f32 %v9719_v44, %v18274_v11 }
 0xce7   : > { %v10367_v37 = vpop.f32.mrf.mxu3 }
 0xce8   : > { %v18473_v63 = vadd.f32 %v10367_v37, %v18319_v31 }
 0xceb   : > { %v9722_v2 = vpop.f32.mrf.mxu0 }
 0xcec   : > { %v18476_v39 = vadd.f32 %v9722_v2, %v18288_v8  ;;  %12353 = vmatmul.msk.bf16.gmra.mxu3 %vm645_vm0, %v19605_v17 }
 0xcee   : > { %12373 = vmatmul.msk.bf16.gmra.mxu0 %vm645_vm0, %v19606_v10 }
 0xcef   : > { %v10370_v15 = vpop.f32.mrf.mxu3 }
 0xcf0   : > { %v18483_v55 = vadd.f32 %v10370_v15, %v18333_v30  ;;  %v19613_v15 = vld [vmem:[#allocation99_spill] sm:$0xff] }
 0xcf3   : > { %v9724_v11 = vpop.f32.mrf.mxu0 }
 0xcf4   : > { %v18486_v33 = vadd.f32 %v9724_v11, %v18294_v19 }
 0xcf7   : > { %v10372_v31 = vpop.f32.mrf.mxu3 }
 0xcf8   : > { %v18489_v3 = vadd.f32 %v10372_v31, %v18339_v47 }
 0xcfb   : > { %v9727_v8 = vpop.f32.mrf.mxu0 }
 0xcfc   : > { %v18492_v4 = vadd.f32 %v9727_v8, %v18311_v36  ;;  %12354 = vmatmul.msk.bf16.gmra.mxu3 %vm645_vm0, %v19607_v9  ;;  %v19615_v9 = vld [vmem:[#allocation69_spill] sm:$0xff] }
 0xcfe   : > { %12374 = vmatmul.msk.bf16.gmra.mxu0 %vm645_vm0, %v19608_v46 }
 0xcff   : > { %v10375_v30 = vpop.f32.mrf.mxu3 }
 0xd00   : > { %v18499_v54 = vadd.f32 %v10375_v30, %v18353_v14 }
 0xd03   : > { %v9729_v19 = vpop.f32.mrf.mxu0 }
 0xd04   : > { %v18502_v13 = vadd.f32 %v9729_v19, %v18317_v35 }
 0xd07   : > { %v10377_v47 = vpop.f32.mrf.mxu3 }
 0xd08   : > { %v18505_v60 = vadd.f32 %v10377_v47, %v18359_v16  ;;  %v19611_v16 = vld [vmem:[#allocation10_spill] sm:$0xff] }
 0xd0b   : > { %v9732_v36 = vpop.f32.mrf.mxu0 }
 0xd0c   : > { %v18508_v0 = vadd.f32 %v9732_v36, %v18331_v61  ;;  %12355 = vmatmul.msk.bf16.gmra.mxu3 %vm645_vm0, %v19609_v24 }
 0xd0e   : > { %12375 = vmatmul.msk.bf16.gmra.mxu0 %vm645_vm0, %v19610_v58  ;;  %v19616_v58 = vld [vmem:[#allocation26_spill] sm:$0xff] }
 0xd13   : > { %v9734_v14 = vpop.f32.mrf.mxu0 }
 0xd14   : > { %v18515_v32 = vadd.f32 %v9734_v14, %v18337_v50  ;;  %v19612_v50 = vld [vmem:[#allocation98_spill] sm:$0xff] }
 0xd1b   : > { %v9737_v35 = vpop.f32.mrf.mxu0 }
 0xd1c   : > { %v18518_v44 = vadd.f32 %v9737_v35, %v18351_v41  ;;  %12356 = vmatmul.msk.bf16.gmra.mxu3 %vm645_vm0, %v18069_v40 }
 0xd1e   : > { %12376 = vmatmul.msk.bf16.gmra.mxu0 %vm645_vm0, %v19611_v16 }
 0xd23   : > { %v9739_v61 = vpop.f32.mrf.mxu0 }
 0xd24   : > { %v18525_v37 = vadd.f32 %v9739_v61, %v18357_v26  ;;  %v10274_v26 = vsel %vm2368_vm15, %v18074_v29, %v19613_v15 }
 0xd2b   : > { %v9742_v2 = vpop.f32.mrf.mxu0 }
 0xd2c   : > { %v18528_v17 = vadd.f32 %v9742_v2, %v18373_v25  ;;  %12357 = vmatmul.msk.bf16.gmra.mxu3 %vm645_vm0, %v18078_v18  ;;  %v19614_v25 = vld [vmem:[#allocation109_spill] sm:$0xff] }
 0xd2e   : > { %12377 = vmatmul.msk.bf16.gmra.mxu0 %vm645_vm0, %v19612_v50 }
 0xd33   : > { %v9744_v41 = vpop.f32.mrf.mxu0 }
 0xd34   : > { %v18535_v40 = vadd.f32 %v9744_v41, %v18379_v38  ;;  %v18552_v38 = vld [vmem:[%s18774_s16] ss:$0 sm:$0xff] }
 0xd35   : > { %v19617_v41 = vld [vmem:[#allocation34_spill] sm:$0xff] }
 0xd3b   : > { %v9747_v10 = vpop.f32.mrf.mxu0 }
 0xd3c   : > { %v18541_v11 = vadd.f32 %v9747_v10, %v18393_v48  ;;  %12358 = vmatmul.msk.bf16.gmra.mxu3 %vm645_vm0, %v10274_v26  ;;  %v9935_v26 = vpop.f32.mrf.mxu2 }
 0xd3e   : > { %12378 = vmatmul.msk.bf16.gmra.mxu0 %vm645_vm0, %v19614_v25 }
 0xd43   : > { %v9749_v18 = vpop.f32.mrf.mxu0 }
 0xd44   : > { %v18547_v31 = vadd.f32 %v9749_v18, %v18399_v53  ;;  %v10097_v18 = vpop.f32.mrf.mxu1 }
 0xd4b   : > { %v10592_v8 = vpop.f32.mrf.mxu0 }
 0xd4c   : > { %v10682_v29 = vadd.f32 %v10592_v8, %v18413_v43 }
 0xd4e   : > { %v10721_v48 = vadd.f32 %v18552_v38, %v10682_v29  ;;  %12379 = vmatmul.msk.bf16.gmra.mxu0 %vm645_vm0, %v19615_v9  ;;  %v10380_v29 = vpop.f32.mrf.mxu3 }
 0xd50   : > { %v10757_v53 = vmax.f32 %v10721_v48, 0.0 }
 0xd52   : > { %10793 = vst.msk [vmem:[%s18562_s23] sm:$0xff] %vm645_vm0, %v10757_v53  ;;  %v19618_v53 = vld [vmem:[#allocation54_spill] sm:$0xff] }
 0xd53   : > { %v10594_v46 = vpop.f32.mrf.mxu0 }
 0xd54   : > { %v10683_v43 = vadd.f32 %v10594_v46, %v18419_v1  ;;  %v9937_v46 = vpop.f32.mrf.mxu2 }
 0xd56   : > { %v10722_v30 = vadd.f32 %v18552_v38, %v10683_v43 }
 0xd58   : > { %v10758_v19 = vmax.f32 %v10722_v30, 0.0  ;;  %v10382_v30 = vpop.f32.mrf.mxu3 }
 0xd5a   : > { %10794 = vst.msk [vmem:[%s18562_s23 + $0x8] sm:$0xff] %vm645_vm0, %v10758_v19 }
 0xd5b   : > { %v10597_v47 = vpop.f32.mrf.mxu0 }
 0xd5c   : > { %v10684_v36 = vadd.f32 %v10597_v47, %v18435_v59 }
 0xd5e   : > { %v10723_v24 = vadd.f32 %v18552_v38, %v10684_v36  ;;  %12380 = vmatmul.msk.bf16.gmra.mxu0 %vm645_vm0, %v19616_v58  ;;  %v9940_v58 = vpop.f32.mrf.mxu2 }
 0xd60   : > { %v10759_v14 = vmax.f32 %v10723_v24, 0.0 }
 0xd62   : > { %10795 = vst.msk [vmem:[%s18562_s23 + $0x10] sm:$0xff] %vm645_vm0, %v10759_v14 }
 0xd63   : > { %v10599_v35 = vpop.f32.mrf.mxu0 }
 0xd64   : > { %v10685_v1 = vadd.f32 %v10599_v35, %v18441_v23 }
 0xd66   : > { %v10724_v16 = vadd.f32 %v18552_v38, %v10685_v1  ;;  %v10385_v1 = vpop.f32.mrf.mxu3 }
 0xd68   : > { %v10760_v61 = vmax.f32 %v10724_v16, 0.0 }
 0xd6a   : > { %10796 = vst.msk [vmem:[%s18562_s23 + $0x18] sm:$0xff] %vm645_vm0, %v10760_v61  ;;  %v19619_v61 = vld [vmem:[#allocation44_spill] sm:$0xff] }
 0xd6b   : > { %v10602_v2 = vpop.f32.mrf.mxu0 }
 0xd6c   : > { %v10686_v59 = vadd.f32 %v10602_v2, %v18451_v52 }
 0xd6e   : > { %v10725_v50 = vadd.f32 %v18552_v38, %v10686_v59  ;;  %12381 = vmatmul.msk.bf16.gmra.mxu0 %vm645_vm0, %v19617_v41 }
 0xd70   : > { %v10761_v10 = vmax.f32 %v10725_v50, 0.0 }
 0xd72   : > { %10797 = vst.msk [vmem:[%s18562_s23 + $0x20] sm:$0xff] %vm645_vm0, %v10761_v10 }
 0xd73   : > { %v10604_v15 = vpop.f32.mrf.mxu0 }
 0xd74   : > { %v10687_v23 = vadd.f32 %v10604_v15, %v18457_v51  ;;  %v10099_v51 = vpop.f32.mrf.mxu1  ;;  %v10387_v15 = vpop.f32.mrf.mxu3 }
 0xd76   : > { %v10726_v25 = vadd.f32 %v18552_v38, %v10687_v23 }
 0xd78   : > { %v10762_v8 = vmax.f32 %v10726_v25, 0.0 }
 0xd7a   : > { %10798 = vst.msk [vmem:[%s18562_s23 + $0x28] sm:$0xff] %vm645_vm0, %v10762_v8 }
 0xd7b   : > { %v10607_v52 = vpop.f32.mrf.mxu0 }
 0xd7c   : > { %v10688_v48 = vadd.f32 %v10607_v52, %v18467_v57  ;;  %v10102_v14 = vpop.f32.mrf.mxu1 }
 0xd7e   : > { %v10727_v9 = vadd.f32 %v18552_v38, %v10688_v48  ;;  %12382 = vmatmul.msk.bf16.gmra.mxu0 %vm645_vm0, %v19618_v53  ;;  %v19620_v48 = vld [vmem:[#allocation7_spill] sm:$0xff] }
 0xd80   : > { %v10763_v43 = vmax.f32 %v10727_v9, 0.0 }
 0xd82   : > { %10799 = vst.msk [vmem:[%s18562_s23 + $0x30] sm:$0xff] %vm645_vm0, %v10763_v43 }
 0xd83   : > { %v10609_v19 = vpop.f32.mrf.mxu0 }
 0xd84   : > { %v10689_v47 = vadd.f32 %v10609_v19, %v18473_v63  ;;  %v9942_v63 = vpop.f32.mrf.mxu2  ;;  %v10104_v41 = vpop.f32.mrf.mxu1  ;;  %v10007_v19 = vadd.f32 %v9935_v26, %v18364_v6 }
 0xd86   : > { %v10728_v36 = vadd.f32 %v18552_v38, %v10689_v47 }
 0xd88   : > { %v10764_v24 = vmax.f32 %v10728_v36, 0.0 }
 0xd8a   : > { %10800 = vst.msk [vmem:[%s18562_s23 + $0x38] sm:$0xff] %vm645_vm0, %v10764_v24 }
 0xd8b   : > { %v10612_v57 = vpop.f32.mrf.mxu0 }
 0xd8c   : > { %v10690_v35 = vadd.f32 %v10612_v57, %v18483_v55  ;;  %v9945_v8 = vpop.f32.mrf.mxu2  ;;  %v10107_v9 = vpop.f32.mrf.mxu1 }
 0xd8e   : > { %v10729_v16 = vadd.f32 %v18552_v38, %v10690_v35  ;;  %12383 = vmatmul.msk.bf16.gmra.mxu0 %vm645_vm0, %v19619_v61 }
 0xd90   : > { %v10765_v2 = vmax.f32 %v10729_v16, 0.0 }
 0xd92   : > { %10801 = vst.msk [vmem:[%s18562_s23 + $0x40] sm:$0xff] %vm645_vm0, %v10765_v2 }
 0xd93   : > { %v10614_v59 = vpop.f32.mrf.mxu0 }
 0xd94   : > { %v10691_v50 = vadd.f32 %v10614_v59, %v18489_v3  ;;  %v10390_v3 = vpop.f32.mrf.mxu3  ;;  %v9947_v24 = vpop.f32.mrf.mxu2  ;;  %v10008_v59 = vadd.f32 %v9937_v46, %v18376_v5 }
 0xd95   : > { %v10109_v35 = vpop.f32.mrf.mxu1 }
 0xd96   : > { %v10730_v10 = vadd.f32 %v18552_v38, %v10691_v50  ;;  %v10170_v6 = vadd.f32 %v10099_v51, %v10008_v59 }
 0xd98   : > { %v10766_v23 = vmax.f32 %v10730_v10, 0.0 }
 0xd9a   : > { %10811 = vrot.lane.b32.xlu2 %v10766_v23, %s12631_s28  ;;  %v19621_v23 = vld [vmem:[#allocation93_spill] sm:$0xff] }
 0xd9b   : > { %v10617_v55 = vpop.f32.mrf.mxu0 }
 0xd9c   : > { %v10692_v25 = vadd.f32 %v10617_v55, %v18499_v54  ;;  %v10169_v54 = vadd.f32 %v10097_v18, %v10007_v19  ;;  %v10392_v61 = vpop.f32.mrf.mxu3  ;;  %v9950_v26 = vpop.f32.mrf.mxu2  ;;  %v10453_v55 = vadd.f32 %v10382_v30, %v10170_v6 }
 0xd9e   : > { %v10731_v52 = vadd.f32 %v18552_v38, %v10692_v25  ;;  %12384 = vmatmul.msk.bf16.gmra.mxu0 %vm645_vm0, %v19620_v48  ;;  %v10452_v16 = vadd.f32 %v10380_v29, %v10169_v54  ;;  %v10009_v29 = vadd.f32 %v9940_v58, %v18384_v42  ;;  %v10112_v25 = vpop.f32.mrf.mxu1 }
 0xda0   : > { %v10767_v53 = vmax.f32 %v10731_v52, 0.0  ;;  %v10171_v46 = vadd.f32 %v10102_v14, %v10009_v29 }
 0xda2   : > { %10813 = vrot.lane.b32.xlu0 %v10767_v53, %s12631_s28 }
 0xda3   : > { %v10619_v43 = vpop.f32.mrf.mxu0 }
 0xda4   : > { %v10693_v47 = vadd.f32 %v10619_v43, %v18505_v60  ;;  %v10395_v48 = vpop.f32.mrf.mxu3  ;;  %v10454_v43 = vadd.f32 %v10385_v1, %v10171_v46  ;;  %v9952_v19 = vpop.f32.mrf.mxu2  ;;  %v10011_v1 = vadd.f32 %v9945_v8, %v18404_v28 }
 0xda6   : > { %v10732_v36 = vadd.f32 %v18552_v38, %v10693_v47  ;;  %v10010_v47 = vadd.f32 %v9942_v63, %v18396_v34 }
 0xda8   : > { %v10768_v57 = vmax.f32 %v10732_v36, 0.0  ;;  %v10114_v36 = vpop.f32.mrf.mxu1  ;;  %v10172_v58 = vadd.f32 %v10104_v41, %v10010_v47  ;;  %v10012_v41 = vadd.f32 %v9947_v24, %v18416_v45 }
 0xdaa   : > { %10815 = vrot.lane.b32.xlu1 %v10768_v57, %s12631_s28  ;;  %v10174_v8 = vadd.f32 %v10109_v35, %v10012_v41  ;;  %v10014_v35 = vadd.f32 %v9952_v19, %v18438_v12 }
 0xdab   : > { %v10622_v2 = vpop.f32.mrf.mxu0 }
 0xdac   : > { %v10694_v50 = vadd.f32 %v10622_v2, %v10452_v16  ;;  %v10397_v42 = vpop.f32.mrf.mxu3  ;;  %v10455_v16 = vadd.f32 %v10387_v15, %v10172_v58  ;;  %v9955_v59 = vpop.f32.mrf.mxu2  ;;  %v19623_v58 = vrot.slane %v19597_v20, 3 }
 0xdae   : > { %v10733_v10 = vadd.f32 %v18552_v38, %v10694_v50  ;;  %12385 = vmatmul.msk.bf16.gmra.mxu0 %vm645_vm0, %v19621_v23  ;;  %v10173_v50 = vadd.f32 %v10107_v9, %v10011_v1 }
 0xdb0   : > { %v10769_v60 = vmax.f32 %v10733_v10, 0.0  ;;  %v10117_v63 = vpop.f32.mrf.mxu1  ;;  %v10456_v6 = vadd.f32 %v10390_v3, %v10173_v50 }
 0xdb2   : > { %10817 = vrot.lane.b32.xlu2 %v10769_v60, %s12631_s28 }
 0xdb3   : > { %v10624_v18 = vpop.f32.mrf.mxu0 }
 0xdb4   : > { %v10695_v52 = vadd.f32 %v10624_v18, %v10453_v55  ;;  %v10400_v23 = vpop.f32.mrf.mxu3  ;;  %v19622_v55 = vld [vmem:[#allocation41_spill] sm:$0xff]  ;;  %v9957_v28 = vpop.f32.mrf.mxu2 }
 0xdb6   : > { %v10734_v5 = vadd.f32 %v18552_v38, %v10695_v52  ;;  %v10457_v52 = vadd.f32 %v10392_v61, %v10174_v8 }
 0xdb8   : > { %v10770_v53 = vmax.f32 %v10734_v5, 0.0  ;;  %v10119_v29 = vpop.f32.mrf.mxu1  ;;  %v10013_v5 = vadd.f32 %v9950_v26, %v18427_v7 }
 0xdba   : > { %10819 = vrot.lane.b32.xlu0 %v10770_v53, %s12631_s28  ;;  %v10175_v24 = vadd.f32 %v10112_v25, %v10013_v5  ;;  %v10176_v25 = vadd.f32 %v10114_v36, %v10014_v35 }
 0xdbb   : > { %v10627_v51 = vpop.f32.mrf.mxu0 }
 0xdbc   : > { %v10696_v30 = vadd.f32 %v10627_v51, %v10454_v43  ;;  %v10402_v9 = vpop.f32.mrf.mxu3  ;;  %v9960_v43 = vpop.f32.mrf.mxu2  ;;  %v10458_v51 = vadd.f32 %v10395_v48, %v10175_v24 }
 0xdbe   : > { %v10735_v54 = vadd.f32 %v18552_v38, %v10696_v30  ;;  %12386 = vmatmul.msk.bf16.gmra.mxu0 %vm645_vm0, %v18060_v56 }
 0xdc0   : > { %v10771_v57 = vmax.f32 %v10735_v54, 0.0  ;;  %v10122_v30 = vpop.f32.mrf.mxu1 }
 0xdc2   : > { %10821 = vrot.lane.b32.xlu1 %v10771_v57, %s12631_s28  ;;  %v19624_v57 = vrot.slane %v18013_v62, 3 }
 0xdc3   : > { %v10629_v14 = vpop.f32.mrf.mxu0 }
 0xdc4   : > { %v10697_v2 = vadd.f32 %v10629_v14, %v10455_v16  ;;  %v10405_v54 = vpop.f32.mrf.mxu3  ;;  %v10516_v7 = vsel %vm2603_vm14, %v19624_v57, %v19623_v58  ;;  %v10459_v16 = vadd.f32 %v10397_v42, %v10176_v25  ;;  %v9962_v12 = vpop.f32.mrf.mxu2  ;;  %v10015_v14 = vadd.f32 %v9955_v59, %v18444_v22 }
 0xdc5   : > { %v10016_v42 = vadd.f32 %v9957_v28, %v18454_v49 }
 0xdc6   : > { %v10736_v34 = vadd.f32 %v18552_v38, %v10697_v2 }
 0xdc7   : > { %v10178_v22 = vadd.f32 %v10119_v29, %v10016_v42 }
 0xdc8   : > { %v10772_v10 = vmax.f32 %v10736_v34, 0.0  ;;  %v10124_v20 = vpop.f32.mrf.mxu1  ;;  %v10177_v34 = vadd.f32 %v10117_v63, %v10015_v14 }
 0xdca   : > { %10823 = vrot.lane.b32.xlu2 %v10772_v10, %s12631_s28  ;;  %v10460_v10 = vadd.f32 %v10400_v23, %v10177_v34  ;;  %v10017_v23 = vadd.f32 %v9960_v43, %v18460_v21 }
 0xdcb   : > { %v10632_v56 = vpop.f32.mrf.mxu0 }
 0xdcc   : > { %v10698_v15 = vadd.f32 %v10632_v56, %v10456_v6  ;;  %v10407_v2 = vpop.f32.mrf.mxu3  ;;  %v9965_v56 = vpop.f32.mrf.mxu2 }
 0xdce   : > { %v10737_v60 = vadd.f32 %v18552_v38, %v10698_v15  ;;  %12387 = vmatmul.msk.bf16.gmra.mxu0 %vm645_vm0, %v19622_v55  ;;  %v10461_v55 = vadd.f32 %v10402_v9, %v10178_v22 }
 0xdd0   : > { %v10773_v18 = vmax.f32 %v10737_v60, 0.0  ;;  %v10127_v15 = vpop.f32.mrf.mxu1 }
 0xdd2   : > { %10825 = vrot.lane.b32.xlu0 %v10773_v18, %s12631_s28 }
 0xdd3   : > { %v10634_v3 = vpop.f32.mrf.mxu0 }
 0xdd4   : > { %v10699_v46 = vadd.f32 %v10634_v3, %v10457_v52  ;;  %v10410_v60 = vpop.f32.mrf.mxu3  ;;  %v9967_v28 = vpop.f32.mrf.mxu2  ;;  %v10179_v52 = vadd.f32 %v10122_v30, %v10017_v23  ;;  %v10019_v30 = vadd.f32 %v9965_v56, %v18476_v39 }
 0xdd6   : > { %v10738_v45 = vadd.f32 %v18552_v38, %v10699_v46  ;;  %v10462_v29 = vadd.f32 %v10405_v54, %v10179_v52 }
 0xdd8   : > { %v10774_v53 = vmax.f32 %v10738_v45, 0.0  ;;  %v10129_v5 = vpop.f32.mrf.mxu1  ;;  %v10018_v45 = vadd.f32 %v9962_v12, %v18470_v27 }
 0xdda   : > { %10827 = vrot.lane.b32.xlu1 %v10774_v53, %s12631_s28  ;;  %v10180_v53 = vadd.f32 %v10124_v20, %v10018_v45 }
 0xddb   : > { %v10637_v47 = vpop.f32.mrf.mxu0 }
 0xddc   : > { %v10700_v61 = vadd.f32 %v10637_v47, %v10458_v51  ;;  %v10412_v9 = vpop.f32.mrf.mxu3  ;;  %v9970_v51 = vpop.f32.mrf.mxu2  ;;  %v10463_v47 = vadd.f32 %v10407_v2, %v10180_v53 }
 0xdde   : > { %v10739_v26 = vadd.f32 %v18552_v38, %v10700_v61  ;;  %12388 = vmatmul.msk.bf16.gmra.mxu0 %vm645_vm0, %v10516_v7  ;;  %vm10838_vm0 = vcmask 523520   ;;  %v10181_v7 = vadd.f32 %v10127_v15, %v10019_v30 }
 0xde0   : > { %v10775_v48 = vmax.f32 %v10739_v26, 0.0  ;;  %v10132_v61 = vpop.f32.mrf.mxu1  ;;  %v10464_v26 = vadd.f32 %v10410_v60, %v10181_v7 }
 0xde2   : > { %10857 = vrot.lane.b32.xlu2 %v10775_v48, %s12632_s24 }
 0xde3   : > { %v10639_v19 = vpop.f32.mrf.mxu0 }
 0xde4   : > { %v10701_v1 = vadd.f32 %v10639_v19, %v10459_v16  ;;  %v10415_v58 = vpop.f32.mrf.mxu3  ;;  %v9972_v25 = vpop.f32.mrf.mxu2  ;;  %v10020_v16 = vadd.f32 %v9967_v28, %v18486_v33 }
 0xde5   : > { %v10022_v60 = vadd.f32 %v9972_v25, %v18502_v13 }
 0xde6   : > { %v10740_v62 = vadd.f32 %v18552_v38, %v10701_v1  ;;  %v10182_v20 = vadd.f32 %v10129_v5, %v10020_v16 }
 0xde8   : > { %v10776_v50 = vmax.f32 %v10740_v62, 0.0  ;;  %v10134_v39 = vpop.f32.mrf.mxu1  ;;  %v10465_v2 = vadd.f32 %v10412_v9, %v10182_v20 }
 0xdea   : > { %10859 = vrot.lane.b32.xlu0 %v10776_v50, %s12632_s24  ;;  %v10021_v50 = vadd.f32 %v9970_v51, %v18492_v4 }
 0xdeb   : > { %v10642_v36 = vpop.f32.mrf.mxu0 }
 0xdec   : > { %v10702_v6 = vadd.f32 %v10642_v36, %v10460_v10  ;;  %v10417_v1 = vpop.f32.mrf.mxu3  ;;  %v9975_v36 = vpop.f32.mrf.mxu2  ;;  %v10183_v56 = vadd.f32 %v10132_v61, %v10021_v50 }
 0xded   : > { %v10023_v5 = vadd.f32 %v9975_v36, %v18508_v0 }
 0xdee   : > { %v10741_v41 = vadd.f32 %v18552_v38, %v10702_v6  ;;  %v10466_v22 = vadd.f32 %v10415_v58, %v10183_v56 }
 0xdf0   : > { %v10777_v59 = vmax.f32 %v10741_v41, 0.0  ;;  %v10137_v6 = vpop.f32.mrf.mxu1 }
 0xdf2   : > { %10861 = vrot.lane.b32.xlu1 %v10777_v59, %s12632_s24 }
 0xdf3   : > { %v10644_v63 = vpop.f32.mrf.mxu0 }
 0xdf4   : > { %v10703_v8 = vadd.f32 %v10644_v63, %v10461_v55  ;;  %v10812_v18 = vpop.permute.xlu2 %10811  ;;  %v10420_v15 = vpop.f32.mrf.mxu3 }
 0xdf5   : > { %10839 = vst.msk [vmem:[%s18562_s23] sm:$0xff] %vm10838_vm0, %v10812_v18  ;;  %v9977_v23 = vpop.f32.mrf.mxu2 }
 0xdf6   : > { %v10742_v49 = vadd.f32 %v18552_v38, %v10703_v8  ;;  %v10184_v8 = vadd.f32 %v10134_v39, %v10022_v60 }
 0xdf8   : > { %v10778_v3 = vmax.f32 %v10742_v49, 0.0  ;;  %v10139_v49 = vpop.f32.mrf.mxu1  ;;  %v10467_v28 = vadd.f32 %v10417_v1, %v10184_v8 }
 0xdfa   : > { %10863 = vrot.lane.b32.xlu2 %v10778_v3, %s12632_s24 }
 0xdfb   : > { %v10647_v46 = vpop.f32.mrf.mxu0 }
 0xdfc   : > { %v10704_v24 = vadd.f32 %v10647_v46, %v10462_v29  ;;  %v10422_v52 = vpop.f32.mrf.mxu3  ;;  %v10185_v46 = vadd.f32 %v10137_v6, %v10023_v5 }
 0xdfe   : > { %v10743_v21 = vadd.f32 %v18552_v38, %v10704_v24  ;;  %v9980_v24 = vpop.f32.mrf.mxu2 }
 0xe00   : > { %v10779_v43 = vmax.f32 %v10743_v21, 0.0  ;;  %v10468_v21 = vadd.f32 %v10420_v15, %v10185_v46  ;;  %v10142_v51 = vpop.f32.mrf.mxu1 }
 0xe02   : > { %10865 = vrot.lane.b32.xlu0 %v10779_v43, %s12632_s24  ;;  %v10024_v43 = vadd.f32 %v9977_v23, %v18515_v32 }
 0xe03   : > { %v10649_v35 = vpop.f32.mrf.mxu0 }
 0xe04   : > { %v10705_v54 = vadd.f32 %v10649_v35, %v10463_v47  ;;  %v10425_v35 = vpop.f32.mrf.mxu3  ;;  %v10186_v61 = vadd.f32 %v10139_v49, %v10024_v43 }
 0xe06   : > { %v10744_v57 = vadd.f32 %v18552_v38, %v10705_v54  ;;  %v10469_v58 = vadd.f32 %v10422_v52, %v10186_v61 }
 0xe08   : > { %v10780_v27 = vmax.f32 %v10744_v57, 0.0  ;;  %v9982_v57 = vpop.f32.mrf.mxu2  ;;  %v10144_v25 = vpop.f32.mrf.mxu1 }
 0xe09   : > { %v10026_v1 = vadd.f32 %v9982_v57, %v18525_v37 }
 0xe0a   : > { %10867 = vrot.lane.b32.xlu1 %v10780_v27, %s12632_s24  ;;  %v10025_v27 = vadd.f32 %v9980_v24, %v18518_v44 }
 0xe0b   : > { %v10652_v48 = vpop.f32.mrf.mxu0  ;;  %v10188_v50 = vadd.f32 %v10144_v25, %v10026_v1 }
 0xe0c   : > { %v10706_v12 = vadd.f32 %v10652_v48, %v10464_v26  ;;  %v10818_v19 = vpop.permute.xlu2 %10817  ;;  %v10427_v16 = vpop.f32.mrf.mxu3 }
 0xe0d   : > { %10842 = vst.msk [vmem:[%s18562_s23 + $0x18] sm:$0xff] %vm10838_vm0, %v10818_v19  ;;  %v10471_v36 = vadd.f32 %v10427_v16, %v10188_v50 }
 0xe0e   : > { %v10745_v14 = vadd.f32 %v18552_v38, %v10706_v12  ;;  %v10187_v12 = vadd.f32 %v10142_v51, %v10025_v27 }
 0xe10   : > { %v10781_v62 = vmax.f32 %v10745_v14, 0.0  ;;  %v10470_v39 = vadd.f32 %v10425_v35, %v10187_v12 }
 0xe12   : > { %10869 = vrot.lane.b32.xlu2 %v10781_v62, %s12632_s24  ;;  %v9985_v62 = vpop.f32.mrf.mxu2 }
 0xe13   : > { %v10654_v34 = vpop.f32.mrf.mxu0  ;;  %v10027_v6 = vadd.f32 %v9985_v62, %v18528_v17 }
 0xe14   : > { %v10707_v10 = vadd.f32 %v10654_v34, %v10465_v2  ;;  %v10814_v33 = vpop.permute.xlu0 %10813  ;;  %v10147_v34 = vpop.f32.mrf.mxu1 }
 0xe15   : > { %10840 = vst.msk [vmem:[%s18562_s23 + $0x8] sm:$0xff] %vm10838_vm0, %v10814_v33  ;;  %v10430_v33 = vpop.f32.mrf.mxu3 }
 0xe16   : > { %v10746_v42 = vadd.f32 %v18552_v38, %v10707_v10 }
 0xe18   : > { %v10782_v41 = vmax.f32 %v10746_v42, 0.0 }
 0xe1a   : > { %10871 = vrot.lane.b32.xlu0 %v10782_v41, %s12632_s24  ;;  %v9987_v15 = vpop.f32.mrf.mxu2 }
 0xe1b   : > { %v10657_v59 = vpop.f32.mrf.mxu0  ;;  %v10028_v23 = vadd.f32 %v9987_v15, %v18535_v40 }
 0xe1c   : > { %v10708_v4 = vadd.f32 %v10657_v59, %v10466_v22  ;;  %v10816_v55 = vpop.permute.xlu1 %10815  ;;  %v10189_v22 = vadd.f32 %v10147_v34, %v10027_v6  ;;  %v10149_v60 = vpop.f32.mrf.mxu1 }
 0xe1d   : > { %10841 = vst.msk [vmem:[%s18562_s23 + $0x10] sm:$0xff] %vm10838_vm0, %v10816_v55  ;;  %v10432_v55 = vpop.f32.mrf.mxu3  ;;  %v10190_v49 = vadd.f32 %v10149_v60, %v10028_v23 }
 0xe1e   : > { %v10747_v63 = vadd.f32 %v18552_v38, %v10708_v4  ;;  %v10472_v4 = vadd.f32 %v10430_v33, %v10189_v22 }
 0xe20   : > { %v10783_v18 = vmax.f32 %v10747_v63, 0.0 }
 0xe22   : > { %10873 = vrot.lane.b32.xlu1 %v10783_v18, %s12632_s24  ;;  %v9990_v52 = vpop.f32.mrf.mxu2 }
 0xe23   : > { %v10659_v3 = vpop.f32.mrf.mxu0 }
 0xe24   : > { %v10709_v29 = vadd.f32 %v10659_v3, %v10467_v28  ;;  %v10824_v13 = vpop.permute.xlu2 %10823  ;;  %v10473_v3 = vadd.f32 %v10432_v55, %v10190_v49  ;;  %v10152_v40 = vpop.f32.mrf.mxu1 }
 0xe25   : > { %10845 = vst.msk [vmem:[%s18562_s23 + $0x30] sm:$0xff] %vm10838_vm0, %v10824_v13  ;;  %v10435_v46 = vpop.f32.mrf.mxu3 }
 0xe26   : > { %v10748_v9 = vadd.f32 %v18552_v38, %v10709_v29  ;;  %v10029_v29 = vadd.f32 %v9990_v52, %v18541_v11 }
 0xe28   : > { %v10784_v45 = vmax.f32 %v10748_v9, 0.0  ;;  %v10191_v24 = vadd.f32 %v10152_v40, %v10029_v29 }
 0xe2a   : > { %10903 = vrot.lane.b32.xlu2 %v10784_v45, %s12633_s25  ;;  %v9992_v43 = vpop.f32.mrf.mxu2 }
 0xe2b   : > { %v10662_v53 = vpop.f32.mrf.mxu0 }
 0xe2c   : > { %v10710_v0 = vadd.f32 %v10662_v53, %v10468_v21  ;;  %v10820_v47 = vpop.permute.xlu0 %10819  ;;  %v10474_v53 = vadd.f32 %v10435_v46, %v10191_v24 }
 0xe2d   : > { %10843 = vst.msk [vmem:[%s18562_s23 + $0x20] sm:$0xff] %vm10838_vm0, %v10820_v47  ;;  %v10437_v61 = vpop.f32.mrf.mxu3 }
 0xe2e   : > { %v10749_v30 = vadd.f32 %v18552_v38, %v10710_v0  ;;  %v10030_v0 = vadd.f32 %v9992_v43, %v18547_v31 }
 0xe30   : > { %v10785_v54 = vmax.f32 %v10749_v30, 0.0  ;;  %v10154_v30 = vpop.f32.mrf.mxu1 }
 0xe32   : > { %10905 = vrot.lane.b32.xlu0 %v10785_v54, %s12633_s25  ;;  %v10192_v54 = vadd.f32 %v10154_v30, %v10030_v0 }
 0xe33   : > { %v10664_v7 = vpop.f32.mrf.mxu0 }
 0xe34   : > { %v10711_v26 = vadd.f32 %v10664_v7, %v10469_v58  ;;  %v10822_v32 = vpop.permute.xlu1 %10821  ;;  %v10475_v57 = vadd.f32 %v10437_v61, %v10192_v54 }
 0xe35   : > { %10844 = vst.msk [vmem:[%s18562_s23 + $0x28] sm:$0xff] %vm10838_vm0, %v10822_v32 }
 0xe36   : > { %v10750_v48 = vadd.f32 %v18552_v38, %v10711_v26 }
 0xe38   : > { %v10786_v19 = vmax.f32 %v10750_v48, 0.0 }
 0xe3a   : > { %10907 = vrot.lane.b32.xlu1 %v10786_v19, %s12633_s25 }
 0xe3b   : > { %v10667_v14 = vpop.f32.mrf.mxu0 }
 0xe3c   : > { %v10712_v44 = vadd.f32 %v10667_v14, %v10470_v39  ;;  %v10858_v20 = vpop.permute.xlu2 %10857 }
 0xe3d   : > { %10885 = vst.msk [vmem:[%s18562_s23] sm:$0xff] %vm10884_vm10, %v10858_v20 }
 0xe3e   : > { %v10751_v2 = vadd.f32 %v18552_v38, %v10712_v44 }
 0xe40   : > { %v10787_v10 = vmax.f32 %v10751_v2, 0.0 }
 0xe42   : > { %10909 = vrot.lane.b32.xlu2 %v10787_v10, %s12633_s25 }
 0xe43   : > { %v10669_v42 = vpop.f32.mrf.mxu0 }
 0xe44   : > { %v10713_v37 = vadd.f32 %v10669_v42, %v10471_v36  ;;  %v10826_v56 = vpop.permute.xlu0 %10825 }
 0xe45   : > { %10846 = vst.msk [vmem:[%s18562_s23 + $0x38] sm:$0xff] %vm10838_vm0, %v10826_v56 }
 0xe46   : > { %v10752_v41 = vadd.f32 %v18552_v38, %v10713_v37 }
 0xe48   : > { %v10788_v59 = vmax.f32 %v10752_v41, 0.0 }
 0xe4a   : > { %10911 = vrot.lane.b32.xlu0 %v10788_v59, %s12633_s25 }
 0xe4b   : > { %v10672_v63 = vpop.f32.mrf.mxu0 }
 0xe4c   : > { %v10714_v17 = vadd.f32 %v10672_v63, %v10472_v4  ;;  %v10828_v8 = vpop.permute.xlu1 %10827 }
 0xe4d   : > { %10847 = vst.msk [vmem:[%s18562_s23 + $0x40] sm:$0xff] %vm10838_vm0, %v10828_v8 }
 0xe4e   : > { %v10753_v18 = vadd.f32 %v18552_v38, %v10714_v17 }
 0xe50   : > { %v10789_v28 = vmax.f32 %v10753_v18, 0.0 }
 0xe52   : > { %10913 = vrot.lane.b32.xlu1 %v10789_v28, %s12633_s25 }
 0xe53   : > { %v10674_v5 = vpop.f32.mrf.mxu0 }
 0xe54   : > { %v10715_v13 = vadd.f32 %v10674_v5, %v10473_v3  ;;  %v10864_v9 = vpop.permute.xlu2 %10863 }
 0xe55   : > { %10888 = vst.msk [vmem:[%s18562_s23 + $0x18] sm:$0xff] %vm10884_vm10, %v10864_v9 }
 0xe56   : > { %v10754_v45 = vadd.f32 %v18552_v38, %v10715_v13 }
 0xe58   : > { %v10790_v21 = vmax.f32 %v10754_v45, 0.0 }
 0xe5a   : > { %10915 = vrot.lane.b32.xlu2 %v10790_v21, %s12633_s25 }
 0xe5b   : > { %v10677_v51 = vpop.f32.mrf.mxu0 }
 0xe5c   : > { %v10716_v11 = vadd.f32 %v10677_v51, %v10474_v53  ;;  %v10860_v47 = vpop.permute.xlu0 %10859 }
 0xe5d   : > { %10886 = vst.msk [vmem:[%s18562_s23 + $0x8] sm:$0xff] %vm10884_vm10, %v10860_v47 }
 0xe5e   : > { %v10755_v35 = vadd.f32 %v18552_v38, %v10716_v11 }
 0xe60   : > { %v10791_v58 = vmax.f32 %v10755_v35, 0.0 }
 0xe62   : > { %10917 = vrot.lane.b32.xlu0 %v10791_v58, %s12633_s25 }
 0xe63   : > { %v10679_v7 = vpop.f32.mrf.mxu0 }
 0xe64   : > { %v10717_v27 = vadd.f32 %v10679_v7, %v10475_v57  ;;  %v10862_v31 = vpop.permute.xlu1 %10861 }
 0xe65   : > { %10887 = vst.msk [vmem:[%s18562_s23 + $0x10] sm:$0xff] %vm10884_vm10, %v10862_v31 }
 0xe66   : > { %v10756_v26 = vadd.f32 %v18552_v38, %v10717_v27 }
 0xe68   : > { %v10792_v32 = vmax.f32 %v10756_v26, 0.0 }
 0xe6a   : > { %10919 = vrot.lane.b32.xlu1 %v10792_v32, %s12633_s25 }
 0xe6c   : > { %v10870_v25 = vpop.permute.xlu2 %10869 }
 0xe6d   : > { %10891 = vst.msk [vmem:[%s18562_s23 + $0x30] sm:$0xff] %vm10884_vm10, %v10870_v25 }
 0xe74   : > { %v10866_v48 = vpop.permute.xlu0 %10865 }
 0xe75   : > { %10889 = vst.msk [vmem:[%s18562_s23 + $0x20] sm:$0xff] %vm10884_vm10, %v10866_v48 }
 0xe7c   : > { %v10868_v16 = vpop.permute.xlu1 %10867 }
 0xe7d   : > { %10890 = vst.msk [vmem:[%s18562_s23 + $0x28] sm:$0xff] %vm10884_vm10, %v10868_v16 }
 0xe84   : > { %v10904_v12 = vpop.permute.xlu2 %10903 }
 0xe85   : > { %10931 = vst.msk [vmem:[%s18562_s23] sm:$0xff] %vm10930_vm11, %v10904_v12 }
 0xe8c   : > { %v10872_v38 = vpop.permute.xlu0 %10871 }
 0xe8d   : > { %10892 = vst.msk [vmem:[%s18562_s23 + $0x38] sm:$0xff] %vm10884_vm10, %v10872_v38 }
 0xe94   : > { %v10874_v19 = vpop.permute.xlu1 %10873 }
 0xe95   : > { %10893 = vst.msk [vmem:[%s18562_s23 + $0x40] sm:$0xff] %vm10884_vm10, %v10874_v19 }
 0xe9c   : > { %v10910_v39 = vpop.permute.xlu2 %10909 }
 0xe9d   : > { %10934 = vst.msk [vmem:[%s18562_s23 + $0x18] sm:$0xff] %vm10930_vm11, %v10910_v39 }
 0xea4   : > { %v10906_v14 = vpop.permute.xlu0 %10905 }
 0xea5   : > { %10932 = vst.msk [vmem:[%s18562_s23 + $0x8] sm:$0xff] %vm10930_vm11, %v10906_v14 }
 0xeac   : > { %v10908_v1 = vpop.permute.xlu1 %10907 }
 0xead   : > { %10933 = vst.msk [vmem:[%s18562_s23 + $0x10] sm:$0xff] %vm10930_vm11, %v10908_v1 }
 0xeb4   : > { %v10916_v44 = vpop.permute.xlu2 %10915 }
 0xeb5   : > { %10937 = vst.msk [vmem:[%s18562_s23 + $0x30] sm:$0xff] %vm10930_vm11, %v10916_v44 }
 0xebc   : > { %v10912_v20 = vpop.permute.xlu0 %10911 }
 0xebd   : > { %10935 = vst.msk [vmem:[%s18562_s23 + $0x20] sm:$0xff] %vm10930_vm11, %v10912_v20 }
 0xec4   : > { %v10914_v62 = vpop.permute.xlu1 %10913 }
 0xec5   : > { %10936 = vst.msk [vmem:[%s18562_s23 + $0x28] sm:$0xff] %vm10930_vm11, %v10914_v62 }
 0xed4   : > { %v10918_v2 = vpop.permute.xlu0 %10917 }
 0xed5   : > { %10938 = vst.msk [vmem:[%s18562_s23 + $0x38] sm:$0xff] %vm10930_vm11, %v10918_v2 }
 0xedc   : > { %v10920_v34 = vpop.permute.xlu1 %10919 }
 0xedd   : > { %10939 = vst.msk [vmem:[%s18562_s23 + $0x40] sm:$0xff] %vm10930_vm11, %v10920_v34 }
 0xede PF: > { %s28_s27 = sadd.s32 1, %s12628_s27  }
 0xedf   : > { %p25_p4 = scmp.ge.s32.totalorder %s28_s27, 4  }
 0xee1   :  { %27 = sbr.rel (!%p25_p4) target bundleno = 5 (0x5), region = 165 }

</bundles_post_ra>
